<compile_context>
chip_gen: v6e
topology: v6e:2x2x1
jax: 0.10.0
libtpu: 0.0.40
codegen_flags: <defaults>
</compile_context>

<pallas_src>
import math

import jax
import jax.numpy as jnp
from jax.experimental import pallas as pl
from jax.experimental.pallas import tpu as pltpu

_BN_EPS = 1e-5
# Stand-in for the -inf max-pool padding.  Every pooling window contains at
# least one real element (padding <= kernel//2), so this value is never
# selected, and unlike -inf it cannot produce NaN in the 0/1 selection matmul.
_NEG_LARGE = -1e30


# ---------------------------------------------------------------------------
# In-kernel math helpers
# ---------------------------------------------------------------------------
def _erf_approx(x):
    # Abramowitz & Stegun 7.1.26, |err| < 1.5e-7 (~f32 exact): reproduces
    # PyTorch's exact-erf nn.GELU() using only exp/abs/where (VPU/EUP ops).
    p = 0.3275911
    a1, a2, a3, a4, a5 = (0.254829592, -0.284496736, 1.421413741,
                          -1.453152027, 1.061405429)
    ax = jnp.abs(x)
    t = 1.0 / (1.0 + p * ax)
    poly = ((((a5 * t + a4) * t + a3) * t + a2) * t + a1) * t
    y = 1.0 - poly * jnp.exp(-ax * ax)
    return jnp.where(x >= 0, y, -y)


def _gelu(x):
    return 0.5 * x * (1.0 + _erf_approx(x * (1.0 / math.sqrt(2.0))))


def _conv_stride1(h, buf_ref, w_ref, b_ref):
    """Stride-1 Conv1d (+ folded BN shift) via K shifted-slice matmuls.

    h:       (Tin, Cin) activation value (time on sublanes, channels on lanes)
    buf_ref: (Tin + 2*pad, Cin) VMEM staging scratch (zero padded)
    w_ref:   (K, Cin, Cout) BN-scale-folded weights
    b_ref:   (1, Cout) BN shift
    returns  (Tout, Cout) pre-activation, Tout = Tin + 2*pad - K + 1
    """
    tin = h.shape[0]
    k = w_ref.shape[0]
    tpad = buf_ref.shape[0]
    pad = (tpad - tin) // 2
    tout = tpad - k + 1
    buf_ref[...] = jnp.zeros(buf_ref.shape, dtype=buf_ref.dtype)
    buf_ref[pad:pad + tin, :] = h
    acc = jnp.dot(buf_ref[0:tout, :], w_ref[0],
                  preferred_element_type=jnp.float32)
    for i in range(1, k):
        acc = acc + jnp.dot(buf_ref[i:i + tout, :], w_ref[i],
                            preferred_element_type=jnp.float32)
    return acc + b_ref[...]


def _maxpool(h, buf_ref, sel_ref):
    """MaxPool1d(kernel=K, stride=s, padding=pad), fused in-kernel.

    h:       (Tin, C) activation value
    buf_ref: (Tin + 2*pad, C) VMEM staging scratch (padded with -1e30)
    sel_ref: (Tout, Tm) constant 0/1 stride-subsampling matrix,
             Tm = Tin + 2*pad - K + 1
    Stride-1 window max via K shifted slices (VPU max), then the pooling
    stride is applied with a tiny selection matmul (out[t] = m[s*t]).
    """
    tin = h.shape[0]
    tpad = buf_ref.shape[0]
    pad = (tpad - tin) // 2
    tm = sel_ref.shape[1]
    k = tpad - tm + 1
    buf_ref[...] = jnp.full(buf_ref.shape, _NEG_LARGE, dtype=buf_ref.dtype)
    buf_ref[pad:pad + tin, :] = h
    m = buf_ref[0:tm, :]
    for i in range(1, k):
        m = jnp.maximum(m, buf_ref[i:i + tm, :])
    return jnp.dot(sel_ref[...], m, preferred_element_type=jnp.float32)


# ---------------------------------------------------------------------------
# The fused kernel: whole _MRCNN forward for one batch element per grid step
# ---------------------------------------------------------------------------
def _mrcnn_kernel(
    # batched inputs (leading batch dim squeezed by the BlockSpec)
    p1_ref, p2_ref,
    # features1 weights (BN folded) + shifts
    w11_ref, b11_ref, w12_ref, b12_ref, w13_ref, b13_ref,
    # features2 weights (BN folded) + shifts
    w21_ref, b21_ref, w22_ref, b22_ref, w23_ref, b23_ref,
    # max-pool stride-subsampling matrices
    s11_ref, s12_ref, s21_ref, s22_ref,
    # AFR (_SEBasicBlock) weights: [conv1 | downsample] merged, conv2, SE fcs
    wa1_ref, ba1_ref, wa2_ref, ba2_ref, wse1_ref, wse2_ref,
    # output block: (t_cat, planes)
    out_ref,
    # VMEM staging scratch
    f1_pool1_buf, f1_conv2_buf, f1_conv3_buf, f1_pool2_buf,
    f2_pool1_buf, f2_conv2_buf, f2_conv3_buf, f2_pool2_buf,
):
    f32 = jnp.float32

    # --------------------------- features1 ---------------------------
    h = _gelu(jnp.dot(p1_ref[...], w11_ref[...], preferred_element_type=f32)
              + b11_ref[...])                                   # (100, 64)
    h = _maxpool(h, f1_pool1_buf, s11_ref)                      # (51, 64)
    # Dropout(0.5): identity in eval mode.
    h = _gelu(_conv_stride1(h, f1_conv2_buf, w12_ref, b12_ref))  # (52, 128)
    h = _gelu(_conv_stride1(h, f1_conv3_buf, w13_ref, b13_ref))  # (53, 128)
    x1 = _maxpool(h, f1_pool2_buf, s12_ref)                     # (14, 128)

    # --------------------------- features2 ---------------------------
    g = _gelu(jnp.dot(p2_ref[...], w21_ref[...], preferred_element_type=f32)
              + b21_ref[...])                                   # (13, 64)
    g = _maxpool(g, f2_pool1_buf, s21_ref)                      # (7, 64)
    # Dropout(0.5): identity in eval mode.
    g = _gelu(_conv_stride1(g, f2_conv2_buf, w22_ref, b22_ref))  # (7, 128)
    g = _gelu(_conv_stride1(g, f2_conv3_buf, w23_ref, b23_ref))  # (7, 128)
    x2 = _maxpool(g, f2_pool2_buf, s22_ref)                     # (4, 128)

    # -------- AFR _SEBasicBlock on concat([x1, x2], time), inlined --------
    # All AFR ops are pointwise in time (1x1 convs, per-channel SE scale), so
    # the concat is never materialized; only the SE squeeze is shared.
    planes = wa2_ref.shape[0]
    wa1 = wa1_ref[...]                                          # (128, 2*planes)
    ba1 = ba1_ref[...]
    za = jnp.dot(x1, wa1, preferred_element_type=f32) + ba1     # (14, 64)
    zb = jnp.dot(x2, wa1, preferred_element_type=f32) + ba1     # (4, 64)
    h1a = jnp.maximum(za[:, 0:planes], 0.0)                     # conv1+bn1+relu
    h1b = jnp.maximum(zb[:, 0:planes], 0.0)
    res_a = za[:, planes:]                                      # downsample+bn
    res_b = zb[:, planes:]

    wa2 = wa2_ref[...]
    ba2 = ba2_ref[...]
    h2a = jnp.dot(h1a, wa2, preferred_element_type=f32) + ba2   # (14, 32)
    h2b = jnp.dot(h1b, wa2, preferred_element_type=f32) + ba2   # (4, 32)

    # SE squeeze (AdaptiveAvgPool1d over the 18 concatenated steps) + excite.
    n_t = h2a.shape[0] + h2b.shape[0]
    y = (jnp.sum(h2a, axis=0, keepdims=True)
         + jnp.sum(h2b, axis=0, keepdims=True)) * (1.0 / n_t)   # (1, 32)
    z = jnp.maximum(jnp.dot(y, wse1_ref[...],
                            preferred_element_type=f32), 0.0)   # (1, hid)
    sig = jax.nn.sigmoid(jnp.dot(z, wse2_ref[...],
                                 preferred_element_type=f32))   # (1, 32)

    # SE rescale, residual add, final ReLU; write straight into the output.
    ta = h2a.shape[0]
    out_ref[0:ta, :] = jnp.maximum(h2a * sig + res_a, 0.0).astype(out_ref.dtype)
    out_ref[ta:ta + h2b.shape[0], :] = jnp.maximum(
        h2b * sig + res_b, 0.0).astype(out_ref.dtype)


# ---------------------------------------------------------------------------
# Trace-time glue: BN folding, im2col for the two front convs, pool matrices
# ---------------------------------------------------------------------------
def _conv_len(t, k, s, p):
    return (t + 2 * p - k) // s + 1


def _im2col_1ch(xs, k, stride, pad):
    # xs: (B, T) single-channel signal -> (B, Tout, k) conv patches
    t = xs.shape[1]
    tout = _conv_len(t, k, stride, pad)
    xp = jnp.pad(xs, ((0, 0), (pad, pad)))
    idx = stride * jnp.arange(tout)[:, None] + jnp.arange(k)[None, :]
    return xp[:, idx]


def _subsample_matrix(tout, tm, stride):
    rows = jnp.arange(tout)[:, None]
    cols = jnp.arange(tm)[None, :]
    return (cols == stride * rows).astype(jnp.float32)


def _bn_scale_shift(p):
    scale = p["gamma"] / jnp.sqrt(p["var"] + _BN_EPS)
    bias = p["b"] if p["b"] is not None else jnp.zeros_like(p["mean"])
    shift = scale * (bias - p["mean"]) + p["beta"]
    return scale, shift


def _fold_first(p):
    # Conv1d(1, Cout, K): weight (Cout, 1, K) -> (K, Cout), BN scale folded in.
    scale, shift = _bn_scale_shift(p)
    w = jnp.transpose(p["w"][:, 0, :]) * scale[None, :]
    return w, shift[None, :]


def _fold_taps(p):
    # Conv1d(Cin, Cout, K): weight (Cout, Cin, K) -> (K, Cin, Cout), BN folded.
    scale, shift = _bn_scale_shift(p)
    w = jnp.transpose(p["w"], (2, 1, 0)) * scale[None, None, :]
    return w, shift[None, :]


def _fold_1x1(p):
    # Conv1d(Cin, Cout, 1): weight (Cout, Cin, 1) -> (Cin, Cout), BN folded.
    scale, shift = _bn_scale_shift(p)
    w = jnp.transpose(p["w"][:, :, 0]) * scale[None, :]
    return w, shift[None, :]


def _full_spec(arr):
    zero = (0,) * arr.ndim
    return pl.BlockSpec(arr.shape, lambda b, _z=zero: _z)


def _batched_spec(arr):
    # (B, d0, d1) -> per-grid-step (d0, d1) block (batch dim squeezed)
    return pl.BlockSpec((None,) + tuple(arr.shape[1:]), lambda b: (b, 0, 0))


@jax.jit
def mrcnn_forward(x, params):
    """Eval-mode _MRCNN forward.  x: (B, 1, T) -> (B, after_reduced_cnn_size, 18)."""
    B, _, T = x.shape
    xs = x[:, 0, :]                         # the module always has 1 input channel

    # Kernel sizes from the weights; strides / paddings are _MRCNN constants.
    k11 = params["f1_c1"]["w"].shape[2]     # 50
    k12 = params["f1_c2"]["w"].shape[2]     # 8
    k13 = params["f1_c3"]["w"].shape[2]     # 8
    k21 = params["f2_c1"]["w"].shape[2]     # 400
    k22 = params["f2_c2"]["w"].shape[2]     # kernel_size (7)
    k23 = params["f2_c3"]["w"].shape[2]

    # ---- JAX-level im2col only for the two strided front convs (tiny) ----
    p1 = _im2col_1ch(xs, k11, 6, 24)        # (B, 100, 50)
    p2 = _im2col_1ch(xs, k21, 50, 200)      # (B, 13, 400)

    # ---- fold eval-mode BatchNorm into conv weights / shifts ----
    w11, b11 = _fold_first(params["f1_c1"])
    w12, b12 = _fold_taps(params["f1_c2"])
    w13, b13 = _fold_taps(params["f1_c3"])
    w21, b21 = _fold_first(params["f2_c1"])
    w22, b22 = _fold_taps(params["f2_c2"])
    w23, b23 = _fold_taps(params["f2_c3"])
    wc1, bc1 = _fold_1x1(params["afr_c1"])          # (128, 32)
    wds, bds = _fold_1x1(params["afr_ds"])          # (128, 32)
    wa1 = jnp.concatenate([wc1, wds], axis=1)       # merged [conv1 | downsample]
    ba1 = jnp.concatenate([bc1, bds], axis=1)
    wa2, ba2 = _fold_1x1(params["afr_c2"])
    wse1 = params["se_w1"]
    wse2 = params["se_w2"]

    # ---- static time-length bookkeeping (mirrors the PyTorch layer configs) ----
    t11 = _conv_len(T, k11, 6, 24)          # conv1        -> 100
    t12 = _conv_len(t11, 8, 2, 4)           # maxpool 8/2  -> 51
    t13 = _conv_len(t12, k12, 1, 4)         # conv2        -> 52
    t14 = _conv_len(t13, k13, 1, 4)         # conv3        -> 53
    t15 = _conv_len(t14, 4, 4, 2)           # maxpool 4/4  -> 14
    t21 = _conv_len(T, k21, 50, 200)        # conv1        -> 13
    t22 = _conv_len(t21, 4, 2, 2)           # maxpool 4/2  -> 7
    t23 = _conv_len(t22, k22, 1, 3)         # conv2        -> 7
    t24 = _conv_len(t23, k23, 1, 3)         # conv3        -> 7
    t25 = _conv_len(t24, 2, 2, 1)           # maxpool 2/2  -> 4
    t_cat = t15 + t25                       # 18
    planes = wa2.shape[0]                   # after_reduced_cnn_size

    # ---- constant 0/1 pooling-stride selection matrices ----
    s11 = _subsample_matrix(t12, t11 + 2 * 4 - 8 + 1, 2)
    s12 = _subsample_matrix(t15, t14 + 2 * 2 - 4 + 1, 4)
    s21 = _subsample_matrix(t22, t21 + 2 * 2 - 4 + 1, 2)
    s22 = _subsample_matrix(t25, t24 + 2 * 1 - 2 + 1, 2)

    c11, c12, c13 = w11.shape[1], w12.shape[2], w13.shape[2]
    c21, c22, c23 = w21.shape[1], w22.shape[2], w23.shape[2]

    operands = [
        p1, p2,
        w11, b11, w12, b12, w13, b13,
        w21, b21, w22, b22, w23, b23,
        s11, s12, s21, s22,
        wa1, ba1, wa2, ba2, wse1, wse2,
    ]
    in_specs = [_batched_spec(p1), _batched_spec(p2)]
    in_specs += [_full_spec(a) for a in operands[2:]]

    scratch_shapes = [
        pltpu.VMEM((t11 + 2 * 4, c11), jnp.float32),   # f1 maxpool-1 staging
        pltpu.VMEM((t12 + 2 * 4, c11), jnp.float32),   # f1 conv-2 staging
        pltpu.VMEM((t13 + 2 * 4, c12), jnp.float32),   # f1 conv-3 staging
        pltpu.VMEM((t14 + 2 * 2, c13), jnp.float32),   # f1 maxpool-2 staging
        pltpu.VMEM((t21 + 2 * 2, c21), jnp.float32),   # f2 maxpool-1 staging
        pltpu.VMEM((t22 + 2 * 3, c21), jnp.float32),   # f2 conv-2 staging
        pltpu.VMEM((t23 + 2 * 3, c22), jnp.float32),   # f2 conv-3 staging
        pltpu.VMEM((t24 + 2 * 1, c23), jnp.float32),   # f2 maxpool-2 staging
    ]

    out = pl.pallas_call(
        _mrcnn_kernel,
        out_shape=jax.ShapeDtypeStruct((B, t_cat, planes), jnp.float32),
        grid=(B,),
        in_specs=in_specs,
        out_specs=pl.BlockSpec((None, t_cat, planes), lambda b: (b, 0, 0)),
        scratch_shapes=scratch_shapes,
        compiler_params=pltpu.CompilerParams(
            dimension_semantics=("parallel",)),
    )(*operands)

    return jnp.transpose(out, (0, 2, 1))    # (B, planes, 18) == PyTorch NCW


# ---------------------------------------------------------------------------
# Parameters (deterministic synthetic init, PyTorch shapes)
# ---------------------------------------------------------------------------
def init_params(key, after_reduced_cnn_size=32, kernel_size=7):
    keys = iter(jax.random.split(key, 16))

    def conv_bn_p(cout, cin, k, bias):
        kw, kb, kg, kbe, km, kv = jax.random.split(next(keys), 6)
        return {
            "w": jax.random.normal(kw, (cout, cin, k), jnp.float32) / math.sqrt(cin * k),
            "b": (0.1 * jax.random.normal(kb, (cout,), jnp.float32)) if bias else None,
            "gamma": 1.0 + 0.1 * jax.random.normal(kg, (cout,), jnp.float32),
            "beta": 0.1 * jax.random.normal(kbe, (cout,), jnp.float32),
            "mean": 0.1 * jax.random.normal(km, (cout,), jnp.float32),
            "var": jax.random.uniform(kv, (cout,), jnp.float32, 0.5, 1.5),
        }

    c = after_reduced_cnn_size
    hid = max(c // 16, 1)
    return {
        # features1
        "f1_c1": conv_bn_p(64, 1, 50, False),
        "f1_c2": conv_bn_p(128, 64, 8, False),
        "f1_c3": conv_bn_p(128, 128, 8, False),
        # features2
        "f2_c1": conv_bn_p(64, 1, 400, False),
        "f2_c2": conv_bn_p(128, 64, kernel_size, False),
        "f2_c3": conv_bn_p(128, 128, kernel_size, False),
        # AFR _SEBasicBlock(128, c): conv1 = Conv1d(128, c, kernel_size=stride=1, bias=True)
        "afr_c1": conv_bn_p(c, 128, 1, True),
        "afr_c2": conv_bn_p(c, c, 1, True),
        "afr_ds": conv_bn_p(c, 128, 1, False),   # downsample (bias=False) + BN
        # SE fc weights stored transposed (in, out) so the kernel computes x @ W
        "se_w1": 0.2 * jax.random.normal(next(keys), (c, hid), jnp.float32),
        "se_w2": 0.2 * jax.random.normal(next(keys), (hid, c), jnp.float32),
    }


if __name__ == "__main__":
    key = jax.random.PRNGKey(0)
    kx, kp = jax.random.split(key)
    B, T = 2, 600
    x = jax.random.normal(kx, (B, 1, T), jnp.float32)   # (batch, 1 EEG channel, n_times)
    params = init_params(kp, after_reduced_cnn_size=32, kernel_size=7)

    out = mrcnn_forward(x, params)
    out = jax.block_until_ready(out)

    # features1 -> T=14, features2 -> T=4, concat -> 18 ; AFR -> 32 channels
    assert out.shape == (B, 32, 18), out.shape
    assert bool(jnp.all(jnp.isfinite(out)))
    print("KERNEL_OK")
</pallas_src>

<mosaic_0001>
module attributes {stable_mosaic.version = 11 : i64} {
  func.func @_mrcnn_kernel(%arg0: i32, %arg1: memref<1x100x50xf32, #tpu.memory_space<vmem>>, %arg2: memref<1x13x400xf32, #tpu.memory_space<vmem>>, %arg3: memref<50x64xf32, #tpu.memory_space<vmem>>, %arg4: memref<1x64xf32, #tpu.memory_space<vmem>>, %arg5: memref<8x64x128xf32, #tpu.memory_space<vmem>>, %arg6: memref<1x128xf32, #tpu.memory_space<vmem>>, %arg7: memref<8x128x128xf32, #tpu.memory_space<vmem>>, %arg8: memref<1x128xf32, #tpu.memory_space<vmem>>, %arg9: memref<400x64xf32, #tpu.memory_space<vmem>>, %arg10: memref<1x64xf32, #tpu.memory_space<vmem>>, %arg11: memref<7x64x128xf32, #tpu.memory_space<vmem>>, %arg12: memref<1x128xf32, #tpu.memory_space<vmem>>, %arg13: memref<7x128x128xf32, #tpu.memory_space<vmem>>, %arg14: memref<1x128xf32, #tpu.memory_space<vmem>>, %arg15: memref<51x101xf32, #tpu.memory_space<vmem>>, %arg16: memref<14x54xf32, #tpu.memory_space<vmem>>, %arg17: memref<7x14xf32, #tpu.memory_space<vmem>>, %arg18: memref<4x8xf32, #tpu.memory_space<vmem>>, %arg19: memref<128x64xf32, #tpu.memory_space<vmem>>, %arg20: memref<1x64xf32, #tpu.memory_space<vmem>>, %arg21: memref<32x32xf32, #tpu.memory_space<vmem>>, %arg22: memref<1x32xf32, #tpu.memory_space<vmem>>, %arg23: memref<32x2xf32, #tpu.memory_space<vmem>>, %arg24: memref<2x32xf32, #tpu.memory_space<vmem>>, %arg25: memref<1x18x32xf32, #tpu.memory_space<vmem>>, %arg26: memref<108x64xf32, #tpu.memory_space<vmem>>, %arg27: memref<59x64xf32, #tpu.memory_space<vmem>>, %arg28: memref<60x128xf32, #tpu.memory_space<vmem>>, %arg29: memref<57x128xf32, #tpu.memory_space<vmem>>, %arg30: memref<17x64xf32, #tpu.memory_space<vmem>>, %arg31: memref<13x64xf32, #tpu.memory_space<vmem>>, %arg32: memref<13x128xf32, #tpu.memory_space<vmem>>, %arg33: memref<9x128xf32, #tpu.memory_space<vmem>>) attributes {dimension_semantics = [#tpu.dimension_semantics<parallel>], iteration_bounds = array<i64: 2>, scalar_prefetch = 0 : i64, scratch_operands = 8 : i64, tpu.core_type = #tpu.core_type<tc>, window_params = [{transform_indices = @transform_0, window_bounds = array<i64: 1, 100, 50>}, {transform_indices = @transform_1, window_bounds = array<i64: 1, 13, 400>}, {pipeline_mode = #tpu.pipeline_mode<synchronous>, transform_indices = @transform_2, window_bounds = array<i64: 50, 64>}, {pipeline_mode = #tpu.pipeline_mode<synchronous>, transform_indices = @transform_3, window_bounds = array<i64: 1, 64>}, {pipeline_mode = #tpu.pipeline_mode<synchronous>, transform_indices = @transform_4, window_bounds = array<i64: 8, 64, 128>}, {pipeline_mode = #tpu.pipeline_mode<synchronous>, transform_indices = @transform_5, window_bounds = array<i64: 1, 128>}, {pipeline_mode = #tpu.pipeline_mode<synchronous>, transform_indices = @transform_6, window_bounds = array<i64: 8, 128, 128>}, {pipeline_mode = #tpu.pipeline_mode<synchronous>, transform_indices = @transform_7, window_bounds = array<i64: 1, 128>}, {pipeline_mode = #tpu.pipeline_mode<synchronous>, transform_indices = @transform_8, window_bounds = array<i64: 400, 64>}, {pipeline_mode = #tpu.pipeline_mode<synchronous>, transform_indices = @transform_9, window_bounds = array<i64: 1, 64>}, {pipeline_mode = #tpu.pipeline_mode<synchronous>, transform_indices = @transform_10, window_bounds = array<i64: 7, 64, 128>}, {pipeline_mode = #tpu.pipeline_mode<synchronous>, transform_indices = @transform_11, window_bounds = array<i64: 1, 128>}, {pipeline_mode = #tpu.pipeline_mode<synchronous>, transform_indices = @transform_12, window_bounds = array<i64: 7, 128, 128>}, {pipeline_mode = #tpu.pipeline_mode<synchronous>, transform_indices = @transform_13, window_bounds = array<i64: 1, 128>}, {pipeline_mode = #tpu.pipeline_mode<synchronous>, transform_indices = @transform_14, window_bounds = array<i64: 51, 101>}, {pipeline_mode = #tpu.pipeline_mode<synchronous>, transform_indices = @transform_15, window_bounds = array<i64: 14, 54>}, {pipeline_mode = #tpu.pipeline_mode<synchronous>, transform_indices = @transform_16, window_bounds = array<i64: 7, 14>}, {pipeline_mode = #tpu.pipeline_mode<synchronous>, transform_indices = @transform_17, window_bounds = array<i64: 4, 8>}, {pipeline_mode = #tpu.pipeline_mode<synchronous>, transform_indices = @transform_18, window_bounds = array<i64: 128, 64>}, {pipeline_mode = #tpu.pipeline_mode<synchronous>, transform_indices = @transform_19, window_bounds = array<i64: 1, 64>}, {pipeline_mode = #tpu.pipeline_mode<synchronous>, transform_indices = @transform_20, window_bounds = array<i64: 32, 32>}, {pipeline_mode = #tpu.pipeline_mode<synchronous>, transform_indices = @transform_21, window_bounds = array<i64: 1, 32>}, {pipeline_mode = #tpu.pipeline_mode<synchronous>, transform_indices = @transform_22, window_bounds = array<i64: 32, 2>}, {pipeline_mode = #tpu.pipeline_mode<synchronous>, transform_indices = @transform_23, window_bounds = array<i64: 2, 32>}, {transform_indices = @transform_24, window_bounds = array<i64: 1, 18, 32>}]} {
    %c0 = arith.constant 0 : index
    %c0_0 = arith.constant 0 : index
    %c0_1 = arith.constant 0 : index
    %0 = vector.load %arg1[%c0, %c0_0, %c0_1] : memref<1x100x50xf32, #tpu.memory_space<vmem>>, vector<1x100x50xf32>
    %1 = vector.shape_cast %0 : vector<1x100x50xf32> to vector<100x50xf32>
    %c0_2 = arith.constant 0 : index
    %c0_3 = arith.constant 0 : index
    %2 = vector.load %arg3[%c0_2, %c0_3] : memref<50x64xf32, #tpu.memory_space<vmem>>, vector<50x64xf32>
    %cst = arith.constant dense<0.000000e+00> : vector<100x64xf32>
    %3 = tpu.matmul %1, %2, %cst {dimension_numbers = #tpu.dot_dimension_numbers<[1], [0], [0], [1], [0, 0, 1, 1], [], []>} : vector<100x50xf32>, vector<50x64xf32>, vector<100x64xf32> -> vector<100x64xf32>
    %c0_4 = arith.constant 0 : index
    %c0_5 = arith.constant 0 : index
    %4 = vector.load %arg4[%c0_4, %c0_5] : memref<1x64xf32, #tpu.memory_space<vmem>>, vector<1x64xf32>
    %5 = vector.broadcast %4 : vector<1x64xf32> to vector<100x64xf32>
    %6 = arith.addf %3, %5 : vector<100x64xf32>
    %cst_6 = arith.constant 5.000000e-01 : f32
    %7 = vector.broadcast %cst_6 : f32 to vector<100x64xf32>
    %8 = arith.mulf %7, %6 : vector<100x64xf32>
    %cst_7 = arith.constant 0.707106769 : f32
    %9 = vector.broadcast %cst_7 : f32 to vector<100x64xf32>
    %10 = arith.mulf %6, %9 : vector<100x64xf32>
    %11 = math.absf %10 : vector<100x64xf32>
    %cst_8 = arith.constant 0.327591091 : f32
    %12 = vector.broadcast %cst_8 : f32 to vector<100x64xf32>
    %13 = arith.mulf %12, %11 : vector<100x64xf32>
    %cst_9 = arith.constant 1.000000e+00 : f32
    %14 = vector.broadcast %cst_9 : f32 to vector<100x64xf32>
    %15 = arith.addf %14, %13 : vector<100x64xf32>
    %cst_10 = arith.constant 1.000000e+00 : f32
    %16 = vector.broadcast %cst_10 : f32 to vector<100x64xf32>
    %17 = arith.divf %16, %15 : vector<100x64xf32>
    %cst_11 = arith.constant 1.06140542 : f32
    %18 = vector.broadcast %cst_11 : f32 to vector<100x64xf32>
    %19 = arith.mulf %18, %17 : vector<100x64xf32>
    %cst_12 = arith.constant -1.45315206 : f32
    %20 = vector.broadcast %cst_12 : f32 to vector<100x64xf32>
    %21 = arith.addf %19, %20 : vector<100x64xf32>
    %22 = arith.mulf %21, %17 : vector<100x64xf32>
    %cst_13 = arith.constant 1.42141378 : f32
    %23 = vector.broadcast %cst_13 : f32 to vector<100x64xf32>
    %24 = arith.addf %22, %23 : vector<100x64xf32>
    %25 = arith.mulf %24, %17 : vector<100x64xf32>
    %cst_14 = arith.constant -0.284496725 : f32
    %26 = vector.broadcast %cst_14 : f32 to vector<100x64xf32>
    %27 = arith.addf %25, %26 : vector<100x64xf32>
    %28 = arith.mulf %27, %17 : vector<100x64xf32>
    %cst_15 = arith.constant 0.254829586 : f32
    %29 = vector.broadcast %cst_15 : f32 to vector<100x64xf32>
    %30 = arith.addf %28, %29 : vector<100x64xf32>
    %31 = arith.mulf %30, %17 : vector<100x64xf32>
    %cst_16 = arith.constant 0.000000e+00 : f32
    %32 = vector.broadcast %cst_16 : f32 to vector<100x64xf32>
    %33 = arith.subf %32, %11 : vector<100x64xf32>
    %34 = arith.mulf %33, %11 : vector<100x64xf32>
    %35 = math.exp %34 : vector<100x64xf32>
    %36 = arith.mulf %31, %35 : vector<100x64xf32>
    %cst_17 = arith.constant 1.000000e+00 : f32
    %37 = vector.broadcast %cst_17 : f32 to vector<100x64xf32>
    %38 = arith.subf %37, %36 : vector<100x64xf32>
    %cst_18 = arith.constant 0.000000e+00 : f32
    %39 = vector.broadcast %cst_18 : f32 to vector<100x64xf32>
    %40 = arith.cmpf oge, %10, %39 : vector<100x64xf32>
    %cst_19 = arith.constant 0.000000e+00 : f32
    %41 = vector.broadcast %cst_19 : f32 to vector<100x64xf32>
    %42 = arith.subf %41, %38 : vector<100x64xf32>
    %43 = arith.select %40, %38, %42 : vector<100x64xi1>, vector<100x64xf32>
    %cst_20 = arith.constant 1.000000e+00 : f32
    %44 = vector.broadcast %cst_20 : f32 to vector<100x64xf32>
    %45 = arith.addf %44, %43 : vector<100x64xf32>
    %46 = arith.mulf %8, %45 : vector<100x64xf32>
    %cst_21 = arith.constant -1.000000e+30 : f32
    %47 = vector.broadcast %cst_21 : f32 to vector<108x64xf32>
    %c0_22 = arith.constant 0 : index
    %c0_23 = arith.constant 0 : index
    %48 = vector.load %arg26[%c0_22, %c0_23] : memref<108x64xf32, #tpu.memory_space<vmem>>, vector<108x64xf32>
    tpu.vector_store %arg26[%c0_22, %c0_23], %47 {strides = array<i32>} : memref<108x64xf32, #tpu.memory_space<vmem>>, vector<108x64xf32>,
    %c4 = arith.constant 4 : index
    %c0_24 = arith.constant 0 : index
    %49 = vector.load %arg26[%c4, %c0_24] : memref<108x64xf32, #tpu.memory_space<vmem>>, vector<100x64xf32>
    tpu.vector_store %arg26[%c4, %c0_24], %46 {strides = array<i32>} : memref<108x64xf32, #tpu.memory_space<vmem>>, vector<100x64xf32>,
    %c0_25 = arith.constant 0 : index
    %c0_26 = arith.constant 0 : index
    %50 = vector.load %arg26[%c0_25, %c0_26] : memref<108x64xf32, #tpu.memory_space<vmem>>, vector<101x64xf32>
    %c1 = arith.constant 1 : index
    %c0_27 = arith.constant 0 : index
    %51 = vector.load %arg26[%c1, %c0_27] : memref<108x64xf32, #tpu.memory_space<vmem>>, vector<101x64xf32>
    %52 = arith.maximumf %50, %51 : vector<101x64xf32>
    %c2 = arith.constant 2 : index
    %c0_28 = arith.constant 0 : index
    %53 = vector.load %arg26[%c2, %c0_28] : memref<108x64xf32, #tpu.memory_space<vmem>>, vector<101x64xf32>
    %54 = arith.maximumf %52, %53 : vector<101x64xf32>
    %c3 = arith.constant 3 : index
    %c0_29 = arith.constant 0 : index
    %55 = vector.load %arg26[%c3, %c0_29] : memref<108x64xf32, #tpu.memory_space<vmem>>, vector<101x64xf32>
    %56 = arith.maximumf %54, %55 : vector<101x64xf32>
    %c4_30 = arith.constant 4 : index
    %c0_31 = arith.constant 0 : index
    %57 = vector.load %arg26[%c4_30, %c0_31] : memref<108x64xf32, #tpu.memory_space<vmem>>, vector<101x64xf32>
    %58 = arith.maximumf %56, %57 : vector<101x64xf32>
    %c5 = arith.constant 5 : index
    %c0_32 = arith.constant 0 : index
    %59 = vector.load %arg26[%c5, %c0_32] : memref<108x64xf32, #tpu.memory_space<vmem>>, vector<101x64xf32>
    %60 = arith.maximumf %58, %59 : vector<101x64xf32>
    %c6 = arith.constant 6 : index
    %c0_33 = arith.constant 0 : index
    %61 = vector.load %arg26[%c6, %c0_33] : memref<108x64xf32, #tpu.memory_space<vmem>>, vector<101x64xf32>
    %62 = arith.maximumf %60, %61 : vector<101x64xf32>
    %c7 = arith.constant 7 : index
    %c0_34 = arith.constant 0 : index
    %63 = vector.load %arg26[%c7, %c0_34] : memref<108x64xf32, #tpu.memory_space<vmem>>, vector<101x64xf32>
    %64 = arith.maximumf %62, %63 : vector<101x64xf32>
    %c0_35 = arith.constant 0 : index
    %c0_36 = arith.constant 0 : index
    %65 = vector.load %arg15[%c0_35, %c0_36] : memref<51x101xf32, #tpu.memory_space<vmem>>, vector<51x101xf32>
    %cst_37 = arith.constant dense<0.000000e+00> : vector<51x64xf32>
    %66 = tpu.matmul %65, %64, %cst_37 {dimension_numbers = #tpu.dot_dimension_numbers<[1], [0], [0], [1], [0, 0, 1, 1], [], []>} : vector<51x101xf32>, vector<101x64xf32>, vector<51x64xf32> -> vector<51x64xf32>
    %cst_38 = arith.constant 0.000000e+00 : f32
    %67 = vector.broadcast %cst_38 : f32 to vector<59x64xf32>
    %c0_39 = arith.constant 0 : index
    %c0_40 = arith.constant 0 : index
    %68 = vector.load %arg27[%c0_39, %c0_40] : memref<59x64xf32, #tpu.memory_space<vmem>>, vector<59x64xf32>
    tpu.vector_store %arg27[%c0_39, %c0_40], %67 {strides = array<i32>} : memref<59x64xf32, #tpu.memory_space<vmem>>, vector<59x64xf32>,
    %c4_41 = arith.constant 4 : index
    %c0_42 = arith.constant 0 : index
    %69 = vector.load %arg27[%c4_41, %c0_42] : memref<59x64xf32, #tpu.memory_space<vmem>>, vector<51x64xf32>
    tpu.vector_store %arg27[%c4_41, %c0_42], %66 {strides = array<i32>} : memref<59x64xf32, #tpu.memory_space<vmem>>, vector<51x64xf32>,
    %c0_43 = arith.constant 0 : index
    %c0_44 = arith.constant 0 : index
    %70 = vector.load %arg27[%c0_43, %c0_44] : memref<59x64xf32, #tpu.memory_space<vmem>>, vector<52x64xf32>
    %c0_45 = arith.constant 0 : index
    %c0_46 = arith.constant 0 : index
    %c0_47 = arith.constant 0 : index
    %71 = vector.load %arg5[%c0_45, %c0_46, %c0_47] : memref<8x64x128xf32, #tpu.memory_space<vmem>>, vector<1x64x128xf32>
    %72 = vector.shape_cast %71 : vector<1x64x128xf32> to vector<64x128xf32>
    %cst_48 = arith.constant dense<0.000000e+00> : vector<52x128xf32>
    %73 = tpu.matmul %70, %72, %cst_48 {dimension_numbers = #tpu.dot_dimension_numbers<[1], [0], [0], [1], [0, 0, 1, 1], [], []>} : vector<52x64xf32>, vector<64x128xf32>, vector<52x128xf32> -> vector<52x128xf32>
    %c1_49 = arith.constant 1 : index
    %c0_50 = arith.constant 0 : index
    %74 = vector.load %arg27[%c1_49, %c0_50] : memref<59x64xf32, #tpu.memory_space<vmem>>, vector<52x64xf32>
    %c1_51 = arith.constant 1 : index
    %c0_52 = arith.constant 0 : index
    %c0_53 = arith.constant 0 : index
    %75 = vector.load %arg5[%c1_51, %c0_52, %c0_53] : memref<8x64x128xf32, #tpu.memory_space<vmem>>, vector<1x64x128xf32>
    %76 = vector.shape_cast %75 : vector<1x64x128xf32> to vector<64x128xf32>
    %cst_54 = arith.constant dense<0.000000e+00> : vector<52x128xf32>
    %77 = tpu.matmul %74, %76, %cst_54 {dimension_numbers = #tpu.dot_dimension_numbers<[1], [0], [0], [1], [0, 0, 1, 1], [], []>} : vector<52x64xf32>, vector<64x128xf32>, vector<52x128xf32> -> vector<52x128xf32>
    %78 = arith.addf %73, %77 : vector<52x128xf32>
    %c2_55 = arith.constant 2 : index
    %c0_56 = arith.constant 0 : index
    %79 = vector.load %arg27[%c2_55, %c0_56] : memref<59x64xf32, #tpu.memory_space<vmem>>, vector<52x64xf32>
    %c2_57 = arith.constant 2 : index
    %c0_58 = arith.constant 0 : index
    %c0_59 = arith.constant 0 : index
    %80 = vector.load %arg5[%c2_57, %c0_58, %c0_59] : memref<8x64x128xf32, #tpu.memory_space<vmem>>, vector<1x64x128xf32>
    %81 = vector.shape_cast %80 : vector<1x64x128xf32> to vector<64x128xf32>
    %cst_60 = arith.constant dense<0.000000e+00> : vector<52x128xf32>
    %82 = tpu.matmul %79, %81, %cst_60 {dimension_numbers = #tpu.dot_dimension_numbers<[1], [0], [0], [1], [0, 0, 1, 1], [], []>} : vector<52x64xf32>, vector<64x128xf32>, vector<52x128xf32> -> vector<52x128xf32>
    %83 = arith.addf %78, %82 : vector<52x128xf32>
    %c3_61 = arith.constant 3 : index
    %c0_62 = arith.constant 0 : index
    %84 = vector.load %arg27[%c3_61, %c0_62] : memref<59x64xf32, #tpu.memory_space<vmem>>, vector<52x64xf32>
    %c3_63 = arith.constant 3 : index
    %c0_64 = arith.constant 0 : index
    %c0_65 = arith.constant 0 : index
    %85 = vector.load %arg5[%c3_63, %c0_64, %c0_65] : memref<8x64x128xf32, #tpu.memory_space<vmem>>, vector<1x64x128xf32>
    %86 = vector.shape_cast %85 : vector<1x64x128xf32> to vector<64x128xf32>
    %cst_66 = arith.constant dense<0.000000e+00> : vector<52x128xf32>
    %87 = tpu.matmul %84, %86, %cst_66 {dimension_numbers = #tpu.dot_dimension_numbers<[1], [0], [0], [1], [0, 0, 1, 1], [], []>} : vector<52x64xf32>, vector<64x128xf32>, vector<52x128xf32> -> vector<52x128xf32>
    %88 = arith.addf %83, %87 : vector<52x128xf32>
    %c4_67 = arith.constant 4 : index
    %c0_68 = arith.constant 0 : index
    %89 = vector.load %arg27[%c4_67, %c0_68] : memref<59x64xf32, #tpu.memory_space<vmem>>, vector<52x64xf32>
    %c4_69 = arith.constant 4 : index
    %c0_70 = arith.constant 0 : index
    %c0_71 = arith.constant 0 : index
    %90 = vector.load %arg5[%c4_69, %c0_70, %c0_71] : memref<8x64x128xf32, #tpu.memory_space<vmem>>, vector<1x64x128xf32>
    %91 = vector.shape_cast %90 : vector<1x64x128xf32> to vector<64x128xf32>
    %cst_72 = arith.constant dense<0.000000e+00> : vector<52x128xf32>
    %92 = tpu.matmul %89, %91, %cst_72 {dimension_numbers = #tpu.dot_dimension_numbers<[1], [0], [0], [1], [0, 0, 1, 1], [], []>} : vector<52x64xf32>, vector<64x128xf32>, vector<52x128xf32> -> vector<52x128xf32>
    %93 = arith.addf %88, %92 : vector<52x128xf32>
    %c5_73 = arith.constant 5 : index
    %c0_74 = arith.constant 0 : index
    %94 = vector.load %arg27[%c5_73, %c0_74] : memref<59x64xf32, #tpu.memory_space<vmem>>, vector<52x64xf32>
    %c5_75 = arith.constant 5 : index
    %c0_76 = arith.constant 0 : index
    %c0_77 = arith.constant 0 : index
    %95 = vector.load %arg5[%c5_75, %c0_76, %c0_77] : memref<8x64x128xf32, #tpu.memory_space<vmem>>, vector<1x64x128xf32>
    %96 = vector.shape_cast %95 : vector<1x64x128xf32> to vector<64x128xf32>
    %cst_78 = arith.constant dense<0.000000e+00> : vector<52x128xf32>
    %97 = tpu.matmul %94, %96, %cst_78 {dimension_numbers = #tpu.dot_dimension_numbers<[1], [0], [0], [1], [0, 0, 1, 1], [], []>} : vector<52x64xf32>, vector<64x128xf32>, vector<52x128xf32> -> vector<52x128xf32>
    %98 = arith.addf %93, %97 : vector<52x128xf32>
    %c6_79 = arith.constant 6 : index
    %c0_80 = arith.constant 0 : index
    %99 = vector.load %arg27[%c6_79, %c0_80] : memref<59x64xf32, #tpu.memory_space<vmem>>, vector<52x64xf32>
    %c6_81 = arith.constant 6 : index
    %c0_82 = arith.constant 0 : index
    %c0_83 = arith.constant 0 : index
    %100 = vector.load %arg5[%c6_81, %c0_82, %c0_83] : memref<8x64x128xf32, #tpu.memory_space<vmem>>, vector<1x64x128xf32>
    %101 = vector.shape_cast %100 : vector<1x64x128xf32> to vector<64x128xf32>
    %cst_84 = arith.constant dense<0.000000e+00> : vector<52x128xf32>
    %102 = tpu.matmul %99, %101, %cst_84 {dimension_numbers = #tpu.dot_dimension_numbers<[1], [0], [0], [1], [0, 0, 1, 1], [], []>} : vector<52x64xf32>, vector<64x128xf32>, vector<52x128xf32> -> vector<52x128xf32>
    %103 = arith.addf %98, %102 : vector<52x128xf32>
    %c7_85 = arith.constant 7 : index
    %c0_86 = arith.constant 0 : index
    %104 = vector.load %arg27[%c7_85, %c0_86] : memref<59x64xf32, #tpu.memory_space<vmem>>, vector<52x64xf32>
    %c7_87 = arith.constant 7 : index
    %c0_88 = arith.constant 0 : index
    %c0_89 = arith.constant 0 : index
    %105 = vector.load %arg5[%c7_87, %c0_88, %c0_89] : memref<8x64x128xf32, #tpu.memory_space<vmem>>, vector<1x64x128xf32>
    %106 = vector.shape_cast %105 : vector<1x64x128xf32> to vector<64x128xf32>
    %cst_90 = arith.constant dense<0.000000e+00> : vector<52x128xf32>
    %107 = tpu.matmul %104, %106, %cst_90 {dimension_numbers = #tpu.dot_dimension_numbers<[1], [0], [0], [1], [0, 0, 1, 1], [], []>} : vector<52x64xf32>, vector<64x128xf32>, vector<52x128xf32> -> vector<52x128xf32>
    %108 = arith.addf %103, %107 : vector<52x128xf32>
    %c0_91 = arith.constant 0 : index
    %c0_92 = arith.constant 0 : index
    %109 = vector.load %arg6[%c0_91, %c0_92] : memref<1x128xf32, #tpu.memory_space<vmem>>, vector<1x128xf32>
    %110 = vector.broadcast %109 : vector<1x128xf32> to vector<52x128xf32>
    %111 = arith.addf %108, %110 : vector<52x128xf32>
    %cst_93 = arith.constant 5.000000e-01 : f32
    %112 = vector.broadcast %cst_93 : f32 to vector<52x128xf32>
    %113 = arith.mulf %112, %111 : vector<52x128xf32>
    %cst_94 = arith.constant 0.707106769 : f32
    %114 = vector.broadcast %cst_94 : f32 to vector<52x128xf32>
    %115 = arith.mulf %111, %114 : vector<52x128xf32>
    %116 = math.absf %115 : vector<52x128xf32>
    %cst_95 = arith.constant 0.327591091 : f32
    %117 = vector.broadcast %cst_95 : f32 to vector<52x128xf32>
    %118 = arith.mulf %117, %116 : vector<52x128xf32>
    %cst_96 = arith.constant 1.000000e+00 : f32
    %119 = vector.broadcast %cst_96 : f32 to vector<52x128xf32>
    %120 = arith.addf %119, %118 : vector<52x128xf32>
    %cst_97 = arith.constant 1.000000e+00 : f32
    %121 = vector.broadcast %cst_97 : f32 to vector<52x128xf32>
    %122 = arith.divf %121, %120 : vector<52x128xf32>
    %cst_98 = arith.constant 1.06140542 : f32
    %123 = vector.broadcast %cst_98 : f32 to vector<52x128xf32>
    %124 = arith.mulf %123, %122 : vector<52x128xf32>
    %cst_99 = arith.constant -1.45315206 : f32
    %125 = vector.broadcast %cst_99 : f32 to vector<52x128xf32>
    %126 = arith.addf %124, %125 : vector<52x128xf32>
    %127 = arith.mulf %126, %122 : vector<52x128xf32>
    %cst_100 = arith.constant 1.42141378 : f32
    %128 = vector.broadcast %cst_100 : f32 to vector<52x128xf32>
    %129 = arith.addf %127, %128 : vector<52x128xf32>
    %130 = arith.mulf %129, %122 : vector<52x128xf32>
    %cst_101 = arith.constant -0.284496725 : f32
    %131 = vector.broadcast %cst_101 : f32 to vector<52x128xf32>
    %132 = arith.addf %130, %131 : vector<52x128xf32>
    %133 = arith.mulf %132, %122 : vector<52x128xf32>
    %cst_102 = arith.constant 0.254829586 : f32
    %134 = vector.broadcast %cst_102 : f32 to vector<52x128xf32>
    %135 = arith.addf %133, %134 : vector<52x128xf32>
    %136 = arith.mulf %135, %122 : vector<52x128xf32>
    %cst_103 = arith.constant 0.000000e+00 : f32
    %137 = vector.broadcast %cst_103 : f32 to vector<52x128xf32>
    %138 = arith.subf %137, %116 : vector<52x128xf32>
    %139 = arith.mulf %138, %116 : vector<52x128xf32>
    %140 = math.exp %139 : vector<52x128xf32>
    %141 = arith.mulf %136, %140 : vector<52x128xf32>
    %cst_104 = arith.constant 1.000000e+00 : f32
    %142 = vector.broadcast %cst_104 : f32 to vector<52x128xf32>
    %143 = arith.subf %142, %141 : vector<52x128xf32>
    %cst_105 = arith.constant 0.000000e+00 : f32
    %144 = vector.broadcast %cst_105 : f32 to vector<52x128xf32>
    %145 = arith.cmpf oge, %115, %144 : vector<52x128xf32>
    %cst_106 = arith.constant 0.000000e+00 : f32
    %146 = vector.broadcast %cst_106 : f32 to vector<52x128xf32>
    %147 = arith.subf %146, %143 : vector<52x128xf32>
    %148 = arith.select %145, %143, %147 : vector<52x128xi1>, vector<52x128xf32>
    %cst_107 = arith.constant 1.000000e+00 : f32
    %149 = vector.broadcast %cst_107 : f32 to vector<52x128xf32>
    %150 = arith.addf %149, %148 : vector<52x128xf32>
    %151 = arith.mulf %113, %150 : vector<52x128xf32>
    %cst_108 = arith.constant 0.000000e+00 : f32
    %152 = vector.broadcast %cst_108 : f32 to vector<60x128xf32>
    %c0_109 = arith.constant 0 : index
    %c0_110 = arith.constant 0 : index
    %153 = vector.load %arg28[%c0_109, %c0_110] : memref<60x128xf32, #tpu.memory_space<vmem>>, vector<60x128xf32>
    tpu.vector_store %arg28[%c0_109, %c0_110], %152 {strides = array<i32>} : memref<60x128xf32, #tpu.memory_space<vmem>>, vector<60x128xf32>,
    %c4_111 = arith.constant 4 : index
    %c0_112 = arith.constant 0 : index
    %154 = vector.load %arg28[%c4_111, %c0_112] : memref<60x128xf32, #tpu.memory_space<vmem>>, vector<52x128xf32>
    tpu.vector_store %arg28[%c4_111, %c0_112], %151 {strides = array<i32>} : memref<60x128xf32, #tpu.memory_space<vmem>>, vector<52x128xf32>,
    %c0_113 = arith.constant 0 : index
    %c0_114 = arith.constant 0 : index
    %155 = vector.load %arg28[%c0_113, %c0_114] : memref<60x128xf32, #tpu.memory_space<vmem>>, vector<53x128xf32>
    %c0_115 = arith.constant 0 : index
    %c0_116 = arith.constant 0 : index
    %c0_117 = arith.constant 0 : index
    %156 = vector.load %arg7[%c0_115, %c0_116, %c0_117] : memref<8x128x128xf32, #tpu.memory_space<vmem>>, vector<1x128x128xf32>
    %157 = vector.shape_cast %156 : vector<1x128x128xf32> to vector<128x128xf32>
    %cst_118 = arith.constant dense<0.000000e+00> : vector<53x128xf32>
    %158 = tpu.matmul %155, %157, %cst_118 {dimension_numbers = #tpu.dot_dimension_numbers<[1], [0], [0], [1], [0, 0, 1, 1], [], []>} : vector<53x128xf32>, vector<128x128xf32>, vector<53x128xf32> -> vector<53x128xf32>
    %c1_119 = arith.constant 1 : index
    %c0_120 = arith.constant 0 : index
    %159 = vector.load %arg28[%c1_119, %c0_120] : memref<60x128xf32, #tpu.memory_space<vmem>>, vector<53x128xf32>
    %c1_121 = arith.constant 1 : index
    %c0_122 = arith.constant 0 : index
    %c0_123 = arith.constant 0 : index
    %160 = vector.load %arg7[%c1_121, %c0_122, %c0_123] : memref<8x128x128xf32, #tpu.memory_space<vmem>>, vector<1x128x128xf32>
    %161 = vector.shape_cast %160 : vector<1x128x128xf32> to vector<128x128xf32>
    %cst_124 = arith.constant dense<0.000000e+00> : vector<53x128xf32>
    %162 = tpu.matmul %159, %161, %cst_124 {dimension_numbers = #tpu.dot_dimension_numbers<[1], [0], [0], [1], [0, 0, 1, 1], [], []>} : vector<53x128xf32>, vector<128x128xf32>, vector<53x128xf32> -> vector<53x128xf32>
    %163 = arith.addf %158, %162 : vector<53x128xf32>
    %c2_125 = arith.constant 2 : index
    %c0_126 = arith.constant 0 : index
    %164 = vector.load %arg28[%c2_125, %c0_126] : memref<60x128xf32, #tpu.memory_space<vmem>>, vector<53x128xf32>
    %c2_127 = arith.constant 2 : index
    %c0_128 = arith.constant 0 : index
    %c0_129 = arith.constant 0 : index
    %165 = vector.load %arg7[%c2_127, %c0_128, %c0_129] : memref<8x128x128xf32, #tpu.memory_space<vmem>>, vector<1x128x128xf32>
    %166 = vector.shape_cast %165 : vector<1x128x128xf32> to vector<128x128xf32>
    %cst_130 = arith.constant dense<0.000000e+00> : vector<53x128xf32>
    %167 = tpu.matmul %164, %166, %cst_130 {dimension_numbers = #tpu.dot_dimension_numbers<[1], [0], [0], [1], [0, 0, 1, 1], [], []>} : vector<53x128xf32>, vector<128x128xf32>, vector<53x128xf32> -> vector<53x128xf32>
    %168 = arith.addf %163, %167 : vector<53x128xf32>
    %c3_131 = arith.constant 3 : index
    %c0_132 = arith.constant 0 : index
    %169 = vector.load %arg28[%c3_131, %c0_132] : memref<60x128xf32, #tpu.memory_space<vmem>>, vector<53x128xf32>
    %c3_133 = arith.constant 3 : index
    %c0_134 = arith.constant 0 : index
    %c0_135 = arith.constant 0 : index
    %170 = vector.load %arg7[%c3_133, %c0_134, %c0_135] : memref<8x128x128xf32, #tpu.memory_space<vmem>>, vector<1x128x128xf32>
    %171 = vector.shape_cast %170 : vector<1x128x128xf32> to vector<128x128xf32>
    %cst_136 = arith.constant dense<0.000000e+00> : vector<53x128xf32>
    %172 = tpu.matmul %169, %171, %cst_136 {dimension_numbers = #tpu.dot_dimension_numbers<[1], [0], [0], [1], [0, 0, 1, 1], [], []>} : vector<53x128xf32>, vector<128x128xf32>, vector<53x128xf32> -> vector<53x128xf32>
    %173 = arith.addf %168, %172 : vector<53x128xf32>
    %c4_137 = arith.constant 4 : index
    %c0_138 = arith.constant 0 : index
    %174 = vector.load %arg28[%c4_137, %c0_138] : memref<60x128xf32, #tpu.memory_space<vmem>>, vector<53x128xf32>
    %c4_139 = arith.constant 4 : index
    %c0_140 = arith.constant 0 : index
    %c0_141 = arith.constant 0 : index
    %175 = vector.load %arg7[%c4_139, %c0_140, %c0_141] : memref<8x128x128xf32, #tpu.memory_space<vmem>>, vector<1x128x128xf32>
    %176 = vector.shape_cast %175 : vector<1x128x128xf32> to vector<128x128xf32>
    %cst_142 = arith.constant dense<0.000000e+00> : vector<53x128xf32>
    %177 = tpu.matmul %174, %176, %cst_142 {dimension_numbers = #tpu.dot_dimension_numbers<[1], [0], [0], [1], [0, 0, 1, 1], [], []>} : vector<53x128xf32>, vector<128x128xf32>, vector<53x128xf32> -> vector<53x128xf32>
    %178 = arith.addf %173, %177 : vector<53x128xf32>
    %c5_143 = arith.constant 5 : index
    %c0_144 = arith.constant 0 : index
    %179 = vector.load %arg28[%c5_143, %c0_144] : memref<60x128xf32, #tpu.memory_space<vmem>>, vector<53x128xf32>
    %c5_145 = arith.constant 5 : index
    %c0_146 = arith.constant 0 : index
    %c0_147 = arith.constant 0 : index
    %180 = vector.load %arg7[%c5_145, %c0_146, %c0_147] : memref<8x128x128xf32, #tpu.memory_space<vmem>>, vector<1x128x128xf32>
    %181 = vector.shape_cast %180 : vector<1x128x128xf32> to vector<128x128xf32>
    %cst_148 = arith.constant dense<0.000000e+00> : vector<53x128xf32>
    %182 = tpu.matmul %179, %181, %cst_148 {dimension_numbers = #tpu.dot_dimension_numbers<[1], [0], [0], [1], [0, 0, 1, 1], [], []>} : vector<53x128xf32>, vector<128x128xf32>, vector<53x128xf32> -> vector<53x128xf32>
    %183 = arith.addf %178, %182 : vector<53x128xf32>
    %c6_149 = arith.constant 6 : index
    %c0_150 = arith.constant 0 : index
    %184 = vector.load %arg28[%c6_149, %c0_150] : memref<60x128xf32, #tpu.memory_space<vmem>>, vector<53x128xf32>
    %c6_151 = arith.constant 6 : index
    %c0_152 = arith.constant 0 : index
    %c0_153 = arith.constant 0 : index
    %185 = vector.load %arg7[%c6_151, %c0_152, %c0_153] : memref<8x128x128xf32, #tpu.memory_space<vmem>>, vector<1x128x128xf32>
    %186 = vector.shape_cast %185 : vector<1x128x128xf32> to vector<128x128xf32>
    %cst_154 = arith.constant dense<0.000000e+00> : vector<53x128xf32>
    %187 = tpu.matmul %184, %186, %cst_154 {dimension_numbers = #tpu.dot_dimension_numbers<[1], [0], [0], [1], [0, 0, 1, 1], [], []>} : vector<53x128xf32>, vector<128x128xf32>, vector<53x128xf32> -> vector<53x128xf32>
    %188 = arith.addf %183, %187 : vector<53x128xf32>
    %c7_155 = arith.constant 7 : index
    %c0_156 = arith.constant 0 : index
    %189 = vector.load %arg28[%c7_155, %c0_156] : memref<60x128xf32, #tpu.memory_space<vmem>>, vector<53x128xf32>
    %c7_157 = arith.constant 7 : index
    %c0_158 = arith.constant 0 : index
    %c0_159 = arith.constant 0 : index
    %190 = vector.load %arg7[%c7_157, %c0_158, %c0_159] : memref<8x128x128xf32, #tpu.memory_space<vmem>>, vector<1x128x128xf32>
    %191 = vector.shape_cast %190 : vector<1x128x128xf32> to vector<128x128xf32>
    %cst_160 = arith.constant dense<0.000000e+00> : vector<53x128xf32>
    %192 = tpu.matmul %189, %191, %cst_160 {dimension_numbers = #tpu.dot_dimension_numbers<[1], [0], [0], [1], [0, 0, 1, 1], [], []>} : vector<53x128xf32>, vector<128x128xf32>, vector<53x128xf32> -> vector<53x128xf32>
    %193 = arith.addf %188, %192 : vector<53x128xf32>
    %c0_161 = arith.constant 0 : index
    %c0_162 = arith.constant 0 : index
    %194 = vector.load %arg8[%c0_161, %c0_162] : memref<1x128xf32, #tpu.memory_space<vmem>>, vector<1x128xf32>
    %195 = vector.broadcast %194 : vector<1x128xf32> to vector<53x128xf32>
    %196 = arith.addf %193, %195 : vector<53x128xf32>
    %cst_163 = arith.constant 5.000000e-01 : f32
    %197 = vector.broadcast %cst_163 : f32 to vector<53x128xf32>
    %198 = arith.mulf %197, %196 : vector<53x128xf32>
    %cst_164 = arith.constant 0.707106769 : f32
    %199 = vector.broadcast %cst_164 : f32 to vector<53x128xf32>
    %200 = arith.mulf %196, %199 : vector<53x128xf32>
    %201 = math.absf %200 : vector<53x128xf32>
    %cst_165 = arith.constant 0.327591091 : f32
    %202 = vector.broadcast %cst_165 : f32 to vector<53x128xf32>
    %203 = arith.mulf %202, %201 : vector<53x128xf32>
    %cst_166 = arith.constant 1.000000e+00 : f32
    %204 = vector.broadcast %cst_166 : f32 to vector<53x128xf32>
    %205 = arith.addf %204, %203 : vector<53x128xf32>
    %cst_167 = arith.constant 1.000000e+00 : f32
    %206 = vector.broadcast %cst_167 : f32 to vector<53x128xf32>
    %207 = arith.divf %206, %205 : vector<53x128xf32>
    %cst_168 = arith.constant 1.06140542 : f32
    %208 = vector.broadcast %cst_168 : f32 to vector<53x128xf32>
    %209 = arith.mulf %208, %207 : vector<53x128xf32>
    %cst_169 = arith.constant -1.45315206 : f32
    %210 = vector.broadcast %cst_169 : f32 to vector<53x128xf32>
    %211 = arith.addf %209, %210 : vector<53x128xf32>
    %212 = arith.mulf %211, %207 : vector<53x128xf32>
    %cst_170 = arith.constant 1.42141378 : f32
    %213 = vector.broadcast %cst_170 : f32 to vector<53x128xf32>
    %214 = arith.addf %212, %213 : vector<53x128xf32>
    %215 = arith.mulf %214, %207 : vector<53x128xf32>
    %cst_171 = arith.constant -0.284496725 : f32
    %216 = vector.broadcast %cst_171 : f32 to vector<53x128xf32>
    %217 = arith.addf %215, %216 : vector<53x128xf32>
    %218 = arith.mulf %217, %207 : vector<53x128xf32>
    %cst_172 = arith.constant 0.254829586 : f32
    %219 = vector.broadcast %cst_172 : f32 to vector<53x128xf32>
    %220 = arith.addf %218, %219 : vector<53x128xf32>
    %221 = arith.mulf %220, %207 : vector<53x128xf32>
    %cst_173 = arith.constant 0.000000e+00 : f32
    %222 = vector.broadcast %cst_173 : f32 to vector<53x128xf32>
    %223 = arith.subf %222, %201 : vector<53x128xf32>
    %224 = arith.mulf %223, %201 : vector<53x128xf32>
    %225 = math.exp %224 : vector<53x128xf32>
    %226 = arith.mulf %221, %225 : vector<53x128xf32>
    %cst_174 = arith.constant 1.000000e+00 : f32
    %227 = vector.broadcast %cst_174 : f32 to vector<53x128xf32>
    %228 = arith.subf %227, %226 : vector<53x128xf32>
    %cst_175 = arith.constant 0.000000e+00 : f32
    %229 = vector.broadcast %cst_175 : f32 to vector<53x128xf32>
    %230 = arith.cmpf oge, %200, %229 : vector<53x128xf32>
    %cst_176 = arith.constant 0.000000e+00 : f32
    %231 = vector.broadcast %cst_176 : f32 to vector<53x128xf32>
    %232 = arith.subf %231, %228 : vector<53x128xf32>
    %233 = arith.select %230, %228, %232 : vector<53x128xi1>, vector<53x128xf32>
    %cst_177 = arith.constant 1.000000e+00 : f32
    %234 = vector.broadcast %cst_177 : f32 to vector<53x128xf32>
    %235 = arith.addf %234, %233 : vector<53x128xf32>
    %236 = arith.mulf %198, %235 : vector<53x128xf32>
    %cst_178 = arith.constant -1.000000e+30 : f32
    %237 = vector.broadcast %cst_178 : f32 to vector<57x128xf32>
    %c0_179 = arith.constant 0 : index
    %c0_180 = arith.constant 0 : index
    %238 = vector.load %arg29[%c0_179, %c0_180] : memref<57x128xf32, #tpu.memory_space<vmem>>, vector<57x128xf32>
    tpu.vector_store %arg29[%c0_179, %c0_180], %237 {strides = array<i32>} : memref<57x128xf32, #tpu.memory_space<vmem>>, vector<57x128xf32>,
    %c2_181 = arith.constant 2 : index
    %c0_182 = arith.constant 0 : index
    %239 = vector.load %arg29[%c2_181, %c0_182] : memref<57x128xf32, #tpu.memory_space<vmem>>, vector<53x128xf32>
    tpu.vector_store %arg29[%c2_181, %c0_182], %236 {strides = array<i32>} : memref<57x128xf32, #tpu.memory_space<vmem>>, vector<53x128xf32>,
    %c0_183 = arith.constant 0 : index
    %c0_184 = arith.constant 0 : index
    %240 = vector.load %arg29[%c0_183, %c0_184] : memref<57x128xf32, #tpu.memory_space<vmem>>, vector<54x128xf32>
    %c1_185 = arith.constant 1 : index
    %c0_186 = arith.constant 0 : index
    %241 = vector.load %arg29[%c1_185, %c0_186] : memref<57x128xf32, #tpu.memory_space<vmem>>, vector<54x128xf32>
    %242 = arith.maximumf %240, %241 : vector<54x128xf32>
    %c2_187 = arith.constant 2 : index
    %c0_188 = arith.constant 0 : index
    %243 = vector.load %arg29[%c2_187, %c0_188] : memref<57x128xf32, #tpu.memory_space<vmem>>, vector<54x128xf32>
    %244 = arith.maximumf %242, %243 : vector<54x128xf32>
    %c3_189 = arith.constant 3 : index
    %c0_190 = arith.constant 0 : index
    %245 = vector.load %arg29[%c3_189, %c0_190] : memref<57x128xf32, #tpu.memory_space<vmem>>, vector<54x128xf32>
    %246 = arith.maximumf %244, %245 : vector<54x128xf32>
    %c0_191 = arith.constant 0 : index
    %c0_192 = arith.constant 0 : index
    %247 = vector.load %arg16[%c0_191, %c0_192] : memref<14x54xf32, #tpu.memory_space<vmem>>, vector<14x54xf32>
    %cst_193 = arith.constant dense<0.000000e+00> : vector<14x128xf32>
    %248 = tpu.matmul %247, %246, %cst_193 {dimension_numbers = #tpu.dot_dimension_numbers<[1], [0], [0], [1], [0, 0, 1, 1], [], []>} : vector<14x54xf32>, vector<54x128xf32>, vector<14x128xf32> -> vector<14x128xf32>
    %c0_194 = arith.constant 0 : index
    %c0_195 = arith.constant 0 : index
    %c0_196 = arith.constant 0 : index
    %249 = vector.load %arg2[%c0_194, %c0_195, %c0_196] : memref<1x13x400xf32, #tpu.memory_space<vmem>>, vector<1x13x400xf32>
    %250 = vector.shape_cast %249 : vector<1x13x400xf32> to vector<13x400xf32>
    %c0_197 = arith.constant 0 : index
    %c0_198 = arith.constant 0 : index
    %251 = vector.load %arg9[%c0_197, %c0_198] : memref<400x64xf32, #tpu.memory_space<vmem>>, vector<400x64xf32>
    %cst_199 = arith.constant dense<0.000000e+00> : vector<13x64xf32>
    %252 = tpu.matmul %250, %251, %cst_199 {dimension_numbers = #tpu.dot_dimension_numbers<[1], [0], [0], [1], [0, 0, 1, 1], [], []>} : vector<13x400xf32>, vector<400x64xf32>, vector<13x64xf32> -> vector<13x64xf32>
    %c0_200 = arith.constant 0 : index
    %c0_201 = arith.constant 0 : index
    %253 = vector.load %arg10[%c0_200, %c0_201] : memref<1x64xf32, #tpu.memory_space<vmem>>, vector<1x64xf32>
    %254 = vector.broadcast %253 : vector<1x64xf32> to vector<13x64xf32>
    %255 = arith.addf %252, %254 : vector<13x64xf32>
    %cst_202 = arith.constant 5.000000e-01 : f32
    %256 = vector.broadcast %cst_202 : f32 to vector<13x64xf32>
    %257 = arith.mulf %256, %255 : vector<13x64xf32>
    %cst_203 = arith.constant 0.707106769 : f32
    %258 = vector.broadcast %cst_203 : f32 to vector<13x64xf32>
    %259 = arith.mulf %255, %258 : vector<13x64xf32>
    %260 = math.absf %259 : vector<13x64xf32>
    %cst_204 = arith.constant 0.327591091 : f32
    %261 = vector.broadcast %cst_204 : f32 to vector<13x64xf32>
    %262 = arith.mulf %261, %260 : vector<13x64xf32>
    %cst_205 = arith.constant 1.000000e+00 : f32
    %263 = vector.broadcast %cst_205 : f32 to vector<13x64xf32>
    %264 = arith.addf %263, %262 : vector<13x64xf32>
    %cst_206 = arith.constant 1.000000e+00 : f32
    %265 = vector.broadcast %cst_206 : f32 to vector<13x64xf32>
    %266 = arith.divf %265, %264 : vector<13x64xf32>
    %cst_207 = arith.constant 1.06140542 : f32
    %267 = vector.broadcast %cst_207 : f32 to vector<13x64xf32>
    %268 = arith.mulf %267, %266 : vector<13x64xf32>
    %cst_208 = arith.constant -1.45315206 : f32
    %269 = vector.broadcast %cst_208 : f32 to vector<13x64xf32>
    %270 = arith.addf %268, %269 : vector<13x64xf32>
    %271 = arith.mulf %270, %266 : vector<13x64xf32>
    %cst_209 = arith.constant 1.42141378 : f32
    %272 = vector.broadcast %cst_209 : f32 to vector<13x64xf32>
    %273 = arith.addf %271, %272 : vector<13x64xf32>
    %274 = arith.mulf %273, %266 : vector<13x64xf32>
    %cst_210 = arith.constant -0.284496725 : f32
    %275 = vector.broadcast %cst_210 : f32 to vector<13x64xf32>
    %276 = arith.addf %274, %275 : vector<13x64xf32>
    %277 = arith.mulf %276, %266 : vector<13x64xf32>
    %cst_211 = arith.constant 0.254829586 : f32
    %278 = vector.broadcast %cst_211 : f32 to vector<13x64xf32>
    %279 = arith.addf %277, %278 : vector<13x64xf32>
    %280 = arith.mulf %279, %266 : vector<13x64xf32>
    %cst_212 = arith.constant 0.000000e+00 : f32
    %281 = vector.broadcast %cst_212 : f32 to vector<13x64xf32>
    %282 = arith.subf %281, %260 : vector<13x64xf32>
    %283 = arith.mulf %282, %260 : vector<13x64xf32>
    %284 = math.exp %283 : vector<13x64xf32>
    %285 = arith.mulf %280, %284 : vector<13x64xf32>
    %cst_213 = arith.constant 1.000000e+00 : f32
    %286 = vector.broadcast %cst_213 : f32 to vector<13x64xf32>
    %287 = arith.subf %286, %285 : vector<13x64xf32>
    %cst_214 = arith.constant 0.000000e+00 : f32
    %288 = vector.broadcast %cst_214 : f32 to vector<13x64xf32>
    %289 = arith.cmpf oge, %259, %288 : vector<13x64xf32>
    %cst_215 = arith.constant 0.000000e+00 : f32
    %290 = vector.broadcast %cst_215 : f32 to vector<13x64xf32>
    %291 = arith.subf %290, %287 : vector<13x64xf32>
    %292 = arith.select %289, %287, %291 : vector<13x64xi1>, vector<13x64xf32>
    %cst_216 = arith.constant 1.000000e+00 : f32
    %293 = vector.broadcast %cst_216 : f32 to vector<13x64xf32>
    %294 = arith.addf %293, %292 : vector<13x64xf32>
    %295 = arith.mulf %257, %294 : vector<13x64xf32>
    %cst_217 = arith.constant -1.000000e+30 : f32
    %296 = vector.broadcast %cst_217 : f32 to vector<17x64xf32>
    %c0_218 = arith.constant 0 : index
    %c0_219 = arith.constant 0 : index
    %297 = vector.load %arg30[%c0_218, %c0_219] : memref<17x64xf32, #tpu.memory_space<vmem>>, vector<17x64xf32>
    tpu.vector_store %arg30[%c0_218, %c0_219], %296 {strides = array<i32>} : memref<17x64xf32, #tpu.memory_space<vmem>>, vector<17x64xf32>,
    %c2_220 = arith.constant 2 : index
    %c0_221 = arith.constant 0 : index
    %298 = vector.load %arg30[%c2_220, %c0_221] : memref<17x64xf32, #tpu.memory_space<vmem>>, vector<13x64xf32>
    tpu.vector_store %arg30[%c2_220, %c0_221], %295 {strides = array<i32>} : memref<17x64xf32, #tpu.memory_space<vmem>>, vector<13x64xf32>,
    %c0_222 = arith.constant 0 : index
    %c0_223 = arith.constant 0 : index
    %299 = vector.load %arg30[%c0_222, %c0_223] : memref<17x64xf32, #tpu.memory_space<vmem>>, vector<14x64xf32>
    %c1_224 = arith.constant 1 : index
    %c0_225 = arith.constant 0 : index
    %300 = vector.load %arg30[%c1_224, %c0_225] : memref<17x64xf32, #tpu.memory_space<vmem>>, vector<14x64xf32>
    %301 = arith.maximumf %299, %300 : vector<14x64xf32>
    %c2_226 = arith.constant 2 : index
    %c0_227 = arith.constant 0 : index
    %302 = vector.load %arg30[%c2_226, %c0_227] : memref<17x64xf32, #tpu.memory_space<vmem>>, vector<14x64xf32>
    %303 = arith.maximumf %301, %302 : vector<14x64xf32>
    %c3_228 = arith.constant 3 : index
    %c0_229 = arith.constant 0 : index
    %304 = vector.load %arg30[%c3_228, %c0_229] : memref<17x64xf32, #tpu.memory_space<vmem>>, vector<14x64xf32>
    %305 = arith.maximumf %303, %304 : vector<14x64xf32>
    %c0_230 = arith.constant 0 : index
    %c0_231 = arith.constant 0 : index
    %306 = vector.load %arg17[%c0_230, %c0_231] : memref<7x14xf32, #tpu.memory_space<vmem>>, vector<7x14xf32>
    %cst_232 = arith.constant dense<0.000000e+00> : vector<7x64xf32>
    %307 = tpu.matmul %306, %305, %cst_232 {dimension_numbers = #tpu.dot_dimension_numbers<[1], [0], [0], [1], [0, 0, 1, 1], [], []>} : vector<7x14xf32>, vector<14x64xf32>, vector<7x64xf32> -> vector<7x64xf32>
    %cst_233 = arith.constant 0.000000e+00 : f32
    %308 = vector.broadcast %cst_233 : f32 to vector<13x64xf32>
    %c0_234 = arith.constant 0 : index
    %c0_235 = arith.constant 0 : index
    %309 = vector.load %arg31[%c0_234, %c0_235] : memref<13x64xf32, #tpu.memory_space<vmem>>, vector<13x64xf32>
    tpu.vector_store %arg31[%c0_234, %c0_235], %308 {strides = array<i32>} : memref<13x64xf32, #tpu.memory_space<vmem>>, vector<13x64xf32>,
    %c3_236 = arith.constant 3 : index
    %c0_237 = arith.constant 0 : index
    %310 = vector.load %arg31[%c3_236, %c0_237] : memref<13x64xf32, #tpu.memory_space<vmem>>, vector<7x64xf32>
    tpu.vector_store %arg31[%c3_236, %c0_237], %307 {strides = array<i32>} : memref<13x64xf32, #tpu.memory_space<vmem>>, vector<7x64xf32>,
    %c0_238 = arith.constant 0 : index
    %c0_239 = arith.constant 0 : index
    %311 = vector.load %arg31[%c0_238, %c0_239] : memref<13x64xf32, #tpu.memory_space<vmem>>, vector<7x64xf32>
    %c0_240 = arith.constant 0 : index
    %c0_241 = arith.constant 0 : index
    %c0_242 = arith.constant 0 : index
    %312 = vector.load %arg11[%c0_240, %c0_241, %c0_242] : memref<7x64x128xf32, #tpu.memory_space<vmem>>, vector<1x64x128xf32>
    %313 = vector.shape_cast %312 : vector<1x64x128xf32> to vector<64x128xf32>
    %cst_243 = arith.constant dense<0.000000e+00> : vector<7x128xf32>
    %314 = tpu.matmul %311, %313, %cst_243 {dimension_numbers = #tpu.dot_dimension_numbers<[1], [0], [0], [1], [0, 0, 1, 1], [], []>} : vector<7x64xf32>, vector<64x128xf32>, vector<7x128xf32> -> vector<7x128xf32>
    %c1_244 = arith.constant 1 : index
    %c0_245 = arith.constant 0 : index
    %315 = vector.load %arg31[%c1_244, %c0_245] : memref<13x64xf32, #tpu.memory_space<vmem>>, vector<7x64xf32>
    %c1_246 = arith.constant 1 : index
    %c0_247 = arith.constant 0 : index
    %c0_248 = arith.constant 0 : index
    %316 = vector.load %arg11[%c1_246, %c0_247, %c0_248] : memref<7x64x128xf32, #tpu.memory_space<vmem>>, vector<1x64x128xf32>
    %317 = vector.shape_cast %316 : vector<1x64x128xf32> to vector<64x128xf32>
    %cst_249 = arith.constant dense<0.000000e+00> : vector<7x128xf32>
    %318 = tpu.matmul %315, %317, %cst_249 {dimension_numbers = #tpu.dot_dimension_numbers<[1], [0], [0], [1], [0, 0, 1, 1], [], []>} : vector<7x64xf32>, vector<64x128xf32>, vector<7x128xf32> -> vector<7x128xf32>
    %319 = arith.addf %314, %318 : vector<7x128xf32>
    %c2_250 = arith.constant 2 : index
    %c0_251 = arith.constant 0 : index
    %320 = vector.load %arg31[%c2_250, %c0_251] : memref<13x64xf32, #tpu.memory_space<vmem>>, vector<7x64xf32>
    %c2_252 = arith.constant 2 : index
    %c0_253 = arith.constant 0 : index
    %c0_254 = arith.constant 0 : index
    %321 = vector.load %arg11[%c2_252, %c0_253, %c0_254] : memref<7x64x128xf32, #tpu.memory_space<vmem>>, vector<1x64x128xf32>
    %322 = vector.shape_cast %321 : vector<1x64x128xf32> to vector<64x128xf32>
    %cst_255 = arith.constant dense<0.000000e+00> : vector<7x128xf32>
    %323 = tpu.matmul %320, %322, %cst_255 {dimension_numbers = #tpu.dot_dimension_numbers<[1], [0], [0], [1], [0, 0, 1, 1], [], []>} : vector<7x64xf32>, vector<64x128xf32>, vector<7x128xf32> -> vector<7x128xf32>
    %324 = arith.addf %319, %323 : vector<7x128xf32>
    %c3_256 = arith.constant 3 : index
    %c0_257 = arith.constant 0 : index
    %325 = vector.load %arg31[%c3_256, %c0_257] : memref<13x64xf32, #tpu.memory_space<vmem>>, vector<7x64xf32>
    %c3_258 = arith.constant 3 : index
    %c0_259 = arith.constant 0 : index
    %c0_260 = arith.constant 0 : index
    %326 = vector.load %arg11[%c3_258, %c0_259, %c0_260] : memref<7x64x128xf32, #tpu.memory_space<vmem>>, vector<1x64x128xf32>
    %327 = vector.shape_cast %326 : vector<1x64x128xf32> to vector<64x128xf32>
    %cst_261 = arith.constant dense<0.000000e+00> : vector<7x128xf32>
    %328 = tpu.matmul %325, %327, %cst_261 {dimension_numbers = #tpu.dot_dimension_numbers<[1], [0], [0], [1], [0, 0, 1, 1], [], []>} : vector<7x64xf32>, vector<64x128xf32>, vector<7x128xf32> -> vector<7x128xf32>
    %329 = arith.addf %324, %328 : vector<7x128xf32>
    %c4_262 = arith.constant 4 : index
    %c0_263 = arith.constant 0 : index
    %330 = vector.load %arg31[%c4_262, %c0_263] : memref<13x64xf32, #tpu.memory_space<vmem>>, vector<7x64xf32>
    %c4_264 = arith.constant 4 : index
    %c0_265 = arith.constant 0 : index
    %c0_266 = arith.constant 0 : index
    %331 = vector.load %arg11[%c4_264, %c0_265, %c0_266] : memref<7x64x128xf32, #tpu.memory_space<vmem>>, vector<1x64x128xf32>
    %332 = vector.shape_cast %331 : vector<1x64x128xf32> to vector<64x128xf32>
    %cst_267 = arith.constant dense<0.000000e+00> : vector<7x128xf32>
    %333 = tpu.matmul %330, %332, %cst_267 {dimension_numbers = #tpu.dot_dimension_numbers<[1], [0], [0], [1], [0, 0, 1, 1], [], []>} : vector<7x64xf32>, vector<64x128xf32>, vector<7x128xf32> -> vector<7x128xf32>
    %334 = arith.addf %329, %333 : vector<7x128xf32>
    %c5_268 = arith.constant 5 : index
    %c0_269 = arith.constant 0 : index
    %335 = vector.load %arg31[%c5_268, %c0_269] : memref<13x64xf32, #tpu.memory_space<vmem>>, vector<7x64xf32>
    %c5_270 = arith.constant 5 : index
    %c0_271 = arith.constant 0 : index
    %c0_272 = arith.constant 0 : index
    %336 = vector.load %arg11[%c5_270, %c0_271, %c0_272] : memref<7x64x128xf32, #tpu.memory_space<vmem>>, vector<1x64x128xf32>
    %337 = vector.shape_cast %336 : vector<1x64x128xf32> to vector<64x128xf32>
    %cst_273 = arith.constant dense<0.000000e+00> : vector<7x128xf32>
    %338 = tpu.matmul %335, %337, %cst_273 {dimension_numbers = #tpu.dot_dimension_numbers<[1], [0], [0], [1], [0, 0, 1, 1], [], []>} : vector<7x64xf32>, vector<64x128xf32>, vector<7x128xf32> -> vector<7x128xf32>
    %339 = arith.addf %334, %338 : vector<7x128xf32>
    %c6_274 = arith.constant 6 : index
    %c0_275 = arith.constant 0 : index
    %340 = vector.load %arg31[%c6_274, %c0_275] : memref<13x64xf32, #tpu.memory_space<vmem>>, vector<7x64xf32>
    %c6_276 = arith.constant 6 : index
    %c0_277 = arith.constant 0 : index
    %c0_278 = arith.constant 0 : index
    %341 = vector.load %arg11[%c6_276, %c0_277, %c0_278] : memref<7x64x128xf32, #tpu.memory_space<vmem>>, vector<1x64x128xf32>
    %342 = vector.shape_cast %341 : vector<1x64x128xf32> to vector<64x128xf32>
    %cst_279 = arith.constant dense<0.000000e+00> : vector<7x128xf32>
    %343 = tpu.matmul %340, %342, %cst_279 {dimension_numbers = #tpu.dot_dimension_numbers<[1], [0], [0], [1], [0, 0, 1, 1], [], []>} : vector<7x64xf32>, vector<64x128xf32>, vector<7x128xf32> -> vector<7x128xf32>
    %344 = arith.addf %339, %343 : vector<7x128xf32>
    %c0_280 = arith.constant 0 : index
    %c0_281 = arith.constant 0 : index
    %345 = vector.load %arg12[%c0_280, %c0_281] : memref<1x128xf32, #tpu.memory_space<vmem>>, vector<1x128xf32>
    %346 = vector.broadcast %345 : vector<1x128xf32> to vector<7x128xf32>
    %347 = arith.addf %344, %346 : vector<7x128xf32>
    %cst_282 = arith.constant 5.000000e-01 : f32
    %348 = vector.broadcast %cst_282 : f32 to vector<7x128xf32>
    %349 = arith.mulf %348, %347 : vector<7x128xf32>
    %cst_283 = arith.constant 0.707106769 : f32
    %350 = vector.broadcast %cst_283 : f32 to vector<7x128xf32>
    %351 = arith.mulf %347, %350 : vector<7x128xf32>
    %352 = math.absf %351 : vector<7x128xf32>
    %cst_284 = arith.constant 0.327591091 : f32
    %353 = vector.broadcast %cst_284 : f32 to vector<7x128xf32>
    %354 = arith.mulf %353, %352 : vector<7x128xf32>
    %cst_285 = arith.constant 1.000000e+00 : f32
    %355 = vector.broadcast %cst_285 : f32 to vector<7x128xf32>
    %356 = arith.addf %355, %354 : vector<7x128xf32>
    %cst_286 = arith.constant 1.000000e+00 : f32
    %357 = vector.broadcast %cst_286 : f32 to vector<7x128xf32>
    %358 = arith.divf %357, %356 : vector<7x128xf32>
    %cst_287 = arith.constant 1.06140542 : f32
    %359 = vector.broadcast %cst_287 : f32 to vector<7x128xf32>
    %360 = arith.mulf %359, %358 : vector<7x128xf32>
    %cst_288 = arith.constant -1.45315206 : f32
    %361 = vector.broadcast %cst_288 : f32 to vector<7x128xf32>
    %362 = arith.addf %360, %361 : vector<7x128xf32>
    %363 = arith.mulf %362, %358 : vector<7x128xf32>
    %cst_289 = arith.constant 1.42141378 : f32
    %364 = vector.broadcast %cst_289 : f32 to vector<7x128xf32>
    %365 = arith.addf %363, %364 : vector<7x128xf32>
    %366 = arith.mulf %365, %358 : vector<7x128xf32>
    %cst_290 = arith.constant -0.284496725 : f32
    %367 = vector.broadcast %cst_290 : f32 to vector<7x128xf32>
    %368 = arith.addf %366, %367 : vector<7x128xf32>
    %369 = arith.mulf %368, %358 : vector<7x128xf32>
    %cst_291 = arith.constant 0.254829586 : f32
    %370 = vector.broadcast %cst_291 : f32 to vector<7x128xf32>
    %371 = arith.addf %369, %370 : vector<7x128xf32>
    %372 = arith.mulf %371, %358 : vector<7x128xf32>
    %cst_292 = arith.constant 0.000000e+00 : f32
    %373 = vector.broadcast %cst_292 : f32 to vector<7x128xf32>
    %374 = arith.subf %373, %352 : vector<7x128xf32>
    %375 = arith.mulf %374, %352 : vector<7x128xf32>
    %376 = math.exp %375 : vector<7x128xf32>
    %377 = arith.mulf %372, %376 : vector<7x128xf32>
    %cst_293 = arith.constant 1.000000e+00 : f32
    %378 = vector.broadcast %cst_293 : f32 to vector<7x128xf32>
    %379 = arith.subf %378, %377 : vector<7x128xf32>
    %cst_294 = arith.constant 0.000000e+00 : f32
    %380 = vector.broadcast %cst_294 : f32 to vector<7x128xf32>
    %381 = arith.cmpf oge, %351, %380 : vector<7x128xf32>
    %cst_295 = arith.constant 0.000000e+00 : f32
    %382 = vector.broadcast %cst_295 : f32 to vector<7x128xf32>
    %383 = arith.subf %382, %379 : vector<7x128xf32>
    %384 = arith.select %381, %379, %383 : vector<7x128xi1>, vector<7x128xf32>
    %cst_296 = arith.constant 1.000000e+00 : f32
    %385 = vector.broadcast %cst_296 : f32 to vector<7x128xf32>
    %386 = arith.addf %385, %384 : vector<7x128xf32>
    %387 = arith.mulf %349, %386 : vector<7x128xf32>
    %cst_297 = arith.constant 0.000000e+00 : f32
    %388 = vector.broadcast %cst_297 : f32 to vector<13x128xf32>
    %c0_298 = arith.constant 0 : index
    %c0_299 = arith.constant 0 : index
    %389 = vector.load %arg32[%c0_298, %c0_299] : memref<13x128xf32, #tpu.memory_space<vmem>>, vector<13x128xf32>
    tpu.vector_store %arg32[%c0_298, %c0_299], %388 {strides = array<i32>} : memref<13x128xf32, #tpu.memory_space<vmem>>, vector<13x128xf32>,
    %c3_300 = arith.constant 3 : index
    %c0_301 = arith.constant 0 : index
    %390 = vector.load %arg32[%c3_300, %c0_301] : memref<13x128xf32, #tpu.memory_space<vmem>>, vector<7x128xf32>
    tpu.vector_store %arg32[%c3_300, %c0_301], %387 {strides = array<i32>} : memref<13x128xf32, #tpu.memory_space<vmem>>, vector<7x128xf32>,
    %c0_302 = arith.constant 0 : index
    %c0_303 = arith.constant 0 : index
    %391 = vector.load %arg32[%c0_302, %c0_303] : memref<13x128xf32, #tpu.memory_space<vmem>>, vector<7x128xf32>
    %c0_304 = arith.constant 0 : index
    %c0_305 = arith.constant 0 : index
    %c0_306 = arith.constant 0 : index
    %392 = vector.load %arg13[%c0_304, %c0_305, %c0_306] : memref<7x128x128xf32, #tpu.memory_space<vmem>>, vector<1x128x128xf32>
    %393 = vector.shape_cast %392 : vector<1x128x128xf32> to vector<128x128xf32>
    %cst_307 = arith.constant dense<0.000000e+00> : vector<7x128xf32>
    %394 = tpu.matmul %391, %393, %cst_307 {dimension_numbers = #tpu.dot_dimension_numbers<[1], [0], [0], [1], [0, 0, 1, 1], [], []>} : vector<7x128xf32>, vector<128x128xf32>, vector<7x128xf32> -> vector<7x128xf32>
    %c1_308 = arith.constant 1 : index
    %c0_309 = arith.constant 0 : index
    %395 = vector.load %arg32[%c1_308, %c0_309] : memref<13x128xf32, #tpu.memory_space<vmem>>, vector<7x128xf32>
    %c1_310 = arith.constant 1 : index
    %c0_311 = arith.constant 0 : index
    %c0_312 = arith.constant 0 : index
    %396 = vector.load %arg13[%c1_310, %c0_311, %c0_312] : memref<7x128x128xf32, #tpu.memory_space<vmem>>, vector<1x128x128xf32>
    %397 = vector.shape_cast %396 : vector<1x128x128xf32> to vector<128x128xf32>
    %cst_313 = arith.constant dense<0.000000e+00> : vector<7x128xf32>
    %398 = tpu.matmul %395, %397, %cst_313 {dimension_numbers = #tpu.dot_dimension_numbers<[1], [0], [0], [1], [0, 0, 1, 1], [], []>} : vector<7x128xf32>, vector<128x128xf32>, vector<7x128xf32> -> vector<7x128xf32>
    %399 = arith.addf %394, %398 : vector<7x128xf32>
    %c2_314 = arith.constant 2 : index
    %c0_315 = arith.constant 0 : index
    %400 = vector.load %arg32[%c2_314, %c0_315] : memref<13x128xf32, #tpu.memory_space<vmem>>, vector<7x128xf32>
    %c2_316 = arith.constant 2 : index
    %c0_317 = arith.constant 0 : index
    %c0_318 = arith.constant 0 : index
    %401 = vector.load %arg13[%c2_316, %c0_317, %c0_318] : memref<7x128x128xf32, #tpu.memory_space<vmem>>, vector<1x128x128xf32>
    %402 = vector.shape_cast %401 : vector<1x128x128xf32> to vector<128x128xf32>
    %cst_319 = arith.constant dense<0.000000e+00> : vector<7x128xf32>
    %403 = tpu.matmul %400, %402, %cst_319 {dimension_numbers = #tpu.dot_dimension_numbers<[1], [0], [0], [1], [0, 0, 1, 1], [], []>} : vector<7x128xf32>, vector<128x128xf32>, vector<7x128xf32> -> vector<7x128xf32>
    %404 = arith.addf %399, %403 : vector<7x128xf32>
    %c3_320 = arith.constant 3 : index
    %c0_321 = arith.constant 0 : index
    %405 = vector.load %arg32[%c3_320, %c0_321] : memref<13x128xf32, #tpu.memory_space<vmem>>, vector<7x128xf32>
    %c3_322 = arith.constant 3 : index
    %c0_323 = arith.constant 0 : index
    %c0_324 = arith.constant 0 : index
    %406 = vector.load %arg13[%c3_322, %c0_323, %c0_324] : memref<7x128x128xf32, #tpu.memory_space<vmem>>, vector<1x128x128xf32>
    %407 = vector.shape_cast %406 : vector<1x128x128xf32> to vector<128x128xf32>
    %cst_325 = arith.constant dense<0.000000e+00> : vector<7x128xf32>
    %408 = tpu.matmul %405, %407, %cst_325 {dimension_numbers = #tpu.dot_dimension_numbers<[1], [0], [0], [1], [0, 0, 1, 1], [], []>} : vector<7x128xf32>, vector<128x128xf32>, vector<7x128xf32> -> vector<7x128xf32>
    %409 = arith.addf %404, %408 : vector<7x128xf32>
    %c4_326 = arith.constant 4 : index
    %c0_327 = arith.constant 0 : index
    %410 = vector.load %arg32[%c4_326, %c0_327] : memref<13x128xf32, #tpu.memory_space<vmem>>, vector<7x128xf32>
    %c4_328 = arith.constant 4 : index
    %c0_329 = arith.constant 0 : index
    %c0_330 = arith.constant 0 : index
    %411 = vector.load %arg13[%c4_328, %c0_329, %c0_330] : memref<7x128x128xf32, #tpu.memory_space<vmem>>, vector<1x128x128xf32>
    %412 = vector.shape_cast %411 : vector<1x128x128xf32> to vector<128x128xf32>
    %cst_331 = arith.constant dense<0.000000e+00> : vector<7x128xf32>
    %413 = tpu.matmul %410, %412, %cst_331 {dimension_numbers = #tpu.dot_dimension_numbers<[1], [0], [0], [1], [0, 0, 1, 1], [], []>} : vector<7x128xf32>, vector<128x128xf32>, vector<7x128xf32> -> vector<7x128xf32>
    %414 = arith.addf %409, %413 : vector<7x128xf32>
    %c5_332 = arith.constant 5 : index
    %c0_333 = arith.constant 0 : index
    %415 = vector.load %arg32[%c5_332, %c0_333] : memref<13x128xf32, #tpu.memory_space<vmem>>, vector<7x128xf32>
    %c5_334 = arith.constant 5 : index
    %c0_335 = arith.constant 0 : index
    %c0_336 = arith.constant 0 : index
    %416 = vector.load %arg13[%c5_334, %c0_335, %c0_336] : memref<7x128x128xf32, #tpu.memory_space<vmem>>, vector<1x128x128xf32>
    %417 = vector.shape_cast %416 : vector<1x128x128xf32> to vector<128x128xf32>
    %cst_337 = arith.constant dense<0.000000e+00> : vector<7x128xf32>
    %418 = tpu.matmul %415, %417, %cst_337 {dimension_numbers = #tpu.dot_dimension_numbers<[1], [0], [0], [1], [0, 0, 1, 1], [], []>} : vector<7x128xf32>, vector<128x128xf32>, vector<7x128xf32> -> vector<7x128xf32>
    %419 = arith.addf %414, %418 : vector<7x128xf32>
    %c6_338 = arith.constant 6 : index
    %c0_339 = arith.constant 0 : index
    %420 = vector.load %arg32[%c6_338, %c0_339] : memref<13x128xf32, #tpu.memory_space<vmem>>, vector<7x128xf32>
    %c6_340 = arith.constant 6 : index
    %c0_341 = arith.constant 0 : index
    %c0_342 = arith.constant 0 : index
    %421 = vector.load %arg13[%c6_340, %c0_341, %c0_342] : memref<7x128x128xf32, #tpu.memory_space<vmem>>, vector<1x128x128xf32>
    %422 = vector.shape_cast %421 : vector<1x128x128xf32> to vector<128x128xf32>
    %cst_343 = arith.constant dense<0.000000e+00> : vector<7x128xf32>
    %423 = tpu.matmul %420, %422, %cst_343 {dimension_numbers = #tpu.dot_dimension_numbers<[1], [0], [0], [1], [0, 0, 1, 1], [], []>} : vector<7x128xf32>, vector<128x128xf32>, vector<7x128xf32> -> vector<7x128xf32>
    %424 = arith.addf %419, %423 : vector<7x128xf32>
    %c0_344 = arith.constant 0 : index
    %c0_345 = arith.constant 0 : index
    %425 = vector.load %arg14[%c0_344, %c0_345] : memref<1x128xf32, #tpu.memory_space<vmem>>, vector<1x128xf32>
    %426 = vector.broadcast %425 : vector<1x128xf32> to vector<7x128xf32>
    %427 = arith.addf %424, %426 : vector<7x128xf32>
    %cst_346 = arith.constant 5.000000e-01 : f32
    %428 = vector.broadcast %cst_346 : f32 to vector<7x128xf32>
    %429 = arith.mulf %428, %427 : vector<7x128xf32>
    %cst_347 = arith.constant 0.707106769 : f32
    %430 = vector.broadcast %cst_347 : f32 to vector<7x128xf32>
    %431 = arith.mulf %427, %430 : vector<7x128xf32>
    %432 = math.absf %431 : vector<7x128xf32>
    %cst_348 = arith.constant 0.327591091 : f32
    %433 = vector.broadcast %cst_348 : f32 to vector<7x128xf32>
    %434 = arith.mulf %433, %432 : vector<7x128xf32>
    %cst_349 = arith.constant 1.000000e+00 : f32
    %435 = vector.broadcast %cst_349 : f32 to vector<7x128xf32>
    %436 = arith.addf %435, %434 : vector<7x128xf32>
    %cst_350 = arith.constant 1.000000e+00 : f32
    %437 = vector.broadcast %cst_350 : f32 to vector<7x128xf32>
    %438 = arith.divf %437, %436 : vector<7x128xf32>
    %cst_351 = arith.constant 1.06140542 : f32
    %439 = vector.broadcast %cst_351 : f32 to vector<7x128xf32>
    %440 = arith.mulf %439, %438 : vector<7x128xf32>
    %cst_352 = arith.constant -1.45315206 : f32
    %441 = vector.broadcast %cst_352 : f32 to vector<7x128xf32>
    %442 = arith.addf %440, %441 : vector<7x128xf32>
    %443 = arith.mulf %442, %438 : vector<7x128xf32>
    %cst_353 = arith.constant 1.42141378 : f32
    %444 = vector.broadcast %cst_353 : f32 to vector<7x128xf32>
    %445 = arith.addf %443, %444 : vector<7x128xf32>
    %446 = arith.mulf %445, %438 : vector<7x128xf32>
    %cst_354 = arith.constant -0.284496725 : f32
    %447 = vector.broadcast %cst_354 : f32 to vector<7x128xf32>
    %448 = arith.addf %446, %447 : vector<7x128xf32>
    %449 = arith.mulf %448, %438 : vector<7x128xf32>
    %cst_355 = arith.constant 0.254829586 : f32
    %450 = vector.broadcast %cst_355 : f32 to vector<7x128xf32>
    %451 = arith.addf %449, %450 : vector<7x128xf32>
    %452 = arith.mulf %451, %438 : vector<7x128xf32>
    %cst_356 = arith.constant 0.000000e+00 : f32
    %453 = vector.broadcast %cst_356 : f32 to vector<7x128xf32>
    %454 = arith.subf %453, %432 : vector<7x128xf32>
    %455 = arith.mulf %454, %432 : vector<7x128xf32>
    %456 = math.exp %455 : vector<7x128xf32>
    %457 = arith.mulf %452, %456 : vector<7x128xf32>
    %cst_357 = arith.constant 1.000000e+00 : f32
    %458 = vector.broadcast %cst_357 : f32 to vector<7x128xf32>
    %459 = arith.subf %458, %457 : vector<7x128xf32>
    %cst_358 = arith.constant 0.000000e+00 : f32
    %460 = vector.broadcast %cst_358 : f32 to vector<7x128xf32>
    %461 = arith.cmpf oge, %431, %460 : vector<7x128xf32>
    %cst_359 = arith.constant 0.000000e+00 : f32
    %462 = vector.broadcast %cst_359 : f32 to vector<7x128xf32>
    %463 = arith.subf %462, %459 : vector<7x128xf32>
    %464 = arith.select %461, %459, %463 : vector<7x128xi1>, vector<7x128xf32>
    %cst_360 = arith.constant 1.000000e+00 : f32
    %465 = vector.broadcast %cst_360 : f32 to vector<7x128xf32>
    %466 = arith.addf %465, %464 : vector<7x128xf32>
    %467 = arith.mulf %429, %466 : vector<7x128xf32>
    %cst_361 = arith.constant -1.000000e+30 : f32
    %468 = vector.broadcast %cst_361 : f32 to vector<9x128xf32>
    %c0_362 = arith.constant 0 : index
    %c0_363 = arith.constant 0 : index
    %469 = vector.load %arg33[%c0_362, %c0_363] : memref<9x128xf32, #tpu.memory_space<vmem>>, vector<9x128xf32>
    tpu.vector_store %arg33[%c0_362, %c0_363], %468 {strides = array<i32>} : memref<9x128xf32, #tpu.memory_space<vmem>>, vector<9x128xf32>,
    %c1_364 = arith.constant 1 : index
    %c0_365 = arith.constant 0 : index
    %470 = vector.load %arg33[%c1_364, %c0_365] : memref<9x128xf32, #tpu.memory_space<vmem>>, vector<7x128xf32>
    tpu.vector_store %arg33[%c1_364, %c0_365], %467 {strides = array<i32>} : memref<9x128xf32, #tpu.memory_space<vmem>>, vector<7x128xf32>,
    %c0_366 = arith.constant 0 : index
    %c0_367 = arith.constant 0 : index
    %471 = vector.load %arg33[%c0_366, %c0_367] : memref<9x128xf32, #tpu.memory_space<vmem>>, vector<8x128xf32>
    %c1_368 = arith.constant 1 : index
    %c0_369 = arith.constant 0 : index
    %472 = vector.load %arg33[%c1_368, %c0_369] : memref<9x128xf32, #tpu.memory_space<vmem>>, vector<8x128xf32>
    %473 = arith.maximumf %471, %472 : vector<8x128xf32>
    %c0_370 = arith.constant 0 : index
    %c0_371 = arith.constant 0 : index
    %474 = vector.load %arg18[%c0_370, %c0_371] : memref<4x8xf32, #tpu.memory_space<vmem>>, vector<4x8xf32>
    %cst_372 = arith.constant dense<0.000000e+00> : vector<4x128xf32>
    %475 = tpu.matmul %474, %473, %cst_372 {dimension_numbers = #tpu.dot_dimension_numbers<[1], [0], [0], [1], [0, 0, 1, 1], [], []>} : vector<4x8xf32>, vector<8x128xf32>, vector<4x128xf32> -> vector<4x128xf32>
    %c0_373 = arith.constant 0 : index
    %c0_374 = arith.constant 0 : index
    %476 = vector.load %arg19[%c0_373, %c0_374] : memref<128x64xf32, #tpu.memory_space<vmem>>, vector<128x64xf32>
    %c0_375 = arith.constant 0 : index
    %c0_376 = arith.constant 0 : index
    %477 = vector.load %arg20[%c0_375, %c0_376] : memref<1x64xf32, #tpu.memory_space<vmem>>, vector<1x64xf32>
    %cst_377 = arith.constant dense<0.000000e+00> : vector<14x64xf32>
    %478 = tpu.matmul %248, %476, %cst_377 {dimension_numbers = #tpu.dot_dimension_numbers<[1], [0], [0], [1], [0, 0, 1, 1], [], []>} : vector<14x128xf32>, vector<128x64xf32>, vector<14x64xf32> -> vector<14x64xf32>
    %479 = vector.broadcast %477 : vector<1x64xf32> to vector<14x64xf32>
    %480 = arith.addf %478, %479 : vector<14x64xf32>
    %cst_378 = arith.constant dense<0.000000e+00> : vector<4x64xf32>
    %481 = tpu.matmul %475, %476, %cst_378 {dimension_numbers = #tpu.dot_dimension_numbers<[1], [0], [0], [1], [0, 0, 1, 1], [], []>} : vector<4x128xf32>, vector<128x64xf32>, vector<4x64xf32> -> vector<4x64xf32>
    %482 = vector.broadcast %477 : vector<1x64xf32> to vector<4x64xf32>
    %483 = arith.addf %481, %482 : vector<4x64xf32>
    %484 = vector.extract_strided_slice %480 {offsets = [0, 0], sizes = [14, 32], strides = [1, 1]} : vector<14x64xf32> to vector<14x32xf32>
    %cst_379 = arith.constant 0.000000e+00 : f32
    %485 = vector.broadcast %cst_379 : f32 to vector<14x32xf32>
    %486 = arith.maximumf %484, %485 : vector<14x32xf32>
    %487 = vector.extract_strided_slice %483 {offsets = [0, 0], sizes = [4, 32], strides = [1, 1]} : vector<4x64xf32> to vector<4x32xf32>
    %cst_380 = arith.constant 0.000000e+00 : f32
    %488 = vector.broadcast %cst_380 : f32 to vector<4x32xf32>
    %489 = arith.maximumf %487, %488 : vector<4x32xf32>
    %490 = vector.extract_strided_slice %480 {offsets = [0, 32], sizes = [14, 32], strides = [1, 1]} : vector<14x64xf32> to vector<14x32xf32>
    %491 = vector.extract_strided_slice %483 {offsets = [0, 32], sizes = [4, 32], strides = [1, 1]} : vector<4x64xf32> to vector<4x32xf32>
    %c0_381 = arith.constant 0 : index
    %c0_382 = arith.constant 0 : index
    %492 = vector.load %arg21[%c0_381, %c0_382] : memref<32x32xf32, #tpu.memory_space<vmem>>, vector<32x32xf32>
    %c0_383 = arith.constant 0 : index
    %c0_384 = arith.constant 0 : index
    %493 = vector.load %arg22[%c0_383, %c0_384] : memref<1x32xf32, #tpu.memory_space<vmem>>, vector<1x32xf32>
    %cst_385 = arith.constant dense<0.000000e+00> : vector<14x32xf32>
    %494 = tpu.matmul %486, %492, %cst_385 {dimension_numbers = #tpu.dot_dimension_numbers<[1], [0], [0], [1], [0, 0, 1, 1], [], []>} : vector<14x32xf32>, vector<32x32xf32>, vector<14x32xf32> -> vector<14x32xf32>
    %495 = vector.broadcast %493 : vector<1x32xf32> to vector<14x32xf32>
    %496 = arith.addf %494, %495 : vector<14x32xf32>
    %cst_386 = arith.constant dense<0.000000e+00> : vector<4x32xf32>
    %497 = tpu.matmul %489, %492, %cst_386 {dimension_numbers = #tpu.dot_dimension_numbers<[1], [0], [0], [1], [0, 0, 1, 1], [], []>} : vector<4x32xf32>, vector<32x32xf32>, vector<4x32xf32> -> vector<4x32xf32>
    %498 = vector.broadcast %493 : vector<1x32xf32> to vector<4x32xf32>
    %499 = arith.addf %497, %498 : vector<4x32xf32>
    %cst_387 = arith.constant dense<0.000000e+00> : vector<32xf32>
    %500 = vector.multi_reduction <add>, %496, %cst_387 [0] : vector<14x32xf32> to vector<32xf32>
    %501 = vector.shape_cast %500 : vector<32xf32> to vector<1x32xf32>
    %cst_388 = arith.constant dense<0.000000e+00> : vector<32xf32>
    %502 = vector.multi_reduction <add>, %499, %cst_388 [0] : vector<4x32xf32> to vector<32xf32>
    %503 = vector.shape_cast %502 : vector<32xf32> to vector<1x32xf32>
    %504 = arith.addf %501, %503 : vector<1x32xf32>
    %cst_389 = arith.constant 0.055555556 : f32
    %505 = vector.broadcast %cst_389 : f32 to vector<1x32xf32>
    %506 = arith.mulf %504, %505 : vector<1x32xf32>
    %c0_390 = arith.constant 0 : index
    %c0_391 = arith.constant 0 : index
    %507 = vector.load %arg23[%c0_390, %c0_391] : memref<32x2xf32, #tpu.memory_space<vmem>>, vector<32x2xf32>
    %cst_392 = arith.constant dense<0.000000e+00> : vector<1x2xf32>
    %508 = tpu.matmul %506, %507, %cst_392 {dimension_numbers = #tpu.dot_dimension_numbers<[1], [0], [0], [1], [0, 0, 1, 1], [], []>} : vector<1x32xf32>, vector<32x2xf32>, vector<1x2xf32> -> vector<1x2xf32>
    %cst_393 = arith.constant 0.000000e+00 : f32
    %509 = vector.broadcast %cst_393 : f32 to vector<1x2xf32>
    %510 = arith.maximumf %508, %509 : vector<1x2xf32>
    %c0_394 = arith.constant 0 : index
    %c0_395 = arith.constant 0 : index
    %511 = vector.load %arg24[%c0_394, %c0_395] : memref<2x32xf32, #tpu.memory_space<vmem>>, vector<2x32xf32>
    %cst_396 = arith.constant dense<0.000000e+00> : vector<1x32xf32>
    %512 = tpu.matmul %510, %511, %cst_396 {dimension_numbers = #tpu.dot_dimension_numbers<[1], [0], [0], [1], [0, 0, 1, 1], [], []>} : vector<1x2xf32>, vector<2x32xf32>, vector<1x32xf32> -> vector<1x32xf32>
    %513 = arith.negf %512 : vector<1x32xf32>
    %514 = math.exp %513 : vector<1x32xf32>
    %cst_397 = arith.constant 1.000000e+00 : f32
    %515 = vector.broadcast %cst_397 : f32 to vector<1x32xf32>
    %516 = arith.addf %515, %514 : vector<1x32xf32>
    %517 = arith.divf %515, %516 : vector<1x32xf32>
    %518 = vector.broadcast %517 : vector<1x32xf32> to vector<14x32xf32>
    %519 = arith.mulf %496, %518 : vector<14x32xf32>
    %520 = arith.addf %519, %490 : vector<14x32xf32>
    %cst_398 = arith.constant 0.000000e+00 : f32
    %521 = vector.broadcast %cst_398 : f32 to vector<14x32xf32>
    %522 = arith.maximumf %520, %521 : vector<14x32xf32>
    %c0_399 = arith.constant 0 : index
    %c0_400 = arith.constant 0 : index
    %c0_401 = arith.constant 0 : index
    %523 = vector.load %arg25[%c0_399, %c0_400, %c0_401] : memref<1x18x32xf32, #tpu.memory_space<vmem>>, vector<1x14x32xf32>
    %524 = vector.shape_cast %523 : vector<1x14x32xf32> to vector<14x32xf32>
    %525 = vector.shape_cast %522 : vector<14x32xf32> to vector<1x14x32xf32>
    tpu.vector_store %arg25[%c0_399, %c0_400, %c0_401], %525 {strides = array<i32>} : memref<1x18x32xf32, #tpu.memory_space<vmem>>, vector<1x14x32xf32>,
    %526 = vector.broadcast %517 : vector<1x32xf32> to vector<4x32xf32>
    %527 = arith.mulf %499, %526 : vector<4x32xf32>
    %528 = arith.addf %527, %491 : vector<4x32xf32>
    %cst_402 = arith.constant 0.000000e+00 : f32
    %529 = vector.broadcast %cst_402 : f32 to vector<4x32xf32>
    %530 = arith.maximumf %528, %529 : vector<4x32xf32>
    %c0_403 = arith.constant 0 : index
    %c14 = arith.constant 14 : index
    %c0_404 = arith.constant 0 : index
    %531 = vector.load %arg25[%c0_403, %c14, %c0_404] : memref<1x18x32xf32, #tpu.memory_space<vmem>>, vector<1x4x32xf32>
    %532 = vector.shape_cast %531 : vector<1x4x32xf32> to vector<4x32xf32>
    %533 = vector.shape_cast %530 : vector<4x32xf32> to vector<1x4x32xf32>
    tpu.vector_store %arg25[%c0_403, %c14, %c0_404], %533 {strides = array<i32>} : memref<1x18x32xf32, #tpu.memory_space<vmem>>, vector<1x4x32xf32>,
    return
  }
  func.func @transform_0(%arg0: i32) -> (i32, i32, i32) {
    %c0_i32 = arith.constant 0 : i32
    %c0_i32_0 = arith.constant 0 : i32
    %c0_i32_1 = arith.constant 0 : i32
    return %arg0, %c0_i32, %c0_i32_0 : i32, i32, i32
  }
  func.func @transform_1(%arg0: i32) -> (i32, i32, i32) {
    %c0_i32 = arith.constant 0 : i32
    %c0_i32_0 = arith.constant 0 : i32
    %c0_i32_1 = arith.constant 0 : i32
    return %arg0, %c0_i32, %c0_i32_0 : i32, i32, i32
  }
  func.func @transform_2(%arg0: i32) -> (i32, i32) {
    %c0_i32 = arith.constant 0 : i32
    %c0_i32_0 = arith.constant 0 : i32
    %c0_i32_1 = arith.constant 0 : i32
    return %c0_i32, %c0_i32_0 : i32, i32
  }
  func.func @transform_3(%arg0: i32) -> (i32, i32) {
    %c0_i32 = arith.constant 0 : i32
    %c0_i32_0 = arith.constant 0 : i32
    %c0_i32_1 = arith.constant 0 : i32
    return %c0_i32, %c0_i32_0 : i32, i32
  }
  func.func @transform_4(%arg0: i32) -> (i32, i32, i32) {
    %c0_i32 = arith.constant 0 : i32
    %c0_i32_0 = arith.constant 0 : i32
    %c0_i32_1 = arith.constant 0 : i32
    %c0_i32_2 = arith.constant 0 : i32
    return %c0_i32, %c0_i32_0, %c0_i32_1 : i32, i32, i32
  }
  func.func @transform_5(%arg0: i32) -> (i32, i32) {
    %c0_i32 = arith.constant 0 : i32
    %c0_i32_0 = arith.constant 0 : i32
    %c0_i32_1 = arith.constant 0 : i32
    return %c0_i32, %c0_i32_0 : i32, i32
  }
  func.func @transform_6(%arg0: i32) -> (i32, i32, i32) {
    %c0_i32 = arith.constant 0 : i32
    %c0_i32_0 = arith.constant 0 : i32
    %c0_i32_1 = arith.constant 0 : i32
    %c0_i32_2 = arith.constant 0 : i32
    return %c0_i32, %c0_i32_0, %c0_i32_1 : i32, i32, i32
  }
  func.func @transform_7(%arg0: i32) -> (i32, i32) {
    %c0_i32 = arith.constant 0 : i32
    %c0_i32_0 = arith.constant 0 : i32
    %c0_i32_1 = arith.constant 0 : i32
    return %c0_i32, %c0_i32_0 : i32, i32
  }
  func.func @transform_8(%arg0: i32) -> (i32, i32) {
    %c0_i32 = arith.constant 0 : i32
    %c0_i32_0 = arith.constant 0 : i32
    %c0_i32_1 = arith.constant 0 : i32
    return %c0_i32, %c0_i32_0 : i32, i32
  }
  func.func @transform_9(%arg0: i32) -> (i32, i32) {
    %c0_i32 = arith.constant 0 : i32
    %c0_i32_0 = arith.constant 0 : i32
    %c0_i32_1 = arith.constant 0 : i32
    return %c0_i32, %c0_i32_0 : i32, i32
  }
  func.func @transform_10(%arg0: i32) -> (i32, i32, i32) {
    %c0_i32 = arith.constant 0 : i32
    %c0_i32_0 = arith.constant 0 : i32
    %c0_i32_1 = arith.constant 0 : i32
    %c0_i32_2 = arith.constant 0 : i32
    return %c0_i32, %c0_i32_0, %c0_i32_1 : i32, i32, i32
  }
  func.func @transform_11(%arg0: i32) -> (i32, i32) {
    %c0_i32 = arith.constant 0 : i32
    %c0_i32_0 = arith.constant 0 : i32
    %c0_i32_1 = arith.constant 0 : i32
    return %c0_i32, %c0_i32_0 : i32, i32
  }
  func.func @transform_12(%arg0: i32) -> (i32, i32, i32) {
    %c0_i32 = arith.constant 0 : i32
    %c0_i32_0 = arith.constant 0 : i32
    %c0_i32_1 = arith.constant 0 : i32
    %c0_i32_2 = arith.constant 0 : i32
    return %c0_i32, %c0_i32_0, %c0_i32_1 : i32, i32, i32
  }
  func.func @transform_13(%arg0: i32) -> (i32, i32) {
    %c0_i32 = arith.constant 0 : i32
    %c0_i32_0 = arith.constant 0 : i32
    %c0_i32_1 = arith.constant 0 : i32
    return %c0_i32, %c0_i32_0 : i32, i32
  }
  func.func @transform_14(%arg0: i32) -> (i32, i32) {
    %c0_i32 = arith.constant 0 : i32
    %c0_i32_0 = arith.constant 0 : i32
    %c0_i32_1 = arith.constant 0 : i32
    return %c0_i32, %c0_i32_0 : i32, i32
  }
  func.func @transform_15(%arg0: i32) -> (i32, i32) {
    %c0_i32 = arith.constant 0 : i32
    %c0_i32_0 = arith.constant 0 : i32
    %c0_i32_1 = arith.constant 0 : i32
    return %c0_i32, %c0_i32_0 : i32, i32
  }
  func.func @transform_16(%arg0: i32) -> (i32, i32) {
    %c0_i32 = arith.constant 0 : i32
    %c0_i32_0 = arith.constant 0 : i32
    %c0_i32_1 = arith.constant 0 : i32
    return %c0_i32, %c0_i32_0 : i32, i32
  }
  func.func @transform_17(%arg0: i32) -> (i32, i32) {
    %c0_i32 = arith.constant 0 : i32
    %c0_i32_0 = arith.constant 0 : i32
    %c0_i32_1 = arith.constant 0 : i32
    return %c0_i32, %c0_i32_0 : i32, i32
  }
  func.func @transform_18(%arg0: i32) -> (i32, i32) {
    %c0_i32 = arith.constant 0 : i32
    %c0_i32_0 = arith.constant 0 : i32
    %c0_i32_1 = arith.constant 0 : i32
    return %c0_i32, %c0_i32_0 : i32, i32
  }
  func.func @transform_19(%arg0: i32) -> (i32, i32) {
    %c0_i32 = arith.constant 0 : i32
    %c0_i32_0 = arith.constant 0 : i32
    %c0_i32_1 = arith.constant 0 : i32
    return %c0_i32, %c0_i32_0 : i32, i32
  }
  func.func @transform_20(%arg0: i32) -> (i32, i32) {
    %c0_i32 = arith.constant 0 : i32
    %c0_i32_0 = arith.constant 0 : i32
    %c0_i32_1 = arith.constant 0 : i32
    return %c0_i32, %c0_i32_0 : i32, i32
  }
  func.func @transform_21(%arg0: i32) -> (i32, i32) {
    %c0_i32 = arith.constant 0 : i32
    %c0_i32_0 = arith.constant 0 : i32
    %c0_i32_1 = arith.constant 0 : i32
    return %c0_i32, %c0_i32_0 : i32, i32
  }
  func.func @transform_22(%arg0: i32) -> (i32, i32) {
    %c0_i32 = arith.constant 0 : i32
    %c0_i32_0 = arith.constant 0 : i32
    %c0_i32_1 = arith.constant 0 : i32
    return %c0_i32, %c0_i32_0 : i32, i32
  }
  func.func @transform_23(%arg0: i32) -> (i32, i32) {
    %c0_i32 = arith.constant 0 : i32
    %c0_i32_0 = arith.constant 0 : i32
    %c0_i32_1 = arith.constant 0 : i32
    return %c0_i32, %c0_i32_0 : i32, i32
  }
  func.func @transform_24(%arg0: i32) -> (i32, i32, i32) {
    %c0_i32 = arith.constant 0 : i32
    %c0_i32_0 = arith.constant 0 : i32
    %c0_i32_1 = arith.constant 0 : i32
    return %arg0, %c0_i32, %c0_i32_0 : i32, i32, i32
  }
}

</mosaic_0001>

<bundles_post_ra>
// kernel: mrcnn_forward.1
= control target key start
LH: loop header
LB: loop body
LE: loop exit
PB: predicated region body
PF: predicated region fallthrough
CT: control target
= control target key end

     0   :  { %s12460_s0 = inlined_call_operand.vmem [shape: f32[2,100,50], index: 0, kind: input, shape index: {}]   ;;  %s12461_s1 = inlined_call_operand.vmem [shape: f32[2,13,400], index: 1, kind: input, shape index: {}]   ;;  %s12462_s2 = inlined_call_operand.vmem [shape: f32[50,64], index: 2, kind: input, shape index: {}]   ;;  %s12463_s3 = inlined_call_operand.vmem [shape: f32[1,64], index: 3, kind: input, shape index: {}]   ;;  %s12464_s4 = inlined_call_operand.vmem [shape: f32[8,64,128], index: 4, kind: input, shape index: {}]   ;;  %s12465_s5 = inlined_call_operand.vmem [shape: f32[1,128], index: 5, kind: input, shape index: {}]   ;;  %s12466_s6 = inlined_call_operand.vmem [shape: f32[8,128,128], index: 6, kind: input, shape index: {}]   ;;  %s12467_s7 = inlined_call_operand.vmem [shape: f32[1,128], index: 7, kind: input, shape index: {}]   ;;  %s12468_s8 = inlined_call_operand.vmem [shape: f32[400,64], index: 8, kind: input, shape index: {}]   ;;  %s12469_s9 = inlined_call_operand.vmem [shape: f32[1,64], index: 9, kind: input, shape index: {}]   ;;  %s12470_s10 = inlined_call_operand.vmem [shape: f32[7,64,128], index: 10, kind: input, shape index: {}]   ;;  %s12471_s11 = inlined_call_operand.vmem [shape: f32[1,128], index: 11, kind: input, shape index: {}]   ;;  %s12472_s12 = inlined_call_operand.vmem [shape: f32[7,128,128], index: 12, kind: input, shape index: {}]   ;;  %s12473_s13 = inlined_call_operand.vmem [shape: f32[1,128], index: 13, kind: input, shape index: {}]   ;;  %s12474_s14 = inlined_call_operand.vmem [shape: f32[51,101], index: 14, kind: input, shape index: {}]   ;;  %s12475_s15 = inlined_call_operand.vmem [shape: f32[14,54], index: 15, kind: input, shape index: {}]   ;;  %s12476_s16 = inlined_call_operand.vmem [shape: f32[7,14], index: 16, kind: input, shape index: {}]   ;;  %s12477_s17 = inlined_call_operand.vmem [shape: f32[4,8], index: 17, kind: input, shape index: {}]   ;;  %s12478_s18 = inlined_call_operand.vmem [shape: f32[128,64], index: 18, kind: input, shape index: {}]   ;;  %s12479_s19 = inlined_call_operand.vmem [shape: f32[1,64], index: 19, kind: input, shape index: {}]   ;;  %s12480_s20 = inlined_call_operand.vmem [shape: f32[32,32], index: 20, kind: input, shape index: {}]   ;;  %s12481_s21 = inlined_call_operand.vmem [shape: f32[1,32], index: 21, kind: input, shape index: {}]   ;;  %s12482_s22 = inlined_call_operand.vmem [shape: f32[32,2], index: 22, kind: input, shape index: {}]   ;;  %s12483_s23 = inlined_call_operand.vmem [shape: f32[2,32], index: 23, kind: input, shape index: {}]   ;;  %s12484_s24 = inlined_call_operand.vmem [shape: f32[2,18,32], index: 24, kind: output, shape index: {}]  }
   0x1   :  { %12489 = sst [smem:[#allocation10_spill]] %s12460_s0 }
   0x2   :  { %12490 = sst [smem:[#allocation11_spill]] %s12461_s1 }
   0x3   :  { %12491 = sst [smem:[#allocation12_spill]] %s12462_s2 }
   0x4   :  { %12492 = sst [smem:[#allocation13_spill]] %s12463_s3 }
   0x5   :  { %12493 = sst [smem:[#allocation14_spill]] %s12464_s4 }
   0x6   :  { %12494 = sst [smem:[#allocation15_spill]] %s12465_s5  ;;  %s9461_s5 = smov 0  }
   0x7   :  { %12495 = sst [smem:[#allocation16_spill]] %s12466_s6 }
   0x8   :  { %12496 = sst [smem:[#allocation17_spill]] %s12467_s7 }
   0x9   :  { %12497 = sst [smem:[#allocation18_spill]] %s12468_s8 }
   0xa LB: > { %s6778_s26 = sadd.s32 4294967295, %s9330_s5   ;;  %p6782_p0 = scmp.ge.s32.totalorder %s9330_s5, 1  ;;  %s9330_s5 = sphi %s9461_s5, %s34_s5  }
   0xb   : > { %p672_p1 = scmp.lt.s32.totalorder %s9330_s5, 3 }
   0xd   : > { %p673_p2 = pnand %p6782_p0, %p672_p1 }
   0xe   : > { %s12498_s6 = sld [smem:[#allocation12_spill]] (!%p673_p2)  ;;  %p743_p3 = scmp.lt.s32.totalorder (!%p673_p2), %s6778_s26, 1 }
   0xf   : > { %676 = sbr.rel (%p673_p2) target bundleno = 3597 (0xe0d), region = 116  ;;  %s12499_s29 = sld [smem:[#allocation10_spill]] (!%p673_p2) }
  0x10   : > { %s12500_s8 = sld [smem:[#allocation13_spill]] (!%p673_p2) }
  0x11   : > { %s12501_s27 = sld [smem:[#allocation14_spill]] (!%p673_p2) }
  0x12   : > { %s12502_s1 = sld [smem:[#allocation16_spill]] (!%p673_p2) }
  0x13   : > { %s12503_s7 = sld [smem:[#allocation15_spill]] (!%p673_p2) }
  0x14   : > { %v777_v0 = vld [vmem:[%s12498_s6 + $0x30] sm:$0x3]  ;;  %vm825_vm0 = vcmask 1041408   ;;  %v9332_v1 = vmov 0.0   ;;  %v776_v2 = vld [vmem:[%s12498_s6 + $0x28] sm:$0xff]  ;;  %vm9333_vm1 = vmmov 0  }
  0x15   : > { %7841 = vmatprep.subr.mxu0 %v9332_v1  ;;  %3023 = vst [vmem:[#allocation4] sm:$0xff] %v9332_v1  ;;  %3024 = vst [vmem:[#allocation4 + $0x8] sm:$0xff] %v9332_v1  ;;  %7894 = vmatprep.subr.mxu1 %v9332_v1  ;;  %v775_v3 = vld [vmem:[%s12498_s6 + $0x20] sm:$0xff]  ;;  %s12508_s26 = smov (!%p743_p3, %s6778_s26), 1  ;;  %v774_v4 = vld [vmem:[%s12498_s6 + $0x18] sm:$0xff]  ;;  %vm785_vm2 = vcmask 408576  }
  0x16   : > { %3025 = vst [vmem:[#allocation4 + $0x10] sm:$0xff] %v9332_v1  ;;  %3026 = vst [vmem:[#allocation4 + $0x18] sm:$0xff] %v9332_v1  ;;  %7842 = vmatpush3.msk.msra.mxu0 %vm825_vm0, %v777_v0  ;;  %7855 = vmatprep.mubr.msk.f32.mxu0 %vm9333_vm1, %v9332_v1  ;;  %s9176_s25 = smul.u32 104, %s12508_s26  ;;  %v773_v5 = vld [vmem:[%s12498_s6 + $0x10] sm:$0xff]  ;;  %v772_v6 = vld [vmem:[%s12498_s6 + $0x8] sm:$0xff]  ;;  %vm1310_vm3 = vcmask 523264  }
  0x17   : > { %3027 = vst [vmem:[#allocation4 + $0x20] sm:$0xff] %v9332_v1  ;;  %3028 = vst [vmem:[#allocation4 + $0x28] sm:$0xff] %v9332_v1  ;;  %7843 = vmatprep.subr.mxu0 %v9332_v1  ;;  %7920 = vmatprep.mubr.msk.f32.mxu1 %vm9333_vm1, %v9332_v1  ;;  %v771_v7 = vld [vmem:[%s12498_s6] sm:$0xff]  ;;  %v9334_v21 = vmov -1e+30   ;;  %vm1324_vm4 = vcmask 519168  }
  0x18   : > { %3029 = vst [vmem:[#allocation4 + $0x30] sm:$0xff] %v9332_v1  ;;  %3030 = vst [vmem:[#allocation4 + $0x38] sm:$0xf] %v9332_v1  ;;  %7844 = vmatpush3.msra.mxu0 %v776_v2  ;;  %s9514_s0 = scalar_lea.vmem %s12499_s29, %s9176_s25  ;;  %v9608_v22 = vld [vmem:[%s12500_s8] ss:$0 sm:$0xff]  ;;  %s12504_s4 = sld [smem:[#allocation18_spill]] }
  0x19   : > { %5425 = vst [vmem:[#allocation8] sm:$0xff] %v9332_v1  ;;  %5426 = vst [vmem:[#allocation8 + $0x8] sm:$0x1f] %v9332_v1  ;;  %7845 = vmatprep.subr.mxu0 %v9332_v1  ;;  %v758_v8 = vld [vmem:[%s9514_s0] sm:$0xff]  ;;  %v759_v9 = vld [vmem:[%s9514_s0 + $0x8] sm:$0xff]  ;;  %s7209_s28 = sshll.u32 %s12508_s26, 6 }
  0x1a   : > { %7846 = vmatpush3.msra.mxu0 %v775_v3  ;;  %v760_v10 = vld [vmem:[%s9514_s0 + $0x10] sm:$0xff]  ;;  %v761_v11 = vld [vmem:[%s9514_s0 + $0x18] sm:$0xff]  ;;  %v762_v12 = vld [vmem:[%s9514_s0 + $0x20] sm:$0xff]  ;;  %1311 = vst.msk [vmem:[#allocation2] sm:$0xff] %vm1310_vm3, %v9334_v21  ;;  %s12506_s30 = sld [smem:[#allocation11_spill]]  ;;  %s9335_s8 = smov 96  }
  0x1b   : > { %7847 = vmatprep.subr.mxu0 %v9332_v1  ;;  %v763_v13 = vld [vmem:[%s9514_s0 + $0x28] sm:$0xff]  ;;  %v764_v14 = vld [vmem:[%s9514_s0 + $0x30] sm:$0xff]  ;;  %v765_v15 = vld [vmem:[%s9514_s0 + $0x38] sm:$0xff]  ;;  %1312 = vst.msk [vmem:[#allocation2 + $0x8] sm:$0xff] %vm1310_vm3, %v9334_v21  ;;  %s9177_s29 = smul.u32 24, %s12508_s26 }
  0x1c   : > { %7848 = vmatpush3.msra.mxu0 %v774_v4  ;;  %v766_v16 = vld [vmem:[%s9514_s0 + $0x40] sm:$0xff]  ;;  %v767_v17 = vld [vmem:[%s9514_s0 + $0x48] sm:$0xff]  ;;  %v768_v18 = vld [vmem:[%s9514_s0 + $0x50] sm:$0xff]  ;;  %1313 = vst.msk [vmem:[#allocation2 + $0x10] sm:$0xff] %vm1310_vm3, %v9334_v21 }
  0x1d   : > { %7849 = vmatprep.subr.mxu0 %v9332_v1  ;;  %v769_v19 = vld [vmem:[%s9514_s0 + $0x58] sm:$0xff]  ;;  %v770_v20 = vld [vmem:[%s9514_s0 + $0x60] sm:$0xf]  ;;  %1314 = vst.msk [vmem:[#allocation2 + $0x18] sm:$0xff] %vm1310_vm3, %v9334_v21  ;;  %1315 = vst.msk [vmem:[#allocation2 + $0x20] sm:$0xff] %vm1310_vm3, %v9334_v21  ;;  %s12505_s0 = sld [smem:[#allocation17_spill]] }
  0x1e   : > { %7850 = vmatpush3.msra.mxu0 %v773_v5  ;;  %1316 = vst.msk [vmem:[#allocation2 + $0x28] sm:$0xff] %vm1310_vm3, %v9334_v21  ;;  %1317 = vst.msk [vmem:[#allocation2 + $0x30] sm:$0xff] %vm1310_vm3, %v9334_v21 }
  0x1f   : > { %7851 = vmatprep.subr.mxu0 %v9332_v1  ;;  %1318 = vst.msk [vmem:[#allocation2 + $0x38] sm:$0xff] %vm1310_vm3, %v9334_v21  ;;  %1319 = vst.msk [vmem:[#allocation2 + $0x40] sm:$0xff] %vm1310_vm3, %v9334_v21 }
  0x20   : > { %7852 = vmatpush3.msra.mxu0 %v772_v6  ;;  %1320 = vst.msk [vmem:[#allocation2 + $0x48] sm:$0xff] %vm1310_vm3, %v9334_v21  ;;  %1321 = vst.msk [vmem:[#allocation2 + $0x50] sm:$0xff] %vm1310_vm3, %v9334_v21  ;;  %s11298_s3 = scalar_lea.vmem %s12506_s30, %s7209_s28  ;;  %s757_s30 = scalar_lea.vmem %s12484_s24, %s9177_s29 }
  0x21   : > { %7853 = vmatprep.subr.mxu0 %v9332_v1  ;;  %1322 = vst.msk [vmem:[#allocation2 + $0x58] sm:$0xff] %vm1310_vm3, %v9334_v21  ;;  %1323 = vst.msk [vmem:[#allocation2 + $0x60] sm:$0xff] %vm1310_vm3, %v9334_v21 }
  0x22   : > { %7854 = vmatpush3.msra.mxu0 %v771_v7  ;;  %1667 = vst.msk [vmem:[#allocation3] sm:$0xff] %vm1310_vm3, %v9332_v1  ;;  %1668 = vst.msk [vmem:[#allocation3 + $0x8] sm:$0xff] %vm1310_vm3, %v9332_v1 }
  0x23   : > { %7856 = vmatmul.mubr.msk.f32.vlgmr.msra.gmra.mxu0 %vm785_vm2, %v758_v8  ;;  %7978 = vmatprep.subr.mxu0 %v9332_v1  ;;  %1669 = vst.msk [vmem:[#allocation3 + $0x10] sm:$0xff] %vm1310_vm3, %v9332_v1  ;;  %1670 = vst.msk [vmem:[#allocation3 + $0x18] sm:$0xff] %vm1310_vm3, %v9332_v1 }
  0x24   : > { %7858 = vmatprep.mubr.msk.f32.mxu0 %vm9333_vm1, %v9332_v1  ;;  %1671 = vst.msk [vmem:[#allocation3 + $0x20] sm:$0xff] %vm1310_vm3, %v9332_v1  ;;  %1672 = vst.msk [vmem:[#allocation3 + $0x28] sm:$0xff] %vm1310_vm3, %v9332_v1 }
  0x25   : > { %1673 = vst.msk [vmem:[#allocation3 + $0x30] sm:$0xff] %vm1310_vm3, %v9332_v1  ;;  %4274 = vst [vmem:[#allocation5] sm:$0xff] %v9334_v21 }
  0x26   : > { %4275 = vst [vmem:[#allocation5 + $0x8] sm:$0xff] %v9334_v21  ;;  %4276 = vst [vmem:[#allocation5 + $0x10] sm:$0xff] %v9334_v21 }
  0x27   : > { %7859 = vmatmul.mubr.msk.f32.gmra.mxu0 %vm785_vm2, %v759_v9  ;;  %4277 = vst [vmem:[#allocation5 + $0x18] sm:$0xff] %v9334_v21  ;;  %4278 = vst [vmem:[#allocation5 + $0x20] sm:$0xff] %v9334_v21 }
  0x28   : > { %7861 = vmatprep.mubr.msk.f32.mxu0 %vm9333_vm1, %v9332_v1  ;;  %4279 = vst [vmem:[#allocation5 + $0x28] sm:$0xff] %v9334_v21  ;;  %4280 = vst [vmem:[#allocation5 + $0x30] sm:$0xff] %v9334_v21 }
  0x29   : > { %4281 = vst [vmem:[#allocation5 + $0x38] sm:$0x1] %v9334_v21  ;;  %4702 = vst.msk [vmem:[#allocation6] sm:$0xff] %vm1310_vm3, %v9334_v21 }
  0x2a   : > { %4703 = vst.msk [vmem:[#allocation6 + $0x8] sm:$0xff] %vm1310_vm3, %v9334_v21  ;;  %4801 = vst.msk [vmem:[#allocation7] sm:$0xff] %vm1310_vm3, %v9332_v1 }
  0x2b   : > { %7862 = vmatmul.mubr.msk.f32.gmra.mxu0 %vm785_vm2, %v760_v10  ;;  %6083 = vst [vmem:[#allocation9] sm:$0xff] %v9334_v21  ;;  %6084 = vst [vmem:[#allocation9 + $0x8] sm:$0x1] %v9334_v21 }
  0x2c   : > { %7864 = vmatprep.mubr.msk.f32.mxu0 %vm9333_vm1, %v9332_v1  ;;  %1325 = vst.msk [vmem:[#allocation2 + $0x68] sm:$0xf] %vm1324_vm4, %v9334_v21 }
  0x2f   : > { %7865 = vmatmul.mubr.msk.f32.gmra.mxu0 %vm785_vm2, %v761_v11 }
  0x30   : > { %7867 = vmatprep.mubr.msk.f32.mxu0 %vm9333_vm1, %v9332_v1 }
  0x33   : > { %7868 = vmatmul.mubr.msk.f32.gmra.mxu0 %vm785_vm2, %v762_v12 }
  0x34   : > { %7870 = vmatprep.mubr.msk.f32.mxu0 %vm9333_vm1, %v9332_v1 }
  0x37   : > { %7871 = vmatmul.mubr.msk.f32.gmra.mxu0 %vm785_vm2, %v763_v13 }
  0x38   : > { %7873 = vmatprep.mubr.msk.f32.mxu0 %vm9333_vm1, %v9332_v1 }
  0x3b   : > { %7874 = vmatmul.mubr.msk.f32.gmra.mxu0 %vm785_vm2, %v764_v14 }
  0x3c   : > { %7876 = vmatprep.mubr.msk.f32.mxu0 %vm9333_vm1, %v9332_v1 }
  0x3f   : > { %7877 = vmatmul.mubr.msk.f32.gmra.mxu0 %vm785_vm2, %v765_v15 }
  0x40   : > { %7879 = vmatprep.mubr.msk.f32.mxu0 %vm9333_vm1, %v9332_v1 }
  0x43   : > { %7880 = vmatmul.mubr.msk.f32.gmra.mxu0 %vm785_vm2, %v766_v16 }
  0x44   : > { %7882 = vmatprep.mubr.msk.f32.mxu0 %vm9333_vm1, %v9332_v1 }
  0x47   : > { %7883 = vmatmul.mubr.msk.f32.gmra.mxu0 %vm785_vm2, %v767_v17 }
  0x48   : > { %7885 = vmatprep.mubr.msk.f32.mxu0 %vm9333_vm1, %v9332_v1 }
  0x4b   : > { %7886 = vmatmul.mubr.msk.f32.gmra.mxu0 %vm785_vm2, %v768_v18 }
  0x4c   : > { %7888 = vmatprep.mubr.msk.f32.mxu0 %vm9333_vm1, %v9332_v1 }
  0x4f   : > { %7889 = vmatmul.mubr.msk.f32.gmra.mxu0 %vm785_vm2, %v769_v19 }
  0x50   : > { %7891 = vmatprep.mubr.msk.f32.mxu0 %vm9333_vm1, %v9332_v1 }
  0x53   : > { %7892 = vmatmul.mubr.msk.f32.gmra.mxu0 %vm785_vm2, %v770_v20 }
  0x54   : > { %7994 = vmatprep.mubr.msk.f32.mxu0 %vm9333_vm1, %v9332_v1 }
  0xe3   : > { %v895_v23 = vpop.f32.mrf.mxu0 }
  0xe4   : > { %v896_v24 = vadd.f32 %v9608_v22, %v895_v23 }
  0xe5   : > { %v7857_v25 = vpop.f32.mrf.mxu0 }
  0xe6   : > { %v9612_v26 = vmul.f32 0.70710677, %v896_v24  ;;  %v9645_v6 = vmul.f32 0.5, %v896_v24 }
  0xe7   : > { %v900_v27 = vpop.f32.mrf.mxu0 }
  0xe8   : > { %v985_v28 = vand.u32 2147483647, %v9612_v26  ;;  %v901_v29 = vadd.f32 %v9608_v22, %v900_v27  ;;  %vm1245_vm5 = vcmp.ge.f32.partialorder %v9612_v26, 0.0 }
  0xe9   : > { %v7860_v30 = vpop.f32.mrf.mxu0 }
  0xea   : > { %v998_v31 = vmul.f32 0.3275911, %v985_v28  ;;  %v9616_v32 = vmul.f32 0.70710677, %v901_v29  ;;  %v1167_v46 = vsub.f32 0.0, %v985_v28  ;;  %v9648_v10 = vmul.f32 0.5, %v901_v29 }
  0xeb   : > { %v905_v33 = vpop.f32.mrf.mxu0 }
  0xec   : > { %v1011_v34 = vadd.f32 1.0, %v998_v31  ;;  %v986_v35 = vand.u32 2147483647, %v9616_v32  ;;  %v906_v36 = vadd.f32 %v9608_v22, %v905_v33  ;;  %v1180_v56 = vmul.f32 %v1167_v46, %v985_v28 }
  0xed   : > { %v7863_v37 = vpop.f32.mrf.mxu0  ;;  %vm1246_vm6 = vcmp.ge.f32.partialorder %v9616_v32, 0.0 }
  0xee   : > { %9190 = vrcp.f32 %v1011_v34  ;;  %v999_v38 = vmul.f32 0.3275911, %v986_v35  ;;  %v9620_v39 = vmul.f32 0.70710677, %v906_v36  ;;  %v1168_v53 = vsub.f32 0.0, %v986_v35 }
  0xef   : > { %v910_v40 = vpop.f32.mrf.mxu0  ;;  %v1193_v3 = vmul.f32 1.442695, %v1180_v56  ;;  %v9664_v29 = vmul.f32 0.5, %v906_v36 }
  0xf0   : > { %v1012_v41 = vadd.f32 1.0, %v999_v38  ;;  %v9623_v42 = vadd.f32 %v9608_v22, %v910_v40  ;;  %v987_v43 = vand.u32 2147483647, %v9620_v39  ;;  %v1181_v62 = vmul.f32 %v1168_v53, %v986_v35 }
  0xf1   : > { %v7866_v44 = vpop.f32.mrf.mxu0  ;;  %vm1247_vm7 = vcmp.ge.f32.partialorder %v9620_v39, 0.0 }
  0xf2   : > { %9192 = vrcp.f32 %v1012_v41  ;;  %v9627_v45 = vmul.f32 0.70710677, %v9623_v42  ;;  %v1000_v47 = vmul.f32 0.3275911, %v987_v43  ;;  %v1169_v63 = vsub.f32 0.0, %v987_v43 }
  0xf3   : > { %v915_v48 = vpop.f32.mrf.mxu0  ;;  %v1195_v16 = vmul.f32 1.442695, %v1181_v62 }
  0xf4   : > { %v988_v49 = vand.u32 2147483647, %v9627_v45  ;;  %v9631_v50 = vadd.f32 %v9608_v22, %v915_v48  ;;  %v1013_v51 = vadd.f32 1.0, %v1000_v47  ;;  %v1182_v17 = vmul.f32 %v1169_v63, %v987_v43 }
  0xf5   : > { %v7869_v52 = vpop.f32.mrf.mxu0  ;;  %vm1248_vm8 = vcmp.ge.f32.partialorder %v9627_v45, 0.0 }
  0xf6   : > { %v1001_v54 = vmul.f32 0.3275911, %v988_v49  ;;  %v9634_v55 = vmul.f32 0.70710677, %v9631_v50  ;;  %9194 = vrcp.f32 %v1013_v51  ;;  %v1170_v8 = vsub.f32 0.0, %v988_v49 }
  0xf7   : > { %v920_v57 = vpop.f32.mrf.mxu0  ;;  %v1197_v38 = vmul.f32 1.442695, %v1182_v17 }
  0xf8   : > { %v1014_v58 = vadd.f32 1.0, %v1001_v54  ;;  %v989_v59 = vand.u32 2147483647, %v9634_v55  ;;  %v9638_v60 = vadd.f32 %v9608_v22, %v920_v57  ;;  %v1183_v27 = vmul.f32 %v1170_v8, %v988_v49 }
  0xf9   : > { %v7872_v61 = vpop.f32.mrf.mxu0  ;;  %vm1249_vm9 = vcmp.ge.f32.partialorder %v9634_v55, 0.0 }
  0xfa   : > { %9196 = vrcp.f32 %v1014_v58  ;;  %v1002_v0 = vmul.f32 0.3275911, %v989_v59  ;;  %v9643_v4 = vmul.f32 0.70710677, %v9638_v60  ;;  %v1171_v11 = vsub.f32 0.0, %v989_v59 }
  0xfb   : > { %v9640_v2 = vpop.eup %9190  ;;  %v925_v5 = vpop.f32.mrf.mxu0  ;;  %v1199_v48 = vmul.f32 1.442695, %v1183_v27 }
  0xfc   : > { %v1050_v7 = vmul.f32 1.0614054, %v9640_v2  ;;  %v1015_v9 = vadd.f32 1.0, %v1002_v0  ;;  %v990_v12 = vand.u32 2147483647, %v9643_v4  ;;  %v9652_v13 = vadd.f32 %v9608_v22, %v925_v5 }
  0xfd   : > { %v7875_v14 = vpop.f32.mrf.mxu0  ;;  %v1184_v30 = vmul.f32 %v1171_v11, %v989_v59  ;;  %vm1250_vm10 = vcmp.ge.f32.partialorder %v9643_v4, 0.0 }
  0xfe   : > { %v1063_v15 = vadd.f32 -1.4531521, %v1050_v7  ;;  %9198 = vrcp.f32 %v1015_v9  ;;  %v1003_v19 = vmul.f32 0.3275911, %v990_v12  ;;  %v1172_v20 = vsub.f32 0.0, %v990_v12 }
  0xff   : > { %v9654_v18 = vpop.eup %9192  ;;  %9200 = vpow2.f32 %v1193_v3  ;;  %v9657_v21 = vmul.f32 0.70710677, %v9652_v13  ;;  %v930_v23 = vpop.f32.mrf.mxu0  ;;  %v1201_v52 = vmul.f32 1.442695, %v1184_v30 }
 0x100   : > { %v1076_v24 = vmul.f32 %v9640_v2, %v1063_v15  ;;  %v1051_v25 = vmul.f32 1.0614054, %v9654_v18  ;;  %v9662_v28 = vadd.f32 %v9608_v22, %v930_v23  ;;  %v1016_v31 = vadd.f32 1.0, %v1003_v19 }
 0x101   : > { %v991_v33 = vand.u32 2147483647, %v9657_v21  ;;  %v7878_v34 = vpop.f32.mrf.mxu0  ;;  %9202 = vpow2.f32 %v1195_v16  ;;  %v1185_v40 = vmul.f32 %v1172_v20, %v990_v12  ;;  %v9689_v12 = vmul.f32 0.5, %v9623_v42 }
 0x102   : > { %v1089_v35 = vadd.f32 1.4214138, %v1076_v24  ;;  %v1064_v37 = vadd.f32 -1.4531521, %v1051_v25  ;;  %9204 = vrcp.f32 %v1016_v31  ;;  %v9672_v49 = vmul.f32 0.70710677, %v9662_v28 }
 0x103   : > { %v1004_v41 = vmul.f32 0.3275911, %v991_v33  ;;  %v1173_v43 = vsub.f32 0.0, %v991_v33  ;;  %v935_v44 = vpop.f32.mrf.mxu0  ;;  %v9667_v46 = vpop.eup %9194  ;;  %9206 = vpow2.f32 %v1197_v38  ;;  %v1203_v63 = vmul.f32 1.442695, %v1185_v40 }
 0x104   : > { %v1102_v47 = vmul.f32 %v9640_v2, %v1089_v35  ;;  %v1077_v36 = vmul.f32 %v9654_v18, %v1064_v37  ;;  %v1052_v51 = vmul.f32 1.0614054, %v9667_v46  ;;  %v9676_v59 = vand.u32 2147483647, %v9672_v49 }
 0x105   : > { %v1017_v53 = vadd.f32 1.0, %v1004_v41  ;;  %v1186_v54 = vmul.f32 %v1173_v43, %v991_v33  ;;  %v7881_v56 = vpop.f32.mrf.mxu0  ;;  %v9681_v0 = vadd.f32 %v9608_v22, %v935_v44  ;;  %v9705_v37 = vmul.f32 0.5, %v9631_v50 }
 0x106   : > { %v1115_v57 = vadd.f32 -0.28449672, %v1102_v47  ;;  %v1090_v58 = vadd.f32 1.4214138, %v1077_v36  ;;  %v1065_v62 = vadd.f32 -1.4531521, %v1052_v51 }
 0x107   : > { %v9678_v61 = vpop.eup %9196  ;;  %9208 = vrcp.f32 %v1017_v53  ;;  %v940_v3 = vpop.f32.mrf.mxu0  ;;  %v1005_v9 = vmul.f32 0.3275911, %v9676_v59  ;;  %v1205_v14 = vmul.f32 1.442695, %v1186_v54  ;;  %v9695_v25 = vmul.f32 0.70710677, %v9681_v0 }
 0x108   : > { %v1128_v5 = vmul.f32 %v9640_v2, %v1115_v57  ;;  %v1103_v7 = vmul.f32 %v9654_v18, %v1090_v58  ;;  %v1053_v8 = vmul.f32 1.0614054, %v9678_v61  ;;  %v1078_v11 = vmul.f32 %v9667_v46, %v1065_v62 }
 0x109   : > { %9210 = vpow2.f32 %v1199_v48  ;;  %v7884_v15 = vpop.f32.mrf.mxu0  ;;  %v1018_v24 = vadd.f32 1.0, %v1005_v9  ;;  %v993_v38 = vand.u32 2147483647, %v9695_v25  ;;  %v1174_v48 = vsub.f32 0.0, %v9676_v59 }
 0x10a   : > { %v1141_v16 = vadd.f32 0.2548296, %v1128_v5  ;;  %v1116_v17 = vadd.f32 -0.28449672, %v1103_v7  ;;  %v1066_v19 = vadd.f32 -1.4531521, %v1053_v8  ;;  %9212 = vpow2.f32 %v1201_v52 }
 0x10b   : > { %v9691_v20 = vpop.eup %9198  ;;  %v1091_v23 = vadd.f32 1.4214138, %v1078_v11  ;;  %9214 = vpow2.f32 %v1203_v63  ;;  %v9697_v27 = vpop.f32.mrf.mxu0  ;;  %v1006_v51 = vmul.f32 0.3275911, %v993_v38  ;;  %v9720_v5 = vadd.f32 %v9608_v22, %v940_v3 }
 0x10c   : > { %v9201_v42 = vpop.eup %9200  ;;  %v1154_v30 = vmul.f32 %v9640_v2, %v1141_v16  ;;  %v1129_v31 = vmul.f32 %v9654_v18, %v1116_v17  ;;  %v1079_v33 = vmul.f32 %v9678_v61, %v1066_v19  ;;  %v1054_v34 = vmul.f32 1.0614054, %v9691_v20 }
 0x10d   : > { %v1104_v35 = vmul.f32 %v9667_v46, %v1091_v23  ;;  %9216 = vrcp.f32 %v1018_v24  ;;  %v7887_v40 = vpop.f32.mrf.mxu0  ;;  %v1019_v63 = vadd.f32 1.0, %v1006_v51  ;;  %v1175_v17 = vsub.f32 0.0, %v993_v38 }
 0x10e   : > { %v1219_v41 = vmul.f32 %v9201_v42, %v1154_v30  ;;  %v1142_v43 = vadd.f32 0.2548296, %v1129_v31  ;;  %v1092_v44 = vadd.f32 1.4214138, %v1079_v33  ;;  %v1067_v47 = vadd.f32 -1.4531521, %v1054_v34  ;;  %v9203_v2 = vpop.eup %9202 }
 0x10f   : > { %v1117_v36 = vadd.f32 -0.28449672, %v1104_v35  ;;  %9218 = vpow2.f32 %v1205_v14  ;;  %v9710_v52 = vpop.f32.mrf.mxu0  ;;  %v9712_v50 = vpop.eup %9204  ;;  %v9747_v32 = vmul.f32 0.70710677, %v9720_v5  ;;  %vm1251_vm11 = vcmp.ge.f32.partialorder %v9657_v21, 0.0 }
 0x110   : > { %v1232_v53 = vsub.f32 1.0, %v1219_v41  ;;  %v1155_v54 = vmul.f32 %v9654_v18, %v1142_v43  ;;  %v1105_v56 = vmul.f32 %v9678_v61, %v1092_v44  ;;  %v1080_v57 = vmul.f32 %v9691_v20, %v1067_v47  ;;  %v9207_v15 = vpop.eup %9206 }
 0x111   : > { %v1130_v58 = vmul.f32 %v9667_v46, %v1117_v36  ;;  %v1055_v62 = vmul.f32 1.0614054, %v9712_v50  ;;  %v7890_v7 = vpop.f32.mrf.mxu0  ;;  %9220 = vrcp.f32 %v1019_v63  ;;  %v1187_v47 = vmul.f32 %v1174_v48, %v9676_v59 }
 0x112   : > { %v1258_v8 = vsub.f32 0.0, %v1232_v53  ;;  %v1220_v9 = vmul.f32 %v9203_v2, %v1155_v54  ;;  %v1118_v11 = vadd.f32 -0.28449672, %v1105_v56  ;;  %v1093_v14 = vadd.f32 1.4214138, %v1080_v57 }
 0x113   : > { %v1143_v16 = vadd.f32 0.2548296, %v1130_v58  ;;  %v1068_v18 = vadd.f32 -1.4531521, %v1055_v62  ;;  %v9722_v19 = vpop.f32.mrf.mxu0  ;;  %v1188_v62 = vmul.f32 %v1175_v17, %v993_v38  ;;  %v9785_v55 = vadd.f32 %v9608_v22, %v9710_v52 }
 0x114   : > { %v9724_v23 = vpop.eup %9208  ;;  %v1271_v24 = vsel %vm1245_vm5, %v1232_v53, %v1258_v8  ;;  %v1233_v42 = vsub.f32 1.0, %v1220_v9  ;;  %v1131_v3 = vmul.f32 %v9678_v61, %v1118_v11  ;;  %v1106_v30 = vmul.f32 %v9691_v20, %v1093_v14 }
 0x115   : > { %v1284_v31 = vadd.f32 1.0, %v1271_v24  ;;  %v1156_v33 = vmul.f32 %v9667_v46, %v1143_v16  ;;  %v1081_v34 = vmul.f32 %v9712_v50, %v1068_v18  ;;  %v1056_v35 = vmul.f32 1.0614054, %v9724_v23  ;;  %v7893_v40 = vpop.f32.mrf.mxu0 }
 0x116   : > { %v9211_v41 = vpop.eup %9210  ;;  %v1259_v43 = vsub.f32 0.0, %v1233_v42  ;;  %v1144_v44 = vadd.f32 0.2548296, %v1131_v3  ;;  %v1119_v26 = vadd.f32 -0.28449672, %v1106_v30  ;;  %vm1252_vm12 = vcmp.ge.f32.partialorder %v9672_v49, 0.0 }
 0x117   : > { %v9213_v2 = vpop.eup %9212  ;;  %v1297_v36 = vmul.f32 %v1284_v31, %v9645_v6  ;;  %v1221_v51 = vmul.f32 %v9207_v15, %v1156_v33  ;;  %v1094_v53 = vadd.f32 1.4214138, %v1081_v34  ;;  %v1069_v54 = vadd.f32 -1.4531521, %v1056_v35 }
 0x118   : > { %v9215_v46 = vpop.eup %9214  ;;  %v1272_v56 = vsel %vm1246_vm6, %v1233_v42, %v1259_v43  ;;  %v1157_v57 = vmul.f32 %v9678_v61, %v1144_v44  ;;  %v1132_v58 = vmul.f32 %v9691_v20, %v1119_v26  ;;  %v1207_v11 = vmul.f32 1.442695, %v1187_v47 }
 0x119   : > { %1326 = vst.msk [vmem:[#allocation2 + $0x4] sm:$0xff] %vm1310_vm3, %v1297_v36  ;;  %v1285_v59 = vadd.f32 1.0, %v1272_v56  ;;  %v1234_v48 = vsub.f32 1.0, %v1221_v51  ;;  %v1107_v6 = vmul.f32 %v9712_v50, %v1094_v53  ;;  %v1082_v63 = vmul.f32 %v9724_v23, %v1069_v54 }
 0x11a   : > { %v9744_v7 = vpop.eup %9216  ;;  %v1222_v8 = vmul.f32 %v9211_v41, %v1157_v57  ;;  %v1145_v9 = vadd.f32 0.2548296, %v1132_v58  ;;  %v9754_v42 = vand.u32 2147483647, %v9747_v32  ;;  %v1209_v31 = vmul.f32 1.442695, %v1188_v62 }
 0x11b   : > { %v1298_v61 = vmul.f32 %v1285_v59, %v9648_v10  ;;  %v1260_v14 = vsub.f32 0.0, %v1234_v48  ;;  %v1120_v38 = vadd.f32 -0.28449672, %v1107_v6  ;;  %v1095_v15 = vadd.f32 1.4214138, %v1082_v63 }
 0x11c   : > { %v9219_v16 = vpop.eup %9218  ;;  %v1235_v18 = vsub.f32 1.0, %v1222_v8  ;;  %v1158_v17 = vmul.f32 %v9691_v20, %v1145_v9  ;;  %v1057_v24 = vmul.f32 1.0614054, %v9744_v7  ;;  %9222 = vpow2.f32 %v1207_v11 }
 0x11d   : > { %1327 = vst.msk [vmem:[#allocation2 + $0xc] sm:$0xff] %vm1310_vm3, %v1298_v61  ;;  %v1273_v3 = vsel %vm1247_vm7, %v1234_v48, %v1260_v14  ;;  %v1133_v10 = vmul.f32 %v9712_v50, %v1120_v38  ;;  %v1108_v30 = vmul.f32 %v9724_v23, %v1095_v15  ;;  %v1007_v43 = vmul.f32 0.3275911, %v9754_v42 }
 0x11e   : > { %v1286_v33 = vadd.f32 1.0, %v1273_v3  ;;  %v1261_v34 = vsub.f32 0.0, %v1235_v18  ;;  %v1223_v35 = vmul.f32 %v9213_v2, %v1158_v17  ;;  %v1070_v40 = vadd.f32 -1.4531521, %v1057_v24  ;;  %v9762_v44 = vpop.eup %9220 }
 0x11f   : > { %v1146_v20 = vadd.f32 0.2548296, %v1133_v10  ;;  %v1121_v41 = vadd.f32 -0.28449672, %v1108_v30  ;;  %v1058_v54 = vmul.f32 1.0614054, %v9762_v44  ;;  %9224 = vpow2.f32 %v1209_v31 }
 0x120   : > { %v1299_v26 = vmul.f32 %v1286_v33, %v9664_v29  ;;  %v1274_v39 = vsel %vm1248_vm8, %v1235_v18, %v1261_v34  ;;  %v1236_v47 = vsub.f32 1.0, %v1223_v35  ;;  %v1083_v36 = vmul.f32 %v9744_v7, %v1070_v40 }
 0x121   : > { %v1287_v51 = vadd.f32 1.0, %v1274_v39  ;;  %v1159_v53 = vmul.f32 %v9712_v50, %v1146_v20  ;;  %v1134_v2 = vmul.f32 %v9724_v23, %v1121_v41  ;;  %v1020_v58 = vadd.f32 1.0, %v1007_v43 }
 0x122   : > { %1328 = vst.msk [vmem:[#allocation2 + $0x14] sm:$0xff] %vm1310_vm3, %v1299_v26  ;;  %v1262_v56 = vsub.f32 0.0, %v1236_v47  ;;  %v1096_v57 = vadd.f32 1.4214138, %v1083_v36  ;;  %v1071_v59 = vadd.f32 -1.4531521, %v1058_v54  ;;  %v9778_v6 = vadd.f32 %v9608_v22, %v9697_v27 }
 0x123   : > { %v1300_v29 = vmul.f32 %v1287_v51, %v9689_v12  ;;  %v1224_v45 = vmul.f32 %v9215_v46, %v1159_v53  ;;  %v1147_v62 = vadd.f32 0.2548296, %v1134_v2  ;;  %9226 = vrcp.f32 %v1020_v58 }
 0x124   : > { %v1275_v48 = vsel %vm1249_vm9, %v1236_v47, %v1262_v56  ;;  %v1109_v50 = vmul.f32 %v9744_v7, %v1096_v57  ;;  %v1084_v12 = vmul.f32 %v9762_v44, %v1071_v59  ;;  %v1176_v15 = vsub.f32 0.0, %v9754_v42 }
 0x125   : > { %1329 = vst.msk [vmem:[#allocation2 + $0x1c] sm:$0xff] %vm1310_vm3, %v1300_v29  ;;  %v1288_v63 = vadd.f32 1.0, %v1275_v48  ;;  %v1237_v8 = vsub.f32 1.0, %v1224_v45  ;;  %v1160_v9 = vmul.f32 %v9724_v23, %v1147_v62  ;;  %v9792_v23 = vmul.f32 0.70710677, %v9778_v6 }
 0x126   : > { %v1122_v46 = vadd.f32 -0.28449672, %v1109_v50  ;;  %v1097_v38 = vadd.f32 1.4214138, %v1084_v12  ;;  %v1189_v41 = vmul.f32 %v1176_v15, %v9754_v42  ;;  %v965_v26 = vmul.f32 0.5, %v9652_v13  ;;  %v1694_v15 = vld [vmem:[%s12501_s27 + $0x20] sm:$0xff] }
 0x127   : > { %v1301_v11 = vmul.f32 %v1288_v63, %v9705_v37  ;;  %v1263_v61 = vsub.f32 0.0, %v1237_v8  ;;  %v1225_v14 = vmul.f32 %v9219_v16, %v1160_v9  ;;  %v9797_v37 = vmul.f32 0.70710677, %v9785_v55 }
 0x128   : > { %v1135_v27 = vmul.f32 %v9744_v7, %v1122_v46  ;;  %v1110_v52 = vmul.f32 %v9762_v44, %v1097_v38  ;;  %v964_v16 = vmul.f32 0.5, %v9638_v60  ;;  %v9801_v3 = vand.u32 2147483647, %v9792_v23 }
 0x129   : > { %1330 = vst.msk [vmem:[#allocation2 + $0x24] sm:$0xff] %vm1310_vm3, %v1301_v11  ;;  %v1276_v18 = vsel %vm1250_vm10, %v1237_v8, %v1263_v61  ;;  %v1238_v17 = vsub.f32 1.0, %v1225_v14  ;;  %v9804_v31 = vand.u32 2147483647, %v9797_v37  ;;  %v9223_v33 = vpop.eup %9222  ;;  %v1211_v57 = vmul.f32 1.442695, %v1189_v41 }
 0x12a   : > { %v1289_v24 = vadd.f32 1.0, %v1276_v18  ;;  %v1148_v4 = vadd.f32 0.2548296, %v1135_v27  ;;  %v1123_v30 = vadd.f32 -0.28449672, %v1110_v52  ;;  %v966_v59 = vmul.f32 0.5, %v9662_v28 }
 0x12b   : > { %v1264_v10 = vsub.f32 0.0, %v1238_v17  ;;  %v1008_v40 = vmul.f32 0.3275911, %v9801_v3  ;;  %v1009_v43 = vmul.f32 0.3275911, %v9804_v31  ;;  %v1177_v8 = vsub.f32 0.0, %v9801_v3 }
 0x12c   : > { %v1302_v34 = vmul.f32 %v1289_v24, %v964_v16  ;;  %v1161_v35 = vmul.f32 %v9744_v7, %v1148_v4  ;;  %v1136_v60 = vmul.f32 %v9762_v44, %v1123_v30  ;;  %v9225_v51 = vpop.eup %9224  ;;  %v9816_v7 = vadd.f32 %v9608_v22, %v9722_v19  ;;  %v1696_v11 = vld [vmem:[%s12501_s27 + $0x30] sm:$0xff]  ;;  %v1695_v14 = vld [vmem:[%s12501_s27 + $0x28] sm:$0xff]  ;;  %v1693_v24 = vld [vmem:[%s12501_s27 + $0x18] sm:$0xff] }
 0x12d   : > { %v1277_v20 = vsel %vm1251_vm11, %v1238_v17, %v1264_v10  ;;  %v1021_v36 = vadd.f32 1.0, %v1008_v40  ;;  %v1022_v53 = vadd.f32 1.0, %v1009_v43  ;;  %v1178_v46 = vsub.f32 0.0, %v9804_v31 }
 0x12e   : > { %1331 = vst.msk [vmem:[#allocation2 + $0x2c] sm:$0xff] %vm1310_vm3, %v1302_v34  ;;  %v1290_v39 = vadd.f32 1.0, %v1277_v20  ;;  %v1226_v47 = vmul.f32 %v9223_v33, %v1161_v35  ;;  %v1149_v21 = vadd.f32 0.2548296, %v1136_v60  ;;  %v9824_v29 = vmul.f32 0.70710677, %v9816_v7 }
 0x12f   : > { %9228 = vrcp.f32 %v1021_v36  ;;  %vm1253_vm13 = vcmp.ge.f32.partialorder %v9695_v25, 0.0  ;;  %v967_v38 = vmul.f32 0.5, %v9681_v0  ;;  %v1190_v17 = vmul.f32 %v1177_v8, %v9801_v3 }
 0x130   : > { %v1303_v2 = vmul.f32 %v1290_v39, %v965_v26  ;;  %v1239_v54 = vsub.f32 1.0, %v1226_v47  ;;  %v9818_v42 = vpop.eup %9226  ;;  %v1162_v56 = vmul.f32 %v9762_v44, %v1149_v21  ;;  %9230 = vrcp.f32 %v1022_v53  ;;  %v1697_v44 = vld [vmem:[%s12501_s27 + $0x38] sm:$0xff] }
 0x131   : > { %v1059_v58 = vmul.f32 1.0614054, %v9818_v42  ;;  %v997_v62 = vand.u32 2147483647, %v9824_v29  ;;  %7979 = vmatpush3.msra.mxu0 %v1697_v44  ;;  %9232 = vpow2.f32 %v1211_v57  ;;  %v1191_v52 = vmul.f32 %v1178_v46, %v9804_v31 }
 0x132   : > { %1332 = vst.msk [vmem:[#allocation2 + $0x34] sm:$0xff] %vm1310_vm3, %v1303_v2  ;;  %v1265_v13 = vsub.f32 0.0, %v1239_v54  ;;  %v1227_v22 = vmul.f32 %v9225_v51, %v1162_v56  ;;  %7980 = vmatprep.subr.mxu0 %v9332_v1  ;;  %v1213_v33 = vmul.f32 1.442695, %v1190_v17  ;;  %vm1254_vm14 = vcmp.ge.f32.partialorder %v9747_v32, 0.0 }
 0x133   : > { %v1072_v45 = vadd.f32 -1.4531521, %v1059_v58  ;;  %v1010_v49 = vmul.f32 0.3275911, %v997_v62  ;;  %7981 = vmatpush3.msra.mxu0 %v1696_v11  ;;  %v1215_v34 = vmul.f32 1.442695, %v1191_v52 }
 0x134   : > { %v1278_v19 = vsel %vm1252_vm12, %v1239_v54, %v1265_v13  ;;  %v1240_v50 = vsub.f32 1.0, %v1227_v22  ;;  %7982 = vmatprep.subr.mxu0 %v9332_v1  ;;  %v1179_v35 = vsub.f32 0.0, %v997_v62  ;;  %v968_v44 = vmul.f32 0.5, %v9720_v5 }
 0x135   : > { %v1291_v48 = vadd.f32 1.0, %v1278_v19  ;;  %v1085_v63 = vmul.f32 %v9818_v42, %v1072_v45  ;;  %v1023_v61 = vadd.f32 1.0, %v1010_v49  ;;  %7983 = vmatpush3.msra.mxu0 %v1695_v14  ;;  %vm1255_vm15 = vcmp.ge.f32.partialorder %v9792_v23, 0.0 }
 0x136   : > { %v1266_v12 = vsub.f32 0.0, %v1240_v50  ;;  %7984 = vmatprep.subr.mxu0 %v9332_v1  ;;  %v1192_v47 = vmul.f32 %v1179_v35, %v997_v62  ;;  %vm1256_vm2 = vcmp.ge.f32.partialorder %v9797_v37, 0.0  ;;  %v969_v52 = vmul.f32 0.5, %v9778_v6 }
 0x137   : > { %v1304_v9 = vmul.f32 %v1291_v48, %v966_v59  ;;  %v1098_v28 = vadd.f32 1.4214138, %v1085_v63  ;;  %9234 = vrcp.f32 %v1023_v61  ;;  %7985 = vmatpush3.msra.mxu0 %v1694_v15  ;;  %vm1257_vm5 = vcmp.ge.f32.partialorder %v9824_v29, 0.0 }
 0x138   : > { %v1279_v27 = vsel %vm1253_vm13, %v1240_v50, %v1266_v12  ;;  %7986 = vmatprep.subr.mxu0 %v9332_v1  ;;  %9236 = vpow2.f32 %v1213_v33  ;;  %v1217_v57 = vmul.f32 1.442695, %v1192_v47  ;;  %v971_v6 = vmul.f32 0.5, %v9816_v7 }
 0x139   : > { %1333 = vst.msk [vmem:[#allocation2 + $0x3c] sm:$0xff] %vm1310_vm3, %v1304_v9  ;;  %v1292_v18 = vadd.f32 1.0, %v1279_v27  ;;  %v1111_v25 = vmul.f32 %v9818_v42, %v1098_v28  ;;  %7987 = vmatpush3.msra.mxu0 %v1693_v24  ;;  %9238 = vpow2.f32 %v1215_v34  ;;  %v970_v24 = vmul.f32 0.5, %v9785_v55 }
 0x13a   : > { %7988 = vmatprep.subr.mxu0 %v9332_v1  ;;  %9240 = vpow2.f32 %v1217_v57  ;;  %vm1541_vm6 = vcmask 826368   ;;  %vm1674_vm7 = vcmask 518144  }
 0x13b   : > { %v1305_v16 = vmul.f32 %v1292_v18, %v967_v38  ;;  %v1124_v0 = vadd.f32 -0.28449672, %v1111_v25 }
 0x13c   : > { %v9229_v4 = vpop.eup %9228 }
 0x13d   : > { %v9231_v10 = vpop.eup %9230  ;;  %1334 = vst.msk [vmem:[#allocation2 + $0x44] sm:$0xff] %vm1310_vm3, %v1305_v16  ;;  %v1137_v3 = vmul.f32 %v9818_v42, %v1124_v0  ;;  %v1060_v30 = vmul.f32 1.0614054, %v9229_v4 }
 0x13e   : > { %v1061_v31 = vmul.f32 1.0614054, %v9231_v10  ;;  %v9233_v26 = vpop.eup %9232 }
 0x13f   : > { %v1150_v40 = vadd.f32 0.2548296, %v1137_v3  ;;  %v1073_v20 = vadd.f32 -1.4531521, %v1060_v30 }
 0x140   : > { %v1074_v60 = vadd.f32 -1.4531521, %v1061_v31  ;;  %v1359_v7 = vld [vmem:[#allocation2 + $0x39] sm:$0xff] }
 0x141   : > { %v1163_v41 = vmul.f32 %v9818_v42, %v1150_v40  ;;  %v1086_v43 = vmul.f32 %v9229_v4, %v1073_v20 }
 0x142   : > { %v1087_v39 = vmul.f32 %v9231_v10, %v1074_v60 }
 0x143   : > { %v1228_v36 = vmul.f32 %v9233_v26, %v1163_v41  ;;  %v1099_v51 = vadd.f32 1.4214138, %v1086_v43 }
 0x144   : > { %v1100_v21 = vadd.f32 1.4214138, %v1087_v39  ;;  %v9235_v54 = vpop.eup %9234 }
 0x145   : > { %v1241_v53 = vsub.f32 1.0, %v1228_v36  ;;  %v1112_v2 = vmul.f32 %v9229_v4, %v1099_v51  ;;  %v1062_v58 = vmul.f32 1.0614054, %v9235_v54  ;;  %v9237_v12 = vpop.eup %9236  ;;  %v1347_v51 = vld [vmem:[#allocation2 + $0x40] sm:$0xff] }
 0x146   : > { %v1113_v56 = vmul.f32 %v9231_v10, %v1100_v21  ;;  %v9239_v32 = vpop.eup %9238  ;;  %v1360_v21 = vld [vmem:[#allocation2 + $0x41] sm:$0xff] }
 0x147   : > { %v1267_v1 = vsub.f32 0.0, %v1241_v53  ;;  %v1125_v13 = vadd.f32 -0.28449672, %v1112_v2  ;;  %v1075_v45 = vadd.f32 -1.4531521, %v1062_v58  ;;  %v9241_v3 = vpop.eup %9240  ;;  %v1373_v57 = vmax.f32 %v1347_v51, %v1360_v21  ;;  %v1353_v51 = vld [vmem:[#allocation2 + $0x9] sm:$0xff] }
 0x148   : > { %v1126_v42 = vadd.f32 -0.28449672, %v1113_v56 }
 0x149   : > { %v1280_v22 = vsel %vm1254_vm14, %v1241_v53, %v1267_v1  ;;  %v1138_v19 = vmul.f32 %v9229_v4, %v1125_v13  ;;  %v1088_v50 = vmul.f32 %v9235_v54, %v1075_v45  ;;  %v1345_v1 = vld [vmem:[#allocation2 + $0x30] sm:$0xff]  ;;  %v1386_v45 = vld [vmem:[#allocation2 + $0x42] sm:$0xff] }
 0x14a   : > { %v1293_v62 = vadd.f32 1.0, %v1280_v22  ;;  %v1139_v59 = vmul.f32 %v9231_v10, %v1126_v42  ;;  %v1358_v13 = vld [vmem:[#allocation2 + $0x31] sm:$0xff] }
 0x14b   : > { %v1151_v48 = vadd.f32 0.2548296, %v1138_v19  ;;  %v1101_v9 = vadd.f32 1.4214138, %v1088_v50 }
 0x14c   : > { %v1306_v63 = vmul.f32 %v1293_v62, %v968_v44  ;;  %v1152_v8 = vadd.f32 0.2548296, %v1139_v59  ;;  %v1344_v62 = vld [vmem:[#allocation2 + $0x28] sm:$0xff] }
 0x14d   : > { %v1164_v49 = vmul.f32 %v9229_v4, %v1151_v48  ;;  %v1114_v28 = vmul.f32 %v9235_v54, %v1101_v9  ;;  %v1357_v59 = vld [vmem:[#allocation2 + $0x29] sm:$0xff] }
 0x14e   : > { %1335 = vst.msk [vmem:[#allocation2 + $0x4c] sm:$0xff] %vm1310_vm3, %v1306_v63  ;;  %v1165_v46 = vmul.f32 %v9231_v10, %v1152_v8  ;;  %v1371_v8 = vmax.f32 %v1345_v1, %v1358_v13 }
 0x14f   : > { %v1229_v11 = vmul.f32 %v9237_v12, %v1164_v49  ;;  %v1127_v38 = vadd.f32 -0.28449672, %v1114_v28  ;;  %v1399_v12 = vmax.f32 %v1373_v57, %v1386_v45  ;;  %v1352_v57 = vld [vmem:[#allocation2 + $0x1] sm:$0xff] }
 0x150   : > { %v1230_v61 = vmul.f32 %v9239_v32, %v1165_v46  ;;  %v1385_v46 = vld [vmem:[#allocation2 + $0x3a] sm:$0xff] }
 0x151   : > { %v1242_v14 = vsub.f32 1.0, %v1229_v11  ;;  %v1140_v15 = vmul.f32 %v9235_v54, %v1127_v38  ;;  %v1343_v32 = vld [vmem:[#allocation2 + $0x20] sm:$0xff]  ;;  %v1370_v38 = vmax.f32 %v1344_v62, %v1357_v59 }
 0x152   : > { %v1243_v5 = vsub.f32 1.0, %v1230_v61  ;;  %v1356_v11 = vld [vmem:[#allocation2 + $0x21] sm:$0xff] }
 0x153   : > { %v1268_v27 = vsub.f32 0.0, %v1242_v14  ;;  %v1153_v17 = vadd.f32 0.2548296, %v1140_v15 }
 0x154   : > { %v1269_v18 = vsub.f32 0.0, %v1243_v5 }
 0x155   : > { %v1281_v25 = vsel %vm1255_vm15, %v1242_v14, %v1268_v27  ;;  %v1166_v10 = vmul.f32 %v9235_v54, %v1153_v17  ;;  %v1348_v26 = vld [vmem:[#allocation2 + $0x48] sm:$0xff]  ;;  %v1346_v54 = vld [vmem:[#allocation2 + $0x38] sm:$0xff]  ;;  %vm4340_vm15 = vcmask 441344  }
 0x156   : > { %v1294_v16 = vadd.f32 1.0, %v1281_v25  ;;  %v1282_v0 = vsel %vm1256_vm2, %v1243_v5, %v1269_v18  ;;  %v1361_v39 = vld [vmem:[#allocation2 + $0x49] sm:$0xff]  ;;  %v1372_v44 = vmax.f32 %v1346_v54, %v1359_v7  ;;  %v1384_v25 = vld [vmem:[#allocation2 + $0x32] sm:$0xff] }
 0x157   : > { %v1295_v4 = vadd.f32 1.0, %v1282_v0  ;;  %v1231_v31 = vmul.f32 %v9241_v3, %v1166_v10  ;;  %v1374_v29 = vmax.f32 %v1348_v26, %v1361_v39  ;;  %v1387_v42 = vld [vmem:[#allocation2 + $0x4a] sm:$0xff]  ;;  %v1342_v17 = vld [vmem:[#allocation2 + $0x18] sm:$0xff]  ;;  %v1397_v10 = vmax.f32 %v1371_v8, %v1384_v25 }
 0x158   : > { %v1307_v30 = vmul.f32 %v1294_v16, %v969_v52  ;;  %v1413_v14 = vld [vmem:[#allocation2 + $0x4b] sm:$0xff]  ;;  %v1398_v18 = vmax.f32 %v1372_v44, %v1385_v46  ;;  %v1355_v52 = vld [vmem:[#allocation2 + $0x19] sm:$0xff]  ;;  %v1369_v3 = vmax.f32 %v1343_v32, %v1356_v11  ;;  %v1408_v46 = vld [vmem:[#allocation2 + $0x23] sm:$0xff] }
 0x159   : > { %v1308_v33 = vmul.f32 %v1295_v4, %v970_v24  ;;  %v1244_v23 = vsub.f32 1.0, %v1231_v31  ;;  %v1400_v19 = vmax.f32 %v1374_v29, %v1387_v42  ;;  %v1341_v16 = vld [vmem:[#allocation2 + $0x10] sm:$0xff]  ;;  %v1412_v4 = vld [vmem:[#allocation2 + $0x43] sm:$0xff] }
 0x15a   : > { %1336 = vst.msk [vmem:[#allocation2 + $0x54] sm:$0xff] %vm1310_vm3, %v1307_v30  ;;  %v1425_v31 = vmax.f32 %v1399_v12, %v1412_v4  ;;  %v1438_v29 = vld [vmem:[#allocation2 + $0x44] sm:$0xff]  ;;  %v1437_v42 = vld [vmem:[#allocation2 + $0x3c] sm:$0xff]  ;;  %v1436_v12 = vld [vmem:[#allocation2 + $0x34] sm:$0xff] }
 0x15b   : > { %1337 = vst.msk [vmem:[#allocation2 + $0x5c] sm:$0xff] %vm1310_vm3, %v1308_v33  ;;  %v1270_v34 = vsub.f32 0.0, %v1244_v23  ;;  %v1426_v15 = vmax.f32 %v1400_v19, %v1413_v14  ;;  %v1381_v19 = vld [vmem:[#allocation2 + $0x1a] sm:$0xff]  ;;  %v1380_v32 = vld [vmem:[#allocation2 + $0x12] sm:$0xff] }
 0x15c   : > { %v1435_v25 = vld [vmem:[#allocation2 + $0x2c] sm:$0xff]  ;;  %v1463_v4 = vld [vmem:[#allocation2 + $0x3d] sm:$0xff] }
 0x15d   : > { %v1283_v37 = vsel %vm1257_vm5, %v1244_v23, %v1270_v34  ;;  %v1411_v23 = vld [vmem:[#allocation2 + $0x3b] sm:$0xff]  ;;  %v1383_v34 = vld [vmem:[#allocation2 + $0x2a] sm:$0xff] }
 0x15e   : > { %v1296_v35 = vadd.f32 1.0, %v1283_v37  ;;  %v1354_v37 = vld [vmem:[#allocation2 + $0x11] sm:$0xff]  ;;  %v1424_v39 = vmax.f32 %v1398_v18, %v1411_v23  ;;  %v1434_v23 = vld [vmem:[#allocation2 + $0x24] sm:$0xff] }
 0x15f   : > { %v1367_v7 = vmax.f32 %v1341_v16, %v1354_v37 }
 0x160   : > { %v1309_v20 = vmul.f32 %v1296_v35, %v971_v6  ;;  %v9873_v6 = vld [vmem:[#allocation2 + $0x8] sm:$0xff] }
 0x161   : > { %v1349_v40 = vld [vmem:[#allocation2 + $0x50] sm:$0xff] }
 0x162   : > { %v1362_v55 = vld [vmem:[#allocation2 + $0x51] sm:$0xff]  ;;  %v1363_v41 = vld [vmem:[#allocation2 + $0x59] sm:$0xff]  ;;  %1338 = vst.msk [vmem:[#allocation2 + $0x64] sm:$0xf] %vm1324_vm4, %v1309_v20  ;;  %v1396_v20 = vmax.f32 %v1370_v38, %v1383_v34  ;;  %vm1563_vm4 = vcmask 1044480  }
 0x163   : > { %v1350_v60 = vld [vmem:[#allocation2 + $0x58] sm:$0xff]  ;;  %v1375_v47 = vmax.f32 %v1349_v40, %v1362_v55  ;;  %v1439_v55 = vld [vmem:[#allocation2 + $0x4c] sm:$0xff] }
 0x164   : > { %v1376_v43 = vmax.f32 %v1350_v60, %v1363_v41  ;;  %v1389_v36 = vld [vmem:[#allocation2 + $0x5a] sm:$0xff]  ;;  %v1388_v2 = vld [vmem:[#allocation2 + $0x52] sm:$0xff]  ;;  %v1368_v60 = vmax.f32 %v1342_v17, %v1355_v52  ;;  %v1452_v26 = vmax.f32 %v1426_v15, %v1439_v55  ;;  %v1379_v52 = vld [vmem:[#allocation2 + $0xa] sm:$0xff] }
 0x165   : > { %v1401_v56 = vmax.f32 %v1375_v47, %v1388_v2  ;;  %v1415_v58 = vld [vmem:[#allocation2 + $0x5b] sm:$0xff]  ;;  %v1414_v63 = vld [vmem:[#allocation2 + $0x53] sm:$0xff]  ;;  %v1490_v55 = vld [vmem:[#allocation2 + $0x46] sm:$0xff] }
 0x166   : > { %v1402_v53 = vmax.f32 %v1376_v43, %v1389_v36  ;;  %v1441_v61 = vld [vmem:[#allocation2 + $0x5c] sm:$0xff]  ;;  %v1440_v24 = vld [vmem:[#allocation2 + $0x54] sm:$0xff] }
 0x167   : > { %v1427_v9 = vmax.f32 %v1401_v56, %v1414_v63  ;;  %v1410_v47 = vld [vmem:[#allocation2 + $0x33] sm:$0xff]  ;;  %v1382_v36 = vld [vmem:[#allocation2 + $0x22] sm:$0xff] }
 0x168   : > { %v1428_v22 = vmax.f32 %v1402_v53, %v1415_v58  ;;  %v1466_v53 = vld [vmem:[#allocation2 + $0x55] sm:$0xff]  ;;  %v1423_v2 = vmax.f32 %v1397_v10, %v1410_v47  ;;  %v1395_v54 = vmax.f32 %v1369_v3, %v1382_v36  ;;  %v1339_v56 = vld [vmem:[#allocation2] sm:$0xff]  ;;  %v1451_v58 = vmax.f32 %v1425_v31, %v1438_v29  ;;  %v1465_v62 = vld [vmem:[#allocation2 + $0x4d] sm:$0xff] }
 0x169   : > { %v1351_v48 = vld [vmem:[#allocation2 + $0x60] sm:$0x1f]  ;;  %v1453_v33 = vmax.f32 %v1427_v9, %v1440_v24  ;;  %v1468_v21 = vld [vmem:[#allocation2 + $0x65] sm:$0x1f]  ;;  %v1450_v9 = vmax.f32 %v1424_v39, %v1437_v42  ;;  %v1365_v16 = vmax.f32 %v1339_v56, %v1352_v57  ;;  %v1491_v24 = vld [vmem:[#allocation2 + $0x4e] sm:$0xff] }
 0x16a   : > { %v1364_v50 = vld [vmem:[#allocation2 + $0x61] sm:$0x1f]  ;;  %v1454_v27 = vmax.f32 %v1428_v22, %v1441_v61  ;;  %v1409_v22 = vld [vmem:[#allocation2 + $0x2b] sm:$0xff]  ;;  %v1494_v45 = vld [vmem:[#allocation2 + $0x66] sm:$0x1f]  ;;  %v1449_v14 = vmax.f32 %v1423_v2, %v1436_v12  ;;  %v1421_v38 = vmax.f32 %v1395_v54, %v1408_v46 }
 0x16b   : > { %v1377_v49 = vmax.f32 %v1351_v48, %v1364_v50  ;;  %v1390_v28 = vld [vmem:[#allocation2 + $0x62] sm:$0x1f]  ;;  %v1479_v13 = vmax.f32 %v1453_v33, %v1466_v53  ;;  %v1422_v59 = vmax.f32 %v1396_v20, %v1409_v22  ;;  %v1394_v48 = vmax.f32 %v1368_v60, %v1381_v19  ;;  %v1520_v11 = vld [vmem:[#allocation2 + $0x67] sm:$0x1f]  ;;  %v1406_v34 = vld [vmem:[#allocation2 + $0x13] sm:$0xff] }
 0x16c   : > { %v1416_v0 = vld [vmem:[#allocation2 + $0x63] sm:$0x1f]  ;;  %v1366_v50 = vmax.f32 %v9873_v6, %v1353_v51  ;;  %v1407_v17 = vld [vmem:[#allocation2 + $0x1b] sm:$0xff]  ;;  %v1476_v31 = vmax.f32 %v1450_v9, %v1463_v4  ;;  %v1447_v60 = vmax.f32 %v1421_v38, %v1434_v23  ;;  %v1405_v36 = vld [vmem:[#allocation2 + $0xb] sm:$0xff] }
 0x16d   : > { %v1403_v5 = vmax.f32 %v1377_v49, %v1390_v28  ;;  %v1442_v35 = vld [vmem:[#allocation2 + $0x64] sm:$0x1f]  ;;  %v1478_v49 = vmax.f32 %v1452_v26, %v1465_v62  ;;  %v1492_v28 = vld [vmem:[#allocation2 + $0x56] sm:$0xff]  ;;  %v1448_v10 = vmax.f32 %v1422_v59, %v1435_v25  ;;  %v1420_v3 = vmax.f32 %v1394_v48, %v1407_v17  ;;  %v1461_v29 = vld [vmem:[#allocation2 + $0x2d] sm:$0xff] }
 0x16e   : > { %v1467_v40 = vld [vmem:[#allocation2 + $0x5d] sm:$0xff]  ;;  %v1464_v61 = vld [vmem:[#allocation2 + $0x45] sm:$0xff]  ;;  %v1505_v15 = vmax.f32 %v1479_v13, %v1492_v28  ;;  %v1392_v37 = vmax.f32 %v1366_v50, %v1379_v52  ;;  %v1462_v20 = vld [vmem:[#allocation2 + $0x35] sm:$0xff] }
 0x16f   : > { %v1429_v30 = vmax.f32 %v1403_v5, %v1416_v0  ;;  %v1480_v43 = vmax.f32 %v1454_v27, %v1467_v40  ;;  %v1493_v44 = vld [vmem:[#allocation2 + $0x5e] sm:$0xff]  ;;  %v1393_v5 = vmax.f32 %v1367_v7, %v1380_v32  ;;  %v1477_v18 = vmax.f32 %v1451_v58, %v1464_v61  ;;  %v1516_v58 = vld [vmem:[#allocation2 + $0x47] sm:$0xff]  ;;  %v1488_v42 = vld [vmem:[#allocation2 + $0x36] sm:$0xff] }
 0x170   : > { %v1519_v0 = vld [vmem:[#allocation2 + $0x5f] sm:$0xff]  ;;  %v1504_v33 = vmax.f32 %v1478_v49, %v1491_v24  ;;  %v1518_v40 = vld [vmem:[#allocation2 + $0x57] sm:$0xff]  ;;  %v1475_v39 = vmax.f32 %v1449_v14, %v1462_v20  ;;  %v1474_v56 = vmax.f32 %v1448_v10, %v1461_v29  ;;  %v1431_v59 = vld [vmem:[#allocation2 + $0xc] sm:$0xff] }
 0x171   : > { %v1455_v41 = vmax.f32 %v1429_v30, %v1442_v35  ;;  %v1506_v8 = vmax.f32 %v1480_v43, %v1493_v44  ;;  %v1378_v6 = vld [vmem:[#allocation2 + $0x2] sm:$0xff]  ;;  %v9877_v35 = vld [vmem:[#allocation4] sm:$0xff]  ;;  %v1531_v43 = vmax.f32 %v1505_v15, %v1518_v40  ;;  %v1503_v26 = vmax.f32 %v1477_v18, %v1490_v55 }
 0x172   : > { %v1433_v47 = vld [vmem:[#allocation2 + $0x1c] sm:$0xff]  ;;  %v1391_v51 = vmax.f32 %v1365_v16, %v1378_v6  ;;  %v1460_v57 = vld [vmem:[#allocation2 + $0x25] sm:$0xff]  ;;  %v1432_v19 = vld [vmem:[#allocation2 + $0x14] sm:$0xff]  ;;  %v1501_v44 = vmax.f32 %v1475_v39, %v1488_v42  ;;  %1675 = vst.msk [vmem:[#allocation3 + $0x38] sm:$0x7] %vm1674_vm7, %v9877_v35 }
 0x173   : > { %v1481_v1 = vmax.f32 %v1455_v41, %v1468_v21  ;;  %v1532_v30 = vmax.f32 %v1506_v8, %v1519_v0  ;;  %v1419_v41 = vmax.f32 %v1393_v5, %v1406_v34  ;;  %v1517_v21 = vld [vmem:[#allocation2 + $0x4f] sm:$0xff]  ;;  %v1489_v53 = vld [vmem:[#allocation2 + $0x3e] sm:$0xff]  ;;  %v1446_v2 = vmax.f32 %v1420_v3, %v1433_v47  ;;  %v1486_v28 = vld [vmem:[#allocation2 + $0x26] sm:$0xff] }
 0x174   : > { %v1530_v54 = vmax.f32 %v1504_v33, %v1517_v21  ;;  %v1502_v7 = vmax.f32 %v1476_v31, %v1489_v53  ;;  %v1404_v13 = vld [vmem:[#allocation2 + $0x3] sm:$0xff]  ;;  %v1473_v22 = vmax.f32 %v1447_v60, %v1460_v57  ;;  %v1458_v61 = vld [vmem:[#allocation2 + $0x15] sm:$0xff]  ;;  %v1457_v25 = vld [vmem:[#allocation2 + $0xd] sm:$0xff] }
 0x175   : > { %v1507_v63 = vmax.f32 %v1481_v1, %v1494_v45  ;;  %v1418_v1 = vmax.f32 %v1392_v37, %v1405_v36  ;;  %v1529_v45 = vmax.f32 %v1503_v26, %v1516_v58  ;;  %v1445_v62 = vmax.f32 %v1419_v41, %v1432_v19  ;;  %v1515_v50 = vld [vmem:[#allocation2 + $0x3f] sm:$0xff]  ;;  %v1513_v15 = vld [vmem:[#allocation2 + $0x2f] sm:$0xff]  ;;  %v1512_v0 = vld [vmem:[#allocation2 + $0x27] sm:$0xff] }
 0x176   : > { %v1417_v48 = vmax.f32 %v1391_v51, %v1404_v13  ;;  %v1459_v8 = vld [vmem:[#allocation2 + $0x1d] sm:$0xff]  ;;  %v1528_v49 = vmax.f32 %v1502_v7, %v1515_v50  ;;  %v1499_v38 = vmax.f32 %v1473_v22, %v1486_v28  ;;  %v1456_v4 = vld [vmem:[#allocation2 + $0x5] sm:$0xff]  ;;  %v1483_v31 = vld [vmem:[#allocation2 + $0xe] sm:$0xff] }
 0x177   : > { %v1533_v27 = vmax.f32 %v1507_v63, %v1520_v11  ;;  %v1487_v63 = vld [vmem:[#allocation2 + $0x2e] sm:$0xff]  ;;  %v1472_v12 = vmax.f32 %v1446_v2, %v1459_v8  ;;  %v1444_v46 = vmax.f32 %v1418_v1, %v1431_v59  ;;  %v1430_v32 = vld [vmem:[#allocation2 + $0x4] sm:$0xff]  ;;  %v1514_v11 = vld [vmem:[#allocation2 + $0x37] sm:$0xff]  ;;  %v1471_v5 = vmax.f32 %v1445_v62, %v1458_v61 }
 0x178   : > { %v1500_v9 = vmax.f32 %v1474_v56, %v1487_v63  ;;  %v1527_v14 = vmax.f32 %v1501_v44, %v1514_v11  ;;  %v1485_v18 = vld [vmem:[#allocation2 + $0x1e] sm:$0xff]  ;;  %v1484_v24 = vld [vmem:[#allocation2 + $0x16] sm:$0xff]  ;;  %v1525_v10 = vmax.f32 %v1499_v38, %v1512_v0  ;;  %v1482_v6 = vld [vmem:[#allocation2 + $0x6] sm:$0xff] }
 0x179   : > { %7895 = vmatpush3.msk.msra.mxu1 %vm1563_vm4, %v1533_v27  ;;  %v1443_v27 = vmax.f32 %v1417_v48, %v1430_v32  ;;  %v1498_v52 = vmax.f32 %v1472_v12, %v1485_v18  ;;  %v1470_v16 = vmax.f32 %v1444_v46, %v1457_v25  ;;  %v1497_v3 = vmax.f32 %v1471_v5, %v1484_v24  ;;  %v1511_v33 = vld [vmem:[#allocation2 + $0x1f] sm:$0xff]  ;;  %v1510_v37 = vld [vmem:[#allocation2 + $0x17] sm:$0xff]  ;;  %v1509_v20 = vld [vmem:[#allocation2 + $0xf] sm:$0xff] }
 0x17a   : > { %7896 = vmatprep.subr.mxu1 %v9877_v35  ;;  %v1526_v17 = vmax.f32 %v1500_v9, %v1513_v15  ;;  %v1508_v41 = vld [vmem:[#allocation2 + $0x7] sm:$0xff]  ;;  %v6817_v39 = vld [vmem:[%s12501_s27 + $0x78] sm:$0xff]  ;;  %v6816_v47 = vld [vmem:[%s12501_s27 + $0x70] sm:$0xff] }
 0x17b   : > { %7897 = vmatpush3.msra.mxu1 %v1532_v30  ;;  %v1469_v30 = vmax.f32 %v1443_v27, %v1456_v4  ;;  %v1524_v23 = vmax.f32 %v1498_v52, %v1511_v33  ;;  %v1496_v34 = vmax.f32 %v1470_v16, %v1483_v31  ;;  %v1523_v40 = vmax.f32 %v1497_v3, %v1510_v37  ;;  %v1534_v26 = vld [vmem:[%s12474_s14] sm:$0xff]  ;;  %v1535_v36 = vld [vmem:[%s12474_s14 + $0x8] sm:$0xff]  ;;  %v1536_v21 = vld [vmem:[%s12474_s14 + $0x10] sm:$0xff] }
 0x17c   : > { %7898 = vmatprep.subr.mxu1 %v9877_v35  ;;  %v6815_v51 = vld [vmem:[%s12501_s27 + $0x68] sm:$0xff]  ;;  %v1537_v53 = vld [vmem:[%s12474_s14 + $0x18] sm:$0xff]  ;;  %v1538_v29 = vld [vmem:[%s12474_s14 + $0x20] sm:$0xff] }
 0x17d   : > { %7899 = vmatpush3.msra.mxu1 %v1531_v43  ;;  %v1495_v55 = vmax.f32 %v1469_v30, %v1482_v6  ;;  %v1522_v60 = vmax.f32 %v1496_v34, %v1509_v20  ;;  %v1539_v2 = vld [vmem:[%s12474_s14 + $0x28] sm:$0xff]  ;;  %v6814_v7 = vld [vmem:[%s12501_s27 + $0x60] sm:$0xff]  ;;  %v6813_v56 = vld [vmem:[%s12501_s27 + $0x58] sm:$0xff] }
 0x17e   : > { %7900 = vmatprep.subr.mxu1 %v9877_v35  ;;  %v6812_v57 = vld [vmem:[%s12501_s27 + $0x50] sm:$0xff]  ;;  %v6811_v13 = vld [vmem:[%s12501_s27 + $0x48] sm:$0xff]  ;;  %v6810_v42 = vld [vmem:[%s12501_s27 + $0x40] sm:$0xff] }
 0x17f   : > { %7901 = vmatpush3.msra.mxu1 %v1530_v54  ;;  %v1521_v43 = vmax.f32 %v1495_v55, %v1508_v41  ;;  %v1540_v54 = vld [vmem:[%s12474_s14 + $0x30] sm:$0x7]  ;;  %v1691_v58 = vld [vmem:[%s12501_s27 + $0x8] sm:$0xff]  ;;  %v1690_v22 = vld [vmem:[%s12501_s27] sm:$0xff] }
 0x180   : > { %7902 = vmatprep.subr.mxu1 %v9877_v35  ;;  %v1692_v1 = vld [vmem:[%s12501_s27 + $0x10] sm:$0xff]  ;;  %v6839_v59 = vld [vmem:[%s12501_s27 + $0xb8] sm:$0xff]  ;;  %v6837_v61 = vld [vmem:[%s12501_s27 + $0xa8] sm:$0xff] }
 0x181   : > { %7903 = vmatpush3.msra.mxu1 %v1529_v45  ;;  %7989 = vmatpush3.msra.mxu0 %v1692_v1  ;;  %v6854_v8 = vld [vmem:[%s12501_s27 + $0xf8] sm:$0xff]  ;;  %v6838_v9 = vld [vmem:[%s12501_s27 + $0xb0] sm:$0xff]  ;;  %v6852_v27 = vld [vmem:[%s12501_s27 + $0xe8] sm:$0xff] }
 0x182   : > { %7904 = vmatprep.subr.mxu1 %v9877_v35  ;;  %7990 = vmatprep.subr.mxu0 %v9877_v35  ;;  %v6853_v11 = vld [vmem:[%s12501_s27 + $0xf0] sm:$0xff]  ;;  %v6836_v18 = vld [vmem:[%s12501_s27 + $0xa0] sm:$0xff]  ;;  %v6835_v24 = vld [vmem:[%s12501_s27 + $0x98] sm:$0xff] }
 0x183   : > { %7905 = vmatpush3.msra.mxu1 %v1528_v49  ;;  %7991 = vmatpush3.msra.mxu0 %v1691_v58  ;;  %v6851_v16 = vld [vmem:[%s12501_s27 + $0xe0] sm:$0xff]  ;;  %v6850_v30 = vld [vmem:[%s12501_s27 + $0xd8] sm:$0xff]  ;;  %v6834_v31 = vld [vmem:[%s12501_s27 + $0x90] sm:$0xff] }
 0x184   : > { %7906 = vmatprep.subr.mxu1 %v9877_v35  ;;  %7992 = vmatprep.subr.mxu0 %v9877_v35  ;;  %v6849_v37 = vld [vmem:[%s12501_s27 + $0xd0] sm:$0xff]  ;;  %v6833_v6 = vld [vmem:[%s12501_s27 + $0x88] sm:$0xff]  ;;  %v6847_v41 = vld [vmem:[%s12501_s27 + $0xc0] sm:$0xff] }
 0x185   : > { %7907 = vmatpush3.msra.mxu1 %v1527_v14  ;;  %7993 = vmatpush3.msra.mxu0 %v1690_v22  ;;  %v6866_v1 = vld [vmem:[%s12501_s27 + $0x120] sm:$0xff]  ;;  %v6865_v22 = vld [vmem:[%s12501_s27 + $0x118] sm:$0xff] }
 0x186   : > { %7908 = vmatprep.subr.mxu1 %v9877_v35  ;;  %8052 = vmatprep.subr.mxu0 %v9877_v35 }
 0x187   : > { %7909 = vmatpush3.msra.mxu1 %v1526_v17 }
 0x188   : > { %7910 = vmatprep.subr.mxu1 %v9877_v35 }
 0x189   : > { %7911 = vmatpush3.msra.mxu1 %v1525_v10 }
 0x18a   : > { %7912 = vmatprep.subr.mxu1 %v9877_v35 }
 0x18b   : > { %7913 = vmatpush3.msra.mxu1 %v1524_v23 }
 0x18c   : > { %7914 = vmatprep.subr.mxu1 %v9877_v35 }
 0x18d   : > { %7915 = vmatpush3.msra.mxu1 %v1523_v40  ;;  %v6848_v40 = vld [vmem:[%s12501_s27 + $0xc8] sm:$0xff] }
 0x18e   : > { %7916 = vmatprep.subr.mxu1 %v9877_v35 }
 0x18f   : > { %7917 = vmatpush3.msra.mxu1 %v1522_v60  ;;  %v6832_v60 = vld [vmem:[%s12501_s27 + $0x80] sm:$0xff] }
 0x190   : > { %7918 = vmatprep.subr.mxu1 %v9877_v35 }
 0x191   : > { %7919 = vmatpush3.msra.mxu1 %v1521_v43 }
 0x192   : > { %7921 = vmatmul.mubr.msk.f32.vlgmr.msra.gmra.mxu1 %vm1541_vm6, %v1534_v26  ;;  %7941 = vmatprep.subr.mxu1 %v9877_v35 }
 0x193   : > { %7923 = vmatprep.mubr.msk.f32.mxu1 %vm9333_vm1, %v9877_v35  ;;  %7942 = vmatpush3.msra.mxu1 %v6817_v39  ;;  %v6869_v39 = vld [vmem:[%s12501_s27 + $0x138] sm:$0xff] }
 0x194   : > { %7943 = vmatprep.subr.mxu1 %v9877_v35 }
 0x195   : > { %7944 = vmatpush3.msra.mxu1 %v6816_v47  ;;  %v6884_v47 = vld [vmem:[%s12501_s27 + $0x178] sm:$0xff] }
 0x196   : > { %7924 = vmatmul.mubr.msk.f32.gmra.mxu1 %vm1541_vm6, %v1535_v36  ;;  %7945 = vmatprep.subr.mxu1 %v9877_v35 }
 0x197   : > { %7926 = vmatprep.mubr.msk.f32.mxu1 %vm9333_vm1, %v9877_v35  ;;  %7946 = vmatpush3.msra.mxu1 %v6815_v51 }
 0x198   : > { %7947 = vmatprep.subr.mxu1 %v9877_v35 }
 0x199   : > { %7948 = vmatpush3.msra.mxu1 %v6814_v7  ;;  %v6882_v7 = vld [vmem:[%s12501_s27 + $0x168] sm:$0xff] }
 0x19a   : > { %7927 = vmatmul.mubr.msk.f32.gmra.mxu1 %vm1541_vm6, %v1536_v21  ;;  %7949 = vmatprep.subr.mxu1 %v9877_v35  ;;  %v6868_v21 = vld [vmem:[%s12501_s27 + $0x130] sm:$0xff] }
 0x19b   : > { %7929 = vmatprep.mubr.msk.f32.mxu1 %vm9333_vm1, %v9877_v35  ;;  %7950 = vmatpush3.msra.mxu1 %v6813_v56 }
 0x19c   : > { %7951 = vmatprep.subr.mxu1 %v9877_v35 }
 0x19d   : > { %7952 = vmatpush3.msra.mxu1 %v6812_v57 }
 0x19e   : > { %7930 = vmatmul.mubr.msk.f32.gmra.mxu1 %vm1541_vm6, %v1537_v53  ;;  %7953 = vmatprep.subr.mxu1 %v9877_v35  ;;  %v6883_v53 = vld [vmem:[%s12501_s27 + $0x170] sm:$0xff] }
 0x19f   : > { %7932 = vmatprep.mubr.msk.f32.mxu1 %vm9333_vm1, %v9877_v35  ;;  %7954 = vmatpush3.msra.mxu1 %v6811_v13  ;;  %v6881_v13 = vld [vmem:[%s12501_s27 + $0x160] sm:$0xff] }
 0x1a0   : > { %7955 = vmatprep.subr.mxu1 %v9877_v35 }
 0x1a1   : > { %7956 = vmatpush3.msra.mxu1 %v6810_v42 }
 0x1a2   : > { %7933 = vmatmul.mubr.msk.f32.gmra.mxu1 %vm1541_vm6, %v1538_v29  ;;  %8015 = vmatprep.subr.mxu1 %v9877_v35 }
 0x1a3   : > { %7935 = vmatprep.mubr.msk.f32.mxu1 %vm9333_vm1, %v9877_v35 }
 0x1a6   : > { %7936 = vmatmul.mubr.msk.f32.gmra.mxu1 %vm1541_vm6, %v1539_v2 }
 0x1a7   : > { %7938 = vmatprep.mubr.msk.f32.mxu1 %vm9333_vm1, %v9877_v35 }
 0x1aa   : > { %7939 = vmatmul.mubr.msk.f32.gmra.mxu1 %vm1541_vm6, %v1540_v54  ;;  %v6867_v54 = vld [vmem:[%s12501_s27 + $0x128] sm:$0xff] }
 0x1ab   : > { %7957 = vmatprep.mubr.msk.f32.mxu1 %vm9333_vm1, %v9877_v35 }
 0x252   : > { %v1633_v19 = vpop.f32.mrf.mxu1 }
 0x253   : > { %1676 = vst.msk [vmem:[#allocation3 + $0x4] sm:$0xff] %vm1310_vm3, %v1633_v19  ;;  %v6880_v19 = vld [vmem:[%s12501_s27 + $0x158] sm:$0xff] }
 0x254   : > { %v7922_v45 = vpop.f32.mrf.mxu1 }
 0x256   : > { %v1638_v44 = vpop.f32.mrf.mxu1 }
 0x257   : > { %1677 = vst.msk [vmem:[#allocation3 + $0xc] sm:$0xff] %vm1310_vm3, %v1638_v44 }
 0x258   : > { %v7925_v62 = vpop.f32.mrf.mxu1 }
 0x259   : > { %v6864_v62 = vld [vmem:[%s12501_s27 + $0x110] sm:$0xff] }
 0x25a   : > { %v1643_v48 = vpop.f32.mrf.mxu1  ;;  %v1698_v50 = vld [vmem:[#allocation3 + $0x1] sm:$0xff] }
 0x25b   : > { %v1683_v63 = vld [vmem:[#allocation3] sm:$0xff]  ;;  %1678 = vst.msk [vmem:[#allocation3 + $0x14] sm:$0xff] %vm1310_vm3, %v1643_v48  ;;  %7958 = vmatmul.mubr.msk.f32.vlgmr.msra.gmra.mxu1 %vm1310_vm3, %v1698_v50  ;;  %v6863_v48 = vld [vmem:[%s12501_s27 + $0x108] sm:$0xff] }
 0x25c   : > { %7995 = vmatmul.mubr.msk.f32.vlgmr.msra.gmra.mxu0 %vm1310_vm3, %v1683_v63  ;;  %v7928_v49 = vpop.f32.mrf.mxu1  ;;  %7960 = vmatprep.mubr.msk.f32.mxu1 %vm9333_vm1, %v9877_v35  ;;  %v1956_v43 = vld [vmem:[#allocation3 + $0x2] sm:$0xff] }
 0x25d   : > { %7997 = vmatprep.mubr.msk.f32.mxu0 %vm9333_vm1, %v9877_v35  ;;  %8016 = vmatpush3.msra.mxu1 %v6839_v59  ;;  %v2100_v26 = vld [vmem:[#allocation3 + $0x3] sm:$0xff]  ;;  %v6862_v49 = vld [vmem:[%s12501_s27 + $0x100] sm:$0xff] }
 0x25e   : > { %8053 = vmatpush3.msra.mxu0 %v6854_v8  ;;  %v1648_v12 = vpop.f32.mrf.mxu1  ;;  %v1699_v46 = vld [vmem:[#allocation3 + $0x9] sm:$0xff]  ;;  %8017 = vmatprep.subr.mxu1 %v9877_v35  ;;  %v6879_v59 = vld [vmem:[%s12501_s27 + $0x150] sm:$0xff]  ;;  %v6878_v8 = vld [vmem:[%s12501_s27 + $0x148] sm:$0xff] }
 0x25f   : > { %v1684_v32 = vld [vmem:[#allocation3 + $0x8] sm:$0xff]  ;;  %8054 = vmatprep.subr.mxu0 %v9877_v35  ;;  %1679 = vst.msk [vmem:[#allocation3 + $0x1c] sm:$0xff] %vm1310_vm3, %v1648_v12  ;;  %7961 = vmatmul.mubr.msk.f32.gmra.mxu1 %vm1310_vm3, %v1699_v46 }
 0x260   : > { %7998 = vmatmul.mubr.msk.f32.gmra.mxu0 %vm1310_vm3, %v1684_v32  ;;  %v7931_v28 = vpop.f32.mrf.mxu1  ;;  %7963 = vmatprep.mubr.msk.f32.mxu1 %vm9333_vm1, %v9877_v35  ;;  %v1957_v36 = vld [vmem:[#allocation3 + $0xa] sm:$0xff] }
 0x261   : > { %8000 = vmatprep.mubr.msk.f32.mxu0 %vm9333_vm1, %v9877_v35  ;;  %8018 = vmatpush3.msra.mxu1 %v6838_v9  ;;  %v2101_v51 = vld [vmem:[#allocation3 + $0xb] sm:$0xff] }
 0x262   : > { %8055 = vmatpush3.msra.mxu0 %v6853_v11  ;;  %v1653_v14 = vpop.f32.mrf.mxu1  ;;  %v1700_v38 = vld [vmem:[#allocation3 + $0x11] sm:$0xff]  ;;  %8019 = vmatprep.subr.mxu1 %v9877_v35  ;;  %v2244_v12 = vld [vmem:[#allocation3 + $0x4] sm:$0xff] }
 0x263   : > { %v1685_v5 = vld [vmem:[#allocation3 + $0x10] sm:$0xff]  ;;  %8056 = vmatprep.subr.mxu0 %v9877_v35  ;;  %1680 = vst.msk [vmem:[#allocation3 + $0x24] sm:$0xff] %vm1310_vm3, %v1653_v14  ;;  %7964 = vmatmul.mubr.msk.f32.gmra.mxu1 %vm1310_vm3, %v1700_v38  ;;  %v2388_v46 = vld [vmem:[#allocation3 + $0x5] sm:$0xff] }
 0x264   : > { %8001 = vmatmul.mubr.msk.f32.gmra.mxu0 %vm1310_vm3, %v1685_v5  ;;  %v7934_v15 = vpop.f32.mrf.mxu1  ;;  %7966 = vmatprep.mubr.msk.f32.mxu1 %vm9333_vm1, %v9877_v35  ;;  %v1958_v29 = vld [vmem:[#allocation3 + $0x12] sm:$0xff]  ;;  %v6899_v32 = vld [vmem:[%s12501_s27 + $0x1b8] sm:$0xff]  ;;  %v6898_v14 = vld [vmem:[%s12501_s27 + $0x1b0] sm:$0xff] }
 0x265   : > { %8003 = vmatprep.mubr.msk.f32.mxu0 %vm9333_vm1, %v9877_v35  ;;  %8020 = vmatpush3.msra.mxu1 %v6837_v61  ;;  %v2102_v2 = vld [vmem:[#allocation3 + $0x13] sm:$0xff]  ;;  %v6914_v11 = vld [vmem:[%s12501_s27 + $0x1f8] sm:$0xff]  ;;  %v6913_v38 = vld [vmem:[%s12501_s27 + $0x1f0] sm:$0xff] }
 0x266   : > { %8057 = vmatpush3.msra.mxu0 %v6852_v27  ;;  %v1658_v25 = vpop.f32.mrf.mxu1  ;;  %v1701_v17 = vld [vmem:[#allocation3 + $0x19] sm:$0xff]  ;;  %8021 = vmatprep.subr.mxu1 %v9877_v35  ;;  %v6877_v9 = vld [vmem:[%s12501_s27 + $0x140] sm:$0xff] }
 0x267   : > { %v1686_v52 = vld [vmem:[#allocation3 + $0x18] sm:$0xff]  ;;  %8058 = vmatprep.subr.mxu0 %v9877_v35  ;;  %1681 = vst.msk [vmem:[#allocation3 + $0x2c] sm:$0xff] %vm1310_vm3, %v1658_v25  ;;  %7967 = vmatmul.mubr.msk.f32.gmra.mxu1 %vm1310_vm3, %v1701_v17  ;;  %v2245_v28 = vld [vmem:[#allocation3 + $0xc] sm:$0xff] }
 0x268   : > { %8004 = vmatmul.mubr.msk.f32.gmra.mxu0 %vm1310_vm3, %v1686_v52  ;;  %v7937_v0 = vpop.f32.mrf.mxu1  ;;  %7969 = vmatprep.mubr.msk.f32.mxu1 %vm9333_vm1, %v9877_v35  ;;  %v1959_v56 = vld [vmem:[#allocation3 + $0x1a] sm:$0xff]  ;;  %v2389_v61 = vld [vmem:[#allocation3 + $0xd] sm:$0xff] }
 0x269   : > { %8006 = vmatprep.mubr.msk.f32.mxu0 %vm9333_vm1, %v9877_v35  ;;  %8022 = vmatpush3.msra.mxu1 %v6836_v18  ;;  %v2103_v57 = vld [vmem:[#allocation3 + $0x1b] sm:$0xff]  ;;  %v6896_v52 = vld [vmem:[%s12501_s27 + $0x1a0] sm:$0xff] }
 0x26a   : > { %8059 = vmatpush3.msra.mxu0 %v6851_v16  ;;  %v1663_v4 = vpop.f32.mrf.mxu1  ;;  %v1702_v10 = vld [vmem:[#allocation3 + $0x21] sm:$0xff]  ;;  %8023 = vmatprep.subr.mxu1 %v9877_v35  ;;  %v2246_v5 = vld [vmem:[#allocation3 + $0x14] sm:$0xff] }
 0x26b   : > { %v1687_v3 = vld [vmem:[#allocation3 + $0x20] sm:$0xff]  ;;  %8060 = vmatprep.subr.mxu0 %v9877_v35  ;;  %1682 = vst.msk [vmem:[#allocation3 + $0x34] sm:$0x7] %vm1674_vm7, %v1663_v4  ;;  %7970 = vmatmul.mubr.msk.f32.gmra.mxu1 %vm1310_vm3, %v1702_v10  ;;  %v2390_v27 = vld [vmem:[#allocation3 + $0x15] sm:$0xff]  ;;  %v6895_v4 = vld [vmem:[%s12501_s27 + $0x198] sm:$0xff] }
 0x26c   : > { %8007 = vmatmul.mubr.msk.f32.gmra.mxu0 %vm1310_vm3, %v1687_v3  ;;  %v7940_v33 = vpop.f32.mrf.mxu1  ;;  %7972 = vmatprep.mubr.msk.f32.mxu1 %vm9333_vm1, %v9877_v35  ;;  %v1960_v58 = vld [vmem:[#allocation3 + $0x22] sm:$0xff]  ;;  %v6897_v15 = vld [vmem:[%s12501_s27 + $0x1a8] sm:$0xff]  ;;  %v6911_v16 = vld [vmem:[%s12501_s27 + $0x1e0] sm:$0xff] }
 0x26d   : > { %8009 = vmatprep.mubr.msk.f32.mxu0 %vm9333_vm1, %v9877_v35  ;;  %8024 = vmatpush3.msra.mxu1 %v6835_v24  ;;  %v2104_v42 = vld [vmem:[#allocation3 + $0x23] sm:$0xff]  ;;  %v6912_v18 = vld [vmem:[%s12501_s27 + $0x1e8] sm:$0xff] }
 0x26e   : > { %8061 = vmatpush3.msra.mxu0 %v6850_v30  ;;  %v1703_v23 = vld [vmem:[#allocation3 + $0x29] sm:$0xff]  ;;  %8025 = vmatprep.subr.mxu1 %v9877_v35  ;;  %v2247_v25 = vld [vmem:[#allocation3 + $0x1c] sm:$0xff] }
 0x26f   : > { %v1688_v34 = vld [vmem:[#allocation3 + $0x28] sm:$0xff]  ;;  %8062 = vmatprep.subr.mxu0 %v9877_v35  ;;  %7973 = vmatmul.mubr.msk.f32.gmra.mxu1 %vm1310_vm3, %v1703_v23  ;;  %v1689_v20 = vld [vmem:[#allocation3 + $0x30] sm:$0xf]  ;;  %v2391_v17 = vld [vmem:[#allocation3 + $0x1d] sm:$0xff] }
 0x270   : > { %8010 = vmatmul.mubr.msk.f32.gmra.mxu0 %vm1310_vm3, %v1688_v34  ;;  %7975 = vmatprep.mubr.msk.f32.mxu1 %vm9333_vm1, %v9877_v35  ;;  %v1961_v45 = vld [vmem:[#allocation3 + $0x2a] sm:$0xff]  ;;  %v6894_v33 = vld [vmem:[%s12501_s27 + $0x190] sm:$0xff]  ;;  %v6893_v23 = vld [vmem:[%s12501_s27 + $0x188] sm:$0xff] }
 0x271   : > { %8012 = vmatprep.mubr.msk.f32.mxu0 %vm9333_vm1, %v9877_v35  ;;  %8026 = vmatpush3.msra.mxu1 %v6834_v31  ;;  %v2105_v44 = vld [vmem:[#allocation3 + $0x2b] sm:$0xff]  ;;  %v6909_v31 = vld [vmem:[%s12501_s27 + $0x1d0] sm:$0xff] }
 0x272   : > { %8063 = vmatpush3.msra.mxu0 %v6849_v37  ;;  %v1704_v55 = vld [vmem:[#allocation3 + $0x31] sm:$0xf]  ;;  %8027 = vmatprep.subr.mxu1 %v9877_v35  ;;  %v2248_v0 = vld [vmem:[#allocation3 + $0x24] sm:$0xff]  ;;  %v2394_v37 = vld [vmem:[#allocation3 + $0x35] sm:$0xf] }
 0x273   : > { %8064 = vmatprep.subr.mxu0 %v9877_v35  ;;  %7976 = vmatmul.mubr.msk.f32.gmra.mxu1 %vm1310_vm3, %v1704_v55  ;;  %v1962_v50 = vld [vmem:[#allocation3 + $0x32] sm:$0xf]  ;;  %v2392_v24 = vld [vmem:[#allocation3 + $0x25] sm:$0xff] }
 0x274   : > { %8013 = vmatmul.mubr.msk.f32.gmra.mxu0 %vm1310_vm3, %v1689_v20  ;;  %8028 = vmatpush3.msra.mxu1 %v6833_v6  ;;  %v2106_v63 = vld [vmem:[#allocation3 + $0x33] sm:$0xf]  ;;  %v6910_v10 = vld [vmem:[%s12501_s27 + $0x1d8] sm:$0xff]  ;;  %v6908_v6 = vld [vmem:[%s12501_s27 + $0x1c8] sm:$0xff] }
 0x275   : > { %8065 = vmatpush3.msra.mxu0 %v6848_v40  ;;  %8029 = vmatprep.subr.mxu1 %v9877_v35  ;;  %v2249_v3 = vld [vmem:[#allocation3 + $0x2c] sm:$0xff]  ;;  %v2250_v34 = vld [vmem:[#allocation3 + $0x34] sm:$0xf] }
 0x276   : > { %8066 = vmatprep.subr.mxu0 %v9877_v35  ;;  %8030 = vmatpush3.msra.mxu1 %v6832_v60  ;;  %v2393_v30 = vld [vmem:[#allocation3 + $0x2d] sm:$0xff] }
 0x277   : > { %8031 = vmatprep.mubr.msk.f32.mxu1 %vm9333_vm1, %v9877_v35  ;;  %8067 = vmatpush3.msra.mxu0 %v6847_v41  ;;  %v6892_v40 = vld [vmem:[%s12501_s27 + $0x180] sm:$0xff]  ;;  %v2532_v20 = vld [vmem:[#allocation3 + $0x6] sm:$0xff] }
 0x278   : > { %8068 = vmatprep.mubr.msk.f32.mxu0 %vm9333_vm1, %v9877_v35  ;;  %8032 = vmatmul.mubr.msk.f32.vlgmr.msra.gmra.mxu1 %vm1310_vm3, %v1956_v43  ;;  %v6907_v55 = vld [vmem:[%s12501_s27 + $0x1c0] sm:$0xff]  ;;  %v2676_v60 = vld [vmem:[#allocation3 + $0x7] sm:$0xff] }
 0x279   : > { %8069 = vmatmul.mubr.msk.f32.vlgmr.msra.gmra.mxu0 %vm1310_vm3, %v2100_v26  ;;  %8034 = vmatprep.mubr.msk.f32.mxu1 %vm9333_vm1, %v9877_v35  ;;  %v2533_v41 = vld [vmem:[#allocation3 + $0xe] sm:$0xff]  ;;  %v2534_v26 = vld [vmem:[#allocation3 + $0x16] sm:$0xff] }
 0x27a   : > { %8071 = vmatprep.mubr.msk.f32.mxu0 %vm9333_vm1, %v9877_v35  ;;  %8089 = vmatprep.subr.mxu1 %v9877_v35  ;;  %v2677_v43 = vld [vmem:[#allocation3 + $0xf] sm:$0xff] }
 0x27b   : > { %8126 = vmatprep.subr.mxu0 %v9877_v35  ;;  %8090 = vmatpush3.msra.mxu1 %v6869_v39  ;;  %v2678_v39 = vld [vmem:[#allocation3 + $0x17] sm:$0xff] }
 0x27c   : > { %8127 = vmatpush3.msra.mxu0 %v6884_v47  ;;  %8035 = vmatmul.mubr.msk.f32.gmra.mxu1 %vm1310_vm3, %v1957_v36  ;;  %v2535_v47 = vld [vmem:[#allocation3 + $0x1e] sm:$0xff] }
 0x27d   : > { %8072 = vmatmul.mubr.msk.f32.gmra.mxu0 %vm1310_vm3, %v2101_v51  ;;  %8037 = vmatprep.mubr.msk.f32.mxu1 %vm9333_vm1, %v9877_v35  ;;  %v2679_v36 = vld [vmem:[#allocation3 + $0x1f] sm:$0xff] }
 0x27e   : > { %8074 = vmatprep.mubr.msk.f32.mxu0 %vm9333_vm1, %v9877_v35  ;;  %8091 = vmatprep.subr.mxu1 %v9877_v35  ;;  %v2536_v51 = vld [vmem:[#allocation3 + $0x26] sm:$0xff] }
 0x27f   : > { %8128 = vmatprep.subr.mxu0 %v9877_v35  ;;  %8092 = vmatpush3.msra.mxu1 %v6868_v21  ;;  %v2680_v21 = vld [vmem:[#allocation3 + $0x27] sm:$0xff] }
 0x280   : > { %8129 = vmatpush3.msra.mxu0 %v6883_v53  ;;  %8038 = vmatmul.mubr.msk.f32.gmra.mxu1 %vm1310_vm3, %v1958_v29  ;;  %v2537_v53 = vld [vmem:[#allocation3 + $0x2e] sm:$0xff] }
 0x281   : > { %8075 = vmatmul.mubr.msk.f32.gmra.mxu0 %vm1310_vm3, %v2102_v2  ;;  %8040 = vmatprep.mubr.msk.f32.mxu1 %vm9333_vm1, %v9877_v35  ;;  %v2681_v29 = vld [vmem:[#allocation3 + $0x2f] sm:$0xff]  ;;  %v2682_v2 = vld [vmem:[#allocation3 + $0x37] sm:$0xf] }
 0x282   : > { %8077 = vmatprep.mubr.msk.f32.mxu0 %vm9333_vm1, %v9877_v35  ;;  %8093 = vmatprep.subr.mxu1 %v9877_v35 }
 0x283   : > { %8130 = vmatprep.subr.mxu0 %v9877_v35  ;;  %8094 = vmatpush3.msra.mxu1 %v6867_v54  ;;  %v2538_v54 = vld [vmem:[#allocation3 + $0x36] sm:$0xf] }
 0x284   : > { %8131 = vmatpush3.msra.mxu0 %v6882_v7  ;;  %8041 = vmatmul.mubr.msk.f32.gmra.mxu1 %vm1310_vm3, %v1959_v56 }
 0x285   : > { %8078 = vmatmul.mubr.msk.f32.gmra.mxu0 %vm1310_vm3, %v2103_v57  ;;  %8043 = vmatprep.mubr.msk.f32.mxu1 %vm9333_vm1, %v9877_v35  ;;  %v6938_v57 = vld [vmem:[%s12502_s1 + $0xf8] sm:$0xff] }
 0x286   : > { %8080 = vmatprep.mubr.msk.f32.mxu0 %vm9333_vm1, %v9877_v35  ;;  %8095 = vmatprep.subr.mxu1 %v9877_v35 }
 0x287   : > { %8132 = vmatprep.subr.mxu0 %v9877_v35  ;;  %8096 = vmatpush3.msra.mxu1 %v6866_v1  ;;  %v3060_v1 = vld [vmem:[%s12502_s1 + $0x78] sm:$0xff] }
 0x288   : > { %8133 = vmatpush3.msra.mxu0 %v6881_v13  ;;  %8044 = vmatmul.mubr.msk.f32.gmra.mxu1 %vm1310_vm3, %v1960_v58 }
 0x289   : > { %8081 = vmatmul.mubr.msk.f32.gmra.mxu0 %vm1310_vm3, %v2104_v42  ;;  %8046 = vmatprep.mubr.msk.f32.mxu1 %vm9333_vm1, %v9877_v35 }
 0x28a   : > { %8083 = vmatprep.mubr.msk.f32.mxu0 %vm9333_vm1, %v9877_v35  ;;  %8097 = vmatprep.subr.mxu1 %v9877_v35 }
 0x28b   : > { %8134 = vmatprep.subr.mxu0 %v9877_v35  ;;  %8098 = vmatpush3.msra.mxu1 %v6865_v22  ;;  %v6937_v22 = vld [vmem:[%s12502_s1 + $0xf0] sm:$0xff] }
 0x28c   : > { %8135 = vmatpush3.msra.mxu0 %v6880_v19  ;;  %8047 = vmatmul.mubr.msk.f32.gmra.mxu1 %vm1310_vm3, %v1961_v45  ;;  %v3059_v19 = vld [vmem:[%s12502_s1 + $0x70] sm:$0xff] }
 0x28d   : > { %8084 = vmatmul.mubr.msk.f32.gmra.mxu0 %vm1310_vm3, %v2105_v44  ;;  %8099 = vmatprep.subr.mxu1 %v9877_v35 }
 0x28e   : > { %8136 = vmatprep.subr.mxu0 %v9877_v35  ;;  %8049 = vmatprep.mubr.msk.f32.mxu1 %vm9333_vm1, %v9877_v35 }
 0x28f   : > { %8086 = vmatprep.mubr.msk.f32.mxu0 %vm9333_vm1, %v9877_v35  ;;  %8100 = vmatpush3.msra.mxu1 %v6864_v62  ;;  %v6936_v62 = vld [vmem:[%s12502_s1 + $0xe8] sm:$0xff] }
 0x290   : > { %8137 = vmatpush3.msra.mxu0 %v6879_v59  ;;  %8050 = vmatmul.mubr.msk.f32.gmra.mxu1 %vm1310_vm3, %v1962_v50  ;;  %v3058_v59 = vld [vmem:[%s12502_s1 + $0x68] sm:$0xff] }
 0x291   : > { %8087 = vmatmul.mubr.msk.f32.gmra.mxu0 %vm1310_vm3, %v2106_v63  ;;  %8101 = vmatprep.subr.mxu1 %v9877_v35 }
 0x292   : > { %8138 = vmatprep.subr.mxu0 %v9877_v35  ;;  %8102 = vmatpush3.msra.mxu1 %v6863_v48 }
 0x293   : > { %8139 = vmatpush3.msra.mxu0 %v6878_v8  ;;  %8103 = vmatprep.subr.mxu1 %v9877_v35  ;;  %v6935_v8 = vld [vmem:[%s12502_s1 + $0xe0] sm:$0xff] }
 0x294   : > { %8140 = vmatprep.subr.mxu0 %v9877_v35  ;;  %8104 = vmatpush3.msra.mxu1 %v6862_v49  ;;  %v3057_v49 = vld [vmem:[%s12502_s1 + $0x60] sm:$0xff] }
 0x295   : > { %8105 = vmatprep.mubr.msk.f32.mxu1 %vm9333_vm1, %v9877_v35  ;;  %8141 = vmatpush3.msra.mxu0 %v6877_v9 }
 0x296   : > { %8142 = vmatprep.mubr.msk.f32.mxu0 %vm9333_vm1, %v9877_v35  ;;  %8106 = vmatmul.mubr.msk.f32.vlgmr.msra.gmra.mxu1 %vm1310_vm3, %v2244_v12 }
 0x297   : > { %8143 = vmatmul.mubr.msk.f32.vlgmr.msra.gmra.mxu0 %vm1310_vm3, %v2388_v46  ;;  %8108 = vmatprep.mubr.msk.f32.mxu1 %vm9333_vm1, %v9877_v35  ;;  %v10381_v46 = vld [vmem:[#allocation4] sm:$0xff] }
 0x298   : > { %8145 = vmatprep.mubr.msk.f32.mxu0 %vm9333_vm1, %v9877_v35  ;;  %8163 = vmatprep.subr.mxu1 %v9877_v35 }
 0x299   : > { %8200 = vmatprep.subr.mxu0 %v9877_v35  ;;  %8164 = vmatpush3.msra.mxu1 %v6899_v32  ;;  %v3056_v32 = vld [vmem:[%s12502_s1 + $0x58] sm:$0xff] }
 0x29a   : > { %8201 = vmatpush3.msra.mxu0 %v6914_v11  ;;  %8109 = vmatmul.mubr.msk.f32.gmra.mxu1 %vm1310_vm3, %v2245_v28 }
 0x29b   : > { %8146 = vmatmul.mubr.msk.f32.gmra.mxu0 %vm1310_vm3, %v2389_v61  ;;  %8111 = vmatprep.mubr.msk.f32.mxu1 %vm9333_vm1, %v9877_v35 }
 0x29c   : > { %8148 = vmatprep.mubr.msk.f32.mxu0 %vm9333_vm1, %v9877_v35  ;;  %8165 = vmatprep.subr.mxu1 %v9877_v35 }
 0x29d   : > { %8202 = vmatprep.subr.mxu0 %v9877_v35  ;;  %8166 = vmatpush3.msra.mxu1 %v6898_v14  ;;  %v6933_v14 = vld [vmem:[%s12502_s1 + $0xd0] sm:$0xff] }
 0x29e   : > { %8203 = vmatpush3.msra.mxu0 %v6913_v38  ;;  %8112 = vmatmul.mubr.msk.f32.gmra.mxu1 %vm1310_vm3, %v2246_v5  ;;  %v3055_v38 = vld [vmem:[%s12502_s1 + $0x50] sm:$0xff] }
 0x29f   : > { %8149 = vmatmul.mubr.msk.f32.gmra.mxu0 %vm1310_vm3, %v2390_v27  ;;  %8114 = vmatprep.mubr.msk.f32.mxu1 %vm9333_vm1, %v9877_v35 }
 0x2a0   : > { %8151 = vmatprep.mubr.msk.f32.mxu0 %vm9333_vm1, %v9877_v35  ;;  %8167 = vmatprep.subr.mxu1 %v9877_v35 }
 0x2a1   : > { %8204 = vmatprep.subr.mxu0 %v9877_v35  ;;  %8168 = vmatpush3.msra.mxu1 %v6897_v15  ;;  %v6932_v15 = vld [vmem:[%s12502_s1 + $0xc8] sm:$0xff] }
 0x2a2   : > { %8205 = vmatpush3.msra.mxu0 %v6912_v18  ;;  %8115 = vmatmul.mubr.msk.f32.gmra.mxu1 %vm1310_vm3, %v2247_v25  ;;  %v3054_v18 = vld [vmem:[%s12502_s1 + $0x48] sm:$0xff] }
 0x2a3   : > { %8152 = vmatmul.mubr.msk.f32.gmra.mxu0 %vm1310_vm3, %v2391_v17  ;;  %8117 = vmatprep.mubr.msk.f32.mxu1 %vm9333_vm1, %v9877_v35 }
 0x2a4   : > { %8154 = vmatprep.mubr.msk.f32.mxu0 %vm9333_vm1, %v9877_v35  ;;  %8169 = vmatprep.subr.mxu1 %v9877_v35 }
 0x2a5   : > { %8206 = vmatprep.subr.mxu0 %v9877_v35  ;;  %8170 = vmatpush3.msra.mxu1 %v6896_v52 }
 0x2a6   : > { %8207 = vmatpush3.msra.mxu0 %v6911_v16  ;;  %8118 = vmatmul.mubr.msk.f32.gmra.mxu1 %vm1310_vm3, %v2248_v0  ;;  %v6931_v16 = vld [vmem:[%s12502_s1 + $0xc0] sm:$0xff] }
 0x2a7   : > { %8155 = vmatmul.mubr.msk.f32.gmra.mxu0 %vm1310_vm3, %v2392_v24  ;;  %8120 = vmatprep.mubr.msk.f32.mxu1 %vm9333_vm1, %v9877_v35  ;;  %v3053_v0 = vld [vmem:[%s12502_s1 + $0x40] sm:$0xff] }
 0x2a8   : > { %8157 = vmatprep.mubr.msk.f32.mxu0 %vm9333_vm1, %v9877_v35  ;;  %8171 = vmatprep.subr.mxu1 %v9877_v35 }
 0x2a9   : > { %8208 = vmatprep.subr.mxu0 %v9877_v35  ;;  %8172 = vmatpush3.msra.mxu1 %v6895_v4 }
 0x2aa   : > { %8209 = vmatpush3.msra.mxu0 %v6910_v10  ;;  %8121 = vmatmul.mubr.msk.f32.gmra.mxu1 %vm1310_vm3, %v2249_v3  ;;  %v6930_v10 = vld [vmem:[%s12502_s1 + $0xb8] sm:$0xff] }
 0x2ab   : > { %8158 = vmatmul.mubr.msk.f32.gmra.mxu0 %vm1310_vm3, %v2393_v30  ;;  %8173 = vmatprep.subr.mxu1 %v9877_v35  ;;  %v3052_v3 = vld [vmem:[%s12502_s1 + $0x38] sm:$0xff] }
 0x2ac   : > { %8210 = vmatprep.subr.mxu0 %v9877_v35  ;;  %8123 = vmatprep.mubr.msk.f32.mxu1 %vm9333_vm1, %v9877_v35 }
 0x2ad   : > { %8160 = vmatprep.mubr.msk.f32.mxu0 %vm9333_vm1, %v9877_v35  ;;  %8174 = vmatpush3.msra.mxu1 %v6894_v33 }
 0x2ae   : > { %8211 = vmatpush3.msra.mxu0 %v6909_v31  ;;  %8124 = vmatmul.mubr.msk.f32.gmra.mxu1 %vm1310_vm3, %v2250_v34  ;;  %v3051_v34 = vld [vmem:[%s12502_s1 + $0x30] sm:$0xff] }
 0x2af   : > { %8161 = vmatmul.mubr.msk.f32.gmra.mxu0 %vm1310_vm3, %v2394_v37  ;;  %8175 = vmatprep.subr.mxu1 %v9877_v35 }
 0x2b0   : > { %8212 = vmatprep.subr.mxu0 %v9877_v35  ;;  %8176 = vmatpush3.msra.mxu1 %v6893_v23  ;;  %v6929_v23 = vld [vmem:[%s12502_s1 + $0xb0] sm:$0xff] }
 0x2b1   : > { %8213 = vmatpush3.msra.mxu0 %v6908_v6  ;;  %8177 = vmatprep.subr.mxu1 %v9877_v35 }
 0x2b2   : > { %8214 = vmatprep.subr.mxu0 %v9877_v35  ;;  %8178 = vmatpush3.msra.mxu1 %v6892_v40  ;;  %v6928_v40 = vld [vmem:[%s12502_s1 + $0xa8] sm:$0xff] }
 0x2b3   : > { %8179 = vmatprep.mubr.msk.f32.mxu1 %vm9333_vm1, %v9877_v35  ;;  %8215 = vmatpush3.msra.mxu0 %v6907_v55  ;;  %v3050_v55 = vld [vmem:[%s12502_s1 + $0x28] sm:$0xff] }
 0x2b4   : > { %8216 = vmatprep.mubr.msk.f32.mxu0 %vm9333_vm1, %v9877_v35  ;;  %8180 = vmatmul.mubr.msk.f32.vlgmr.msra.gmra.mxu1 %vm1310_vm3, %v2532_v20 }
 0x2b5   : > { %8217 = vmatmul.mubr.msk.f32.vlgmr.msra.gmra.mxu0 %vm1310_vm3, %v2676_v60  ;;  %8182 = vmatprep.mubr.msk.f32.mxu1 %vm9333_vm1, %v9877_v35 }
 0x2b6   : > { %8219 = vmatprep.mubr.msk.f32.mxu0 %vm9333_vm1, %v9877_v35  ;;  %8237 = vmatprep.subr.mxu1 %v9877_v35 }
 0x2b7   : > { %8290 = vmatprep.subr.mxu0 %v9877_v35  ;;  %8238 = vmatpush3.msra.mxu1 %v6938_v57 }
 0x2b8   : > { %8183 = vmatmul.mubr.msk.f32.gmra.mxu1 %vm1310_vm3, %v2533_v41  ;;  %8291 = vmatpush3.msra.mxu0 %v3060_v1 }
 0x2b9   : > { %8220 = vmatmul.mubr.msk.f32.gmra.mxu0 %vm1310_vm3, %v2677_v43  ;;  %8185 = vmatprep.mubr.msk.f32.mxu1 %vm9333_vm1, %v9877_v35  ;;  %v6927_v43 = vld [vmem:[%s12502_s1 + $0xa0] sm:$0xff] }
 0x2ba   : > { %8222 = vmatprep.mubr.msk.f32.mxu0 %vm9333_vm1, %v9877_v35  ;;  %8239 = vmatprep.subr.mxu1 %v9877_v35 }
 0x2bb   : > { %8292 = vmatprep.subr.mxu0 %v9877_v35  ;;  %8240 = vmatpush3.msra.mxu1 %v6937_v22 }
 0x2bc   : > { %8186 = vmatmul.mubr.msk.f32.gmra.mxu1 %vm1310_vm3, %v2534_v26  ;;  %8293 = vmatpush3.msra.mxu0 %v3059_v19  ;;  %v3049_v26 = vld [vmem:[%s12502_s1 + $0x20] sm:$0xff] }
 0x2bd   : > { %8223 = vmatmul.mubr.msk.f32.gmra.mxu0 %vm1310_vm3, %v2678_v39  ;;  %8188 = vmatprep.mubr.msk.f32.mxu1 %vm9333_vm1, %v9877_v35 }
 0x2be   : > { %8225 = vmatprep.mubr.msk.f32.mxu0 %vm9333_vm1, %v9877_v35  ;;  %8241 = vmatprep.subr.mxu1 %v9877_v35 }
 0x2bf   : > { %8294 = vmatprep.subr.mxu0 %v9877_v35  ;;  %8242 = vmatpush3.msra.mxu1 %v6936_v62 }
 0x2c0   : > { %8189 = vmatmul.mubr.msk.f32.gmra.mxu1 %vm1310_vm3, %v2535_v47  ;;  %8295 = vmatpush3.msra.mxu0 %v3058_v59 }
 0x2c1   : > { %8226 = vmatmul.mubr.msk.f32.gmra.mxu0 %vm1310_vm3, %v2679_v36  ;;  %8191 = vmatprep.mubr.msk.f32.mxu1 %vm9333_vm1, %v9877_v35  ;;  %v6926_v36 = vld [vmem:[%s12502_s1 + $0x98] sm:$0xff] }
 0x2c2   : > { %8228 = vmatprep.mubr.msk.f32.mxu0 %vm9333_vm1, %v9877_v35  ;;  %8243 = vmatprep.subr.mxu1 %v9877_v35 }
 0x2c3   : > { %8296 = vmatprep.subr.mxu0 %v9877_v35  ;;  %8244 = vmatpush3.msra.mxu1 %v6935_v8 }
 0x2c4   : > { %8192 = vmatmul.mubr.msk.f32.gmra.mxu1 %vm1310_vm3, %v2536_v51  ;;  %8297 = vmatpush3.msra.mxu0 %v3057_v49  ;;  %v3048_v51 = vld [vmem:[%s12502_s1 + $0x18] sm:$0xff] }
 0x2c5   : > { %8229 = vmatmul.mubr.msk.f32.gmra.mxu0 %vm1310_vm3, %v2680_v21  ;;  %8194 = vmatprep.mubr.msk.f32.mxu1 %vm9333_vm1, %v9877_v35 }
 0x2c6   : > { %8231 = vmatprep.mubr.msk.f32.mxu0 %vm9333_vm1, %v9877_v35  ;;  %8245 = vmatprep.subr.mxu1 %v10381_v46 }
 0x2c7   : > { %8298 = vmatprep.subr.mxu0 %v10381_v46 }
 0x2c8   : > { %8195 = vmatmul.mubr.msk.f32.gmra.mxu1 %vm1310_vm3, %v2537_v53  ;;  %8299 = vmatpush3.msra.mxu0 %v3056_v32 }
 0x2c9   : > { %8232 = vmatmul.mubr.msk.f32.gmra.mxu0 %vm1310_vm3, %v2681_v29  ;;  %8197 = vmatprep.mubr.msk.f32.mxu1 %vm9333_vm1, %v9877_v35 }
 0x2ca   : > { %8234 = vmatprep.mubr.msk.f32.mxu0 %vm9333_vm1, %v9877_v35  ;;  %8300 = vmatprep.subr.mxu0 %v10381_v46 }
 0x2cb   : > { %8301 = vmatpush3.msra.mxu0 %v3055_v38 }
 0x2cc   : > { %8198 = vmatmul.mubr.msk.f32.gmra.mxu1 %vm1310_vm3, %v2538_v54  ;;  %8302 = vmatprep.subr.mxu0 %v10381_v46  ;;  %v3047_v54 = vld [vmem:[%s12502_s1 + $0x10] sm:$0xff] }
 0x2cd   : > { %8235 = vmatmul.mubr.msk.f32.gmra.mxu0 %vm1310_vm3, %v2682_v2  ;;  %8269 = vmatprep.mubr.msk.f32.mxu1 %vm9333_vm1, %v9877_v35  ;;  %v6925_v2 = vld [vmem:[%s12502_s1 + $0x90] sm:$0xff] }
 0x2ce   : > { %8322 = vmatprep.mubr.msk.f32.mxu0 %vm9333_vm1, %v9877_v35  ;;  %v6934_v35 = vld [vmem:[%s12502_s1 + $0xd8] sm:$0xff]  ;;  %8303 = vmatpush3.msra.mxu0 %v3054_v18 }
 0x2cf   : > { %8246 = vmatpush3.msra.mxu1 %v6934_v35  ;;  %8304 = vmatprep.subr.mxu0 %v10381_v46 }
 0x2d0   : > { %8247 = vmatprep.subr.mxu1 %v10381_v46  ;;  %8305 = vmatpush3.msra.mxu0 %v3053_v0 }
 0x2d1   : > { %8248 = vmatpush3.msra.mxu1 %v6933_v14  ;;  %8306 = vmatprep.subr.mxu0 %v10381_v46 }
 0x2d2   : > { %8249 = vmatprep.subr.mxu1 %v10381_v46  ;;  %8307 = vmatpush3.msra.mxu0 %v3052_v3 }
 0x2d3   : > { %8250 = vmatpush3.msra.mxu1 %v6932_v15  ;;  %8308 = vmatprep.subr.mxu0 %v10381_v46 }
 0x2d4   : > { %8251 = vmatprep.subr.mxu1 %v10381_v46  ;;  %8309 = vmatpush3.msra.mxu0 %v3051_v34 }
 0x2d5   : > { %8252 = vmatpush3.msra.mxu1 %v6931_v16  ;;  %8310 = vmatprep.subr.mxu0 %v10381_v46 }
 0x2d6   : > { %8253 = vmatprep.subr.mxu1 %v10381_v46  ;;  %8311 = vmatpush3.msra.mxu0 %v3050_v55 }
 0x2d7   : > { %8254 = vmatpush3.msra.mxu1 %v6930_v10  ;;  %8312 = vmatprep.subr.mxu0 %v10381_v46 }
 0x2d8   : > { %8255 = vmatprep.subr.mxu1 %v10381_v46  ;;  %8313 = vmatpush3.msra.mxu0 %v3049_v26 }
 0x2d9   : > { %8256 = vmatpush3.msra.mxu1 %v6929_v23  ;;  %8314 = vmatprep.subr.mxu0 %v10381_v46 }
 0x2da   : > { %8257 = vmatprep.subr.mxu1 %v10381_v46  ;;  %8315 = vmatpush3.msra.mxu0 %v3048_v51 }
 0x2db   : > { %8258 = vmatpush3.msra.mxu1 %v6928_v40  ;;  %8316 = vmatprep.subr.mxu0 %v10381_v46 }
 0x2dc   : > { %8259 = vmatprep.subr.mxu1 %v10381_v46  ;;  %8317 = vmatpush3.msra.mxu0 %v3047_v54 }
 0x2dd   : > { %8260 = vmatpush3.msra.mxu1 %v6927_v43  ;;  %8318 = vmatprep.subr.mxu0 %v10381_v46 }
 0x2de   : > { %8261 = vmatprep.subr.mxu1 %v10381_v46 }
 0x2df   : > { %8262 = vmatpush3.msra.mxu1 %v6926_v36 }
 0x2e0   : > { %8263 = vmatprep.subr.mxu1 %v10381_v46 }
 0x2e1   : > { %8264 = vmatpush3.msra.mxu1 %v6925_v2 }
 0x2e2   : > { %8265 = vmatprep.subr.mxu1 %v10381_v46 }
 0x31b   : > { %v1801_v7 = vpop.f32.mrf.mxu1 }
 0x31c   : > { %v1922_v56 = vpop.f32.mrf.mxu0 }
 0x31d   : > { %v10353_v13 = vadd.f32 %v1922_v56, %v1801_v7  ;;  %v7959_v58 = vpop.f32.mrf.mxu1  ;;  %v6924_v7 = vld [vmem:[%s12502_s1 + $0x88] sm:$0xff] }
 0x31e   : > { %v7996_v42 = vpop.f32.mrf.mxu0  ;;  %v3046_v56 = vld [vmem:[%s12502_s1 + $0x8] sm:$0xff]  ;;  %8266 = vmatpush3.msra.mxu1 %v6924_v7  ;;  %v6923_v58 = vld [vmem:[%s12502_s1 + $0x80] sm:$0xff] }
 0x31f   : > { %v1806_v45 = vpop.f32.mrf.mxu1  ;;  %8319 = vmatpush3.msra.mxu0 %v3046_v56  ;;  %8267 = vmatprep.subr.mxu1 %v10381_v46  ;;  %v3045_v42 = vld [vmem:[%s12502_s1] sm:$0xff] }
 0x320   : > { %v1927_v44 = vpop.f32.mrf.mxu0  ;;  %8320 = vmatprep.subr.mxu0 %v10381_v46  ;;  %8268 = vmatpush3.msra.mxu1 %v6923_v58 }
 0x321   : > { %v10371_v48 = vadd.f32 %v1927_v44, %v1806_v45  ;;  %v7962_v50 = vpop.f32.mrf.mxu1  ;;  %8321 = vmatpush3.msra.mxu0 %v3045_v42  ;;  %8343 = vmatprep.subr.mxu1 %v10381_v46 }
 0x322   : > { %v7999_v63 = vpop.f32.mrf.mxu0  ;;  %8396 = vmatprep.subr.mxu0 %v10381_v46 }
 0x323   : > { %v1811_v9 = vpop.f32.mrf.mxu1 }
 0x324   : > { %v1932_v12 = vpop.f32.mrf.mxu0 }
 0x325   : > { %v10391_v11 = vadd.f32 %v1932_v12, %v1811_v9  ;;  %v7965_v28 = vpop.f32.mrf.mxu1 }
 0x326   : > { %v8002_v61 = vpop.f32.mrf.mxu0 }
 0x327   : > { %v1816_v5 = vpop.f32.mrf.mxu1 }
 0x328   : > { %v1937_v27 = vpop.f32.mrf.mxu0 }
 0x329   : > { %v10409_v25 = vadd.f32 %v1937_v27, %v1816_v5  ;;  %v7968_v17 = vpop.f32.mrf.mxu1 }
 0x32a   : > { %v8005_v52 = vpop.f32.mrf.mxu0 }
 0x32b   : > { %v1821_v24 = vpop.f32.mrf.mxu1 }
 0x32c   : > { %v1942_v4 = vpop.f32.mrf.mxu0 }
 0x32d   : > { %v10427_v30 = vadd.f32 %v1942_v4, %v1821_v24  ;;  %v7971_v33 = vpop.f32.mrf.mxu1 }
 0x32e   : > { %v8008_v31 = vpop.f32.mrf.mxu0 }
 0x32f   : > { %v1826_v37 = vpop.f32.mrf.mxu1 }
 0x330   : > { %v1947_v6 = vpop.f32.mrf.mxu0 }
 0x331   : > { %v10445_v20 = vadd.f32 %v1947_v6, %v1826_v37  ;;  %v7974_v60 = vpop.f32.mrf.mxu1 }
 0x332   : > { %v8011_v41 = vpop.f32.mrf.mxu0 }
 0x333   : > { %v1831_v39 = vpop.f32.mrf.mxu1 }
 0x334   : > { %v1952_v47 = vpop.f32.mrf.mxu0 }
 0x335   : > { %v10463_v21 = vadd.f32 %v1952_v47, %v1831_v39  ;;  %v7977_v53 = vpop.f32.mrf.mxu1 }
 0x336   : > { %v8014_v29 = vpop.f32.mrf.mxu0 }
 0x338   : > { %v2059_v57 = vpop.f32.mrf.mxu1 }
 0x339   : > { %v2203_v1 = vpop.f32.mrf.mxu0  ;;  %v2093_v53 = vadd.f32 %v2059_v57, %v10353_v13 }
 0x33a   : > { %v8033_v22 = vpop.f32.mrf.mxu1 }
 0x33b   : > { %v8070_v19 = vpop.f32.mrf.mxu0  ;;  %v2237_v56 = vadd.f32 %v2203_v1, %v2093_v53 }
 0x33c   : > { %v2064_v45 = vpop.f32.mrf.mxu1 }
 0x33d   : > { %v2208_v44 = vpop.f32.mrf.mxu0  ;;  %v2094_v58 = vadd.f32 %v2064_v45, %v10371_v48  ;;  %v10520_v48 = vld [vmem:[%s12503_s7] ss:$0 sm:$0xff] }
 0x33e   : > { %v8036_v62 = vpop.f32.mrf.mxu1 }
 0x33f   : > { %v8073_v59 = vpop.f32.mrf.mxu0 }
 0x340   : > { %v2069_v50 = vpop.f32.mrf.mxu1 }
 0x341   : > { %v2213_v63 = vpop.f32.mrf.mxu0 }
 0x342   : > { %v8039_v8 = vpop.f32.mrf.mxu1 }
 0x343   : > { %v8076_v49 = vpop.f32.mrf.mxu0  ;;  %v2238_v8 = vadd.f32 %v2208_v44, %v2094_v58 }
 0x344   : > { %v2074_v9 = vpop.f32.mrf.mxu1  ;;  %v2095_v49 = vadd.f32 %v2069_v50, %v10391_v11 }
 0x345   : > { %v10491_v12 = vpop.f32.mrf.mxu0  ;;  %v2096_v1 = vadd.f32 %v2074_v9, %v10409_v25 }
 0x346   : > { %v8042_v35 = vpop.f32.mrf.mxu1 }
 0x347   : > { %v8079_v32 = vpop.f32.mrf.mxu0  ;;  %v2240_v25 = vadd.f32 %v10491_v12, %v2096_v1 }
 0x348   : > { %v2079_v28 = vpop.f32.mrf.mxu1 }
 0x349   : > { %v10493_v61 = vpop.f32.mrf.mxu0  ;;  %v2097_v11 = vadd.f32 %v2079_v28, %v10427_v30 }
 0x34a   : > { %v8045_v14 = vpop.f32.mrf.mxu1 }
 0x34b   : > { %v8082_v38 = vpop.f32.mrf.mxu0  ;;  %v2239_v14 = vadd.f32 %v2213_v63, %v2095_v49 }
 0x34c   : > { %v10495_v5 = vpop.f32.mrf.mxu1 }
 0x34d   : > { %v10497_v27 = vpop.f32.mrf.mxu0  ;;  %v2098_v28 = vadd.f32 %v10495_v5, %v10445_v20 }
 0x34e   : > { %v8048_v15 = vpop.f32.mrf.mxu1 }
 0x34f   : > { %v8085_v18 = vpop.f32.mrf.mxu0 }
 0x350   : > { %v10499_v17 = vpop.f32.mrf.mxu1 }
 0x351   : > { %v10501_v52 = vpop.f32.mrf.mxu0  ;;  %v2099_v20 = vadd.f32 %v10499_v17, %v10463_v21 }
 0x352   : > { %v8051_v16 = vpop.f32.mrf.mxu1 }
 0x353   : > { %v8088_v0 = vpop.f32.mrf.mxu0  ;;  %v2243_v49 = vadd.f32 %v10501_v52, %v2099_v20 }
 0x356   : > { %v2347_v24 = vpop.f32.mrf.mxu1 }
 0x357   : > { %v2491_v4 = vpop.f32.mrf.mxu0  ;;  %v2381_v19 = vadd.f32 %v2347_v24, %v2237_v56 }
 0x358   : > { %v8107_v10 = vpop.f32.mrf.mxu1 }
 0x359   : > { %v8144_v3 = vpop.f32.mrf.mxu0  ;;  %v2525_v13 = vadd.f32 %v2491_v4, %v2381_v19 }
 0x35a   : > { %v2352_v33 = vpop.f32.mrf.mxu1 }
 0x35b   : > { %v2496_v31 = vpop.f32.mrf.mxu0  ;;  %v2382_v57 = vadd.f32 %v2352_v33, %v2238_v8 }
 0x35c   : > { %v8110_v23 = vpop.f32.mrf.mxu1 }
 0x35d   : > { %v8147_v34 = vpop.f32.mrf.mxu0  ;;  %v2526_v18 = vadd.f32 %v2496_v31, %v2382_v57  ;;  %v2241_v31 = vadd.f32 %v10493_v61, %v2097_v11 }
 0x35e   : > { %v2357_v37 = vpop.f32.mrf.mxu1 }
 0x35f   : > { %v2501_v6 = vpop.f32.mrf.mxu0  ;;  %v2383_v16 = vadd.f32 %v2357_v37, %v2239_v14 }
 0x360   : > { %v8113_v40 = vpop.f32.mrf.mxu1 }
 0x361   : > { %v8150_v55 = vpop.f32.mrf.mxu0  ;;  %v2527_v10 = vadd.f32 %v2501_v6, %v2383_v16 }
 0x362   : > { %v2362_v60 = vpop.f32.mrf.mxu1 }
 0x363   : > { %v2506_v41 = vpop.f32.mrf.mxu0  ;;  %v2384_v23 = vadd.f32 %v2362_v60, %v2240_v25 }
 0x364   : > { %v8116_v43 = vpop.f32.mrf.mxu1 }
 0x365   : > { %v8153_v26 = vpop.f32.mrf.mxu0  ;;  %v2528_v61 = vadd.f32 %v2506_v41, %v2384_v23 }
 0x366   : > { %v2367_v39 = vpop.f32.mrf.mxu1 }
 0x367   : > { %v10503_v47 = vpop.f32.mrf.mxu0  ;;  %v2385_v43 = vadd.f32 %v2367_v39, %v2241_v31 }
 0x368   : > { %v8119_v36 = vpop.f32.mrf.mxu1 }
 0x369   : > { %v8156_v51 = vpop.f32.mrf.mxu0 }
 0x36a   : > { %v10506_v29 = vpop.f32.mrf.mxu1 }
 0x36b   : > { %v10508_v2 = vpop.f32.mrf.mxu0 }
 0x36c   : > { %v8122_v54 = vpop.f32.mrf.mxu1 }
 0x36d   : > { %v8159_v7 = vpop.f32.mrf.mxu0  ;;  %v2242_v54 = vadd.f32 %v10497_v27, %v2098_v28 }
 0x36e   : > { %v10511_v42 = vpop.f32.mrf.mxu1 }
 0x36f   : > { %v10513_v22 = vpop.f32.mrf.mxu0  ;;  %v2386_v41 = vadd.f32 %v10506_v29, %v2242_v54 }
 0x370   : > { %v8125_v62 = vpop.f32.mrf.mxu1 }
 0x371   : > { %v8162_v59 = vpop.f32.mrf.mxu0  ;;  %v2529_v62 = vadd.f32 %v10503_v47, %v2385_v43  ;;  %v2530_v29 = vadd.f32 %v10508_v2, %v2386_v41 }
 0x374   : > { %v2635_v35 = vpop.f32.mrf.mxu1 }
 0x375   : > { %v2779_v32 = vpop.f32.mrf.mxu0  ;;  %v2669_v38 = vadd.f32 %v2635_v35, %v2525_v13 }
 0x376   : > { %v8181_v45 = vpop.f32.mrf.mxu1 }
 0x377   : > { %v8218_v15 = vpop.f32.mrf.mxu0  ;;  %v2813_v44 = vadd.f32 %v2779_v32, %v2669_v38  ;;  %v2387_v38 = vadd.f32 %v10511_v42, %v2243_v49 }
 0x378   : > { %v2640_v50 = vpop.f32.mrf.mxu1 }
 0x379   : > { %v2784_v0 = vpop.f32.mrf.mxu0  ;;  %v10524_v24 = vadd.f32 %v10520_v48, %v2813_v44  ;;  %v2670_v63 = vadd.f32 %v2640_v50, %v2526_v18  ;;  %v2531_v42 = vadd.f32 %v10513_v22, %v2387_v38 }
 0x37a   : > { %v8184_v9 = vpop.f32.mrf.mxu1 }
 0x37b   : > { %v8221_v4 = vpop.f32.mrf.mxu0  ;;  %v10528_v3 = vmul.f32 0.70710677, %v10524_v24  ;;  %v2814_v33 = vadd.f32 %v2784_v0, %v2670_v63 }
 0x37c   : > { %v2645_v34 = vpop.f32.mrf.mxu1 }
 0x37d   : > { %v2789_v30 = vpop.f32.mrf.mxu0  ;;  %v2848_v37 = vand.u32 2147483647, %v10528_v3  ;;  %v10535_v40 = vadd.f32 %v10520_v48, %v2814_v33  ;;  %v2671_v12 = vadd.f32 %v2645_v34, %v2527_v10  ;;  %vm2988_vm8 = vcmp.ge.f32.partialorder %v10528_v3, 0.0 }
 0x37e   : > { %v8187_v55 = vpop.f32.mrf.mxu1 }
 0x37f   : > { %v8224_v6 = vpop.f32.mrf.mxu0  ;;  %v2855_v26 = vmul.f32 0.3275911, %v2848_v37  ;;  %v10538_v36 = vmul.f32 0.70710677, %v10535_v40  ;;  %v2815_v60 = vadd.f32 %v2789_v30, %v2671_v12  ;;  %v2946_v45 = vsub.f32 0.0, %v2848_v37 }
 0x380   : > { %v2650_v51 = vpop.f32.mrf.mxu1 }
 0x381   : > { %v2794_v53 = vpop.f32.mrf.mxu0  ;;  %v2862_v5 = vadd.f32 1.0, %v2855_v26  ;;  %v2849_v7 = vand.u32 2147483647, %v10538_v36  ;;  %v10545_v56 = vadd.f32 %v10520_v48, %v2815_v60  ;;  %v2672_v39 = vadd.f32 %v2650_v51, %v2528_v61 }
 0x382   : > { %v8190_v58 = vpop.f32.mrf.mxu1  ;;  %v2953_v4 = vmul.f32 %v2946_v45, %v2848_v37  ;;  %vm2989_vm9 = vcmp.ge.f32.partialorder %v10538_v36, 0.0 }
 0x383   : > { %v8227_v19 = vpop.f32.mrf.mxu0  ;;  %9242 = vrcp.f32 %v2862_v5  ;;  %v2856_v59 = vmul.f32 0.3275911, %v2849_v7  ;;  %v10550_v27 = vmul.f32 0.70710677, %v10545_v56  ;;  %v2816_v8 = vadd.f32 %v2794_v53, %v2672_v39 }
 0x384   : > { %v2655_v21 = vpop.f32.mrf.mxu1  ;;  %v2947_v23 = vsub.f32 0.0, %v2849_v7  ;;  %v2960_v37 = vmul.f32 1.442695, %v2953_v4 }
 0x385   : > { %v2799_v17 = vpop.f32.mrf.mxu0  ;;  %v2863_v13 = vadd.f32 1.0, %v2856_v59  ;;  %v2673_v57 = vadd.f32 %v2655_v21, %v2529_v62  ;;  %v2850_v35 = vand.u32 2147483647, %v10550_v27  ;;  %v10555_v32 = vadd.f32 %v10520_v48, %v2816_v8 }
 0x386   : > { %v8193_v47 = vpop.f32.mrf.mxu1  ;;  %v2954_v51 = vmul.f32 %v2947_v23, %v2849_v7  ;;  %vm2990_vm10 = vcmp.ge.f32.partialorder %v10550_v27, 0.0  ;;  %v6954_v27 = vld [vmem:[%s12502_s1 + $0x178] sm:$0xff] }
 0x387   : > { %v8230_v14 = vpop.f32.mrf.mxu0  ;;  %9244 = vrcp.f32 %v2863_v13  ;;  %v2817_v1 = vadd.f32 %v2799_v17, %v2673_v57  ;;  %v2857_v15 = vmul.f32 0.3275911, %v2850_v35  ;;  %v10560_v18 = vmul.f32 0.70710677, %v10555_v32 }
 0x388   : > { %v2660_v52 = vpop.f32.mrf.mxu1  ;;  %v2948_v20 = vsub.f32 0.0, %v2850_v35  ;;  %v2962_v8 = vmul.f32 1.442695, %v2954_v51  ;;  %v2834_v51 = vmul.f32 0.5, %v10524_v24 }
 0x389   : > { %v2804_v16 = vpop.f32.mrf.mxu0  ;;  %v10563_v44 = vadd.f32 %v10520_v48, %v2817_v1  ;;  %v2674_v11 = vadd.f32 %v2660_v52, %v2530_v29  ;;  %v2864_v50 = vadd.f32 1.0, %v2857_v15  ;;  %v2851_v0 = vand.u32 2147483647, %v10560_v18 }
 0x38a   : > { %v8196_v63 = vpop.f32.mrf.mxu1  ;;  %v2955_v7 = vmul.f32 %v2948_v20, %v2850_v35  ;;  %vm2991_vm11 = vcmp.ge.f32.partialorder %v10560_v18, 0.0  ;;  %v2837_v18 = vmul.f32 0.5, %v10555_v32 }
 0x38b   : > { %v8233_v2 = vpop.f32.mrf.mxu0  ;;  %v10568_v25 = vmul.f32 0.70710677, %v10563_v44  ;;  %v2818_v9 = vadd.f32 %v2804_v16, %v2674_v11  ;;  %9246 = vrcp.f32 %v2864_v50  ;;  %v2858_v10 = vmul.f32 0.3275911, %v2851_v0 }
 0x38c   : > { %v2665_v33 = vpop.f32.mrf.mxu1  ;;  %v2949_v17 = vsub.f32 0.0, %v2851_v0  ;;  %v2964_v45 = vmul.f32 1.442695, %v2955_v7 }
 0x38d   : > { %v2809_v31 = vpop.f32.mrf.mxu0  ;;  %v2852_v34 = vand.u32 2147483647, %v10568_v25  ;;  %v10572_v30 = vadd.f32 %v10520_v48, %v2818_v9  ;;  %v2675_v28 = vadd.f32 %v2665_v33, %v2531_v42  ;;  %v2865_v12 = vadd.f32 1.0, %v2858_v10 }
 0x38e   : > { %v8199_v55 = vpop.f32.mrf.mxu1  ;;  %v2956_v15 = vmul.f32 %v2949_v17, %v2851_v0  ;;  %vm2992_vm12 = vcmp.ge.f32.partialorder %v10568_v25, 0.0  ;;  %v6952_v25 = vld [vmem:[%s12502_s1 + $0x168] sm:$0xff] }
 0x38f   : > { %v8236_v6 = vpop.f32.mrf.mxu0  ;;  %v2859_v22 = vmul.f32 0.3275911, %v2852_v34  ;;  %v10575_v43 = vmul.f32 0.70710677, %v10572_v30  ;;  %9248 = vrcp.f32 %v2865_v12  ;;  %v2819_v61 = vadd.f32 %v2809_v31, %v2675_v28 }
 0x390   : > { %v9243_v26 = vpop.eup %9242  ;;  %v2966_v33 = vmul.f32 1.442695, %v2956_v15 }
 0x391   : > { %v2883_v60 = vmul.f32 1.0614054, %v9243_v26  ;;  %v2866_v53 = vadd.f32 1.0, %v2859_v22  ;;  %v2853_v54 = vand.u32 2147483647, %v10575_v43  ;;  %v10579_v5 = vadd.f32 %v10520_v48, %v2819_v61 }
 0x392   : > { %v2950_v48 = vsub.f32 0.0, %v2852_v34  ;;  %vm2993_vm13 = vcmp.ge.f32.partialorder %v10575_v43, 0.0 }
 0x393   : > { %v2890_v39 = vadd.f32 -1.4531521, %v2883_v60  ;;  %9250 = vrcp.f32 %v2866_v53  ;;  %v2860_v58 = vmul.f32 0.3275911, %v2853_v54  ;;  %v10582_v62 = vmul.f32 0.70710677, %v10579_v5 }
 0x394   : > { %v9245_v19 = vpop.eup %9244  ;;  %9252 = vpow2.f32 %v2960_v37  ;;  %v2957_v11 = vmul.f32 %v2950_v48, %v2852_v34  ;;  %v2951_v63 = vsub.f32 0.0, %v2853_v54  ;;  %v2835_v48 = vmul.f32 0.5, %v10535_v40 }
 0x395   : > { %v2897_v41 = vmul.f32 %v9243_v26, %v2890_v39  ;;  %v2884_v59 = vmul.f32 1.0614054, %v9245_v19  ;;  %v2867_v21 = vadd.f32 1.0, %v2860_v58  ;;  %v2854_v49 = vand.u32 2147483647, %v10582_v62 }
 0x396   : > { %v2968_v0 = vmul.f32 1.442695, %v2957_v11  ;;  %v2958_v55 = vmul.f32 %v2951_v63, %v2853_v54  ;;  %vm2994_vm14 = vcmp.ge.f32.partialorder %v10582_v62, 0.0 }
 0x397   : > { %v2904_v13 = vadd.f32 1.4214138, %v2897_v41  ;;  %v2891_v57 = vadd.f32 -1.4531521, %v2884_v59  ;;  %9254 = vrcp.f32 %v2867_v21  ;;  %v2861_v47 = vmul.f32 0.3275911, %v2854_v49 }
 0x398   : > { %v10585_v14 = vpop.eup %9246  ;;  %9256 = vpow2.f32 %v2962_v8  ;;  %v2952_v6 = vsub.f32 0.0, %v2854_v49  ;;  %v2970_v21 = vmul.f32 1.442695, %v2958_v55 }
 0x399   : > { %v2911_v29 = vmul.f32 %v9243_v26, %v2904_v13  ;;  %v2898_v38 = vmul.f32 %v9245_v19, %v2891_v57  ;;  %v2885_v1 = vmul.f32 1.0614054, %v10585_v14  ;;  %v2868_v52 = vadd.f32 1.0, %v2861_v47 }
 0x39b   : > { %v2918_v16 = vadd.f32 -0.28449672, %v2911_v29  ;;  %v2905_v35 = vadd.f32 1.4214138, %v2898_v38  ;;  %v2892_v50 = vadd.f32 -1.4531521, %v2885_v1  ;;  %9258 = vrcp.f32 %v2868_v52 }
 0x39c   : > { %v10588_v2 = vpop.eup %9248  ;;  %9260 = vpow2.f32 %v2964_v45 }
 0x39d   : > { %v2925_v42 = vmul.f32 %v9243_v26, %v2918_v16  ;;  %v2912_v9 = vmul.f32 %v9245_v19, %v2905_v35  ;;  %v2899_v4 = vmul.f32 %v10585_v14, %v2892_v50  ;;  %v2886_v10 = vmul.f32 1.0614054, %v10588_v2 }
 0x39e   : > { %9262 = vpow2.f32 %v2966_v33 }
 0x39f   : > { %v2932_v31 = vadd.f32 0.2548296, %v2925_v42  ;;  %v2919_v23 = vadd.f32 -0.28449672, %v2912_v9  ;;  %v2906_v12 = vadd.f32 1.4214138, %v2899_v4  ;;  %9264 = vpow2.f32 %v2968_v0 }
 0x3a0   : > { %v10592_v28 = vpop.eup %9250  ;;  %v2893_v34 = vadd.f32 -1.4531521, %v2886_v10  ;;  %9266 = vpow2.f32 %v2970_v21 }
 0x3a1   : > { %v9253_v22 = vpop.eup %9252  ;;  %v2939_v37 = vmul.f32 %v9243_v26, %v2932_v31  ;;  %v2926_v61 = vmul.f32 %v9245_v19, %v2919_v23  ;;  %v2887_v60 = vmul.f32 1.0614054, %v10592_v28  ;;  %v2913_v53 = vmul.f32 %v10585_v14, %v2906_v12 }
 0x3a2   : > { %v2900_v20 = vmul.f32 %v10588_v2, %v2893_v34  ;;  %v2959_v26 = vmul.f32 %v2952_v6, %v2854_v49 }
 0x3a3   : > { %v2974_v39 = vmul.f32 %v9253_v22, %v2939_v37  ;;  %v2933_v58 = vadd.f32 0.2548296, %v2926_v61  ;;  %v2894_v41 = vadd.f32 -1.4531521, %v2887_v60  ;;  %v2920_v54 = vadd.f32 -0.28449672, %v2913_v53 }
 0x3a4   : > { %v10598_v59 = vpop.eup %9254  ;;  %v2907_v8 = vadd.f32 1.4214138, %v2900_v20 }
 0x3a5   : > { %v2981_v7 = vsub.f32 1.0, %v2974_v39  ;;  %v2940_v17 = vmul.f32 %v9245_v19, %v2933_v58  ;;  %v2901_v13 = vmul.f32 %v10592_v28, %v2894_v41  ;;  %v2888_v24 = vmul.f32 1.0614054, %v10598_v59  ;;  %v9257_v57 = vpop.eup %9256 }
 0x3a6   : > { %v2927_v47 = vmul.f32 %v10585_v14, %v2920_v54  ;;  %v2914_v29 = vmul.f32 %v10588_v2, %v2907_v8  ;;  %v2972_v19 = vmul.f32 1.442695, %v2959_v26 }
 0x3a7   : > { %v2995_v38 = vsub.f32 0.0, %v2981_v7  ;;  %v2975_v1 = vmul.f32 %v9257_v57, %v2940_v17  ;;  %v2908_v45 = vadd.f32 1.4214138, %v2901_v13  ;;  %v2895_v15 = vadd.f32 -1.4531521, %v2888_v24 }
 0x3a8   : > { %v2934_v49 = vadd.f32 0.2548296, %v2927_v47  ;;  %v2921_v52 = vadd.f32 -0.28449672, %v2914_v29  ;;  %v10606_v16 = vpop.eup %9258  ;;  %9268 = vpow2.f32 %v2972_v19  ;;  %v2836_v17 = vmul.f32 0.5, %v10545_v56  ;;  %v6953_v19 = vld [vmem:[%s12502_s1 + $0x170] sm:$0xff] }
 0x3a9   : > { %v3002_v35 = vsel %vm2988_vm8, %v2981_v7, %v2995_v38  ;;  %v2982_v11 = vsub.f32 1.0, %v2975_v1  ;;  %v2915_v3 = vmul.f32 %v10592_v28, %v2908_v45  ;;  %v2902_v40 = vmul.f32 %v10598_v59, %v2895_v15  ;;  %v9261_v4 = vpop.eup %9260 }
 0x3aa   : > { %v3009_v50 = vadd.f32 1.0, %v3002_v35  ;;  %v2941_v63 = vmul.f32 %v10585_v14, %v2934_v49  ;;  %v2928_v42 = vmul.f32 %v10588_v2, %v2921_v52  ;;  %v2889_v9 = vmul.f32 1.0614054, %v10606_v16  ;;  %v6969_v35 = vld [vmem:[%s12502_s1 + $0x1f0] sm:$0xff] }
 0x3ab   : > { %v2996_v10 = vsub.f32 0.0, %v2982_v11  ;;  %v2922_v33 = vadd.f32 -0.28449672, %v2915_v3  ;;  %v2909_v31 = vadd.f32 1.4214138, %v2902_v40  ;;  %v9263_v60 = vpop.eup %9262 }
 0x3ac   : > { %v3016_v23 = vmul.f32 %v3009_v50, %v2834_v51  ;;  %v2976_v0 = vmul.f32 %v9261_v4, %v2941_v63  ;;  %v2935_v12 = vadd.f32 0.2548296, %v2928_v42  ;;  %v2896_v34 = vadd.f32 -1.4531521, %v2889_v9  ;;  %v9265_v51 = vpop.eup %9264 }
 0x3ad   : > { %v3003_v55 = vsel %vm2989_vm9, %v2982_v11, %v2996_v10  ;;  %v2929_v6 = vmul.f32 %v10592_v28, %v2922_v33  ;;  %v2916_v22 = vmul.f32 %v10598_v59, %v2909_v31  ;;  %v9267_v29 = vpop.eup %9266  ;;  %v2838_v10 = vmul.f32 0.5, %v10563_v44 }
 0x3ae   : > { %3031 = vst [vmem:[#allocation4 + $0x4] sm:$0xff] %v3016_v23  ;;  %v3010_v14 = vadd.f32 1.0, %v3003_v55  ;;  %v2983_v37 = vsub.f32 1.0, %v2976_v0  ;;  %v2942_v61 = vmul.f32 %v10588_v2, %v2935_v12  ;;  %v2903_v36 = vmul.f32 %v10606_v16, %v2896_v34  ;;  %v6968_v23 = vld [vmem:[%s12502_s1 + $0x1e8] sm:$0xff]  ;;  %v6951_v12 = vld [vmem:[%s12502_s1 + $0x160] sm:$0xff] }
 0x3af   : > { %v2936_v53 = vadd.f32 0.2548296, %v2929_v6  ;;  %v2923_v20 = vadd.f32 -0.28449672, %v2916_v22  ;;  %v6967_v34 = vld [vmem:[%s12502_s1 + $0x1e0] sm:$0xff]  ;;  %v2839_v6 = vmul.f32 0.5, %v10572_v30 }
 0x3b0   : > { %v3017_v39 = vmul.f32 %v3010_v14, %v2835_v48  ;;  %v2997_v58 = vsub.f32 0.0, %v2983_v37  ;;  %v2977_v41 = vmul.f32 %v9263_v60, %v2942_v61  ;;  %v2910_v54 = vadd.f32 1.4214138, %v2903_v36  ;;  %v6950_v30 = vld [vmem:[%s12502_s1 + $0x158] sm:$0xff] }
 0x3b1   : > { %v2943_v8 = vmul.f32 %v10592_v28, %v2936_v53  ;;  %v2930_v21 = vmul.f32 %v10598_v59, %v2923_v20  ;;  %v6970_v28 = vld [vmem:[%s12502_s1 + $0x1f8] sm:$0xff]  ;;  %v6949_v20 = vld [vmem:[%s12502_s1 + $0x150] sm:$0xff] }
 0x3b2   : > { %3032 = vst [vmem:[#allocation4 + $0xc] sm:$0xff] %v3017_v39  ;;  %v3004_v26 = vsel %vm2990_vm10, %v2983_v37, %v2997_v58  ;;  %v2984_v7 = vsub.f32 1.0, %v2977_v41  ;;  %v2917_v2 = vmul.f32 %v10606_v16, %v2910_v54  ;;  %v6966_v60 = vld [vmem:[%s12502_s1 + $0x1d8] sm:$0xff]  ;;  %v2840_v39 = vmul.f32 0.5, %v10579_v5  ;;  %v6948_v5 = vld [vmem:[%s12502_s1 + $0x148] sm:$0xff] }
 0x3b3   : > { %v3011_v13 = vadd.f32 1.0, %v3004_v26  ;;  %v2978_v24 = vmul.f32 %v9265_v51, %v2943_v8  ;;  %v2937_v57 = vadd.f32 0.2548296, %v2930_v21  ;;  %v6965_v51 = vld [vmem:[%s12502_s1 + $0x1d0] sm:$0xff]  ;;  %v6964_v8 = vld [vmem:[%s12502_s1 + $0x1c8] sm:$0xff]  ;;  %v6947_v21 = vld [vmem:[%s12502_s1 + $0x140] sm:$0xff] }
 0x3b4   : > { %v2998_v48 = vsub.f32 0.0, %v2984_v7  ;;  %v2924_v47 = vadd.f32 -0.28449672, %v2917_v2  ;;  %v6963_v26 = vld [vmem:[%s12502_s1 + $0x1c0] sm:$0xff]  ;;  %vm4347_vm10 = vcmask 1045504  }
 0x3b5   : > { %v3018_v38 = vmul.f32 %v3011_v13, %v2836_v17  ;;  %v2985_v1 = vsub.f32 1.0, %v2978_v24  ;;  %v2944_v56 = vmul.f32 %v10598_v59, %v2937_v57  ;;  %v3061_v45 = vld [vmem:[#allocation4 + $0x1] sm:$0xff]  ;;  %v9269_v32 = vpop.eup %9268 }
 0x3b6   : > { %v3038_v15 = vld [vmem:[#allocation4] sm:$0xff]  ;;  %v3005_v49 = vsel %vm2991_vm11, %v2984_v7, %v2998_v48  ;;  %v2931_v52 = vmul.f32 %v10606_v16, %v2924_v47  ;;  %8270 = vmatmul.mubr.f32.vlgmr.msra.gmra.mxu1 %v3061_v45  ;;  %v6946_v17 = vld [vmem:[%s12502_s1 + $0x138] sm:$0xff]  ;;  %vm4491_vm11 = vcmask 130048  }
 0x3b7   : > { %8323 = vmatmul.mubr.f32.vlgmr.msra.gmra.mxu0 %v3038_v15  ;;  %3033 = vst [vmem:[#allocation4 + $0x14] sm:$0xff] %v3018_v38  ;;  %v3012_v11 = vadd.f32 1.0, %v3005_v49  ;;  %v2999_v59 = vsub.f32 0.0, %v2985_v1  ;;  %v2979_v3 = vmul.f32 %v9267_v29, %v2944_v56  ;;  %8344 = vmatpush3.msra.mxu1 %v6954_v27  ;;  %v6962_v13 = vld [vmem:[%s12502_s1 + $0x1b8] sm:$0xff]  ;;  %v6945_v24 = vld [vmem:[%s12502_s1 + $0x130] sm:$0xff]  ;;  %v6944_v27 = vld [vmem:[%s12502_s1 + $0x128] sm:$0xff] }
 0x3b8   : > { %8397 = vmatpush3.msra.mxu0 %v6970_v28  ;;  %v2938_v40 = vadd.f32 0.2548296, %v2931_v52  ;;  %8345 = vmatprep.subr.mxu1 %v10381_v46  ;;  %v6961_v57 = vld [vmem:[%s12502_s1 + $0x1b0] sm:$0xff]  ;;  %v10729_v48 = vld [vmem:[#allocation8] sm:$0xff]  ;;  %v6960_v28 = vld [vmem:[%s12502_s1 + $0x1a8] sm:$0xff] }
 0x3b9   : > { %8398 = vmatprep.subr.mxu0 %v10381_v46  ;;  %v3019_v50 = vmul.f32 %v3012_v11, %v2837_v18  ;;  %v3006_v63 = vsel %vm2992_vm12, %v2985_v1, %v2999_v59  ;;  %v2986_v42 = vsub.f32 1.0, %v2979_v3  ;;  %8346 = vmatpush3.msra.mxu1 %v6953_v19  ;;  %v3062_v9 = vld [vmem:[#allocation4 + $0x9] sm:$0xff]  ;;  %v6941_v49 = vld [vmem:[%s12502_s1 + $0x110] sm:$0xff]  ;;  %v6940_v19 = vld [vmem:[%s12502_s1 + $0x108] sm:$0xff]  ;;  %vm4707_vm12 = vcmask 520192  }
 0x3ba   : > { %8399 = vmatpush3.msra.mxu0 %v6969_v35  ;;  %v3039_v4 = vld [vmem:[#allocation4 + $0x8] sm:$0xff]  ;;  %v3013_v33 = vadd.f32 1.0, %v3006_v63  ;;  %v2945_v31 = vmul.f32 %v10606_v16, %v2938_v40  ;;  %8272 = vmatprep.mubr.msk.f32.mxu1 %vm9333_vm1, %v10381_v46  ;;  %v6943_v29 = vld [vmem:[%s12502_s1 + $0x120] sm:$0xff]  ;;  %v6957_v52 = vld [vmem:[%s12502_s1 + $0x190] sm:$0xff] }
 0x3bb   : > { %8325 = vmatprep.mubr.msk.f32.mxu0 %vm9333_vm1, %v10381_v46  ;;  %3034 = vst [vmem:[#allocation4 + $0x1c] sm:$0xff] %v3019_v50  ;;  %v3000_v0 = vsub.f32 0.0, %v2986_v42  ;;  %8347 = vmatprep.subr.mxu1 %v10381_v46  ;;  %v6959_v38 = vld [vmem:[%s12502_s1 + $0x1a0] sm:$0xff]  ;;  %v6942_v45 = vld [vmem:[%s12502_s1 + $0x118] sm:$0xff]  ;;  %v6956_v35 = vld [vmem:[%s12502_s1 + $0x188] sm:$0xff] }
 0x3bc   : > { %8400 = vmatprep.subr.mxu0 %v10381_v46  ;;  %v3020_v44 = vmul.f32 %v3013_v33, %v2838_v10  ;;  %v2980_v16 = vmul.f32 %v9269_v32, %v2945_v31  ;;  %8273 = vmatmul.mubr.f32.gmra.mxu1 %v3062_v9  ;;  %v6958_v15 = vld [vmem:[%s12502_s1 + $0x198] sm:$0xff]  ;;  %v6939_v18 = vld [vmem:[%s12502_s1 + $0x100] sm:$0xff]  ;;  %v6985_v63 = vld [vmem:[%s12502_s1 + $0x270] sm:$0xff] }
 0x3bd   : > { %8326 = vmatmul.mubr.f32.gmra.mxu0 %v3039_v4  ;;  %v3007_v55 = vsel %vm2993_vm13, %v2986_v42, %v3000_v0  ;;  %8348 = vmatpush3.msra.mxu1 %v6952_v25  ;;  %v6955_v11 = vld [vmem:[%s12502_s1 + $0x180] sm:$0xff]  ;;  %v6986_v59 = vld [vmem:[%s12502_s1 + $0x278] sm:$0xff]  ;;  %v7001_v42 = vld [vmem:[%s12502_s1 + $0x2f0] sm:$0xff]  ;;  %vm4704_vm13 = vcmask 516096  }
 0x3be   : > { %8401 = vmatpush3.msra.mxu0 %v6968_v23  ;;  %3035 = vst [vmem:[#allocation4 + $0x24] sm:$0xff] %v3020_v44  ;;  %v3014_v22 = vadd.f32 1.0, %v3007_v55  ;;  %v2987_v14 = vsub.f32 1.0, %v2980_v16  ;;  %8349 = vmatprep.subr.mxu1 %v10381_v46  ;;  %v3063_v43 = vld [vmem:[#allocation4 + $0x11] sm:$0xff]  ;;  %v3285_v3 = vld [vmem:[#allocation4 + $0x2] sm:$0xff] }
 0x3bf   : > { %8402 = vmatprep.subr.mxu0 %v10381_v46  ;;  %8350 = vmatpush3.msra.mxu1 %v6951_v12  ;;  %v3040_v37 = vld [vmem:[#allocation4 + $0x10] sm:$0xff]  ;;  %v3416_v40 = vld [vmem:[#allocation4 + $0x3] sm:$0xff]  ;;  %v6984_v9 = vld [vmem:[%s12502_s1 + $0x268] sm:$0xff] }
 0x3c0   : > { %8403 = vmatpush3.msra.mxu0 %v6967_v34  ;;  %v10666_v61 = vmul.f32 %v3014_v22, %v2839_v6  ;;  %v3001_v36 = vsub.f32 0.0, %v2987_v14  ;;  %8275 = vmatprep.mubr.msk.f32.mxu1 %vm9333_vm1, %v10381_v46  ;;  %v7002_v50 = vld [vmem:[%s12502_s1 + $0x2f8] sm:$0xff]  ;;  %v7000_v10 = vld [vmem:[%s12502_s1 + $0x2e8] sm:$0xff]  ;;  %v6983_v33 = vld [vmem:[%s12502_s1 + $0x260] sm:$0xff] }
 0x3c1   : > { %8328 = vmatprep.mubr.msk.f32.mxu0 %vm9333_vm1, %v10381_v46  ;;  %8351 = vmatprep.subr.mxu1 %v10381_v46  ;;  %v3286_v4 = vld [vmem:[#allocation4 + $0xa] sm:$0xff]  ;;  %v3287_v23 = vld [vmem:[#allocation4 + $0x12] sm:$0xff]  ;;  %v6981_v16 = vld [vmem:[%s12502_s1 + $0x250] sm:$0xff] }
 0x3c2   : > { %8404 = vmatprep.subr.mxu0 %v10381_v46  ;;  %3036 = vst [vmem:[#allocation4 + $0x2c] sm:$0xff] %v10666_v61  ;;  %v3008_v53 = vsel %vm2994_vm14, %v2987_v14, %v3001_v36  ;;  %8276 = vmatmul.mubr.f32.gmra.mxu1 %v3063_v43  ;;  %v3064_v41 = vld [vmem:[#allocation4 + $0x19] sm:$0xff]  ;;  %v3417_v32 = vld [vmem:[#allocation4 + $0xb] sm:$0xff] }
 0x3c3   : > { %8329 = vmatmul.mubr.f32.gmra.mxu0 %v3040_v37  ;;  %v3015_v62 = vadd.f32 1.0, %v3008_v53  ;;  %8352 = vmatpush3.msra.mxu1 %v6950_v30  ;;  %v3041_v54 = vld [vmem:[#allocation4 + $0x18] sm:$0xff]  ;;  %v6999_v31 = vld [vmem:[%s12502_s1 + $0x2e0] sm:$0xff]  ;;  %v6982_v25 = vld [vmem:[%s12502_s1 + $0x258] sm:$0xff] }
 0x3c4   : > { %8405 = vmatpush3.msra.mxu0 %v6966_v60  ;;  %8353 = vmatprep.subr.mxu1 %v10381_v46  ;;  %v3418_v0 = vld [vmem:[#allocation4 + $0x13] sm:$0xff]  ;;  %v6998_v44 = vld [vmem:[%s12502_s1 + $0x2d8] sm:$0xff]  ;;  %v6997_v12 = vld [vmem:[%s12502_s1 + $0x2d0] sm:$0xff] }
 0x3c5   : > { %8406 = vmatprep.subr.mxu0 %v10381_v46  ;;  %v3022_v58 = vmul.f32 %v3015_v62, %v2840_v39  ;;  %8354 = vmatpush3.msra.mxu1 %v6949_v20  ;;  %v3065_v7 = vld [vmem:[#allocation4 + $0x21] sm:$0xff]  ;;  %v6980_v34 = vld [vmem:[%s12502_s1 + $0x248] sm:$0xff]  ;;  %v6979_v14 = vld [vmem:[%s12502_s1 + $0x240] sm:$0xff] }
 0x3c6   : > { %8407 = vmatpush3.msra.mxu0 %v6965_v51  ;;  %8278 = vmatprep.mubr.msk.f32.mxu1 %vm9333_vm1, %v10381_v46  ;;  %v3042_v2 = vld [vmem:[#allocation4 + $0x20] sm:$0xff]  ;;  %v6996_v22 = vld [vmem:[%s12502_s1 + $0x2c8] sm:$0xff]  ;;  %v6995_v43 = vld [vmem:[%s12502_s1 + $0x2c0] sm:$0xff] }
 0x3c7   : > { %8331 = vmatprep.mubr.msk.f32.mxu0 %vm9333_vm1, %v10381_v46  ;;  %3037 = vst [vmem:[#allocation4 + $0x34] sm:$0xf] %v3022_v58  ;;  %8355 = vmatprep.subr.mxu1 %v10381_v46  ;;  %v3288_v55 = vld [vmem:[#allocation4 + $0x1a] sm:$0xff]  ;;  %v6978_v37 = vld [vmem:[%s12502_s1 + $0x238] sm:$0xff] }
 0x3c8   : > { %8408 = vmatprep.subr.mxu0 %v10381_v46  ;;  %8279 = vmatmul.mubr.f32.gmra.mxu1 %v3064_v41  ;;  %v3419_v6 = vld [vmem:[#allocation4 + $0x1b] sm:$0xff]  ;;  %v3420_v30 = vld [vmem:[#allocation4 + $0x23] sm:$0xff]  ;;  %v6975_v41 = vld [vmem:[%s12502_s1 + $0x220] sm:$0xff] }
 0x3c9   : > { %8332 = vmatmul.mubr.f32.gmra.mxu0 %v3041_v54  ;;  %8356 = vmatpush3.msra.mxu1 %v6948_v5  ;;  %v3043_v47 = vld [vmem:[#allocation4 + $0x28] sm:$0xff]  ;;  %v6977_v53 = vld [vmem:[%s12502_s1 + $0x230] sm:$0xff]  ;;  %v6976_v51 = vld [vmem:[%s12502_s1 + $0x228] sm:$0xff] }
 0x3ca   : > { %8409 = vmatpush3.msra.mxu0 %v6964_v8  ;;  %8357 = vmatprep.subr.mxu1 %v10381_v46  ;;  %v3289_v36 = vld [vmem:[#allocation4 + $0x22] sm:$0xff]  ;;  %v3290_v39 = vld [vmem:[#allocation4 + $0x2a] sm:$0xff]  ;;  %v6992_v58 = vld [vmem:[%s12502_s1 + $0x2a8] sm:$0xff] }
 0x3cb   : > { %8410 = vmatprep.subr.mxu0 %v10381_v46  ;;  %8358 = vmatpush3.msra.mxu1 %v6947_v21  ;;  %v6994_v60 = vld [vmem:[%s12502_s1 + $0x2b8] sm:$0xff]  ;;  %v6993_v20 = vld [vmem:[%s12502_s1 + $0x2b0] sm:$0xff]  ;;  %v6991_v54 = vld [vmem:[%s12502_s1 + $0x2a0] sm:$0xff] }
 0x3cc   : > { %8411 = vmatpush3.msra.mxu0 %v6963_v26  ;;  %8281 = vmatprep.mubr.msk.f32.mxu1 %vm9333_vm1, %v10381_v46  ;;  %v3421_v62 = vld [vmem:[#allocation4 + $0x2b] sm:$0xff] }
 0x3cd   : > { %8334 = vmatprep.mubr.msk.f32.mxu0 %vm9333_vm1, %v10381_v46  ;;  %8359 = vmatprep.subr.mxu1 %v10381_v46  ;;  %v6974_v5 = vld [vmem:[%s12502_s1 + $0x218] sm:$0xff] }
 0x3ce   : > { %8412 = vmatprep.subr.mxu0 %v10381_v46  ;;  %8282 = vmatmul.mubr.f32.gmra.mxu1 %v3065_v7  ;;  %v3066_v46 = vld [vmem:[#allocation4 + $0x29] sm:$0xff]  ;;  %v3067_v1 = vld [vmem:[#allocation4 + $0x31] sm:$0x1f]  ;;  %v6973_v7 = vld [vmem:[%s12502_s1 + $0x210] sm:$0xff] }
 0x3cf   : > { %8335 = vmatmul.mubr.f32.gmra.mxu0 %v3042_v2  ;;  %8360 = vmatpush3.msra.mxu1 %v6946_v17  ;;  %v3044_v56 = vld [vmem:[#allocation4 + $0x30] sm:$0x1f]  ;;  %v6990_v26 = vld [vmem:[%s12502_s1 + $0x298] sm:$0xff]  ;;  %v6989_v2 = vld [vmem:[%s12502_s1 + $0x290] sm:$0xff] }
 0x3d0   : > { %8413 = vmatpush3.msra.mxu0 %v6962_v13  ;;  %8361 = vmatprep.subr.mxu1 %v10729_v48  ;;  %v3291_v8 = vld [vmem:[#allocation4 + $0x32] sm:$0x1f]  ;;  %v6972_v17 = vld [vmem:[%s12502_s1 + $0x208] sm:$0xff] }
 0x3d1   : > { %8414 = vmatprep.subr.mxu0 %v10729_v48  ;;  %8362 = vmatpush3.msra.mxu1 %v6945_v24  ;;  %v3422_v21 = vld [vmem:[#allocation4 + $0x33] sm:$0x1f]  ;;  %v6988_v13 = vld [vmem:[%s12502_s1 + $0x288] sm:$0xff] }
 0x3d2   : > { %8415 = vmatpush3.msra.mxu0 %v6961_v57  ;;  %8284 = vmatprep.mubr.msk.f32.mxu1 %vm9333_vm1, %v10729_v48  ;;  %v6971_v24 = vld [vmem:[%s12502_s1 + $0x200] sm:$0xff] }
 0x3d3   : > { %8337 = vmatprep.mubr.msk.f32.mxu0 %vm9333_vm1, %v10729_v48  ;;  %8363 = vmatprep.subr.mxu1 %v10729_v48  ;;  %v6987_v57 = vld [vmem:[%s12502_s1 + $0x280] sm:$0xff] }
 0x3d4   : > { %8416 = vmatprep.subr.mxu0 %v10729_v48  ;;  %8285 = vmatmul.mubr.f32.gmra.mxu1 %v3066_v46  ;;  %v7018_v46 = vld [vmem:[%s12502_s1 + $0x378] sm:$0xff] }
 0x3d5   : > { %8338 = vmatmul.mubr.f32.gmra.mxu0 %v3043_v47  ;;  %8364 = vmatpush3.msra.mxu1 %v6944_v27  ;;  %v3547_v47 = vld [vmem:[#allocation4 + $0x4] sm:$0xff] }
 0x3d6   : > { %8417 = vmatpush3.msra.mxu0 %v6960_v28  ;;  %8365 = vmatprep.subr.mxu1 %v10729_v48  ;;  %v3678_v27 = vld [vmem:[#allocation4 + $0x5] sm:$0xff] }
 0x3d7   : > { %8418 = vmatprep.subr.mxu0 %v10729_v48  ;;  %8366 = vmatpush3.msra.mxu1 %v6943_v29  ;;  %v7034_v28 = vld [vmem:[%s12502_s1 + $0x3f8] sm:$0xff]  ;;  %v7017_v29 = vld [vmem:[%s12502_s1 + $0x370] sm:$0xff] }
 0x3d8   : > { %8419 = vmatpush3.msra.mxu0 %v6959_v38  ;;  %8287 = vmatprep.mubr.msk.f32.mxu1 %vm9333_vm1, %v10729_v48  ;;  %v7033_v38 = vld [vmem:[%s12502_s1 + $0x3f0] sm:$0xff] }
 0x3d9   : > { %8340 = vmatprep.mubr.msk.f32.mxu0 %vm9333_vm1, %v10729_v48  ;;  %8367 = vmatprep.subr.mxu1 %v10729_v48 }
 0x3da   : > { %8420 = vmatprep.subr.mxu0 %v10729_v48  ;;  %8288 = vmatmul.mubr.f32.gmra.mxu1 %v3067_v1  ;;  %v7016_v1 = vld [vmem:[%s12502_s1 + $0x368] sm:$0xff] }
 0x3db   : > { %8341 = vmatmul.mubr.f32.gmra.mxu0 %v3044_v56  ;;  %8368 = vmatpush3.msra.mxu1 %v6942_v45  ;;  %v3548_v56 = vld [vmem:[#allocation4 + $0xc] sm:$0xff] }
 0x3dc   : > { %8421 = vmatpush3.msra.mxu0 %v6958_v15  ;;  %8369 = vmatprep.subr.mxu1 %v10729_v48  ;;  %v3679_v45 = vld [vmem:[#allocation4 + $0xd] sm:$0xff]  ;;  %v7032_v15 = vld [vmem:[%s12502_s1 + $0x3e8] sm:$0xff] }
 0x3dd   : > { %8422 = vmatprep.subr.mxu0 %v10729_v48  ;;  %8370 = vmatpush3.msra.mxu1 %v6941_v49  ;;  %v7015_v49 = vld [vmem:[%s12502_s1 + $0x360] sm:$0xff] }
 0x3de   : > { %8423 = vmatpush3.msra.mxu0 %v6957_v52  ;;  %8371 = vmatprep.subr.mxu1 %v10729_v48  ;;  %v7031_v52 = vld [vmem:[%s12502_s1 + $0x3e0] sm:$0xff] }
 0x3df   : > { %8424 = vmatprep.subr.mxu0 %v10729_v48  ;;  %8372 = vmatpush3.msra.mxu1 %v6940_v19  ;;  %v7014_v19 = vld [vmem:[%s12502_s1 + $0x358] sm:$0xff] }
 0x3e0   : > { %8425 = vmatpush3.msra.mxu0 %v6956_v35  ;;  %8373 = vmatprep.subr.mxu1 %v10729_v48  ;;  %v3549_v35 = vld [vmem:[#allocation4 + $0x14] sm:$0xff] }
 0x3e1   : > { %8426 = vmatprep.subr.mxu0 %v10729_v48  ;;  %8374 = vmatpush3.msra.mxu1 %v6939_v18  ;;  %v3680_v18 = vld [vmem:[#allocation4 + $0x15] sm:$0xff] }
 0x3e2   : > { %8375 = vmatprep.mubr.msk.f32.mxu1 %vm9333_vm1, %v10729_v48  ;;  %8427 = vmatpush3.msra.mxu0 %v6955_v11  ;;  %v7030_v11 = vld [vmem:[%s12502_s1 + $0x3d8] sm:$0xff] }
 0x3e3   : > { %8428 = vmatprep.mubr.msk.f32.mxu0 %vm9333_vm1, %v10729_v48  ;;  %8376 = vmatmul.mubr.f32.vlgmr.msra.gmra.mxu1 %v3285_v3  ;;  %v7029_v3 = vld [vmem:[%s12502_s1 + $0x3d0] sm:$0xff] }
 0x3e4   : > { %8429 = vmatmul.mubr.f32.vlgmr.msra.gmra.mxu0 %v3416_v40  ;;  %8449 = vmatprep.subr.mxu1 %v10729_v48  ;;  %v7012_v40 = vld [vmem:[%s12502_s1 + $0x348] sm:$0xff] }
 0x3e5   : > { %8502 = vmatprep.subr.mxu0 %v10729_v48  ;;  %8450 = vmatpush3.msra.mxu1 %v6986_v59  ;;  %v7013_v59 = vld [vmem:[%s12502_s1 + $0x350] sm:$0xff] }
 0x3e6   : > { %8503 = vmatpush3.msra.mxu0 %v7002_v50  ;;  %8451 = vmatprep.subr.mxu1 %v10729_v48  ;;  %v3550_v50 = vld [vmem:[#allocation4 + $0x1c] sm:$0xff] }
 0x3e7   : > { %8504 = vmatprep.subr.mxu0 %v10729_v48  ;;  %8378 = vmatprep.mubr.msk.f32.mxu1 %vm9333_vm1, %v10729_v48 }
 0x3e8   : > { %8431 = vmatprep.mubr.msk.f32.mxu0 %vm9333_vm1, %v10729_v48  ;;  %8452 = vmatpush3.msra.mxu1 %v6985_v63  ;;  %v3681_v63 = vld [vmem:[#allocation4 + $0x1d] sm:$0xff] }
 0x3e9   : > { %8505 = vmatpush3.msra.mxu0 %v7001_v42  ;;  %8379 = vmatmul.mubr.f32.gmra.mxu1 %v3286_v4  ;;  %v7028_v42 = vld [vmem:[%s12502_s1 + $0x3c8] sm:$0xff]  ;;  %v7027_v4 = vld [vmem:[%s12502_s1 + $0x3c0] sm:$0xff] }
 0x3ea   : > { %8432 = vmatmul.mubr.f32.gmra.mxu0 %v3417_v32  ;;  %8453 = vmatprep.subr.mxu1 %v10729_v48  ;;  %v7010_v32 = vld [vmem:[%s12502_s1 + $0x338] sm:$0xff] }
 0x3eb   : > { %8506 = vmatprep.subr.mxu0 %v10729_v48  ;;  %8454 = vmatpush3.msra.mxu1 %v6984_v9  ;;  %v7011_v9 = vld [vmem:[%s12502_s1 + $0x340] sm:$0xff] }
 0x3ec   : > { %8507 = vmatpush3.msra.mxu0 %v7000_v10  ;;  %8455 = vmatprep.subr.mxu1 %v10729_v48  ;;  %v3551_v10 = vld [vmem:[#allocation4 + $0x24] sm:$0xff] }
 0x3ed   : > { %8508 = vmatprep.subr.mxu0 %v10729_v48  ;;  %8381 = vmatprep.mubr.msk.f32.mxu1 %vm9333_vm1, %v10729_v48 }
 0x3ee   : > { %8434 = vmatprep.mubr.msk.f32.mxu0 %vm9333_vm1, %v10729_v48  ;;  %8456 = vmatpush3.msra.mxu1 %v6983_v33  ;;  %v3682_v33 = vld [vmem:[#allocation4 + $0x25] sm:$0xff] }
 0x3ef   : > { %8509 = vmatpush3.msra.mxu0 %v6999_v31  ;;  %8382 = vmatmul.mubr.f32.gmra.mxu1 %v3287_v23  ;;  %v7026_v31 = vld [vmem:[%s12502_s1 + $0x3b8] sm:$0xff]  ;;  %v7025_v23 = vld [vmem:[%s12502_s1 + $0x3b0] sm:$0xff] }
 0x3f0   : > { %8435 = vmatmul.mubr.f32.gmra.mxu0 %v3418_v0  ;;  %8457 = vmatprep.subr.mxu1 %v10729_v48  ;;  %v3683_v0 = vld [vmem:[#allocation4 + $0x2d] sm:$0xff] }
 0x3f1   : > { %8510 = vmatprep.subr.mxu0 %v10729_v48  ;;  %8458 = vmatpush3.msra.mxu1 %v6982_v25  ;;  %v7009_v25 = vld [vmem:[%s12502_s1 + $0x330] sm:$0xff] }
 0x3f2   : > { %8511 = vmatpush3.msra.mxu0 %v6998_v44  ;;  %8459 = vmatprep.subr.mxu1 %v10729_v48  ;;  %v7008_v44 = vld [vmem:[%s12502_s1 + $0x328] sm:$0xff] }
 0x3f3   : > { %8512 = vmatprep.subr.mxu0 %v10729_v48  ;;  %8384 = vmatprep.mubr.msk.f32.mxu1 %vm9333_vm1, %v10729_v48 }
 0x3f4   : > { %8437 = vmatprep.mubr.msk.f32.mxu0 %vm9333_vm1, %v10729_v48  ;;  %8460 = vmatpush3.msra.mxu1 %v6981_v16  ;;  %v7024_v16 = vld [vmem:[%s12502_s1 + $0x3a8] sm:$0xff] }
 0x3f5   : > { %8513 = vmatpush3.msra.mxu0 %v6997_v12  ;;  %8385 = vmatmul.mubr.f32.gmra.mxu1 %v3288_v55  ;;  %v7007_v12 = vld [vmem:[%s12502_s1 + $0x320] sm:$0xff] }
 0x3f6   : > { %8438 = vmatmul.mubr.f32.gmra.mxu0 %v3419_v6  ;;  %8461 = vmatprep.subr.mxu1 %v10729_v48  ;;  %v3553_v55 = vld [vmem:[#allocation4 + $0x34] sm:$0x1f] }
 0x3f7   : > { %8514 = vmatprep.subr.mxu0 %v10729_v48  ;;  %8462 = vmatpush3.msra.mxu1 %v6980_v34  ;;  %v7023_v34 = vld [vmem:[%s12502_s1 + $0x3a0] sm:$0xff] }
 0x3f8   : > { %8515 = vmatpush3.msra.mxu0 %v6996_v22  ;;  %8463 = vmatprep.subr.mxu1 %v10729_v48  ;;  %v3684_v6 = vld [vmem:[#allocation4 + $0x35] sm:$0x1f]  ;;  %v7022_v22 = vld [vmem:[%s12502_s1 + $0x398] sm:$0xff] }
 0x3f9   : > { %8516 = vmatprep.subr.mxu0 %v10729_v48  ;;  %8387 = vmatprep.mubr.msk.f32.mxu1 %vm9333_vm1, %v10729_v48 }
 0x3fa   : > { %8440 = vmatprep.mubr.msk.f32.mxu0 %vm9333_vm1, %v10729_v48  ;;  %8464 = vmatpush3.msra.mxu1 %v6979_v14  ;;  %v7005_v14 = vld [vmem:[%s12502_s1 + $0x310] sm:$0xff] }
 0x3fb   : > { %8517 = vmatpush3.msra.mxu0 %v6995_v43  ;;  %8388 = vmatmul.mubr.f32.gmra.mxu1 %v3289_v36  ;;  %v7021_v43 = vld [vmem:[%s12502_s1 + $0x390] sm:$0xff]  ;;  %v7020_v36 = vld [vmem:[%s12502_s1 + $0x388] sm:$0xff] }
 0x3fc   : > { %8441 = vmatmul.mubr.f32.gmra.mxu0 %v3420_v30  ;;  %8465 = vmatprep.subr.mxu1 %v10729_v48  ;;  %v7003_v30 = vld [vmem:[%s12502_s1 + $0x300] sm:$0xff] }
 0x3fd   : > { %8518 = vmatprep.subr.mxu0 %v10729_v48  ;;  %8466 = vmatpush3.msra.mxu1 %v6978_v37  ;;  %v7004_v37 = vld [vmem:[%s12502_s1 + $0x308] sm:$0xff] }
 0x3fe   : > { %8519 = vmatpush3.msra.mxu0 %v6994_v60  ;;  %8467 = vmatprep.subr.mxu1 %v10729_v48  ;;  %v7019_v60 = vld [vmem:[%s12502_s1 + $0x380] sm:$0xff] }
 0x3ff   : > { %8520 = vmatprep.subr.mxu0 %v10729_v48  ;;  %8390 = vmatprep.mubr.msk.f32.mxu1 %vm9333_vm1, %v10729_v48 }
 0x400   : > { %8443 = vmatprep.mubr.msk.f32.mxu0 %vm9333_vm1, %v10729_v48  ;;  %8468 = vmatpush3.msra.mxu1 %v6977_v53  ;;  %v3809_v53 = vld [vmem:[#allocation4 + $0x6] sm:$0xff] }
 0x401   : > { %8521 = vmatpush3.msra.mxu0 %v6993_v20  ;;  %8391 = vmatmul.mubr.f32.gmra.mxu1 %v3290_v39  ;;  %v3940_v20 = vld [vmem:[#allocation4 + $0x7] sm:$0xff]  ;;  %v3941_v39 = vld [vmem:[#allocation4 + $0xf] sm:$0xff] }
 0x402   : > { %8444 = vmatmul.mubr.f32.gmra.mxu0 %v3421_v62  ;;  %8469 = vmatprep.subr.mxu1 %v10729_v48  ;;  %v3811_v62 = vld [vmem:[#allocation4 + $0x16] sm:$0xff] }
 0x403   : > { %8522 = vmatprep.subr.mxu0 %v10729_v48  ;;  %8470 = vmatpush3.msra.mxu1 %v6976_v51  ;;  %v3810_v51 = vld [vmem:[#allocation4 + $0xe] sm:$0xff] }
 0x404   : > { %8523 = vmatpush3.msra.mxu0 %v6992_v58  ;;  %8471 = vmatprep.subr.mxu1 %v10729_v48  ;;  %v3942_v58 = vld [vmem:[#allocation4 + $0x17] sm:$0xff] }
 0x405   : > { %8524 = vmatprep.subr.mxu0 %v10729_v48  ;;  %8393 = vmatprep.mubr.msk.f32.mxu1 %vm9333_vm1, %v10729_v48 }
 0x406   : > { %8446 = vmatprep.mubr.msk.f32.mxu0 %vm9333_vm1, %v10729_v48  ;;  %8472 = vmatpush3.msra.mxu1 %v6975_v41  ;;  %v3812_v41 = vld [vmem:[#allocation4 + $0x1e] sm:$0xff] }
 0x407   : > { %8525 = vmatpush3.msra.mxu0 %v6991_v54  ;;  %8394 = vmatmul.mubr.f32.gmra.mxu1 %v3291_v8  ;;  %v3943_v54 = vld [vmem:[#allocation4 + $0x1f] sm:$0xff]  ;;  %v3944_v8 = vld [vmem:[#allocation4 + $0x27] sm:$0xff] }
 0x408   : > { %8447 = vmatmul.mubr.f32.gmra.mxu0 %v3422_v21  ;;  %8473 = vmatprep.subr.mxu1 %v10729_v48  ;;  %v3814_v21 = vld [vmem:[#allocation4 + $0x2e] sm:$0xff] }
 0x409   : > { %8526 = vmatprep.subr.mxu0 %v10729_v48  ;;  %8474 = vmatpush3.msra.mxu1 %v6974_v5  ;;  %v3813_v5 = vld [vmem:[#allocation4 + $0x26] sm:$0xff] }
 0x40a   : > { %8527 = vmatpush3.msra.mxu0 %v6990_v26  ;;  %8475 = vmatprep.subr.mxu1 %v10729_v48  ;;  %v3945_v26 = vld [vmem:[#allocation4 + $0x2f] sm:$0xff] }
 0x40b   : > { %8528 = vmatprep.subr.mxu0 %v10729_v48  ;;  %8476 = vmatpush3.msra.mxu1 %v6973_v7  ;;  %v3815_v7 = vld [vmem:[#allocation4 + $0x36] sm:$0x1f] }
 0x40c   : > { %8529 = vmatpush3.msra.mxu0 %v6989_v2  ;;  %8477 = vmatprep.subr.mxu1 %v10729_v48  ;;  %v3946_v2 = vld [vmem:[#allocation4 + $0x37] sm:$0x1f] }
 0x40d   : > { %8530 = vmatprep.subr.mxu0 %v10729_v48  ;;  %8478 = vmatpush3.msra.mxu1 %v6972_v17 }
 0x40e   : > { %8531 = vmatpush3.msra.mxu0 %v6988_v13  ;;  %8479 = vmatprep.subr.mxu1 %v10729_v48 }
 0x40f   : > { %8532 = vmatprep.subr.mxu0 %v10729_v48  ;;  %8480 = vmatpush3.msra.mxu1 %v6971_v24 }
 0x410   : > { %8481 = vmatprep.mubr.msk.f32.mxu1 %vm9333_vm1, %v10729_v48  ;;  %8533 = vmatpush3.msra.mxu0 %v6987_v57 }
 0x411   : > { %8534 = vmatprep.mubr.msk.f32.mxu0 %vm9333_vm1, %v10729_v48  ;;  %8482 = vmatmul.mubr.f32.vlgmr.msra.gmra.mxu1 %v3547_v47 }
 0x412   : > { %8535 = vmatmul.mubr.f32.vlgmr.msra.gmra.mxu0 %v3678_v27  ;;  %8555 = vmatprep.subr.mxu1 %v10729_v48 }
 0x413   : > { %8608 = vmatprep.subr.mxu0 %v10729_v48  ;;  %8556 = vmatpush3.msra.mxu1 %v7018_v46 }
 0x414   : > { %8609 = vmatpush3.msra.mxu0 %v7034_v28  ;;  %8557 = vmatprep.subr.mxu1 %v10729_v48 }
 0x415   : > { %8610 = vmatprep.subr.mxu0 %v10729_v48  ;;  %8484 = vmatprep.mubr.msk.f32.mxu1 %vm9333_vm1, %v10729_v48 }
 0x416   : > { %8537 = vmatprep.mubr.msk.f32.mxu0 %vm9333_vm1, %v10729_v48  ;;  %8558 = vmatpush3.msra.mxu1 %v7017_v29 }
 0x417   : > { %8611 = vmatpush3.msra.mxu0 %v7033_v38  ;;  %8485 = vmatmul.mubr.f32.gmra.mxu1 %v3548_v56 }
 0x418   : > { %8538 = vmatmul.mubr.f32.gmra.mxu0 %v3679_v45  ;;  %8559 = vmatprep.subr.mxu1 %v10729_v48 }
 0x419   : > { %8612 = vmatprep.subr.mxu0 %v10729_v48  ;;  %8560 = vmatpush3.msra.mxu1 %v7016_v1 }
 0x41a   : > { %8613 = vmatpush3.msra.mxu0 %v7032_v15  ;;  %8561 = vmatprep.subr.mxu1 %v10729_v48 }
 0x41b   : > { %8614 = vmatprep.subr.mxu0 %v10729_v48  ;;  %8487 = vmatprep.mubr.msk.f32.mxu1 %vm9333_vm1, %v10729_v48 }
 0x41c   : > { %8540 = vmatprep.mubr.msk.f32.mxu0 %vm9333_vm1, %v10729_v48  ;;  %8562 = vmatpush3.msra.mxu1 %v7015_v49 }
 0x41d   : > { %8615 = vmatpush3.msra.mxu0 %v7031_v52  ;;  %8488 = vmatmul.mubr.f32.gmra.mxu1 %v3549_v35 }
 0x41e   : > { %8541 = vmatmul.mubr.f32.gmra.mxu0 %v3680_v18  ;;  %8563 = vmatprep.subr.mxu1 %v10729_v48 }
 0x41f   : > { %8616 = vmatprep.subr.mxu0 %v10729_v48  ;;  %8564 = vmatpush3.msra.mxu1 %v7014_v19 }
 0x420   : > { %8617 = vmatpush3.msra.mxu0 %v7030_v11  ;;  %8565 = vmatprep.subr.mxu1 %v10729_v48 }
 0x421   : > { %8618 = vmatprep.subr.mxu0 %v10729_v48  ;;  %8490 = vmatprep.mubr.msk.f32.mxu1 %vm9333_vm1, %v10729_v48 }
 0x422   : > { %8543 = vmatprep.mubr.msk.f32.mxu0 %vm9333_vm1, %v10729_v48  ;;  %8566 = vmatpush3.msra.mxu1 %v7013_v59 }
 0x423   : > { %8619 = vmatpush3.msra.mxu0 %v7029_v3  ;;  %8491 = vmatmul.mubr.f32.gmra.mxu1 %v3550_v50 }
 0x424   : > { %8544 = vmatmul.mubr.f32.gmra.mxu0 %v3681_v63  ;;  %8567 = vmatprep.subr.mxu1 %v10729_v48 }
 0x425   : > { %8620 = vmatprep.subr.mxu0 %v10729_v48  ;;  %8568 = vmatpush3.msra.mxu1 %v7012_v40 }
 0x426   : > { %8621 = vmatpush3.msra.mxu0 %v7028_v42  ;;  %8569 = vmatprep.subr.mxu1 %v10729_v48 }
 0x427   : > { %8622 = vmatprep.subr.mxu0 %v10729_v48  ;;  %8493 = vmatprep.mubr.msk.f32.mxu1 %vm9333_vm1, %v10729_v48 }
 0x428   : > { %8546 = vmatprep.mubr.msk.f32.mxu0 %vm9333_vm1, %v10729_v48  ;;  %8570 = vmatpush3.msra.mxu1 %v7011_v9 }
 0x429   : > { %8623 = vmatpush3.msra.mxu0 %v7027_v4  ;;  %8494 = vmatmul.mubr.f32.gmra.mxu1 %v3551_v10 }
 0x42a   : > { %8547 = vmatmul.mubr.f32.gmra.mxu0 %v3682_v33  ;;  %8571 = vmatprep.subr.mxu1 %v10729_v48 }
 0x42b   : > { %8624 = vmatprep.subr.mxu0 %v10729_v48  ;;  %8572 = vmatpush3.msra.mxu1 %v7010_v32 }
 0x42c   : > { %8625 = vmatpush3.msra.mxu0 %v7026_v31  ;;  %8573 = vmatprep.subr.mxu1 %v10729_v48 }
 0x42d   : > { %8626 = vmatprep.subr.mxu0 %v10729_v48  ;;  %8496 = vmatprep.mubr.msk.f32.mxu1 %vm9333_vm1, %v10729_v48 }
 0x42e   : > { %8549 = vmatprep.mubr.msk.f32.mxu0 %vm9333_vm1, %v10729_v48  ;;  %8574 = vmatpush3.msra.mxu1 %v7009_v25 }
 0x42f   : > { %8627 = vmatpush3.msra.mxu0 %v7025_v23  ;;  %8497 = vmatmul.mubr.f32.gmra.mxu1 %v10666_v61  ;;  %v7006_v61 = vld [vmem:[%s12502_s1 + $0x318] sm:$0xff] }
 0x430   : > { %8550 = vmatmul.mubr.f32.gmra.mxu0 %v3683_v0  ;;  %8575 = vmatprep.subr.mxu1 %v10729_v48 }
 0x431   : > { %8628 = vmatprep.subr.mxu0 %v10729_v48  ;;  %8576 = vmatpush3.msra.mxu1 %v7008_v44 }
 0x432   : > { %8629 = vmatpush3.msra.mxu0 %v7024_v16  ;;  %8577 = vmatprep.subr.mxu1 %v10729_v48 }
 0x433   : > { %8630 = vmatprep.subr.mxu0 %v10729_v48  ;;  %8499 = vmatprep.mubr.msk.f32.mxu1 %vm9333_vm1, %v10729_v48 }
 0x434   : > { %8552 = vmatprep.mubr.msk.f32.mxu0 %vm9333_vm1, %v10729_v48  ;;  %8578 = vmatpush3.msra.mxu1 %v7007_v12 }
 0x435   : > { %8631 = vmatpush3.msra.mxu0 %v7023_v34  ;;  %8500 = vmatmul.mubr.f32.gmra.mxu1 %v3553_v55 }
 0x436   : > { %8553 = vmatmul.mubr.f32.gmra.mxu0 %v3684_v6  ;;  %8579 = vmatprep.subr.mxu1 %v10729_v48 }
 0x437   : > { %8632 = vmatprep.subr.mxu0 %v10729_v48  ;;  %8580 = vmatpush3.msra.mxu1 %v7006_v61 }
 0x438   : > { %8633 = vmatpush3.msra.mxu0 %v7022_v22  ;;  %8581 = vmatprep.subr.mxu1 %v10729_v48 }
 0x439   : > { %8634 = vmatprep.subr.mxu0 %v10729_v48  ;;  %8582 = vmatpush3.msra.mxu1 %v7005_v14 }
 0x43a   : > { %8635 = vmatpush3.msra.mxu0 %v7021_v43  ;;  %8583 = vmatprep.subr.mxu1 %v10729_v48 }
 0x43b   : > { %8636 = vmatprep.subr.mxu0 %v10729_v48  ;;  %8584 = vmatpush3.msra.mxu1 %v7004_v37 }
 0x43c   : > { %8637 = vmatpush3.msra.mxu0 %v7020_v36  ;;  %8585 = vmatprep.subr.mxu1 %v10729_v48 }
 0x43d   : > { %8638 = vmatprep.subr.mxu0 %v10729_v48  ;;  %8586 = vmatpush3.msra.mxu1 %v7003_v30 }
 0x43e   : > { %8587 = vmatprep.mubr.msk.f32.mxu1 %vm9333_vm1, %v10729_v48  ;;  %8639 = vmatpush3.msra.mxu0 %v7019_v60 }
 0x43f   : > { %8640 = vmatprep.mubr.msk.f32.mxu0 %vm9333_vm1, %v10729_v48  ;;  %8588 = vmatmul.mubr.f32.vlgmr.msra.gmra.mxu1 %v3809_v53 }
 0x440   : > { %8641 = vmatmul.mubr.f32.vlgmr.msra.gmra.mxu0 %v3940_v20  ;;  %8590 = vmatprep.mubr.msk.f32.mxu1 %vm9333_vm1, %v10729_v48 }
 0x441   : > { %8643 = vmatprep.mubr.msk.f32.mxu0 %vm9333_vm1, %v10729_v48 }
 0x443   : > { %8591 = vmatmul.mubr.f32.gmra.mxu1 %v3810_v51 }
 0x444   : > { %8644 = vmatmul.mubr.f32.gmra.mxu0 %v3941_v39  ;;  %8593 = vmatprep.mubr.msk.f32.mxu1 %vm9333_vm1, %v10729_v48 }
 0x445   : > { %8646 = vmatprep.mubr.msk.f32.mxu0 %vm9333_vm1, %v10729_v48 }
 0x447   : > { %8594 = vmatmul.mubr.f32.gmra.mxu1 %v3811_v62 }
 0x448   : > { %8647 = vmatmul.mubr.f32.gmra.mxu0 %v3942_v58  ;;  %8596 = vmatprep.mubr.msk.f32.mxu1 %vm9333_vm1, %v10729_v48 }
 0x449   : > { %8649 = vmatprep.mubr.msk.f32.mxu0 %vm9333_vm1, %v10729_v48 }
 0x44b   : > { %8597 = vmatmul.mubr.f32.gmra.mxu1 %v3812_v41 }
 0x44c   : > { %8650 = vmatmul.mubr.f32.gmra.mxu0 %v3943_v54  ;;  %8599 = vmatprep.mubr.msk.f32.mxu1 %vm9333_vm1, %v10729_v48 }
 0x44d   : > { %8652 = vmatprep.mubr.msk.f32.mxu0 %vm9333_vm1, %v10729_v48 }
 0x44f   : > { %8600 = vmatmul.mubr.f32.gmra.mxu1 %v3813_v5 }
 0x450   : > { %8653 = vmatmul.mubr.f32.gmra.mxu0 %v3944_v8  ;;  %8602 = vmatprep.mubr.msk.f32.mxu1 %vm9333_vm1, %v10729_v48 }
 0x451   : > { %8655 = vmatprep.mubr.msk.f32.mxu0 %vm9333_vm1, %v10729_v48 }
 0x453   : > { %8603 = vmatmul.mubr.f32.gmra.mxu1 %v3814_v21 }
 0x454   : > { %8656 = vmatmul.mubr.f32.gmra.mxu0 %v3945_v26  ;;  %8605 = vmatprep.mubr.msk.f32.mxu1 %vm9333_vm1, %v10729_v48 }
 0x455   : > { %8658 = vmatprep.mubr.msk.f32.mxu0 %vm9333_vm1, %v10729_v48 }
 0x457   : > { %8606 = vmatmul.mubr.f32.gmra.mxu1 %v3815_v7 }
 0x458   : > { %8659 = vmatmul.mubr.f32.gmra.mxu0 %v3946_v2 }
 0x476   : > { %v3151_v17 = vpop.f32.mrf.mxu1 }
 0x477   : > { %v3251_v13 = vpop.f32.mrf.mxu0 }
 0x478   : > { %v3252_v24 = vadd.f32 %v3251_v13, %v3151_v17  ;;  %v8271_v57 = vpop.f32.mrf.mxu1 }
 0x479   : > { %v8324_v46 = vpop.f32.mrf.mxu0 }
 0x47c   : > { %v3156_v47 = vpop.f32.mrf.mxu1 }
 0x47d   : > { %v3256_v27 = vpop.f32.mrf.mxu0 }
 0x47e   : > { %v3257_v28 = vadd.f32 %v3256_v27, %v3156_v47  ;;  %v8274_v29 = vpop.f32.mrf.mxu1 }
 0x47f   : > { %v8327_v38 = vpop.f32.mrf.mxu0 }
 0x482   : > { %v3161_v1 = vpop.f32.mrf.mxu1 }
 0x483   : > { %v3261_v56 = vpop.f32.mrf.mxu0 }
 0x484   : > { %v3262_v45 = vadd.f32 %v3261_v56, %v3161_v1  ;;  %v8277_v15 = vpop.f32.mrf.mxu1 }
 0x485   : > { %v8330_v49 = vpop.f32.mrf.mxu0 }
 0x488   : > { %v3166_v48 = vpop.f32.mrf.mxu1 }
 0x489   : > { %v3266_v52 = vpop.f32.mrf.mxu0 }
 0x48a   : > { %v3267_v19 = vadd.f32 %v3266_v52, %v3166_v48  ;;  %v8280_v35 = vpop.f32.mrf.mxu1 }
 0x48b   : > { %v8333_v18 = vpop.f32.mrf.mxu0 }
 0x48e   : > { %v3171_v11 = vpop.f32.mrf.mxu1 }
 0x48f   : > { %v3271_v59 = vpop.f32.mrf.mxu0 }
 0x490   : > { %v3272_v3 = vadd.f32 %v3271_v59, %v3171_v11  ;;  %v8283_v40 = vpop.f32.mrf.mxu1 }
 0x491   : > { %v8336_v50 = vpop.f32.mrf.mxu0 }
 0x494   : > { %v3176_v63 = vpop.f32.mrf.mxu1 }
 0x495   : > { %v3276_v42 = vpop.f32.mrf.mxu0 }
 0x496   : > { %v3277_v9 = vadd.f32 %v3276_v42, %v3176_v63  ;;  %v8286_v4 = vpop.f32.mrf.mxu1 }
 0x497   : > { %v8339_v32 = vpop.f32.mrf.mxu0 }
 0x49a   : > { %v3181_v10 = vpop.f32.mrf.mxu1 }
 0x49b   : > { %v3281_v33 = vpop.f32.mrf.mxu0 }
 0x49c   : > { %v3282_v31 = vadd.f32 %v3281_v33, %v3181_v10  ;;  %v8289_v25 = vpop.f32.mrf.mxu1  ;;  %v4465_v33 = vld [vmem:[%s12504_s4 + $0xf8] sm:$0xff] }
 0x49d   : > { %v8342_v23 = vpop.f32.mrf.mxu0  ;;  %7563 = vmatprep.subr.mxu0 %v4465_v33 }
 0x49e   : > { %v4449_v23 = vld [vmem:[%s12504_s4 + $0x78] sm:$0xff] }
 0x49f   : > { %7564 = vmatpush3.msra.mxu0 %v4449_v23 }
 0x4a3   : > { %v3375_v0 = vpop.f32.mrf.mxu1 }
 0x4a4   : > { %v3506_v44 = vpop.f32.mrf.mxu0  ;;  %v3409_v16 = vadd.f32 %v3375_v0, %v3252_v24  ;;  %v4464_v0 = vld [vmem:[%s12504_s4 + $0xf0] sm:$0xff] }
 0x4a5   : > { %v8377_v12 = vpop.f32.mrf.mxu1  ;;  %7565 = vmatprep.subr.mxu0 %v4464_v0 }
 0x4a6   : > { %v8430_v34 = vpop.f32.mrf.mxu0  ;;  %v11130_v61 = vadd.f32 %v3506_v44, %v3409_v16  ;;  %v4338_v44 = vld [vmem:[%s12475_s15] sm:$0xff]  ;;  %v4448_v16 = vld [vmem:[%s12504_s4 + $0x70] sm:$0xff]  ;;  %v4463_v12 = vld [vmem:[%s12504_s4 + $0xe8] sm:$0xff] }
 0x4a7   : > { %8675 = vmatprep.mubr.msk.f32.mxu1 %vm4340_vm15, %v4338_v44  ;;  %7566 = vmatpush3.msra.mxu0 %v4448_v16  ;;  %v4451_v44 = vld [vmem:[%s12504_s4 + $0x88] sm:$0xff] }
 0x4a8   : > { %7567 = vmatprep.subr.mxu0 %v4463_v12 }
 0x4a9   : > { %v3380_v55 = vpop.f32.mrf.mxu1 }
 0x4aa   : > { %v3511_v6 = vpop.f32.mrf.mxu0  ;;  %v3410_v22 = vadd.f32 %v3380_v55, %v3257_v28 }
 0x4ab   : > { %v8380_v14 = vpop.f32.mrf.mxu1 }
 0x4ac   : > { %v8433_v43 = vpop.f32.mrf.mxu0  ;;  %v11132_v37 = vadd.f32 %v3511_v6, %v3410_v22  ;;  %v4447_v6 = vld [vmem:[%s12504_s4 + $0x68] sm:$0xff]  ;;  %v4462_v22 = vld [vmem:[%s12504_s4 + $0xe0] sm:$0xff] }
 0x4ad   : > { %7568 = vmatpush3.msra.mxu0 %v4447_v6 }
 0x4ae   : > { %7569 = vmatprep.subr.mxu0 %v4462_v22  ;;  %v4435_v22 = vld [vmem:[%s12504_s4 + $0x8] sm:$0xff] }
 0x4af   : > { %v3385_v36 = vpop.f32.mrf.mxu1 }
 0x4b0   : > { %v3516_v30 = vpop.f32.mrf.mxu0  ;;  %v3411_v60 = vadd.f32 %v3385_v36, %v3262_v45  ;;  %v4446_v36 = vld [vmem:[%s12504_s4 + $0x60] sm:$0xff] }
 0x4b1   : > { %v8383_v53 = vpop.f32.mrf.mxu1  ;;  %7570 = vmatpush3.msra.mxu0 %v4446_v36 }
 0x4b2   : > { %v8436_v20 = vpop.f32.mrf.mxu0  ;;  %v11134_v51 = vadd.f32 %v3516_v30, %v3411_v60  ;;  %v4461_v30 = vld [vmem:[%s12504_s4 + $0xd8] sm:$0xff]  ;;  %v4460_v53 = vld [vmem:[%s12504_s4 + $0xd0] sm:$0xff] }
 0x4b3   : > { %7571 = vmatprep.subr.mxu0 %v4461_v30  ;;  %v4445_v60 = vld [vmem:[%s12504_s4 + $0x58] sm:$0xff]  ;;  %v4434_v30 = vld [vmem:[%s12504_s4] sm:$0xff] }
 0x4b4   : > { %7572 = vmatpush3.msra.mxu0 %v4445_v60  ;;  %v4427_v60 = vld [vmem:[%s11298_s3 + $0x8] sm:$0xff] }
 0x4b5   : > { %v3390_v39 = vpop.f32.mrf.mxu1  ;;  %7573 = vmatprep.subr.mxu0 %v4460_v53  ;;  %4562 = vmatprep.mubr.f32.mxu0 %v4427_v60 }
 0x4b6   : > { %v3521_v62 = vpop.f32.mrf.mxu0  ;;  %v3412_v58 = vadd.f32 %v3390_v39, %v3267_v19 }
 0x4b7   : > { %v8386_v41 = vpop.f32.mrf.mxu1 }
 0x4b8   : > { %v8439_v54 = vpop.f32.mrf.mxu0  ;;  %v11136_v5 = vadd.f32 %v3521_v62, %v3412_v58  ;;  %v4444_v62 = vld [vmem:[%s12504_s4 + $0x50] sm:$0xff]  ;;  %v4459_v58 = vld [vmem:[%s12504_s4 + $0xc8] sm:$0xff] }
 0x4b9   : > { %7574 = vmatpush3.msra.mxu0 %v4444_v62 }
 0x4ba   : > { %7575 = vmatprep.subr.mxu0 %v4459_v58 }
 0x4bb   : > { %v3395_v8 = vpop.f32.mrf.mxu1 }
 0x4bc   : > { %v3526_v21 = vpop.f32.mrf.mxu0  ;;  %v3413_v26 = vadd.f32 %v3395_v8, %v3272_v3  ;;  %v4443_v8 = vld [vmem:[%s12504_s4 + $0x48] sm:$0xff] }
 0x4bd   : > { %v8389_v7 = vpop.f32.mrf.mxu1  ;;  %7576 = vmatpush3.msra.mxu0 %v4443_v8 }
 0x4be   : > { %v8442_v2 = vpop.f32.mrf.mxu0  ;;  %v11138_v17 = vadd.f32 %v3526_v21, %v3413_v26  ;;  %v4458_v21 = vld [vmem:[%s12504_s4 + $0xc0] sm:$0xff] }
 0x4bf   : > { %7577 = vmatprep.subr.mxu0 %v4458_v21  ;;  %v4442_v26 = vld [vmem:[%s12504_s4 + $0x40] sm:$0xff]  ;;  %v4457_v2 = vld [vmem:[%s12504_s4 + $0xb8] sm:$0xff] }
 0x4c0   : > { %7578 = vmatpush3.msra.mxu0 %v4442_v26  ;;  %v4426_v26 = vld [vmem:[%s11298_s3] sm:$0xff] }
 0x4c1   : > { %v3400_v13 = vpop.f32.mrf.mxu1  ;;  %7579 = vmatprep.subr.mxu0 %v4457_v2 }
 0x4c2   : > { %v3531_v24 = vpop.f32.mrf.mxu0  ;;  %v3414_v57 = vadd.f32 %v3400_v13, %v3277_v9  ;;  %v4441_v13 = vld [vmem:[%s12504_s4 + $0x38] sm:$0xff] }
 0x4c3   : > { %v8392_v46 = vpop.f32.mrf.mxu1  ;;  %7580 = vmatpush3.msra.mxu0 %v4441_v13 }
 0x4c4   : > { %v8445_v47 = vpop.f32.mrf.mxu0  ;;  %v11140_v27 = vadd.f32 %v3531_v24, %v3414_v57  ;;  %v4456_v24 = vld [vmem:[%s12504_s4 + $0xb0] sm:$0xff] }
 0x4c5   : > { %7581 = vmatprep.subr.mxu0 %v4456_v24  ;;  %v4455_v47 = vld [vmem:[%s12504_s4 + $0xa8] sm:$0xff] }
 0x4c7   : > { %v3405_v28 = vpop.f32.mrf.mxu1 }
 0x4c8   : > { %v3536_v29 = vpop.f32.mrf.mxu0  ;;  %v3415_v38 = vadd.f32 %v3405_v28, %v3282_v31 }
 0x4c9   : > { %v8395_v1 = vpop.f32.mrf.mxu1 }
 0x4ca   : > { %v8448_v56 = vpop.f32.mrf.mxu0  ;;  %v11142_v45 = vadd.f32 %v3536_v29, %v3415_v38  ;;  %v4439_v38 = vld [vmem:[%s12504_s4 + $0x28] sm:$0xff] }
 0x4cb   : > { %v4454_v56 = vld [vmem:[%s12504_s4 + $0xa0] sm:$0xff] }
 0x4d1   : > { %v3637_v15 = vpop.f32.mrf.mxu1 }
 0x4d2   : > { %v11144_v49 = vpop.f32.mrf.mxu0  ;;  %v3671_v7 = vadd.f32 %v3637_v15, %v11130_v61  ;;  %v4440_v61 = vld [vmem:[%s12504_s4 + $0x30] sm:$0xff] }
 0x4d3   : > { %v8483_v48 = vpop.f32.mrf.mxu1  ;;  %7582 = vmatpush3.msra.mxu0 %v4440_v61 }
 0x4d4   : > { %v8536_v52 = vpop.f32.mrf.mxu0  ;;  %v3802_v57 = vadd.f32 %v11144_v49, %v3671_v7  ;;  %7583 = vmatprep.subr.mxu0 %v4455_v47  ;;  %v4438_v48 = vld [vmem:[%s12504_s4 + $0x20] sm:$0xff]  ;;  %v11312_v7 = vld [vmem:[#allocation8] sm:$0xff] }
 0x4d5   : > { %7584 = vmatpush3.msra.mxu0 %v4439_v38  ;;  %4802 = vst.msk [vmem:[#allocation7 + $0x8] sm:$0x1f] %vm4707_vm12, %v11312_v7 }
 0x4d6   : > { %7585 = vmatprep.subr.mxu0 %v4454_v56  ;;  %v4430_v56 = vld [vmem:[%s11298_s3 + $0x20] sm:$0x1f] }
 0x4d7   : > { %v11146_v19 = vpop.f32.mrf.mxu1  ;;  %7586 = vmatpush3.msra.mxu0 %v4438_v48 }
 0x4d8   : > { %v11148_v35 = vpop.f32.mrf.mxu0  ;;  %v3672_v46 = vadd.f32 %v11146_v19, %v11132_v37  ;;  %v11250_v37 = vld [vmem:[%s12505_s0] ss:$0 sm:$0xff] }
 0x4d9   : > { %v8486_v18 = vpop.f32.mrf.mxu1 }
 0x4da   : > { %v8539_v11 = vpop.f32.mrf.mxu0  ;;  %v3803_v52 = vadd.f32 %v11148_v35, %v3672_v46 }
 0x4db   : > { %v4453_v11 = vld [vmem:[%s12504_s4 + $0x98] sm:$0xff] }
 0x4dc   : > { %7587 = vmatprep.subr.mxu0 %v4453_v11 }
 0x4dd   : > { %v11150_v59 = vpop.f32.mrf.mxu1 }
 0x4de   : > { %v11152_v3 = vpop.f32.mrf.mxu0  ;;  %v3673_v19 = vadd.f32 %v11150_v59, %v11134_v51  ;;  %v4452_v51 = vld [vmem:[%s12504_s4 + $0x90] sm:$0xff] }
 0x4df   : > { %v8489_v40 = vpop.f32.mrf.mxu1 }
 0x4e0   : > { %v8542_v50 = vpop.f32.mrf.mxu0 }
 0x4e3   : > { %v11154_v63 = vpop.f32.mrf.mxu1 }
 0x4e4   : > { %v11156_v42 = vpop.f32.mrf.mxu0  ;;  %v3674_v16 = vadd.f32 %v11154_v63, %v11136_v5  ;;  %v4450_v5 = vld [vmem:[%s12504_s4 + $0x80] sm:$0xff] }
 0x4e5   : > { %v8492_v9 = vpop.f32.mrf.mxu1 }
 0x4e6   : > { %v8545_v4 = vpop.f32.mrf.mxu0  ;;  %v4437_v9 = vld [vmem:[%s12504_s4 + $0x18] sm:$0xff] }
 0x4e7   : > { %7588 = vmatpush3.msra.mxu0 %v4437_v9 }
 0x4e8   : > { %7589 = vmatprep.subr.mxu0 %v4452_v51 }
 0x4e9   : > { %v11158_v32 = vpop.f32.mrf.mxu1 }
 0x4ea   : > { %v11160_v10 = vpop.f32.mrf.mxu0  ;;  %v3675_v53 = vadd.f32 %v11158_v32, %v11138_v17 }
 0x4eb   : > { %v8495_v31 = vpop.f32.mrf.mxu1 }
 0x4ec   : > { %v8548_v25 = vpop.f32.mrf.mxu0  ;;  %v4436_v31 = vld [vmem:[%s12504_s4 + $0x10] sm:$0xff] }
 0x4ed   : > { %v3804_v25 = vadd.f32 %v11152_v3, %v3673_v19  ;;  %7590 = vmatpush3.msra.mxu0 %v4436_v31 }
 0x4ee   : > { %7591 = vmatprep.subr.mxu0 %v4451_v44 }
 0x4ef   : > { %v11181_v34 = vpop.f32.mrf.mxu1  ;;  %7592 = vmatpush3.msra.mxu0 %v4435_v22 }
 0x4f0   : > { %v11183_v55 = vpop.f32.mrf.mxu0  ;;  %7593 = vmatprep.subr.mxu0 %v4450_v5  ;;  %v3676_v46 = vadd.f32 %v11181_v34, %v11140_v27 }
 0x4f1   : > { %v8498_v14 = vpop.f32.mrf.mxu1  ;;  %7594 = vmatpush3.msra.mxu0 %v4434_v30 }
 0x4f2   : > { %v8551_v43 = vpop.f32.mrf.mxu0  ;;  %8678 = vmatprep.subr.mxu0 %v11312_v7  ;;  %4563 = vmatmul.mubr.f32.vlgmr.msra.gmra.mxu0 %v4426_v26  ;;  %v3807_v34 = vadd.f32 %v11183_v55, %v3676_v46 }
 0x4f5   : > { %v11203_v20 = vpop.f32.mrf.mxu1 }
 0x4f6   : > { %v11205_v39 = vpop.f32.mrf.mxu0  ;;  %v3677_v19 = vadd.f32 %v11203_v20, %v11142_v45 }
 0x4f7   : > { %v8501_v41 = vpop.f32.mrf.mxu1 }
 0x4f8   : > { %v8554_v54 = vpop.f32.mrf.mxu0  ;;  %v3805_v41 = vadd.f32 %v11156_v42, %v3674_v16  ;;  %v4431_v42 = vld [vmem:[%s11298_s3 + $0x28] sm:$0x1f]  ;;  %v3808_v45 = vadd.f32 %v11205_v39, %v3677_v19 }
 0x4f9   : > { %4567 = vmatprep.mubr.f32.mxu0 %v4431_v42 }
 0x4fa   : > { %4568 = vmatmul.mubr.f32.gmra.mxu0 %v4430_v56 }
 0x4fb   : > { %8682 = vmatprep.mubr.msk.f32.mxu0 %vm9333_vm1, %v11312_v7 }
 0x4ff   : > { %v3899_v28 = vpop.f32.mrf.mxu1 }
 0x500   : > { %v4030_v29 = vpop.f32.mrf.mxu0  ;;  %v3933_v1 = vadd.f32 %v3899_v28, %v3802_v57  ;;  %v3806_v57 = vadd.f32 %v11160_v10, %v3675_v53 }
 0x501   : > { %v8589_v15 = vpop.f32.mrf.mxu1 }
 0x502   : > { %v8642_v49 = vpop.f32.mrf.mxu0  ;;  %v4064_v18 = vadd.f32 %v4030_v29, %v3933_v1 }
 0x503   : > { %v3904_v40 = vpop.f32.mrf.mxu1 }
 0x504   : > { %v4035_v50 = vpop.f32.mrf.mxu0  ;;  %v11265_v4 = vadd.f32 %v11250_v37, %v4064_v18  ;;  %v3934_v35 = vadd.f32 %v3904_v40, %v3803_v52 }
 0x505   : > { %v8592_v59 = vpop.f32.mrf.mxu1 }
 0x506   : > { %v8645_v33 = vpop.f32.mrf.mxu0  ;;  %v11275_v23 = vmul.f32 0.70710677, %v11265_v4  ;;  %v4065_v0 = vadd.f32 %v4035_v50, %v3934_v35 }
 0x507   : > { %v3909_v12 = vpop.f32.mrf.mxu1 }
 0x508   : > { %v4040_v6 = vpop.f32.mrf.mxu0  ;;  %v11287_v3 = vand.u32 2147483647, %v11275_v23  ;;  %v11290_v14 = vadd.f32 %v11250_v37, %v4065_v0  ;;  %v3935_v43 = vadd.f32 %v3909_v12, %v3804_v25  ;;  %vm4239_vm2 = vcmp.ge.f32.partialorder %v11275_v23, 0.0 }
 0x509   : > { %v8595_v63 = vpop.f32.mrf.mxu1 }
 0x50a   : > { %v8648_v36 = vpop.f32.mrf.mxu0  ;;  %v4106_v62 = vmul.f32 0.3275911, %v11287_v3  ;;  %v11308_v58 = vmul.f32 0.70710677, %v11290_v14  ;;  %v4066_v54 = vadd.f32 %v4040_v6, %v3935_v43  ;;  %v4197_v11 = vsub.f32 0.0, %v11287_v3 }
 0x50b   : > { %v3914_v8 = vpop.f32.mrf.mxu1 }
 0x50c   : > { %v4045_v21 = vpop.f32.mrf.mxu0  ;;  %v4113_v2 = vadd.f32 1.0, %v4106_v62  ;;  %v4100_v17 = vand.u32 2147483647, %v11308_v58  ;;  %v11317_v32 = vadd.f32 %v11250_v37, %v4066_v54  ;;  %v3936_v13 = vadd.f32 %v3914_v8, %v3805_v41 }
 0x50d   : > { %v8598_v24 = vpop.f32.mrf.mxu1  ;;  %v4204_v44 = vmul.f32 %v4197_v11, %v11287_v3  ;;  %vm4240_vm5 = vcmp.ge.f32.partialorder %v11308_v58, 0.0 }
 0x50e   : > { %v8651_v61 = vpop.f32.mrf.mxu0  ;;  %9270 = vrcp.f32 %v4113_v2  ;;  %v4107_v47 = vmul.f32 0.3275911, %v4100_v17  ;;  %v11324_v28 = vmul.f32 0.70710677, %v11317_v32  ;;  %v4067_v29 = vadd.f32 %v4045_v21, %v3936_v13 }
 0x50f   : > { %v3919_v38 = vpop.f32.mrf.mxu1  ;;  %v4198_v22 = vsub.f32 0.0, %v4100_v17  ;;  %v4211_v3 = vmul.f32 1.442695, %v4204_v44 }
 0x510   : > { %v4050_v1 = vpop.f32.mrf.mxu0  ;;  %v4114_v15 = vadd.f32 1.0, %v4107_v47  ;;  %v3937_v49 = vadd.f32 %v3919_v38, %v3806_v57  ;;  %v4101_v48 = vand.u32 2147483647, %v11324_v28  ;;  %v11329_v10 = vadd.f32 %v11250_v37, %v4067_v29 }
 0x511   : > { %v8601_v52 = vpop.f32.mrf.mxu1  ;;  %v4205_v8 = vmul.f32 %v4198_v22, %v4100_v17  ;;  %vm4241_vm4 = vcmp.ge.f32.partialorder %v11324_v28, 0.0 }
 0x512   : > { %v8654_v27 = vpop.f32.mrf.mxu0  ;;  %9272 = vrcp.f32 %v4114_v15  ;;  %v4068_v18 = vadd.f32 %v4050_v1, %v3937_v49  ;;  %v4108_v40 = vmul.f32 0.3275911, %v4101_v48  ;;  %v11338_v50 = vmul.f32 0.70710677, %v11329_v10 }
 0x513   : > { %v3924_v9 = vpop.f32.mrf.mxu1  ;;  %v4199_v2 = vsub.f32 0.0, %v4101_v48  ;;  %v4213_v29 = vmul.f32 1.442695, %v4205_v8  ;;  %v4085_v8 = vmul.f32 0.5, %v11265_v4 }
 0x514   : > { %v4055_v35 = vpop.f32.mrf.mxu0  ;;  %v11341_v51 = vadd.f32 %v11250_v37, %v4068_v18  ;;  %v3938_v59 = vadd.f32 %v3924_v9, %v3807_v34  ;;  %v4115_v33 = vadd.f32 1.0, %v4108_v40  ;;  %v4102_v55 = vand.u32 2147483647, %v11338_v50 }
 0x515   : > { %v8604_v31 = vpop.f32.mrf.mxu1  ;;  %v4206_v17 = vmul.f32 %v4199_v2, %v4101_v48  ;;  %vm4242_vm6 = vcmp.ge.f32.partialorder %v11338_v50, 0.0 }
 0x516   : > { %v8657_v25 = vpop.f32.mrf.mxu0  ;;  %v11346_v20 = vmul.f32 0.70710677, %v11341_v51  ;;  %v4069_v0 = vadd.f32 %v4055_v35, %v3938_v59  ;;  %9274 = vrcp.f32 %v4115_v33  ;;  %v4109_v16 = vmul.f32 0.3275911, %v4102_v55 }
 0x517   : > { %v3929_v12 = vpop.f32.mrf.mxu1  ;;  %v4200_v1 = vsub.f32 0.0, %v4102_v55  ;;  %v4215_v11 = vmul.f32 1.442695, %v4206_v17 }
 0x518   : > { %v4060_v6 = vpop.f32.mrf.mxu0  ;;  %v4103_v43 = vand.u32 2147483647, %v11346_v20  ;;  %v11351_v5 = vadd.f32 %v11250_v37, %v4069_v0  ;;  %v3939_v63 = vadd.f32 %v3929_v12, %v3808_v45  ;;  %v4116_v36 = vadd.f32 1.0, %v4109_v16 }
 0x519   : > { %v8607_v30 = vpop.f32.mrf.mxu1  ;;  %v4207_v40 = vmul.f32 %v4200_v1, %v4102_v55  ;;  %vm4243_vm7 = vcmp.ge.f32.partialorder %v11346_v20, 0.0 }
 0x51a   : > { %v8660_v39 = vpop.f32.mrf.mxu0  ;;  %v4110_v60 = vmul.f32 0.3275911, %v4103_v43  ;;  %v11354_v53 = vmul.f32 0.70710677, %v11351_v5  ;;  %9276 = vrcp.f32 %v4116_v36  ;;  %v4070_v41 = vadd.f32 %v4060_v6, %v3939_v63 }
 0x51b   : > { %v9271_v62 = vpop.eup %9270  ;;  %v4217_v12 = vmul.f32 1.442695, %v4207_v40  ;;  %v4090_v20 = vmul.f32 0.5, %v11351_v5 }
 0x51c   : > { %v4134_v54 = vmul.f32 1.0614054, %v9271_v62  ;;  %v4117_v21 = vadd.f32 1.0, %v4110_v60  ;;  %v4104_v26 = vand.u32 2147483647, %v11354_v53  ;;  %v11358_v13 = vadd.f32 %v11250_v37, %v4070_v41 }
 0x51d   : > { %v4201_v37 = vsub.f32 0.0, %v4103_v43  ;;  %vm4244_vm8 = vcmp.ge.f32.partialorder %v11354_v53, 0.0 }
 0x51e   : > { %v4141_v24 = vadd.f32 -1.4531521, %v4134_v54  ;;  %9278 = vrcp.f32 %v4117_v21  ;;  %v4111_v61 = vmul.f32 0.3275911, %v4104_v26  ;;  %v11361_v57 = vmul.f32 0.70710677, %v11358_v13 }
 0x51f   : > { %v9273_v42 = vpop.eup %9272  ;;  %9280 = vpow2.f32 %v4211_v3  ;;  %v4208_v59 = vmul.f32 %v4201_v37, %v4103_v43  ;;  %v4202_v31 = vsub.f32 0.0, %v4104_v26  ;;  %v4086_v37 = vmul.f32 0.5, %v11290_v14 }
 0x520   : > { %v4148_v46 = vmul.f32 %v9271_v62, %v4141_v24  ;;  %v4135_v47 = vmul.f32 1.0614054, %v9273_v42  ;;  %v4118_v38 = vadd.f32 1.0, %v4111_v61  ;;  %v4105_v56 = vand.u32 2147483647, %v11361_v57 }
 0x521   : > { %v4219_v55 = vmul.f32 1.442695, %v4208_v59  ;;  %v4209_v30 = vmul.f32 %v4202_v31, %v4104_v26  ;;  %vm4245_vm9 = vcmp.ge.f32.partialorder %v11361_v57, 0.0 }
 0x522   : > { %v4155_v15 = vadd.f32 1.4214138, %v4148_v46  ;;  %v4142_v49 = vadd.f32 -1.4531521, %v4135_v47  ;;  %9282 = vrcp.f32 %v4118_v38  ;;  %v4112_v52 = vmul.f32 0.3275911, %v4105_v56 }
 0x523   : > { %v11364_v27 = vpop.eup %9274  ;;  %9284 = vpow2.f32 %v4213_v29  ;;  %v4203_v39 = vsub.f32 0.0, %v4105_v56  ;;  %v4221_v38 = vmul.f32 1.442695, %v4209_v30 }
 0x524   : > { %v4162_v34 = vmul.f32 %v9271_v62, %v4155_v15  ;;  %v4149_v19 = vmul.f32 %v9273_v42, %v4142_v49  ;;  %v4136_v18 = vmul.f32 1.0614054, %v11364_v27  ;;  %v4119_v9 = vadd.f32 1.0, %v4112_v52 }
 0x526   : > { %v4169_v35 = vadd.f32 -0.28449672, %v4162_v34  ;;  %v4156_v48 = vadd.f32 1.4214138, %v4149_v19  ;;  %v4143_v33 = vadd.f32 -1.4531521, %v4136_v18  ;;  %9286 = vrcp.f32 %v4119_v9 }
 0x527   : > { %v11367_v25 = vpop.eup %9276  ;;  %9288 = vpow2.f32 %v4215_v11 }
 0x528   : > { %v4176_v45 = vmul.f32 %v9271_v62, %v4169_v35  ;;  %v4163_v0 = vmul.f32 %v9273_v42, %v4156_v48  ;;  %v4150_v44 = vmul.f32 %v11364_v27, %v4143_v33  ;;  %v4137_v16 = vmul.f32 1.0614054, %v11367_v25 }
 0x529   : > { %9290 = vpow2.f32 %v4217_v12 }
 0x52a   : > { %v4183_v6 = vadd.f32 0.2548296, %v4176_v45  ;;  %v4170_v22 = vadd.f32 -0.28449672, %v4163_v0  ;;  %v4157_v36 = vadd.f32 1.4214138, %v4150_v44  ;;  %9292 = vpow2.f32 %v4219_v55 }
 0x52b   : > { %v11371_v63 = vpop.eup %9278  ;;  %v4144_v43 = vadd.f32 -1.4531521, %v4137_v16  ;;  %9294 = vpow2.f32 %v4221_v38 }
 0x52c   : > { %v9281_v60 = vpop.eup %9280  ;;  %v4190_v3 = vmul.f32 %v9271_v62, %v4183_v6  ;;  %v4177_v41 = vmul.f32 %v9273_v42, %v4170_v22  ;;  %v4138_v54 = vmul.f32 1.0614054, %v11371_v63  ;;  %v4164_v21 = vmul.f32 %v11364_v27, %v4157_v36 }
 0x52d   : > { %v4151_v2 = vmul.f32 %v11367_v25, %v4144_v43  ;;  %v4210_v62 = vmul.f32 %v4203_v39, %v4105_v56 }
 0x52e   : > { %v4225_v24 = vmul.f32 %v9281_v60, %v4190_v3  ;;  %v4184_v61 = vadd.f32 0.2548296, %v4177_v41  ;;  %v4145_v46 = vadd.f32 -1.4531521, %v4138_v54  ;;  %v4171_v26 = vadd.f32 -0.28449672, %v4164_v21 }
 0x52f   : > { %v11377_v47 = vpop.eup %9282  ;;  %v4158_v29 = vadd.f32 1.4214138, %v4151_v2 }
 0x530   : > { %v4232_v17 = vsub.f32 1.0, %v4225_v24  ;;  %v4191_v1 = vmul.f32 %v9273_v42, %v4184_v61  ;;  %v4152_v15 = vmul.f32 %v11371_v63, %v4145_v46  ;;  %v4139_v4 = vmul.f32 1.0614054, %v11377_v47  ;;  %v9285_v49 = vpop.eup %9284 }
 0x531   : > { %v4178_v52 = vmul.f32 %v11364_v27, %v4171_v26  ;;  %v4165_v34 = vmul.f32 %v11367_v25, %v4158_v29  ;;  %v4223_v42 = vmul.f32 1.442695, %v4210_v62 }
 0x532   : > { %v4246_v19 = vsub.f32 0.0, %v4232_v17  ;;  %v4226_v18 = vmul.f32 %v9285_v49, %v4191_v1  ;;  %v4159_v11 = vadd.f32 1.4214138, %v4152_v15  ;;  %v4146_v40 = vadd.f32 -1.4531521, %v4139_v4 }
 0x533   : > { %v4185_v56 = vadd.f32 0.2548296, %v4178_v52  ;;  %v4172_v9 = vadd.f32 -0.28449672, %v4165_v34  ;;  %v11385_v35 = vpop.eup %9286  ;;  %9296 = vpow2.f32 %v4223_v42  ;;  %v4087_v1 = vmul.f32 0.5, %v11317_v32 }
 0x534   : > { %v4253_v48 = vsel %vm4239_vm2, %v4232_v17, %v4246_v19  ;;  %v4233_v59 = vsub.f32 1.0, %v4226_v18  ;;  %v4166_v23 = vmul.f32 %v11371_v63, %v4159_v11  ;;  %v4153_v14 = vmul.f32 %v11377_v47, %v4146_v40  ;;  %v9289_v44 = vpop.eup %9288 }
 0x535   : > { %v4260_v33 = vadd.f32 1.0, %v4253_v48  ;;  %v4192_v31 = vmul.f32 %v11364_v27, %v4185_v56  ;;  %v4179_v45 = vmul.f32 %v11367_v25, %v4172_v9  ;;  %v4140_v0 = vmul.f32 1.0614054, %v11385_v35 }
 0x536   : > { %v4247_v16 = vsub.f32 0.0, %v4233_v59  ;;  %v4173_v12 = vadd.f32 -0.28449672, %v4166_v23  ;;  %v4160_v6 = vadd.f32 1.4214138, %v4153_v14  ;;  %v9291_v54 = vpop.eup %9290  ;;  %v4088_v32 = vmul.f32 0.5, %v11329_v10 }
 0x537   : > { %v11393_v22 = vmul.f32 %v4260_v33, %v4085_v8  ;;  %v4227_v55 = vmul.f32 %v9289_v44, %v4192_v31  ;;  %v4186_v36 = vadd.f32 0.2548296, %v4179_v45  ;;  %v4147_v43 = vadd.f32 -1.4531521, %v4140_v0  ;;  %v9293_v2 = vpop.eup %9292 }
 0x538   : > { %v4254_v30 = vsel %vm4240_vm5, %v4233_v59, %v4247_v16  ;;  %v4180_v39 = vmul.f32 %v11371_v63, %v4173_v12  ;;  %v4167_v27 = vmul.f32 %v11377_v47, %v4160_v6  ;;  %v9295_v34 = vpop.eup %9294  ;;  %v4089_v14 = vmul.f32 0.5, %v11341_v51 }
 0x539   : > { %4282 = vst [vmem:[#allocation5 + $0x2] sm:$0xff] %v11393_v22  ;;  %v4261_v60 = vadd.f32 1.0, %v4254_v30  ;;  %v4234_v3 = vsub.f32 1.0, %v4227_v55  ;;  %v4193_v58 = vmul.f32 %v11367_v25, %v4186_v36  ;;  %v4154_v41 = vmul.f32 %v11385_v35, %v4147_v43 }
 0x53a   : > { %v4187_v8 = vadd.f32 0.2548296, %v4180_v39  ;;  %v4174_v21 = vadd.f32 -0.28449672, %v4167_v27  ;;  %vm4724_vm2 = vcmask 113664   ;;  %vm4803_vm5 = vcmask 522240  }
 0x53b   : > { %v11400_v24 = vmul.f32 %v4261_v60, %v4086_v37  ;;  %v4248_v61 = vsub.f32 0.0, %v4234_v3  ;;  %v4228_v46 = vmul.f32 %v9291_v54, %v4193_v58  ;;  %v4161_v26 = vadd.f32 1.4214138, %v4154_v41 }
 0x53c   : > { %v4194_v29 = vmul.f32 %v11371_v63, %v4187_v8  ;;  %v4181_v38 = vmul.f32 %v11377_v47, %v4174_v21 }
 0x53d   : > { %4283 = vst [vmem:[#allocation5 + $0xa] sm:$0xff] %v11400_v24  ;;  %v4255_v25 = vsel %vm4241_vm4, %v4234_v3, %v4248_v61  ;;  %v4235_v62 = vsub.f32 1.0, %v4228_v46  ;;  %v4168_v17 = vmul.f32 %v11385_v35, %v4161_v26 }
 0x53e   : > { %v4262_v15 = vadd.f32 1.0, %v4255_v25  ;;  %v4229_v4 = vmul.f32 %v9293_v2, %v4194_v29  ;;  %v4188_v49 = vadd.f32 0.2548296, %v4181_v38 }
 0x53f   : > { %v4249_v37 = vsub.f32 0.0, %v4235_v62  ;;  %v4175_v52 = vadd.f32 -0.28449672, %v4168_v17 }
 0x540   : > { %v11408_v19 = vmul.f32 %v4262_v15, %v4087_v1  ;;  %v4236_v28 = vsub.f32 1.0, %v4229_v4  ;;  %v4195_v63 = vmul.f32 %v11377_v47, %v4188_v49  ;;  %v9297_v50 = vpop.eup %9296  ;;  %v4289_v15 = vld [vmem:[#allocation5] sm:$0xff] }
 0x541   : > { %v4256_v18 = vsel %vm4242_vm6, %v4235_v62, %v4249_v37  ;;  %v4182_v11 = vmul.f32 %v11385_v35, %v4175_v52  ;;  %v4296_v4 = vld [vmem:[#allocation5 + $0x1] sm:$0xff]  ;;  %vm6090_vm6 = vcmask 64512  }
 0x542   : > { %4284 = vst [vmem:[#allocation5 + $0x12] sm:$0xff] %v11408_v19  ;;  %v4263_v40 = vadd.f32 1.0, %v4256_v18  ;;  %v4250_v56 = vsub.f32 0.0, %v4236_v28  ;;  %v4230_v9 = vmul.f32 %v9295_v34, %v4195_v63  ;;  %v4303_v18 = vmax.f32 %v4289_v15, %v4296_v4 }
 0x543   : > { %v4189_v42 = vadd.f32 0.2548296, %v4182_v11 }
 0x544   : > { %v4270_v48 = vmul.f32 %v4263_v40, %v4088_v32  ;;  %v4257_v59 = vsel %vm4243_vm7, %v4236_v28, %v4250_v56  ;;  %v4237_v23 = vsub.f32 1.0, %v4230_v9  ;;  %v4290_v46 = vld [vmem:[#allocation5 + $0x8] sm:$0xff]  ;;  %vm6346_vm7 = vcmask 261120  }
 0x545   : > { %v4264_v47 = vadd.f32 1.0, %v4257_v59  ;;  %v4196_v33 = vmul.f32 %v11385_v35, %v4189_v42  ;;  %v4091_v35 = vmul.f32 0.5, %v11358_v13  ;;  %v4297_v38 = vld [vmem:[#allocation5 + $0x9] sm:$0xff]  ;;  %v4317_v42 = vmax.f32 %v4303_v18, %v11393_v22  ;;  %v4480_v22 = vld [vmem:[%s12504_s4 + $0x170] sm:$0xff] }
 0x546   : > { %4285 = vst [vmem:[#allocation5 + $0x1a] sm:$0xff] %v4270_v48  ;;  %v4251_v31 = vsub.f32 0.0, %v4237_v23  ;;  %v4304_v52 = vmax.f32 %v4290_v46, %v4297_v38 }
 0x547   : > { %v4271_v45 = vmul.f32 %v4264_v47, %v4089_v14  ;;  %v4231_v10 = vmul.f32 %v9297_v50, %v4196_v33  ;;  %v4429_v50 = vld [vmem:[%s11298_s3 + $0x18] sm:$0xff]  ;;  %v4479_v14 = vld [vmem:[%s12504_s4 + $0x168] sm:$0xff]  ;;  %v4478_v47 = vld [vmem:[%s12504_s4 + $0x160] sm:$0xff] }
 0x548   : > { %v4258_v0 = vsel %vm4244_vm8, %v4237_v23, %v4251_v31  ;;  %v4318_v40 = vmax.f32 %v4304_v52, %v11400_v24  ;;  %v4339_v23 = vld [vmem:[%s12475_s15 + $0x8] sm:$0x3f]  ;;  %v4481_v24 = vld [vmem:[%s12504_s4 + $0x178] sm:$0xff]  ;;  %v4476_v31 = vld [vmem:[%s12504_s4 + $0x150] sm:$0xff]  ;;  %vm6502_vm8 = vcmask 259072  }
 0x549   : > { %4286 = vst [vmem:[#allocation5 + $0x22] sm:$0xff] %v4271_v45  ;;  %v4265_v44 = vadd.f32 1.0, %v4258_v0  ;;  %v4238_v16 = vsub.f32 1.0, %v4231_v10  ;;  %v4291_v57 = vld [vmem:[#allocation5 + $0x10] sm:$0xff]  ;;  %v4477_v33 = vld [vmem:[%s12504_s4 + $0x158] sm:$0xff] }
 0x54a   : > { %v4298_v21 = vld [vmem:[#allocation5 + $0x11] sm:$0xff]  ;;  %v4473_v0 = vld [vmem:[%s12504_s4 + $0x138] sm:$0xff] }
 0x54b   : > { %v4272_v12 = vmul.f32 %v4265_v44, %v4090_v20  ;;  %v4252_v6 = vsub.f32 0.0, %v4238_v16  ;;  %v4305_v17 = vmax.f32 %v4291_v57, %v4298_v21  ;;  %v4325_v56 = vld [vmem:[#allocation5 + $0xb] sm:$0xff]  ;;  %v4472_v20 = vld [vmem:[%s12504_s4 + $0x130] sm:$0xff]  ;;  %v4471_v44 = vld [vmem:[%s12504_s4 + $0x128] sm:$0xff] }
 0x54c   : > { %v4332_v59 = vmax.f32 %v4318_v40, %v4325_v56  ;;  %v4474_v10 = vld [vmem:[%s12504_s4 + $0x140] sm:$0xff] }
 0x54d   : > { %4287 = vst [vmem:[#allocation5 + $0x2a] sm:$0xff] %v4272_v12  ;;  %v4259_v51 = vsel %vm4245_vm9, %v4238_v16, %v4252_v6  ;;  %v4292_v60 = vld [vmem:[#allocation5 + $0x18] sm:$0xff]  ;;  %v4319_v63 = vmax.f32 %v4305_v17, %v11408_v19  ;;  %v4470_v16 = vld [vmem:[%s12504_s4 + $0x120] sm:$0xff]  ;;  %v4468_v6 = vld [vmem:[%s12504_s4 + $0x110] sm:$0xff]  ;;  %vm6511_vm9 = vcmask 257024  }
 0x54e   : > { %v4266_v55 = vadd.f32 1.0, %v4259_v51  ;;  %v4299_v58 = vld [vmem:[#allocation5 + $0x19] sm:$0xff] }
 0x54f   : > { %v4306_v13 = vmax.f32 %v4292_v60, %v4299_v58  ;;  %v4326_v11 = vld [vmem:[#allocation5 + $0x13] sm:$0xff]  ;;  %v4812_v60 = vld [vmem:[%s12470_s10 + $0x30] sm:$0xff] }
 0x550   : > { %v4273_v36 = vmul.f32 %v4266_v55, %v4091_v35  ;;  %v4293_v30 = vld [vmem:[#allocation5 + $0x20] sm:$0xff]  ;;  %v4333_v9 = vmax.f32 %v4319_v63, %v4326_v11  ;;  %v4467_v51 = vld [vmem:[%s12504_s4 + $0x108] sm:$0xff]  ;;  %v4466_v35 = vld [vmem:[%s12504_s4 + $0x100] sm:$0xff] }
 0x551   : > { %v4300_v39 = vld [vmem:[#allocation5 + $0x21] sm:$0xff]  ;;  %v4320_v37 = vmax.f32 %v4306_v13, %v4270_v48  ;;  %v4483_v55 = vld [vmem:[%s12504_s4 + $0x188] sm:$0xff] }
 0x552   : > { %4288 = vst [vmem:[#allocation5 + $0x32] sm:$0x1f] %v4273_v36  ;;  %v4307_v54 = vmax.f32 %v4293_v30, %v4300_v39  ;;  %v4327_v34 = vld [vmem:[#allocation5 + $0x1b] sm:$0xff]  ;;  %v4324_v48 = vld [vmem:[#allocation5 + $0x3] sm:$0xff]  ;;  %v4482_v36 = vld [vmem:[%s12504_s4 + $0x180] sm:$0xff] }
 0x553   : > { %v4334_v32 = vmax.f32 %v4320_v37, %v4327_v34  ;;  %v4331_v19 = vmax.f32 %v4317_v42, %v4324_v48  ;;  %v4432_v30 = vld [vmem:[%s11298_s3 + $0x30] sm:$0x1f]  ;;  %v9322_v39 = vld [vmem:[#allocation9] sm:$0xff] }
 0x554   : > { %v4294_v43 = vld [vmem:[#allocation5 + $0x28] sm:$0xff]  ;;  %v4321_v62 = vmax.f32 %v4307_v54, %v4271_v45  ;;  %v4475_v45 = vld [vmem:[%s12504_s4 + $0x148] sm:$0xff]  ;;  %4705 = vst.msk [vmem:[#allocation6 + $0x10] sm:$0x1] %vm4704_vm13, %v9322_v39 }
 0x555   : > { %v4301_v53 = vld [vmem:[#allocation5 + $0x29] sm:$0xff] }
 0x556   : > { %v4308_v27 = vmax.f32 %v4294_v43, %v4301_v53  ;;  %v4328_v1 = vld [vmem:[#allocation5 + $0x23] sm:$0xff] }
 0x557   : > { %v4335_v28 = vmax.f32 %v4321_v62, %v4328_v1  ;;  %v4428_v43 = vld [vmem:[%s11298_s3 + $0x10] sm:$0xff]  ;;  %v4433_v53 = vld [vmem:[%s11298_s3 + $0x38] sm:$0x1f] }
 0x558   : > { %v4322_v61 = vmax.f32 %v4308_v27, %v4272_v12  ;;  %v4469_v12 = vld [vmem:[%s12504_s4 + $0x118] sm:$0xff] }
 0x559   : > { %v4295_v5 = vld [vmem:[#allocation5 + $0x30] sm:$0x3f]  ;;  %v4813_v27 = vld [vmem:[%s12470_s10 + $0x38] sm:$0xff] }
 0x55a   : > { %v4302_v3 = vld [vmem:[#allocation5 + $0x31] sm:$0x3f] }
 0x55b   : > { %v4309_v41 = vmax.f32 %v4295_v5, %v4302_v3  ;;  %v4316_v8 = vld [vmem:[#allocation5 + $0x32] sm:$0x3f]  ;;  %v4811_v5 = vld [vmem:[%s12470_s10 + $0x28] sm:$0xff] }
 0x55c   : > { %v4330_v26 = vld [vmem:[#allocation5 + $0x33] sm:$0x3f]  ;;  %v4329_v29 = vld [vmem:[#allocation5 + $0x2b] sm:$0xff] }
 0x55d   : > { %v4323_v2 = vmax.f32 %v4309_v41, %v4316_v8  ;;  %v4336_v49 = vmax.f32 %v4322_v61, %v4329_v29  ;;  %v4810_v3 = vld [vmem:[%s12470_s10 + $0x20] sm:$0xff] }
 0x55f   : > { %v4337_v25 = vmax.f32 %v4323_v2, %v4330_v26  ;;  %v7039_v2 = vld [vmem:[%s12469_s9] ss:$0 sm:$0xff] }
 0x561   : > { %8661 = vmatprep.subr.msk.mxu1 %vm4347_vm10, %v4337_v25 }
 0x562   : > { %8662 = vmatpush3.msk.msra.mxu1 %vm4347_vm10, %v4337_v25 }
 0x563   : > { %8663 = vmatprep.subr.mxu1 %v4336_v49 }
 0x564   : > { %8664 = vmatpush3.msra.mxu1 %v4336_v49 }
 0x565   : > { %8665 = vmatprep.subr.mxu1 %v4335_v28 }
 0x566   : > { %8666 = vmatpush3.msra.mxu1 %v4335_v28 }
 0x567   : > { %8667 = vmatprep.subr.mxu1 %v4334_v32 }
 0x568   : > { %8668 = vmatpush3.msra.mxu1 %v4334_v32 }
 0x569   : > { %8669 = vmatprep.subr.mxu1 %v4333_v9 }
 0x56a   : > { %8670 = vmatpush3.msra.mxu1 %v4333_v9 }
 0x56b   : > { %8671 = vmatprep.subr.mxu1 %v4332_v59 }
 0x56c   : > { %8672 = vmatpush3.msra.mxu1 %v4332_v59 }
 0x56d   : > { %8673 = vmatprep.subr.mxu1 %v4331_v19 }
 0x56e   : > { %8674 = vmatpush3.msra.mxu1 %v4331_v19 }
 0x56f   : > { %4573 = vmatprep.subr.mxu1 %v11312_v7  ;;  %8676 = vmatmul.mubr.msk.f32.vlgmr.msra.gmra.mxu1 %vm4340_vm15, %v4339_v23 }
 0x570   : > { %4574 = vmatpush1.msra.mxu1 %v4481_v24  ;;  %7040 = vmatprep.mubr.msk.f32.mxu1 %vm4491_vm11, %v4429_v50 }
 0x571   : > { %4575 = vmatprep.subr.mxu1 %v11312_v7 }
 0x572   : > { %4576 = vmatpush1.msra.mxu1 %v4480_v22 }
 0x573   : > { %4577 = vmatprep.subr.mxu1 %v11312_v7 }
 0x574   : > { %4578 = vmatpush1.msra.mxu1 %v4479_v14 }
 0x575   : > { %4579 = vmatprep.subr.mxu1 %v11312_v7 }
 0x576   : > { %4580 = vmatpush1.msra.mxu1 %v4478_v47 }
 0x577   : > { %4581 = vmatprep.subr.mxu1 %v11312_v7 }
 0x578   : > { %4582 = vmatpush1.msra.mxu1 %v4477_v33 }
 0x579   : > { %4583 = vmatprep.subr.mxu1 %v11312_v7 }
 0x57a   : > { %4584 = vmatpush1.msra.mxu1 %v4476_v31 }
 0x57b   : > { %4585 = vmatprep.subr.mxu1 %v11312_v7 }
 0x57c   : > { %4586 = vmatpush1.msra.mxu1 %v4475_v45 }
 0x57d   : > { %4587 = vmatprep.subr.mxu1 %v11312_v7 }
 0x57e   : > { %4588 = vmatpush1.msra.mxu1 %v4474_v10 }
 0x57f   : > { %4589 = vmatprep.subr.mxu1 %v11312_v7 }
 0x580   : > { %4590 = vmatpush1.msra.mxu1 %v4473_v0 }
 0x581   : > { %4591 = vmatprep.subr.mxu1 %v11312_v7 }
 0x582   : > { %4592 = vmatpush1.msra.mxu1 %v4472_v20 }
 0x583   : > { %4593 = vmatprep.subr.mxu1 %v11312_v7 }
 0x584   : > { %4594 = vmatpush1.msra.mxu1 %v4471_v44 }
 0x585   : > { %4595 = vmatprep.subr.mxu1 %v11312_v7 }
 0x586   : > { %4596 = vmatpush1.msra.mxu1 %v4470_v16 }
 0x587   : > { %4597 = vmatprep.subr.mxu1 %v11312_v7 }
 0x588   : > { %4598 = vmatpush1.msra.mxu1 %v4469_v12 }
 0x589   : > { %4599 = vmatprep.subr.mxu1 %v11312_v7 }
 0x58a   : > { %4600 = vmatpush1.msra.mxu1 %v4468_v6 }
 0x58b   : > { %4601 = vmatprep.subr.mxu1 %v11312_v7 }
 0x58c   : > { %4602 = vmatpush1.msra.mxu1 %v4467_v51 }
 0x58d   : > { %4603 = vmatprep.subr.mxu1 %v11312_v7 }
 0x58e   : > { %4604 = vmatpush1.msra.mxu1 %v4466_v35 }
 0x58f   : > { %4633 = vmatprep.subr.mxu1 %v11312_v7 }
 0x590   : > { %4634 = vmatpush2.msra.mxu1 %v4483_v55 }
 0x591   : > { %4635 = vmatprep.subr.mxu1 %v11312_v7 }
 0x592   : > { %4636 = vmatpush2.msra.mxu1 %v4482_v36 }
 0x593   : > { %4638 = vmatmul.mubr.f32.vlgmr.msra.gmra.mxu1 %v4428_v43  ;;  %8704 = vmatprep.subr.mxu1 %v11312_v7 }
 0x594   : > { %7041 = vmatprep.mubr.msk.f32.mxu1 %vm4491_vm11, %v4433_v53  ;;  %8705 = vmatpush3.msra.mxu1 %v4813_v27 }
 0x595   : > { %8706 = vmatprep.subr.mxu1 %v11312_v7 }
 0x596   : > { %8707 = vmatpush3.msra.mxu1 %v4812_v60 }
 0x597   : > { %4643 = vmatmul.mubr.f32.gmra.mxu1 %v4432_v30  ;;  %8708 = vmatprep.subr.mxu1 %v11312_v7 }
 0x598   : > { %8720 = vmatprep.mubr.msk.f32.mxu1 %vm9333_vm1, %v11312_v7  ;;  %8709 = vmatpush3.msra.mxu1 %v4811_v5 }
 0x599   : > { %8710 = vmatprep.subr.mxu1 %v11312_v7 }
 0x59a   : > { %8711 = vmatpush3.msra.mxu1 %v4810_v3 }
 0x59b   : > { %8712 = vmatprep.subr.mxu1 %v11312_v7 }
 0x5b2   : > { %v7595_v58 = vpop.f32.mrf.mxu0 }
 0x5b4   : > { %v7596_v41 = vpop.f32.mrf.mxu0 }
 0x5b5   : > { %v7597_v57 = vadd.f32 %v7596_v41, %v7595_v58 }
 0x5b7   : > { %v4565_v46 = vadd.f32 %v7597_v57, %v7039_v2 }
 0x5ba   : > { %v7598_v54 = vpop.f32.mrf.mxu0 }
 0x5bc   : > { %v7599_v21 = vpop.f32.mrf.mxu0 }
 0x5bd   : > { %v7600_v13 = vadd.f32 %v7599_v21, %v7598_v54 }
 0x5bf   : > { %v4570_v62 = vadd.f32 %v7600_v13, %v7039_v2 }
 0x62f   : > { %v11530_v8 = vpop.f32.mrf.mxu1 }
 0x631   : > { %v11535_v61 = vpop.f32.mrf.mxu1 }
 0x653   : > { %v4639_v26 = vpop.f32.mrf.mxu1 }
 0x654   : > { %v4640_v29 = vadd.f32 %v4639_v26, %v4565_v46 }
 0x655   : > { %v4641_v38 = vpop.f32.mrf.mxu1 }
 0x656   : > { %v4650_v25 = vmul.f32 0.70710677, %v4640_v29  ;;  %v4648_v27 = vmul.f32 0.5, %v4640_v29 }
 0x657   : > { %v4644_v17 = vpop.f32.mrf.mxu1 }
 0x658   : > { %v4652_v1 = vand.u32 2147483647, %v4650_v25  ;;  %v4645_v15 = vadd.f32 %v4644_v17, %v4570_v62  ;;  %vm4692_vm14 = vcmp.ge.f32.partialorder %v4650_v25, 0.0 }
 0x659   : > { %v4646_v4 = vpop.f32.mrf.mxu1 }
 0x65a   : > { %v4654_v49 = vmul.f32 0.3275911, %v4652_v1  ;;  %v4651_v37 = vmul.f32 0.70710677, %v4645_v15  ;;  %v4680_v18 = vsub.f32 0.0, %v4652_v1  ;;  %v4649_v41 = vmul.f32 0.5, %v4645_v15 }
 0x65c   : > { %v4656_v52 = vadd.f32 1.0, %v4654_v49  ;;  %v4653_v34 = vand.u32 2147483647, %v4651_v37  ;;  %v4682_v11 = vmul.f32 %v4680_v18, %v4652_v1  ;;  %vm4693_vm15 = vcmp.ge.f32.partialorder %v4651_v37, 0.0  ;;  %v4723_v37 = vld [vmem:[%s12476_s16] sm:$0x7f] }
 0x65d   : > { %v7047_v18 = vld [vmem:[%s12470_s10 + $0x58] sm:$0xff] }
 0x65e   : > { %9298 = vrcp.f32 %v4656_v52  ;;  %v4655_v28 = vmul.f32 0.3275911, %v4653_v34  ;;  %v4681_v32 = vsub.f32 0.0, %v4653_v34  ;;  %v4684_v9 = vmul.f32 1.442695, %v4682_v11  ;;  %v7051_v52 = vld [vmem:[%s12470_s10 + $0x78] sm:$0xff] }
 0x65f   : > { %v4809_v11 = vld [vmem:[%s12470_s10 + $0x18] sm:$0xff] }
 0x660   : > { %v4657_v63 = vadd.f32 1.0, %v4655_v28  ;;  %v4683_v42 = vmul.f32 %v4681_v32, %v4653_v34  ;;  %v7050_v34 = vld [vmem:[%s12470_s10 + $0x70] sm:$0xff]  ;;  %v7049_v28 = vld [vmem:[%s12470_s10 + $0x68] sm:$0xff]  ;;  %8713 = vmatpush3.msra.mxu1 %v4809_v11 }
 0x661   : > { %v7046_v32 = vld [vmem:[%s12470_s10 + $0x50] sm:$0xff]  ;;  %8714 = vmatprep.subr.mxu1 %v11312_v7  ;;  %v5442_v11 = vld [vmem:[%s12472_s12 + $0x68] sm:$0xff] }
 0x662   : > { %9300 = vrcp.f32 %v4657_v63  ;;  %v4686_v24 = vmul.f32 1.442695, %v4683_v42  ;;  %v7048_v63 = vld [vmem:[%s12470_s10 + $0x60] sm:$0xff] }
 0x663   : > { %9302 = vpow2.f32 %v4684_v9  ;;  %v4807_v9 = vld [vmem:[%s12470_s10 + $0x8] sm:$0xff]  ;;  %v7044_v42 = vld [vmem:[%s12470_s10 + $0x40] sm:$0xff] }
 0x664   : > { %9304 = vpow2.f32 %v4686_v24  ;;  %v7070_v24 = vld [vmem:[%s12470_s10 + $0xf8] sm:$0xff] }
 0x66b   : > { %v9299_v40 = vpop.eup %9298 }
 0x66c   : > { %v4662_v56 = vmul.f32 1.0614054, %v9299_v40 }
 0x66e   : > { %v4664_v48 = vadd.f32 -1.4531521, %v4662_v56  ;;  %v7045_v56 = vld [vmem:[%s12470_s10 + $0x48] sm:$0xff] }
 0x66f   : > { %v9301_v59 = vpop.eup %9300 }
 0x670   : > { %v4666_v19 = vmul.f32 %v9299_v40, %v4664_v48  ;;  %v4663_v23 = vmul.f32 1.0614054, %v9301_v59  ;;  %v9303_v12 = vpop.eup %9302  ;;  %v4806_v48 = vld [vmem:[%s12470_s10] sm:$0xff] }
 0x671   : > { %v9305_v36 = vpop.eup %9304 }
 0x672   : > { %v4668_v50 = vadd.f32 1.4214138, %v4666_v19  ;;  %v4665_v22 = vadd.f32 -1.4531521, %v4663_v23  ;;  %v7061_v23 = vld [vmem:[%s12470_s10 + $0xb8] sm:$0xff] }
 0x674   : > { %v4670_v14 = vmul.f32 %v9299_v40, %v4668_v50  ;;  %v4667_v47 = vmul.f32 %v9301_v59, %v4665_v22 }
 0x676   : > { %v4672_v33 = vadd.f32 -0.28449672, %v4670_v14  ;;  %v4669_v31 = vadd.f32 1.4214138, %v4667_v47  ;;  %v7069_v14 = vld [vmem:[%s12470_s10 + $0xf0] sm:$0xff]  ;;  %v11609_v47 = vld [vmem:[#allocation8] sm:$0xff] }
 0x678   : > { %v4674_v45 = vmul.f32 %v9299_v40, %v4672_v33  ;;  %v4671_v10 = vmul.f32 %v9301_v59, %v4669_v31  ;;  %v7059_v33 = vld [vmem:[%s12470_s10 + $0xa8] sm:$0xff] }
 0x679   : > { %v7068_v31 = vld [vmem:[%s12470_s10 + $0xe8] sm:$0xff] }
 0x67a   : > { %v4676_v0 = vadd.f32 0.2548296, %v4674_v45  ;;  %v4673_v20 = vadd.f32 -0.28449672, %v4671_v10  ;;  %v7058_v45 = vld [vmem:[%s12470_s10 + $0xa0] sm:$0xff] }
 0x67b   : > { %v7067_v10 = vld [vmem:[%s12470_s10 + $0xe0] sm:$0xff] }
 0x67c   : > { %v4678_v44 = vmul.f32 %v9299_v40, %v4676_v0  ;;  %v4675_v16 = vmul.f32 %v9301_v59, %v4673_v20  ;;  %v4808_v40 = vld [vmem:[%s12470_s10 + $0x10] sm:$0xff]  ;;  %v7057_v0 = vld [vmem:[%s12470_s10 + $0x98] sm:$0xff] }
 0x67d   : > { %8715 = vmatpush3.msra.mxu1 %v4808_v40  ;;  %v7066_v20 = vld [vmem:[%s12470_s10 + $0xd8] sm:$0xff]  ;;  %v5441_v40 = vld [vmem:[%s12472_s12 + $0x60] sm:$0xff] }
 0x67e   : > { %v4688_v6 = vmul.f32 %v9303_v12, %v4678_v44  ;;  %v4677_v51 = vadd.f32 0.2548296, %v4675_v16  ;;  %8716 = vmatprep.subr.mxu1 %v11312_v7  ;;  %v7056_v44 = vld [vmem:[%s12470_s10 + $0x90] sm:$0xff]  ;;  %v7055_v12 = vld [vmem:[%s12470_s10 + $0x88] sm:$0xff] }
 0x67f   : > { %8717 = vmatpush3.msra.mxu1 %v4807_v9  ;;  %v7065_v16 = vld [vmem:[%s12470_s10 + $0xd0] sm:$0xff]  ;;  %v5440_v9 = vld [vmem:[%s12472_s12 + $0x58] sm:$0xff] }
 0x680   : > { %v4690_v35 = vsub.f32 1.0, %v4688_v6  ;;  %v4679_v55 = vmul.f32 %v9301_v59, %v4677_v51  ;;  %8718 = vmatprep.subr.mxu1 %v11312_v7  ;;  %v7064_v6 = vld [vmem:[%s12470_s10 + $0xc8] sm:$0xff]  ;;  %v7054_v51 = vld [vmem:[%s12470_s10 + $0x80] sm:$0xff] }
 0x681   : > { %8719 = vmatpush3.msra.mxu1 %v4806_v48  ;;  %v5439_v48 = vld [vmem:[%s12472_s12 + $0x50] sm:$0xff] }
 0x682   : > { %v4694_v43 = vsub.f32 0.0, %v4690_v35  ;;  %v4689_v53 = vmul.f32 %v9305_v36, %v4679_v55  ;;  %8742 = vmatprep.subr.mxu1 %v11312_v7  ;;  %v7079_v55 = vld [vmem:[%s12470_s10 + $0x138] sm:$0xff] }
 0x684   : > { %v4696_v30 = vsel %vm4692_vm14, %v4690_v35, %v4694_v43  ;;  %v4691_v39 = vsub.f32 1.0, %v4689_v53  ;;  %v7063_v35 = vld [vmem:[%s12470_s10 + $0xc0] sm:$0xff]  ;;  %v7088_v53 = vld [vmem:[%s12470_s10 + $0x178] sm:$0xff] }
 0x685   : > { %v4698_v60 = vadd.f32 1.0, %v4696_v30  ;;  %v7078_v30 = vld [vmem:[%s12470_s10 + $0x130] sm:$0xff] }
 0x686   : > { %v4695_v5 = vsub.f32 0.0, %v4691_v39 }
 0x687   : > { %v4700_v3 = vmul.f32 %v4698_v60, %v4648_v27  ;;  %v7077_v27 = vld [vmem:[%s12470_s10 + $0x128] sm:$0xff] }
 0x688   : > { %v4697_v58 = vsel %vm4693_vm15, %v4691_v39, %v4695_v5  ;;  %v7087_v39 = vld [vmem:[%s12470_s10 + $0x170] sm:$0xff]  ;;  %v7086_v60 = vld [vmem:[%s12470_s10 + $0x168] sm:$0xff]  ;;  %v7076_v5 = vld [vmem:[%s12470_s10 + $0x120] sm:$0xff] }
 0x689   : > { %4706 = vst.msk [vmem:[#allocation6 + $0x2] sm:$0xff] %vm1310_vm3, %v4700_v3  ;;  %v4699_v54 = vadd.f32 1.0, %v4697_v58  ;;  %v7085_v3 = vld [vmem:[%s12470_s10 + $0x160] sm:$0xff]  ;;  %v7075_v58 = vld [vmem:[%s12470_s10 + $0x118] sm:$0xff] }
 0x68b   : > { %v4701_v57 = vmul.f32 %v4699_v54, %v4649_v41  ;;  %v7084_v41 = vld [vmem:[%s12470_s10 + $0x158] sm:$0xff]  ;;  %v7074_v54 = vld [vmem:[%s12470_s10 + $0x110] sm:$0xff] }
 0x68d   : > { %4708 = vst.msk [vmem:[#allocation6 + $0xa] sm:$0x1f] %vm4707_vm12, %v4701_v57  ;;  %v7083_v57 = vld [vmem:[%s12470_s10 + $0x150] sm:$0xff] }
 0x690   : > { %v4709_v21 = vld [vmem:[#allocation6] sm:$0xff] }
 0x691   : > { %v4711_v2 = vld [vmem:[#allocation6 + $0x1] sm:$0xff] }
 0x692   : > { %v4713_v13 = vmax.f32 %v4709_v21, %v4711_v2  ;;  %v4715_v29 = vld [vmem:[#allocation6 + $0x2] sm:$0xff]  ;;  %v7073_v21 = vld [vmem:[%s12470_s10 + $0x108] sm:$0xff] }
 0x693   : > { %v7082_v2 = vld [vmem:[%s12470_s10 + $0x148] sm:$0xff] }
 0x694   : > { %v4710_v46 = vld [vmem:[#allocation6 + $0x8] sm:$0x3f]  ;;  %v4717_v17 = vmax.f32 %v4713_v13, %v4715_v29  ;;  %v7072_v13 = vld [vmem:[%s12470_s10 + $0x100] sm:$0xff]  ;;  %v7096_v29 = vld [vmem:[%s12470_s10 + $0x1b0] sm:$0xff] }
 0x695   : > { %v4712_v26 = vld [vmem:[#allocation6 + $0x9] sm:$0x3f] }
 0x696   : > { %v4714_v38 = vmax.f32 %v4710_v46, %v4712_v26  ;;  %v4716_v25 = vld [vmem:[#allocation6 + $0xa] sm:$0x3f]  ;;  %v7081_v46 = vld [vmem:[%s12470_s10 + $0x140] sm:$0xff] }
 0x697   : > { %v4720_v1 = vld [vmem:[#allocation6 + $0xb] sm:$0x3f]  ;;  %v4719_v4 = vld [vmem:[#allocation6 + $0x3] sm:$0xff] }
 0x698   : > { %v4718_v62 = vmax.f32 %v4714_v38, %v4716_v25  ;;  %v4721_v15 = vmax.f32 %v4717_v17, %v4719_v4  ;;  %v7097_v25 = vld [vmem:[%s12470_s10 + $0x1b8] sm:$0xff]  ;;  %v7094_v17 = vld [vmem:[%s12470_s10 + $0x1a0] sm:$0xff]  ;;  %v7092_v4 = vld [vmem:[%s12470_s10 + $0x190] sm:$0xff] }
 0x69a   : > { %v4722_v49 = vmax.f32 %v4718_v62, %v4720_v1  ;;  %v7095_v62 = vld [vmem:[%s12470_s10 + $0x1a8] sm:$0xff]  ;;  %v7093_v1 = vld [vmem:[%s12470_s10 + $0x198] sm:$0xff] }
 0x69c   : > { %8679 = vmatpush3.msk.msra.mxu0 %vm4347_vm10, %v4722_v49  ;;  %v7091_v49 = vld [vmem:[%s12470_s10 + $0x188] sm:$0xff]  ;;  %vm6600_vm10 = vcmask 15360  }
 0x69d   : > { %8680 = vmatprep.subr.mxu0 %v11312_v7 }
 0x69e   : > { %8681 = vmatpush3.msra.mxu0 %v4721_v15  ;;  %v7090_v15 = vld [vmem:[%s12470_s10 + $0x180] sm:$0xff] }
 0x69f   : > { %8683 = vmatmul.mubr.msk.f32.vlgmr.msra.gmra.mxu0 %vm4724_vm2, %v4723_v37  ;;  %8685 = vmatprep.subr.mxu0 %v11312_v7 }
 0x6a0   : > { %8686 = vmatpush3.msra.mxu0 %v7051_v52  ;;  %8701 = vmatprep.mubr.msk.f32.mxu0 %vm9333_vm1, %v11312_v7  ;;  %v7115_v52 = vld [vmem:[%s12472_s12 + $0xf8] sm:$0xff] }
 0x6a1   : > { %8687 = vmatprep.subr.mxu0 %v11312_v7 }
 0x6a2   : > { %8688 = vmatpush3.msra.mxu0 %v7050_v34  ;;  %v5444_v34 = vld [vmem:[%s12472_s12 + $0x78] sm:$0xff] }
 0x6a3   : > { %8689 = vmatprep.subr.mxu0 %v11312_v7 }
 0x6a4   : > { %8690 = vmatpush3.msra.mxu0 %v7049_v28  ;;  %v7114_v28 = vld [vmem:[%s12472_s12 + $0xf0] sm:$0xff] }
 0x6a5   : > { %8691 = vmatprep.subr.mxu0 %v11312_v7 }
 0x6a6   : > { %8692 = vmatpush3.msra.mxu0 %v7048_v63  ;;  %v5443_v63 = vld [vmem:[%s12472_s12 + $0x70] sm:$0xff] }
 0x6a7   : > { %8693 = vmatprep.subr.mxu0 %v11312_v7 }
 0x6a8   : > { %8694 = vmatpush3.msra.mxu0 %v7047_v18  ;;  %v7113_v18 = vld [vmem:[%s12472_s12 + $0xe8] sm:$0xff] }
 0x6a9   : > { %8695 = vmatprep.subr.mxu0 %v11312_v7 }
 0x6aa   : > { %8696 = vmatpush3.msra.mxu0 %v7046_v32  ;;  %v7112_v32 = vld [vmem:[%s12472_s12 + $0xe0] sm:$0xff] }
 0x6ab   : > { %8697 = vmatprep.subr.mxu0 %v11312_v7 }
 0x6ac   : > { %8698 = vmatpush3.msra.mxu0 %v7045_v56  ;;  %v7111_v56 = vld [vmem:[%s12472_s12 + $0xd8] sm:$0xff] }
 0x6ad   : > { %8699 = vmatprep.subr.mxu0 %v11312_v7 }
 0x6ae   : > { %8700 = vmatpush3.msra.mxu0 %v7044_v42  ;;  %v7110_v42 = vld [vmem:[%s12472_s12 + $0xd0] sm:$0xff] }
 0x6af   : > { %8723 = vmatprep.subr.mxu0 %v11312_v7  ;;  %v7060_v7 = vld [vmem:[%s12470_s10 + $0xb0] sm:$0xff] }
 0x75f   : > { %v4797_v59 = vpop.f32.mrf.mxu0 }
 0x760   : > { %4804 = vst.msk [vmem:[#allocation7 + $0x3] sm:$0x7f] %vm4803_vm5, %v4797_v59  ;;  %v7109_v59 = vld [vmem:[%s12472_s12 + $0xc8] sm:$0xff] }
 0x761   : > { %v8684_v19 = vpop.f32.mrf.mxu0 }
 0x762   : > { %v5438_v19 = vld [vmem:[%s12472_s12 + $0x48] sm:$0xff] }
 0x767   : > { %v4814_v50 = vld [vmem:[#allocation7 + $0x1] sm:$0x7f] }
 0x768   : > { %v4805_v22 = vld [vmem:[#allocation7] sm:$0x7f]  ;;  %8702 = vmatmul.mubr.msk.f32.vlgmr.msra.gmra.mxu0 %vm1310_vm3, %v4814_v50  ;;  %v7107_v50 = vld [vmem:[%s12472_s12 + $0xb8] sm:$0xff] }
 0x769   : > { %8721 = vmatmul.mubr.msk.f32.vlgmr.msra.gmra.mxu1 %vm1310_vm3, %v4805_v22  ;;  %8724 = vmatpush3.msra.mxu0 %v7061_v23  ;;  %v4970_v36 = vld [vmem:[#allocation7 + $0x2] sm:$0x7f]  ;;  %v7108_v23 = vld [vmem:[%s12472_s12 + $0xc0] sm:$0xff]  ;;  %v5436_v22 = vld [vmem:[%s12472_s12 + $0x38] sm:$0xff] }
 0x76a   : > { %8743 = vmatpush3.msra.mxu1 %v7070_v24  ;;  %8725 = vmatprep.subr.mxu0 %v11609_v47  ;;  %v5054_v43 = vld [vmem:[#allocation7 + $0x3] sm:$0x7f]  ;;  %v5437_v24 = vld [vmem:[%s12472_s12 + $0x40] sm:$0xff] }
 0x76b   : > { %8744 = vmatprep.subr.mxu1 %v11609_v47  ;;  %8726 = vmatpush3.msra.mxu0 %v7060_v7  ;;  %v5138_v26 = vld [vmem:[#allocation7 + $0x4] sm:$0x7f] }
 0x76c   : > { %8745 = vmatpush3.msra.mxu1 %v7069_v14  ;;  %8727 = vmatprep.subr.mxu0 %v11609_v47  ;;  %v5222_v38 = vld [vmem:[#allocation7 + $0x5] sm:$0x7f] }
 0x76d   : > { %8746 = vmatprep.subr.mxu1 %v11609_v47  ;;  %8728 = vmatpush3.msra.mxu0 %v7059_v33  ;;  %v5306_v37 = vld [vmem:[#allocation7 + $0x6] sm:$0x7f] }
 0x76e   : > { %8747 = vmatpush3.msra.mxu1 %v7068_v31  ;;  %8729 = vmatprep.subr.mxu0 %v11609_v47  ;;  %v7106_v7 = vld [vmem:[%s12472_s12 + $0xb0] sm:$0xff]  ;;  %v7105_v33 = vld [vmem:[%s12472_s12 + $0xa8] sm:$0xff] }
 0x76f   : > { %8748 = vmatprep.subr.mxu1 %v11609_v47  ;;  %8730 = vmatpush3.msra.mxu0 %v7058_v45  ;;  %v5435_v14 = vld [vmem:[%s12472_s12 + $0x30] sm:$0xff]  ;;  %v5434_v31 = vld [vmem:[%s12472_s12 + $0x28] sm:$0xff]  ;;  %v7104_v45 = vld [vmem:[%s12472_s12 + $0xa0] sm:$0xff] }
 0x770   : > { %8749 = vmatpush3.msra.mxu1 %v7067_v10  ;;  %8731 = vmatprep.subr.mxu0 %v11609_v47  ;;  %v5433_v10 = vld [vmem:[%s12472_s12 + $0x20] sm:$0xff] }
 0x771   : > { %8750 = vmatprep.subr.mxu1 %v11609_v47  ;;  %8732 = vmatpush3.msra.mxu0 %v7057_v0  ;;  %v7103_v0 = vld [vmem:[%s12472_s12 + $0x98] sm:$0xff] }
 0x772   : > { %8751 = vmatpush3.msra.mxu1 %v7066_v20  ;;  %8733 = vmatprep.subr.mxu0 %v11609_v47  ;;  %v5432_v20 = vld [vmem:[%s12472_s12 + $0x18] sm:$0xff] }
 0x773   : > { %8752 = vmatprep.subr.mxu1 %v11609_v47  ;;  %8734 = vmatpush3.msra.mxu0 %v7056_v44  ;;  %v7102_v44 = vld [vmem:[%s12472_s12 + $0x90] sm:$0xff] }
 0x774   : > { %8753 = vmatpush3.msra.mxu1 %v7065_v16  ;;  %8735 = vmatprep.subr.mxu0 %v11609_v47  ;;  %v5431_v16 = vld [vmem:[%s12472_s12 + $0x10] sm:$0xff] }
 0x775   : > { %8754 = vmatprep.subr.mxu1 %v11609_v47  ;;  %8736 = vmatpush3.msra.mxu0 %v7055_v12  ;;  %v7101_v12 = vld [vmem:[%s12472_s12 + $0x88] sm:$0xff] }
 0x776   : > { %8755 = vmatpush3.msra.mxu1 %v7064_v6  ;;  %8737 = vmatprep.subr.mxu0 %v11609_v47  ;;  %v5430_v6 = vld [vmem:[%s12472_s12 + $0x8] sm:$0xff] }
 0x777   : > { %8756 = vmatprep.subr.mxu1 %v11609_v47  ;;  %8738 = vmatpush3.msra.mxu0 %v7054_v51  ;;  %v7100_v51 = vld [vmem:[%s12472_s12 + $0x80] sm:$0xff] }
 0x778   : > { %8739 = vmatprep.mubr.msk.f32.mxu0 %vm9333_vm1, %v11609_v47  ;;  %8757 = vmatpush3.msra.mxu1 %v7063_v35  ;;  %v5429_v35 = vld [vmem:[%s12472_s12] sm:$0xff] }
 0x779   : > { %8758 = vmatprep.mubr.msk.f32.mxu1 %vm9333_vm1, %v11609_v47  ;;  %8740 = vmatmul.mubr.msk.f32.vlgmr.msra.gmra.mxu0 %vm1310_vm3, %v4970_v36 }
 0x77a   : > { %8759 = vmatmul.mubr.msk.f32.vlgmr.msra.gmra.mxu1 %vm1310_vm3, %v5054_v43  ;;  %8761 = vmatprep.subr.mxu0 %v11609_v47 }
 0x77b   : > { %8780 = vmatprep.subr.mxu1 %v11609_v47  ;;  %8762 = vmatpush3.msra.mxu0 %v7079_v55 }
 0x77c   : > { %8781 = vmatpush3.msra.mxu1 %v7088_v53  ;;  %8763 = vmatprep.subr.mxu0 %v11609_v47 }
 0x77d   : > { %8782 = vmatprep.subr.mxu1 %v11609_v47  ;;  %8764 = vmatpush3.msra.mxu0 %v7078_v30 }
 0x77e   : > { %8783 = vmatpush3.msra.mxu1 %v7087_v39  ;;  %8765 = vmatprep.subr.mxu0 %v11609_v47 }
 0x77f   : > { %8784 = vmatprep.subr.mxu1 %v11609_v47  ;;  %8766 = vmatpush3.msra.mxu0 %v7077_v27 }
 0x780   : > { %8785 = vmatpush3.msra.mxu1 %v7086_v60  ;;  %8767 = vmatprep.subr.mxu0 %v11609_v47 }
 0x781   : > { %8786 = vmatprep.subr.mxu1 %v11609_v47  ;;  %8768 = vmatpush3.msra.mxu0 %v7076_v5 }
 0x782   : > { %8787 = vmatpush3.msra.mxu1 %v7085_v3  ;;  %8769 = vmatprep.subr.mxu0 %v11609_v47 }
 0x783   : > { %8788 = vmatprep.subr.mxu1 %v11609_v47  ;;  %8770 = vmatpush3.msra.mxu0 %v7075_v58 }
 0x784   : > { %8789 = vmatpush3.msra.mxu1 %v7084_v41  ;;  %8771 = vmatprep.subr.mxu0 %v11609_v47 }
 0x785   : > { %8790 = vmatprep.subr.mxu1 %v11609_v47  ;;  %8772 = vmatpush3.msra.mxu0 %v7074_v54 }
 0x786   : > { %8791 = vmatpush3.msra.mxu1 %v7083_v57  ;;  %8773 = vmatprep.subr.mxu0 %v11609_v47 }
 0x787   : > { %8792 = vmatprep.subr.mxu1 %v11609_v47  ;;  %8774 = vmatpush3.msra.mxu0 %v7073_v21 }
 0x788   : > { %8793 = vmatpush3.msra.mxu1 %v7082_v2  ;;  %8775 = vmatprep.subr.mxu0 %v11609_v47 }
 0x789   : > { %8794 = vmatprep.subr.mxu1 %v11609_v47  ;;  %8776 = vmatpush3.msra.mxu0 %v7072_v13 }
 0x78a   : > { %8777 = vmatprep.mubr.msk.f32.mxu0 %vm9333_vm1, %v11609_v47  ;;  %8795 = vmatpush3.msra.mxu1 %v7081_v46 }
 0x78b   : > { %8796 = vmatprep.mubr.msk.f32.mxu1 %vm9333_vm1, %v11609_v47  ;;  %8778 = vmatmul.mubr.msk.f32.vlgmr.msra.gmra.mxu0 %vm1310_vm3, %v5138_v26  ;;  %v7099_v26 = vld [vmem:[%s12471_s11] ss:$0 sm:$0xff] }
 0x78c   : > { %8797 = vmatmul.mubr.msk.f32.vlgmr.msra.gmra.mxu1 %vm1310_vm3, %v5222_v38  ;;  %8799 = vmatprep.subr.mxu0 %v11609_v47 }
 0x78d   : > { %8815 = vmatprep.mubr.msk.f32.mxu0 %vm9333_vm1, %v11609_v47  ;;  %8800 = vmatpush3.msra.mxu0 %v7097_v25 }
 0x78e   : > { %8818 = vmatprep.subr.mxu1 %v11609_v47  ;;  %8801 = vmatprep.subr.mxu0 %v11609_v47 }
 0x78f   : > { %8850 = vmatprep.mubr.msk.f32.mxu1 %vm9333_vm1, %v11609_v47  ;;  %8802 = vmatpush3.msra.mxu0 %v7096_v29 }
 0x790   : > { %8803 = vmatprep.subr.mxu0 %v11609_v47  ;;  %8819 = vmatpush3.msra.mxu1 %v7115_v52 }
 0x791   : > { %8804 = vmatpush3.msra.mxu0 %v7095_v62  ;;  %8820 = vmatprep.subr.mxu1 %v11609_v47 }
 0x792   : > { %8805 = vmatprep.subr.mxu0 %v11609_v47  ;;  %8821 = vmatpush3.msra.mxu1 %v7114_v28 }
 0x793   : > { %8806 = vmatpush3.msra.mxu0 %v7094_v17  ;;  %8822 = vmatprep.subr.mxu1 %v11609_v47 }
 0x794   : > { %8807 = vmatprep.subr.mxu0 %v11609_v47  ;;  %8823 = vmatpush3.msra.mxu1 %v7113_v18 }
 0x795   : > { %8808 = vmatpush3.msra.mxu0 %v7093_v1  ;;  %8824 = vmatprep.subr.mxu1 %v11609_v47 }
 0x796   : > { %8809 = vmatprep.subr.mxu0 %v11609_v47  ;;  %8825 = vmatpush3.msra.mxu1 %v7112_v32 }
 0x797   : > { %8810 = vmatpush3.msra.mxu0 %v7092_v4  ;;  %8826 = vmatprep.subr.mxu1 %v11609_v47 }
 0x798   : > { %8811 = vmatprep.subr.mxu0 %v11609_v47  ;;  %8827 = vmatpush3.msra.mxu1 %v7111_v56 }
 0x799   : > { %8812 = vmatpush3.msra.mxu0 %v7091_v49  ;;  %8828 = vmatprep.subr.mxu1 %v11609_v47 }
 0x79a   : > { %8813 = vmatprep.subr.mxu0 %v11609_v47  ;;  %8829 = vmatpush3.msra.mxu1 %v7110_v42 }
 0x79b   : > { %8814 = vmatpush3.msra.mxu0 %v7090_v15  ;;  %8830 = vmatprep.subr.mxu1 %v11609_v47 }
 0x79c   : > { %8816 = vmatmul.mubr.msk.f32.vlgmr.msra.gmra.mxu0 %vm1310_vm3, %v5306_v37  ;;  %8853 = vmatprep.subr.mxu0 %v11609_v47 }
 0x79d   : > { %8885 = vmatprep.mubr.msk.f32.mxu0 %vm9333_vm1, %v11609_v47  ;;  %8854 = vmatpush3.msra.mxu0 %v5444_v34 }
 0x79e   : > { %8855 = vmatprep.subr.mxu0 %v11609_v47  ;;  %8831 = vmatpush3.msra.mxu1 %v7109_v59 }
 0x79f   : > { %8856 = vmatpush3.msra.mxu0 %v5443_v63  ;;  %8832 = vmatprep.subr.mxu1 %v11609_v47 }
 0x7a0   : > { %8857 = vmatprep.subr.mxu0 %v11609_v47  ;;  %8833 = vmatpush3.msra.mxu1 %v7108_v23 }
 0x7a1   : > { %8858 = vmatpush3.msra.mxu0 %v5442_v11  ;;  %8834 = vmatprep.subr.mxu1 %v11609_v47 }
 0x7a2   : > { %8859 = vmatprep.subr.mxu0 %v11609_v47  ;;  %8835 = vmatpush3.msra.mxu1 %v7107_v50 }
 0x7a3   : > { %8860 = vmatpush3.msra.mxu0 %v5441_v40  ;;  %8836 = vmatprep.subr.mxu1 %v11609_v47 }
 0x7a4   : > { %8861 = vmatprep.subr.mxu0 %v11609_v47  ;;  %8837 = vmatpush3.msra.mxu1 %v7106_v7  ;;  %v7131_v7 = vld [vmem:[%s12472_s12 + $0x178] sm:$0xff] }
 0x7a5   : > { %8862 = vmatpush3.msra.mxu0 %v5440_v9  ;;  %8838 = vmatprep.subr.mxu1 %v11609_v47 }
 0x7a6   : > { %8863 = vmatprep.subr.mxu0 %v11609_v47  ;;  %8839 = vmatpush3.msra.mxu1 %v7105_v33 }
 0x7a7   : > { %8864 = vmatpush3.msra.mxu0 %v5439_v48  ;;  %8840 = vmatprep.subr.mxu1 %v11609_v47 }
 0x7a8   : > { %8865 = vmatprep.subr.mxu0 %v11609_v47  ;;  %8841 = vmatpush3.msra.mxu1 %v7104_v45  ;;  %v7130_v45 = vld [vmem:[%s12472_s12 + $0x170] sm:$0xff] }
 0x7a9   : > { %8866 = vmatpush3.msra.mxu0 %v5438_v19  ;;  %8842 = vmatprep.subr.mxu1 %v11609_v47 }
 0x7aa   : > { %8867 = vmatprep.subr.mxu0 %v11609_v47  ;;  %8843 = vmatpush3.msra.mxu1 %v7103_v0  ;;  %v7129_v0 = vld [vmem:[%s12472_s12 + $0x168] sm:$0xff] }
 0x7ab   : > { %8868 = vmatpush3.msra.mxu0 %v5437_v24  ;;  %8844 = vmatprep.subr.mxu1 %v11609_v47 }
 0x7ac   : > { %8869 = vmatprep.subr.mxu0 %v11609_v47  ;;  %8845 = vmatpush3.msra.mxu1 %v7102_v44  ;;  %v7128_v44 = vld [vmem:[%s12472_s12 + $0x160] sm:$0xff] }
 0x7ad   : > { %8870 = vmatpush3.msra.mxu0 %v5436_v22  ;;  %8846 = vmatprep.subr.mxu1 %v11609_v47 }
 0x7ae   : > { %8871 = vmatprep.subr.mxu0 %v11609_v47  ;;  %8847 = vmatpush3.msra.mxu1 %v7101_v12  ;;  %v7127_v12 = vld [vmem:[%s12472_s12 + $0x158] sm:$0xff] }
 0x7af   : > { %8872 = vmatpush3.msra.mxu0 %v5435_v14  ;;  %8848 = vmatprep.subr.mxu1 %v11609_v47  ;;  %v7147_v14 = vld [vmem:[%s12472_s12 + $0x1f8] sm:$0xff] }
 0x7b0   : > { %8873 = vmatprep.subr.mxu0 %v11609_v47  ;;  %8849 = vmatpush3.msra.mxu1 %v7100_v51  ;;  %v7126_v51 = vld [vmem:[%s12472_s12 + $0x150] sm:$0xff] }
 0x7b1   : > { %8874 = vmatpush3.msra.mxu0 %v5434_v31  ;;  %8888 = vmatprep.subr.mxu1 %v11609_v47 }
 0x7b2   : > { %8875 = vmatprep.subr.mxu0 %v11609_v47 }
 0x7b3   : > { %8876 = vmatpush3.msra.mxu0 %v5433_v10  ;;  %v7146_v10 = vld [vmem:[%s12472_s12 + $0x1f0] sm:$0xff] }
 0x7b4   : > { %8877 = vmatprep.subr.mxu0 %v11609_v47 }
 0x7b5   : > { %8878 = vmatpush3.msra.mxu0 %v5432_v20  ;;  %v7145_v20 = vld [vmem:[%s12472_s12 + $0x1e8] sm:$0xff] }
 0x7b6   : > { %8879 = vmatprep.subr.mxu0 %v11609_v47 }
 0x7b7   : > { %8880 = vmatpush3.msra.mxu0 %v5431_v16  ;;  %v7144_v16 = vld [vmem:[%s12472_s12 + $0x1e0] sm:$0xff] }
 0x7b8   : > { %8881 = vmatprep.subr.mxu0 %v11609_v47 }
 0x7b9   : > { %8882 = vmatpush3.msra.mxu0 %v5430_v6  ;;  %v7143_v6 = vld [vmem:[%s12472_s12 + $0x1d8] sm:$0xff] }
 0x7ba   : > { %8883 = vmatprep.subr.mxu0 %v11609_v47 }
 0x7bb   : > { %8884 = vmatpush3.msra.mxu0 %v5429_v35  ;;  %v7142_v35 = vld [vmem:[%s12472_s12 + $0x1d0] sm:$0xff] }
 0x7bc   : > { %8923 = vmatprep.subr.mxu0 %v11609_v47 }
 0x828   : > { %v4893_v55 = vpop.f32.mrf.mxu0 }
 0x829   : > { %v4966_v36 = vpop.f32.mrf.mxu1 }
 0x82a   : > { %v8703_v43 = vpop.f32.mrf.mxu0  ;;  %v4967_v54 = vadd.f32 %v4966_v36, %v4893_v55  ;;  %v7125_v55 = vld [vmem:[%s12472_s12 + $0x148] sm:$0xff] }
 0x82b   : > { %v8722_v53 = vpop.f32.mrf.mxu1  ;;  %v7141_v36 = vld [vmem:[%s12472_s12 + $0x1c8] sm:$0xff]  ;;  %v7124_v43 = vld [vmem:[%s12472_s12 + $0x140] sm:$0xff] }
 0x82c   : > { %v7140_v53 = vld [vmem:[%s12472_s12 + $0x1c0] sm:$0xff] }
 0x839   : > { %v5049_v30 = vpop.f32.mrf.mxu0 }
 0x83a   : > { %v5133_v39 = vpop.f32.mrf.mxu1  ;;  %v5053_v57 = vadd.f32 %v5049_v30, %v4967_v54  ;;  %v7123_v30 = vld [vmem:[%s12472_s12 + $0x138] sm:$0xff] }
 0x83b   : > { %v8741_v27 = vpop.f32.mrf.mxu0  ;;  %v7119_v54 = vld [vmem:[%s12472_s12 + $0x118] sm:$0xff] }
 0x83c   : > { %v8760_v60 = vpop.f32.mrf.mxu1  ;;  %v5137_v21 = vadd.f32 %v5133_v39, %v5053_v57  ;;  %v7139_v39 = vld [vmem:[%s12472_s12 + $0x1b8] sm:$0xff]  ;;  %v7122_v27 = vld [vmem:[%s12472_s12 + $0x130] sm:$0xff] }
 0x83d   : > { %v7138_v60 = vld [vmem:[%s12472_s12 + $0x1b0] sm:$0xff]  ;;  %v7135_v57 = vld [vmem:[%s12472_s12 + $0x198] sm:$0xff] }
 0x84b   : > { %v5217_v5 = vpop.f32.mrf.mxu0 }
 0x84c   : > { %v5301_v3 = vpop.f32.mrf.mxu1  ;;  %v5221_v2 = vadd.f32 %v5217_v5, %v5137_v21  ;;  %v7121_v5 = vld [vmem:[%s12472_s12 + $0x128] sm:$0xff]  ;;  %v7118_v21 = vld [vmem:[%s12472_s12 + $0x110] sm:$0xff] }
 0x84d   : > { %v8779_v58 = vpop.f32.mrf.mxu0 }
 0x84e   : > { %v8798_v41 = vpop.f32.mrf.mxu1  ;;  %v5305_v13 = vadd.f32 %v5301_v3, %v5221_v2  ;;  %v7137_v3 = vld [vmem:[%s12472_s12 + $0x1a8] sm:$0xff]  ;;  %v7120_v58 = vld [vmem:[%s12472_s12 + $0x120] sm:$0xff]  ;;  %v7134_v2 = vld [vmem:[%s12472_s12 + $0x190] sm:$0xff] }
 0x84f   : > { %v7136_v41 = vld [vmem:[%s12472_s12 + $0x1a0] sm:$0xff] }
 0x85c   : > { %v5385_v46 = vpop.f32.mrf.mxu0 }
 0x85d   : > { %v5389_v38 = vadd.f32 %v5385_v46, %v5305_v13  ;;  %v7117_v13 = vld [vmem:[%s12472_s12 + $0x108] sm:$0xff] }
 0x85e   : > { %v8817_v25 = vpop.f32.mrf.mxu0  ;;  %v7133_v46 = vld [vmem:[%s12472_s12 + $0x188] sm:$0xff] }
 0x85f   : > { %v5397_v29 = vadd.f32 %v7099_v26, %v5389_v38  ;;  %v7116_v26 = vld [vmem:[%s12472_s12 + $0x100] sm:$0xff]  ;;  %v7163_v25 = vld [vmem:[%s12472_s12 + $0x278] sm:$0xff] }
 0x860   : > { %v7132_v38 = vld [vmem:[%s12472_s12 + $0x180] sm:$0xff] }
 0x861   : > { %v5399_v62 = vmul.f32 0.70710677, %v5397_v29  ;;  %v5398_v24 = vmul.f32 0.5, %v5397_v29 }
 0x863   : > { %v5400_v17 = vand.u32 2147483647, %v5399_v62  ;;  %vm5420_vm3 = vcmp.ge.f32.partialorder %v5399_v62, 0.0 }
 0x865   : > { %v5401_v1 = vmul.f32 0.3275911, %v5400_v17  ;;  %v5414_v49 = vsub.f32 0.0, %v5400_v17 }
 0x867   : > { %v5402_v4 = vadd.f32 1.0, %v5401_v1  ;;  %v5415_v15 = vmul.f32 %v5414_v49, %v5400_v17  ;;  %v7179_v17 = vld [vmem:[%s12472_s12 + $0x2f8] sm:$0xff]  ;;  %v7162_v1 = vld [vmem:[%s12472_s12 + $0x270] sm:$0xff]  ;;  %v7161_v49 = vld [vmem:[%s12472_s12 + $0x268] sm:$0xff] }
 0x869   : > { %9306 = vrcp.f32 %v5402_v4  ;;  %v5416_v34 = vmul.f32 1.442695, %v5415_v15  ;;  %v7178_v4 = vld [vmem:[%s12472_s12 + $0x2f0] sm:$0xff]  ;;  %v7177_v15 = vld [vmem:[%s12472_s12 + $0x2e8] sm:$0xff] }
 0x86b   : > { %9308 = vpow2.f32 %v5416_v34  ;;  %v7159_v34 = vld [vmem:[%s12472_s12 + $0x258] sm:$0xff] }
 0x876   : > { %v9307_v37 = vpop.eup %9306 }
 0x877   : > { %v5405_v52 = vmul.f32 1.0614054, %v9307_v37 }
 0x878   : > { %v9309_v42 = vpop.eup %9308 }
 0x879   : > { %v5406_v28 = vadd.f32 -1.4531521, %v5405_v52  ;;  %v7176_v52 = vld [vmem:[%s12472_s12 + $0x2e0] sm:$0xff] }
 0x87b   : > { %v5407_v63 = vmul.f32 %v9307_v37, %v5406_v28  ;;  %v7175_v28 = vld [vmem:[%s12472_s12 + $0x2d8] sm:$0xff] }
 0x87d   : > { %v5408_v18 = vadd.f32 1.4214138, %v5407_v63  ;;  %v7158_v63 = vld [vmem:[%s12472_s12 + $0x250] sm:$0xff] }
 0x87f   : > { %v5409_v11 = vmul.f32 %v9307_v37, %v5408_v18  ;;  %v7174_v18 = vld [vmem:[%s12472_s12 + $0x2d0] sm:$0xff] }
 0x881   : > { %v5410_v32 = vadd.f32 -0.28449672, %v5409_v11  ;;  %v7157_v11 = vld [vmem:[%s12472_s12 + $0x248] sm:$0xff] }
 0x883   : > { %v5411_v40 = vmul.f32 %v9307_v37, %v5410_v32  ;;  %v7173_v32 = vld [vmem:[%s12472_s12 + $0x2c8] sm:$0xff] }
 0x885   : > { %v5412_v56 = vadd.f32 0.2548296, %v5411_v40  ;;  %v7156_v40 = vld [vmem:[%s12472_s12 + $0x240] sm:$0xff] }
 0x887   : > { %v5413_v9 = vmul.f32 %v9307_v37, %v5412_v56  ;;  %v7160_v37 = vld [vmem:[%s12472_s12 + $0x260] sm:$0xff] }
 0x888   : > { %v7172_v56 = vld [vmem:[%s12472_s12 + $0x2c0] sm:$0xff] }
 0x889   : > { %v5418_v48 = vmul.f32 %v9309_v42, %v5413_v9  ;;  %v7155_v9 = vld [vmem:[%s12472_s12 + $0x238] sm:$0xff] }
 0x88a   : > { %v7171_v42 = vld [vmem:[%s12472_s12 + $0x2b8] sm:$0xff] }
 0x88b   : > { %v5419_v59 = vsub.f32 1.0, %v5418_v48  ;;  %v7154_v48 = vld [vmem:[%s12472_s12 + $0x230] sm:$0xff] }
 0x88d   : > { %v5421_v19 = vsub.f32 0.0, %v5419_v59 }
 0x88f   : > { %v5422_v23 = vsel %vm5420_vm3, %v5419_v59, %v5421_v19  ;;  %v7170_v59 = vld [vmem:[%s12472_s12 + $0x2b0] sm:$0xff]  ;;  %v7153_v19 = vld [vmem:[%s12472_s12 + $0x228] sm:$0xff] }
 0x890   : > { %v5423_v50 = vadd.f32 1.0, %v5422_v23  ;;  %v7169_v23 = vld [vmem:[%s12472_s12 + $0x2a8] sm:$0xff] }
 0x892   : > { %v5424_v22 = vmul.f32 %v5423_v50, %v5398_v24  ;;  %v7152_v24 = vld [vmem:[%s12472_s12 + $0x220] sm:$0xff] }
 0x893   : > { %v7168_v50 = vld [vmem:[%s12472_s12 + $0x2a0] sm:$0xff] }
 0x894   : > { %5427 = vst [vmem:[#allocation8 + $0x3] sm:$0x7f] %v5424_v22  ;;  %v7151_v22 = vld [vmem:[%s12472_s12 + $0x218] sm:$0xff] }
 0x89b   : > { %v5445_v33 = vld [vmem:[#allocation8 + $0x1] sm:$0x7f] }
 0x89c   : > { %v5428_v31 = vld [vmem:[#allocation8] sm:$0x7f]  ;;  %8851 = vmatmul.mubr.f32.vlgmr.msra.gmra.mxu1 %v5445_v33  ;;  %v7166_v33 = vld [vmem:[%s12472_s12 + $0x290] sm:$0xff] }
 0x89d   : > { %8886 = vmatmul.mubr.f32.vlgmr.msra.gmra.mxu0 %v5428_v31  ;;  %8889 = vmatpush3.msra.mxu1 %v7131_v7  ;;  %v5603_v29 = vld [vmem:[#allocation8 + $0x2] sm:$0x7f]  ;;  %v7149_v31 = vld [vmem:[%s12472_s12 + $0x208] sm:$0xff] }
 0x89e   : > { %8924 = vmatpush3.msra.mxu0 %v7147_v14  ;;  %8890 = vmatprep.subr.mxu1 %v11609_v47  ;;  %v5692_v62 = vld [vmem:[#allocation8 + $0x3] sm:$0x7f]  ;;  %v7150_v14 = vld [vmem:[%s12472_s12 + $0x210] sm:$0xff] }
 0x89f   : > { %8925 = vmatprep.subr.mxu0 %v11609_v47  ;;  %8891 = vmatpush3.msra.mxu1 %v7130_v45  ;;  %v7167_v7 = vld [vmem:[%s12472_s12 + $0x298] sm:$0xff]  ;;  %v7165_v45 = vld [vmem:[%s12472_s12 + $0x288] sm:$0xff] }
 0x8a0   : > { %8926 = vmatpush3.msra.mxu0 %v7146_v10  ;;  %8892 = vmatprep.subr.mxu1 %v11609_v47  ;;  %v7148_v10 = vld [vmem:[%s12472_s12 + $0x200] sm:$0xff] }
 0x8a1   : > { %8927 = vmatprep.subr.mxu0 %v11609_v47  ;;  %8893 = vmatpush3.msra.mxu1 %v7129_v0  ;;  %v7164_v0 = vld [vmem:[%s12472_s12 + $0x280] sm:$0xff] }
 0x8a2   : > { %8928 = vmatpush3.msra.mxu0 %v7145_v20  ;;  %8894 = vmatprep.subr.mxu1 %v11609_v47  ;;  %v5781_v20 = vld [vmem:[#allocation8 + $0x4] sm:$0x7f] }
 0x8a3   : > { %8929 = vmatprep.subr.mxu0 %v11609_v47  ;;  %8895 = vmatpush3.msra.mxu1 %v7128_v44  ;;  %v5870_v44 = vld [vmem:[#allocation8 + $0x5] sm:$0x7f] }
 0x8a4   : > { %8930 = vmatpush3.msra.mxu0 %v7144_v16  ;;  %8896 = vmatprep.subr.mxu1 %v11609_v47  ;;  %v7195_v16 = vld [vmem:[%s12472_s12 + $0x378] sm:$0xff] }
 0x8a5   : > { %8931 = vmatprep.subr.mxu0 %v11609_v47  ;;  %8897 = vmatpush3.msra.mxu1 %v7127_v12  ;;  %v7194_v12 = vld [vmem:[%s12472_s12 + $0x370] sm:$0xff] }
 0x8a6   : > { %8932 = vmatpush3.msra.mxu0 %v7143_v6  ;;  %8898 = vmatprep.subr.mxu1 %v11609_v47  ;;  %v7193_v6 = vld [vmem:[%s12472_s12 + $0x368] sm:$0xff] }
 0x8a7   : > { %8933 = vmatprep.subr.mxu0 %v11609_v47  ;;  %8899 = vmatpush3.msra.mxu1 %v7126_v51  ;;  %v7192_v51 = vld [vmem:[%s12472_s12 + $0x360] sm:$0xff] }
 0x8a8   : > { %8934 = vmatpush3.msra.mxu0 %v7142_v35  ;;  %8900 = vmatprep.subr.mxu1 %v11609_v47  ;;  %v7191_v35 = vld [vmem:[%s12472_s12 + $0x358] sm:$0xff] }
 0x8a9   : > { %8935 = vmatprep.subr.mxu0 %v11609_v47  ;;  %8901 = vmatpush3.msra.mxu1 %v7125_v55  ;;  %v7190_v55 = vld [vmem:[%s12472_s12 + $0x350] sm:$0xff] }
 0x8aa   : > { %8936 = vmatpush3.msra.mxu0 %v7141_v36  ;;  %8902 = vmatprep.subr.mxu1 %v11609_v47  ;;  %v7189_v36 = vld [vmem:[%s12472_s12 + $0x348] sm:$0xff] }
 0x8ab   : > { %8937 = vmatprep.subr.mxu0 %v11609_v47  ;;  %8903 = vmatpush3.msra.mxu1 %v7124_v43  ;;  %v7188_v43 = vld [vmem:[%s12472_s12 + $0x340] sm:$0xff] }
 0x8ac   : > { %8938 = vmatpush3.msra.mxu0 %v7140_v53  ;;  %8904 = vmatprep.subr.mxu1 %v11609_v47  ;;  %v7187_v53 = vld [vmem:[%s12472_s12 + $0x338] sm:$0xff] }
 0x8ad   : > { %8939 = vmatprep.subr.mxu0 %v11609_v47  ;;  %8905 = vmatpush3.msra.mxu1 %v7123_v30  ;;  %v7186_v30 = vld [vmem:[%s12472_s12 + $0x330] sm:$0xff] }
 0x8ae   : > { %8940 = vmatpush3.msra.mxu0 %v7139_v39  ;;  %8906 = vmatprep.subr.mxu1 %v11609_v47  ;;  %v7185_v39 = vld [vmem:[%s12472_s12 + $0x328] sm:$0xff] }
 0x8af   : > { %8941 = vmatprep.subr.mxu0 %v11609_v47  ;;  %8907 = vmatpush3.msra.mxu1 %v7122_v27  ;;  %v7184_v27 = vld [vmem:[%s12472_s12 + $0x320] sm:$0xff] }
 0x8b0   : > { %8942 = vmatpush3.msra.mxu0 %v7138_v60  ;;  %8908 = vmatprep.subr.mxu1 %v11609_v47  ;;  %v7183_v60 = vld [vmem:[%s12472_s12 + $0x318] sm:$0xff] }
 0x8b1   : > { %8943 = vmatprep.subr.mxu0 %v11609_v47  ;;  %8909 = vmatpush3.msra.mxu1 %v7121_v5  ;;  %v7182_v5 = vld [vmem:[%s12472_s12 + $0x310] sm:$0xff] }
 0x8b2   : > { %8944 = vmatpush3.msra.mxu0 %v7137_v3  ;;  %8910 = vmatprep.subr.mxu1 %v11609_v47  ;;  %v7181_v3 = vld [vmem:[%s12472_s12 + $0x308] sm:$0xff] }
 0x8b3   : > { %8945 = vmatprep.subr.mxu0 %v11609_v47  ;;  %8911 = vmatpush3.msra.mxu1 %v7120_v58  ;;  %v7180_v58 = vld [vmem:[%s12472_s12 + $0x300] sm:$0xff] }
 0x8b4   : > { %8946 = vmatpush3.msra.mxu0 %v7136_v41  ;;  %8912 = vmatprep.subr.mxu1 %v11609_v47  ;;  %v5959_v41 = vld [vmem:[#allocation8 + $0x6] sm:$0x7f] }
 0x8b5   : > { %8947 = vmatprep.subr.mxu0 %v11609_v47  ;;  %8913 = vmatpush3.msra.mxu1 %v7119_v54 }
 0x8b6   : > { %8948 = vmatpush3.msra.mxu0 %v7135_v57  ;;  %8914 = vmatprep.subr.mxu1 %v11609_v47 }
 0x8b7   : > { %8949 = vmatprep.subr.mxu0 %v11609_v47  ;;  %8915 = vmatpush3.msra.mxu1 %v7118_v21 }
 0x8b8   : > { %8950 = vmatpush3.msra.mxu0 %v7134_v2  ;;  %8916 = vmatprep.subr.mxu1 %v11609_v47 }
 0x8b9   : > { %8951 = vmatprep.subr.mxu0 %v11609_v47  ;;  %8917 = vmatpush3.msra.mxu1 %v7117_v13 }
 0x8ba   : > { %8952 = vmatpush3.msra.mxu0 %v7133_v46  ;;  %8918 = vmatprep.subr.mxu1 %v11609_v47 }
 0x8bb   : > { %8953 = vmatprep.subr.mxu0 %v11609_v47  ;;  %8919 = vmatpush3.msra.mxu1 %v7116_v26 }
 0x8bc   : > { %8920 = vmatprep.mubr.msk.f32.mxu1 %vm9333_vm1, %v11609_v47  ;;  %8954 = vmatpush3.msra.mxu0 %v7132_v38 }
 0x8bd   : > { %8955 = vmatprep.mubr.msk.f32.mxu0 %vm9333_vm1, %v11609_v47  ;;  %8921 = vmatmul.mubr.f32.vlgmr.msra.gmra.mxu1 %v5603_v29  ;;  %v12246_v29 = vld [vmem:[%s12478_s18 + $0x78] sm:$0xff] }
 0x8be   : > { %8956 = vmatmul.mubr.f32.vlgmr.msra.gmra.mxu0 %v5692_v62  ;;  %8958 = vmatprep.subr.mxu1 %v11609_v47  ;;  %v12252_v62 = vld [vmem:[%s12478_s18 + $0x70] sm:$0xff] }
 0x8bf   : > { %8993 = vmatprep.subr.mxu0 %v11609_v47  ;;  %8959 = vmatpush3.msra.mxu1 %v7163_v25 }
 0x8c0   : > { %8994 = vmatpush3.msra.mxu0 %v7179_v17  ;;  %8960 = vmatprep.subr.mxu1 %v11609_v47  ;;  %v12259_v17 = vld [vmem:[%s12478_s18 + $0x68] sm:$0xff] }
 0x8c1   : > { %8995 = vmatprep.subr.mxu0 %v11609_v47  ;;  %8961 = vmatpush3.msra.mxu1 %v7162_v1  ;;  %v12266_v1 = vld [vmem:[%s12478_s18 + $0x60] sm:$0xff] }
 0x8c2   : > { %8996 = vmatpush3.msra.mxu0 %v7178_v4  ;;  %8962 = vmatprep.subr.mxu1 %v11609_v47  ;;  %v12273_v4 = vld [vmem:[%s12478_s18 + $0x58] sm:$0xff] }
 0x8c3   : > { %8997 = vmatprep.subr.mxu0 %v11609_v47  ;;  %8963 = vmatpush3.msra.mxu1 %v7161_v49  ;;  %v12280_v49 = vld [vmem:[%s12478_s18 + $0x50] sm:$0xff] }
 0x8c4   : > { %8998 = vmatpush3.msra.mxu0 %v7177_v15  ;;  %8964 = vmatprep.subr.mxu1 %v11609_v47  ;;  %v12287_v15 = vld [vmem:[%s12478_s18 + $0x48] sm:$0xff] }
 0x8c5   : > { %8999 = vmatprep.subr.mxu0 %v11609_v47  ;;  %8965 = vmatpush3.msra.mxu1 %v7160_v37  ;;  %v12294_v37 = vld [vmem:[%s12478_s18 + $0x40] sm:$0xff] }
 0x8c6   : > { %9000 = vmatpush3.msra.mxu0 %v7176_v52  ;;  %8966 = vmatprep.subr.mxu1 %v11609_v47  ;;  %v12301_v52 = vld [vmem:[%s12478_s18 + $0x38] sm:$0xff] }
 0x8c7   : > { %9001 = vmatprep.subr.mxu0 %v11609_v47  ;;  %8967 = vmatpush3.msra.mxu1 %v7159_v34  ;;  %v12308_v34 = vld [vmem:[%s12478_s18 + $0x30] sm:$0xff] }
 0x8c8   : > { %9002 = vmatpush3.msra.mxu0 %v7175_v28  ;;  %8968 = vmatprep.subr.mxu1 %v11609_v47  ;;  %v12315_v28 = vld [vmem:[%s12478_s18 + $0x28] sm:$0xff] }
 0x8c9   : > { %9003 = vmatprep.subr.mxu0 %v11609_v47  ;;  %8969 = vmatpush3.msra.mxu1 %v7158_v63  ;;  %v12322_v63 = vld [vmem:[%s12478_s18 + $0x20] sm:$0xff] }
 0x8ca   : > { %9004 = vmatpush3.msra.mxu0 %v7174_v18  ;;  %8970 = vmatprep.subr.mxu1 %v11609_v47  ;;  %v12329_v18 = vld [vmem:[%s12478_s18 + $0x18] sm:$0xff] }
 0x8cb   : > { %9005 = vmatprep.subr.mxu0 %v11609_v47  ;;  %8971 = vmatpush3.msra.mxu1 %v7157_v11  ;;  %v12336_v11 = vld [vmem:[%s12478_s18 + $0x10] sm:$0xff] }
 0x8cc   : > { %9006 = vmatpush3.msra.mxu0 %v7173_v32  ;;  %8972 = vmatprep.subr.mxu1 %v11609_v47  ;;  %v12343_v32 = vld [vmem:[%s12478_s18 + $0x8] sm:$0xff] }
 0x8cd   : > { %9007 = vmatprep.subr.mxu0 %v11609_v47  ;;  %8973 = vmatpush3.msra.mxu1 %v7156_v40 }
 0x8ce   : > { %9008 = vmatpush3.msra.mxu0 %v7172_v56  ;;  %8974 = vmatprep.subr.mxu1 %v11609_v47 }
 0x8cf   : > { %9009 = vmatprep.subr.mxu0 %v11609_v47  ;;  %8975 = vmatpush3.msra.mxu1 %v7155_v9  ;;  %v12350_v9 = vld [vmem:[%s12478_s18] sm:$0xff] }
 0x8d0   : > { %9010 = vmatpush3.msra.mxu0 %v7171_v42  ;;  %8976 = vmatprep.subr.mxu1 %v11609_v47 }
 0x8d1   : > { %9011 = vmatprep.subr.mxu0 %v11609_v47  ;;  %8977 = vmatpush3.msra.mxu1 %v7154_v48 }
 0x8d2   : > { %9012 = vmatpush3.msra.mxu0 %v7170_v59  ;;  %8978 = vmatprep.subr.mxu1 %v11609_v47 }
 0x8d3   : > { %9013 = vmatprep.subr.mxu0 %v11609_v47  ;;  %8979 = vmatpush3.msra.mxu1 %v7153_v19 }
 0x8d4   : > { %9014 = vmatpush3.msra.mxu0 %v7169_v23  ;;  %8980 = vmatprep.subr.mxu1 %v11609_v47 }
 0x8d5   : > { %9015 = vmatprep.subr.mxu0 %v11609_v47  ;;  %8981 = vmatpush3.msra.mxu1 %v7152_v24 }
 0x8d6   : > { %9016 = vmatpush3.msra.mxu0 %v7168_v50  ;;  %8982 = vmatprep.subr.mxu1 %v11609_v47 }
 0x8d7   : > { %9017 = vmatprep.subr.mxu0 %v11609_v47  ;;  %8983 = vmatpush3.msra.mxu1 %v7151_v22  ;;  %v7196_v22 = vld [vmem:[%s12473_s13] ss:$0 sm:$0xff] }
 0x8d8   : > { %9018 = vmatpush3.msra.mxu0 %v7167_v7  ;;  %8984 = vmatprep.subr.mxu1 %v11609_v47 }
 0x8d9   : > { %9019 = vmatprep.subr.mxu0 %v11609_v47  ;;  %8985 = vmatpush3.msra.mxu1 %v7150_v14 }
 0x8da   : > { %9020 = vmatpush3.msra.mxu0 %v7166_v33  ;;  %8986 = vmatprep.subr.mxu1 %v11609_v47 }
 0x8db   : > { %9021 = vmatprep.subr.mxu0 %v11609_v47  ;;  %8987 = vmatpush3.msra.mxu1 %v7149_v31 }
 0x8dc   : > { %9022 = vmatpush3.msra.mxu0 %v7165_v45  ;;  %8988 = vmatprep.subr.mxu1 %v11609_v47 }
 0x8dd   : > { %9023 = vmatprep.subr.mxu0 %v11609_v47  ;;  %8989 = vmatpush3.msra.mxu1 %v7148_v10 }
 0x8de   : > { %8990 = vmatprep.mubr.msk.f32.mxu1 %vm9333_vm1, %v11609_v47  ;;  %9024 = vmatpush3.msra.mxu0 %v7164_v0 }
 0x8df   : > { %9025 = vmatprep.mubr.msk.f32.mxu0 %vm9333_vm1, %v11609_v47  ;;  %8991 = vmatmul.mubr.f32.vlgmr.msra.gmra.mxu1 %v5781_v20 }
 0x8e0   : > { %9026 = vmatmul.mubr.f32.vlgmr.msra.gmra.mxu0 %v5870_v44  ;;  %9028 = vmatprep.subr.mxu1 %v11609_v47 }
 0x8e1   : > { %9060 = vmatprep.mubr.msk.f32.mxu1 %vm9333_vm1, %v11609_v47  ;;  %9029 = vmatpush3.msra.mxu1 %v7195_v16 }
 0x8e2   : > { %9063 = vmatprep.subr.mxu0 %v11609_v47  ;;  %9030 = vmatprep.subr.mxu1 %v11609_v47 }
 0x8e3   : > { %9065 = vmatprep.mubr.msk.f32.mxu0 %vm9333_vm1, %v11609_v47  ;;  %9031 = vmatpush3.msra.mxu1 %v7194_v12 }
 0x8e4   : > { %9032 = vmatprep.subr.mxu1 %v11609_v47 }
 0x8e5   : > { %9033 = vmatpush3.msra.mxu1 %v7193_v6 }
 0x8e6   : > { %9034 = vmatprep.subr.mxu1 %v11609_v47 }
 0x8e7   : > { %9035 = vmatpush3.msra.mxu1 %v7192_v51 }
 0x8e8   : > { %9036 = vmatprep.subr.mxu1 %v11609_v47 }
 0x8e9   : > { %9037 = vmatpush3.msra.mxu1 %v7191_v35 }
 0x8ea   : > { %9038 = vmatprep.subr.mxu1 %v11609_v47 }
 0x8eb   : > { %9039 = vmatpush3.msra.mxu1 %v7190_v55 }
 0x8ec   : > { %9040 = vmatprep.subr.mxu1 %v11609_v47 }
 0x8ed   : > { %9041 = vmatpush3.msra.mxu1 %v7189_v36 }
 0x8ee   : > { %9042 = vmatprep.subr.mxu1 %v11609_v47 }
 0x8ef   : > { %9043 = vmatpush3.msra.mxu1 %v7188_v43 }
 0x8f0   : > { %9044 = vmatprep.subr.mxu1 %v11609_v47 }
 0x8f1   : > { %9045 = vmatpush3.msra.mxu1 %v7187_v53 }
 0x8f2   : > { %9046 = vmatprep.subr.mxu1 %v11609_v47 }
 0x8f3   : > { %9047 = vmatpush3.msra.mxu1 %v7186_v30 }
 0x8f4   : > { %9048 = vmatprep.subr.mxu1 %v11609_v47 }
 0x8f5   : > { %9049 = vmatpush3.msra.mxu1 %v7185_v39 }
 0x8f6   : > { %9050 = vmatprep.subr.mxu1 %v11609_v47 }
 0x8f7   : > { %9051 = vmatpush3.msra.mxu1 %v7184_v27 }
 0x8f8   : > { %9052 = vmatprep.subr.mxu1 %v11609_v47 }
 0x8f9   : > { %9053 = vmatpush3.msra.mxu1 %v7183_v60 }
 0x8fa   : > { %9054 = vmatprep.subr.mxu1 %v11609_v47 }
 0x8fb   : > { %9055 = vmatpush3.msra.mxu1 %v7182_v5 }
 0x8fc   : > { %9056 = vmatprep.subr.mxu1 %v11609_v47 }
 0x8fd   : > { %9057 = vmatpush3.msra.mxu1 %v7181_v3 }
 0x8fe   : > { %9058 = vmatprep.subr.mxu1 %v11609_v47 }
 0x8ff   : > { %9059 = vmatpush3.msra.mxu1 %v7180_v58 }
 0x900   : > { %9061 = vmatmul.mubr.f32.vlgmr.msra.gmra.mxu1 %v5959_v41  ;;  %9103 = vmatprep.subr.mxu1 %v11609_v47 }
 0x901   : > { %9135 = vmatprep.mubr.msk.f32.mxu1 %vm9333_vm1, %v11609_v47  ;;  %9104 = vmatpush3.msra.mxu1 %v12246_v29 }
 0x902   : > { %9105 = vmatprep.subr.mxu1 %v11609_v47 }
 0x903   : > { %9106 = vmatpush3.msra.mxu1 %v12252_v62 }
 0x904   : > { %9107 = vmatprep.subr.mxu1 %v11609_v47 }
 0x905   : > { %9108 = vmatpush3.msra.mxu1 %v12259_v17 }
 0x906   : > { %9109 = vmatprep.subr.mxu1 %v11609_v47 }
 0x907   : > { %9110 = vmatpush3.msra.mxu1 %v12266_v1 }
 0x908   : > { %9111 = vmatprep.subr.mxu1 %v11609_v47 }
 0x909   : > { %9112 = vmatpush3.msra.mxu1 %v12273_v4 }
 0x90a   : > { %9113 = vmatprep.subr.mxu1 %v11609_v47 }
 0x90b   : > { %9114 = vmatpush3.msra.mxu1 %v12280_v49 }
 0x90c   : > { %9115 = vmatprep.subr.mxu1 %v11609_v47 }
 0x90d   : > { %9116 = vmatpush3.msra.mxu1 %v12287_v15 }
 0x90e   : > { %9117 = vmatprep.subr.mxu1 %v11609_v47 }
 0x90f   : > { %9118 = vmatpush3.msra.mxu1 %v12294_v37 }
 0x910   : > { %9119 = vmatprep.subr.mxu1 %v11609_v47 }
 0x911   : > { %9120 = vmatpush3.msra.mxu1 %v12301_v52 }
 0x912   : > { %9121 = vmatprep.subr.mxu1 %v11609_v47 }
 0x913   : > { %9122 = vmatpush3.msra.mxu1 %v12308_v34 }
 0x914   : > { %9123 = vmatprep.subr.mxu1 %v11609_v47 }
 0x915   : > { %9124 = vmatpush3.msra.mxu1 %v12315_v28 }
 0x916   : > { %9125 = vmatprep.subr.mxu1 %v11609_v47 }
 0x917   : > { %9126 = vmatpush3.msra.mxu1 %v12322_v63 }
 0x918   : > { %9127 = vmatprep.subr.mxu1 %v11609_v47 }
 0x919   : > { %9128 = vmatpush3.msra.mxu1 %v12329_v18 }
 0x91a   : > { %9129 = vmatprep.subr.mxu1 %v11609_v47 }
 0x91b   : > { %9130 = vmatpush3.msra.mxu1 %v12336_v11 }
 0x91c   : > { %9131 = vmatprep.subr.mxu1 %v11609_v47 }
 0x91d   : > { %9132 = vmatpush3.msra.mxu1 %v12343_v32 }
 0x91e   : > { %9133 = vmatprep.subr.mxu1 %v11609_v47 }
 0x91f   : > { %9134 = vmatpush3.msra.mxu1 %v12350_v9 }
 0x95c   : > { %v5529_v54 = vpop.f32.mrf.mxu1 }
 0x95d   : > { %v5599_v57 = vpop.f32.mrf.mxu0 }
 0x95e   : > { %v5600_v21 = vadd.f32 %v5599_v57, %v5529_v54  ;;  %v8852_v2 = vpop.f32.mrf.mxu1 }
 0x95f   : > { %v8887_v13 = vpop.f32.mrf.mxu0 }
 0x97d   : > { %v5687_v46 = vpop.f32.mrf.mxu1 }
 0x97e   : > { %v5776_v26 = vpop.f32.mrf.mxu0  ;;  %v5691_v59 = vadd.f32 %v5687_v46, %v5600_v21  ;;  %v6089_v46 = vld [vmem:[%s12477_s17] sm:$0xf] }
 0x97f   : > { %v8922_v38 = vpop.f32.mrf.mxu1 }
 0x980   : > { %v8957_v25 = vpop.f32.mrf.mxu0  ;;  %v5780_v19 = vadd.f32 %v5776_v26, %v5691_v59  ;;  %v6337_v26 = vld [vmem:[%s12480_s20 + $0x10] sm:$0xff]  ;;  %v6336_v38 = vld [vmem:[%s12480_s20 + $0x8] sm:$0xff] }
 0x99f   : > { %v5865_v40 = vpop.f32.mrf.mxu1 }
 0x9a0   : > { %v5954_v56 = vpop.f32.mrf.mxu0  ;;  %v5869_v23 = vadd.f32 %v5865_v40, %v5780_v19  ;;  %v6521_v40 = vld [vmem:[%s12482_s22] sm:$0xff] }
 0x9a1   : > { %v8992_v42 = vpop.f32.mrf.mxu1 }
 0x9a2   : > { %v9027_v48 = vpop.f32.mrf.mxu0  ;;  %v5958_v24 = vadd.f32 %v5954_v56, %v5869_v23  ;;  %v7199_v42 = vld [vmem:[%s12481_s21] ss:$0 sm:$0xff] }
 0x9c0   : > { %v6043_v50 = vpop.f32.mrf.mxu1 }
 0x9c1   : > { %v6047_v7 = vadd.f32 %v6043_v50, %v5958_v24 }
 0x9c2   : > { %v9062_v14 = vpop.f32.mrf.mxu1 }
 0x9c3   : > { %v6055_v33 = vadd.f32 %v7196_v22, %v6047_v7 }
 0x9c5   : > { %v6057_v31 = vmul.f32 0.70710677, %v6055_v33  ;;  %v6056_v41 = vmul.f32 0.5, %v6055_v33 }
 0x9c7   : > { %v6058_v45 = vand.u32 2147483647, %v6057_v31  ;;  %vm6078_vm4 = vcmp.ge.f32.partialorder %v6057_v31, 0.0 }
 0x9c9   : > { %v6059_v10 = vmul.f32 0.3275911, %v6058_v45  ;;  %v6072_v20 = vsub.f32 0.0, %v6058_v45 }
 0x9cb   : > { %v6060_v0 = vadd.f32 1.0, %v6059_v10  ;;  %v6073_v44 = vmul.f32 %v6072_v20, %v6058_v45 }
 0x9cd   : > { %9310 = vrcp.f32 %v6060_v0  ;;  %v6074_v6 = vmul.f32 1.442695, %v6073_v44 }
 0x9cf   : > { %9312 = vpow2.f32 %v6074_v6 }
 0x9da   : > { %v9311_v16 = vpop.eup %9310 }
 0x9db   : > { %v6063_v12 = vmul.f32 1.0614054, %v9311_v16 }
 0x9dc   : > { %v9313_v27 = vpop.eup %9312 }
 0x9dd   : > { %v6064_v51 = vadd.f32 -1.4531521, %v6063_v12 }
 0x9df   : > { %v6065_v35 = vmul.f32 %v9311_v16, %v6064_v51 }
 0x9e1   : > { %v6066_v55 = vadd.f32 1.4214138, %v6065_v35 }
 0x9e3   : > { %v6067_v36 = vmul.f32 %v9311_v16, %v6066_v55 }
 0x9e5   : > { %v6068_v43 = vadd.f32 -0.28449672, %v6067_v36 }
 0x9e7   : > { %v6069_v53 = vmul.f32 %v9311_v16, %v6068_v43  ;;  %v6599_v43 = vld [vmem:[%s12483_s23] sm:$0x3] }
 0x9e9   : > { %v6070_v30 = vadd.f32 0.2548296, %v6069_v53 }
 0x9eb   : > { %v6071_v39 = vmul.f32 %v9311_v16, %v6070_v30 }
 0x9ed   : > { %v6076_v60 = vmul.f32 %v9313_v27, %v6071_v39 }
 0x9ef   : > { %v6077_v5 = vsub.f32 1.0, %v6076_v60 }
 0x9f1   : > { %v6079_v3 = vsub.f32 0.0, %v6077_v5 }
 0x9f3   : > { %v6080_v58 = vsel %vm6078_vm4, %v6077_v5, %v6079_v3 }
 0x9f4   : > { %v6081_v54 = vadd.f32 1.0, %v6080_v58 }
 0x9f6   : > { %v6082_v57 = vmul.f32 %v6081_v54, %v6056_v41 }
 0x9f8   : > { %6085 = vst [vmem:[#allocation9 + $0x1] sm:$0x7f] %v6082_v57 }
 0x9ff   : > { %v6086_v21 = vld [vmem:[#allocation9] sm:$0xff] }
 0xa00   : > { %v6087_v2 = vld [vmem:[#allocation9 + $0x1] sm:$0xff] }
 0xa01   : > { %v6088_v13 = vmax.f32 %v6086_v21, %v6087_v2 }
 0xa03   : > { %9064 = vmatpush3.msra.mxu0 %v6088_v13 }
 0xa04   : > { %9066 = vmatmul.mubr.msk.f32.vlgmr.msra.gmra.mxu0 %vm6090_vm6, %v6089_v46  ;;  %9068 = vmatprep.subr.mxu0 %v12246_v29 }
 0xa05   : > { %9069 = vmatpush3.msra.mxu0 %v12246_v29  ;;  %9100 = vmatprep.mubr.f32.mxu0 %v11535_v61  ;;  %v6338_v61 = vld [vmem:[%s12480_s20 + $0x18] sm:$0xff] }
 0xa06   : > { %9070 = vmatprep.subr.mxu0 %v12252_v62 }
 0xa07   : > { %9071 = vmatpush3.msra.mxu0 %v12252_v62  ;;  %v7198_v62 = vld [vmem:[%s12479_s19] ss:$0 sm:$0xff] }
 0xa08   : > { %9072 = vmatprep.subr.mxu0 %v12259_v17 }
 0xa09   : > { %9073 = vmatpush3.msra.mxu0 %v12259_v17 }
 0xa0a   : > { %9074 = vmatprep.subr.mxu0 %v12266_v1 }
 0xa0b   : > { %9075 = vmatpush3.msra.mxu0 %v12266_v1 }
 0xa0c   : > { %9076 = vmatprep.subr.mxu0 %v12273_v4 }
 0xa0d   : > { %9077 = vmatpush3.msra.mxu0 %v12273_v4 }
 0xa0e   : > { %9078 = vmatprep.subr.mxu0 %v12280_v49 }
 0xa0f   : > { %9079 = vmatpush3.msra.mxu0 %v12280_v49 }
 0xa10   : > { %9080 = vmatprep.subr.mxu0 %v12287_v15 }
 0xa11   : > { %9081 = vmatpush3.msra.mxu0 %v12287_v15 }
 0xa12   : > { %9082 = vmatprep.subr.mxu0 %v12294_v37 }
 0xa13   : > { %9083 = vmatpush3.msra.mxu0 %v12294_v37 }
 0xa14   : > { %9084 = vmatprep.subr.mxu0 %v12301_v52 }
 0xa15   : > { %9085 = vmatpush3.msra.mxu0 %v12301_v52 }
 0xa16   : > { %9086 = vmatprep.subr.mxu0 %v12308_v34 }
 0xa17   : > { %9087 = vmatpush3.msra.mxu0 %v12308_v34 }
 0xa18   : > { %9088 = vmatprep.subr.mxu0 %v12315_v28 }
 0xa19   : > { %9089 = vmatpush3.msra.mxu0 %v12315_v28 }
 0xa1a   : > { %9090 = vmatprep.subr.mxu0 %v12322_v63 }
 0xa1b   : > { %9091 = vmatpush3.msra.mxu0 %v12322_v63 }
 0xa1c   : > { %9092 = vmatprep.subr.mxu0 %v12329_v18 }
 0xa1d   : > { %9093 = vmatpush3.msra.mxu0 %v12329_v18  ;;  %v6524_v18 = vld [vmem:[%s12482_s22 + $0x18] sm:$0xff] }
 0xa1e   : > { %9094 = vmatprep.subr.mxu0 %v12336_v11 }
 0xa1f   : > { %9095 = vmatpush3.msra.mxu0 %v12336_v11  ;;  %v6523_v11 = vld [vmem:[%s12482_s22 + $0x10] sm:$0xff] }
 0xa20   : > { %9096 = vmatprep.subr.mxu0 %v12343_v32 }
 0xa21   : > { %9097 = vmatpush3.msra.mxu0 %v12343_v32  ;;  %v6522_v32 = vld [vmem:[%s12482_s22 + $0x8] sm:$0xff] }
 0xa22   : > { %9098 = vmatprep.subr.mxu0 %v12350_v9 }
 0xa23   : > { %9099 = vmatpush3.msra.mxu0 %v12350_v9 }
 0xa24   : > { %9101 = vmatmul.mubr.f32.vlgmr.msra.gmra.mxu0 %v11530_v8  ;;  %9138 = vmatprep.subr.mxu0 %v6338_v61  ;;  %v6335_v8 = vld [vmem:[%s12480_s20] sm:$0xff] }
 0xa25   : > { %9139 = vmatpush3.msra.mxu0 %v6338_v61 }
 0xa26   : > { %9140 = vmatprep.subr.mxu0 %v6337_v26 }
 0xa27   : > { %9141 = vmatpush3.msra.mxu0 %v6337_v26 }
 0xa28   : > { %9142 = vmatprep.subr.mxu0 %v6336_v38 }
 0xa29   : > { %9143 = vmatpush3.msra.mxu0 %v6336_v38 }
 0xa2a   : > { %9144 = vmatprep.subr.mxu0 %v6335_v8 }
 0xa2b   : > { %9145 = vmatpush3.msra.mxu0 %v6335_v8 }
 0xa2c   : > { %9149 = vmatprep.subr.mxu0 %v11609_v47 }
 0xac4   : > { %v6160_v25 = vpop.f32.mrf.mxu0 }
 0xac5   : > { %9136 = vmatmul.mubr.f32.vlgmr.msra.gmra.mxu1 %v6160_v25 }
 0xac6   : > { %v9067_v29 = vpop.f32.mrf.mxu0 }
 0xae4   : > { %v9102_v17 = vpop.f32.mrf.mxu0 }
 0xae5   : > { %v6259_v1 = vadd.f32 %v9102_v17, %v7198_v62 }
 0xae6   : > { %v6253_v4 = vpop.f32.mrf.mxu0 }
 0xae7   : > { %v6254_v49 = vadd.f32 %v7198_v62, %v6253_v4  ;;  %v6333_v37 = vmax.f32 %v6259_v1, 0.0 }
 0xae9   : > { %v6332_v15 = vmax.f32 %v6254_v49, 0.0  ;;  %6691 = vrot.lane.b32.xlu0 %v6254_v49, %s9335_s8 }
 0xaeb   : > { %9146 = vmatprep.mubr.msk.f32.mxu0 %vm6346_vm7, %v6332_v15 }
 0xaec   : > { %9147 = vmatmul.mubr.msk.f32.vlgmr.msra.gmra.mxu0 %vm6346_vm7, %v6333_v37 }
 0xaed   : > { %6693 = vrot.lane.b32.xlu0 %v6259_v1, %s9335_s8  ;;  %9150 = vmatpush3.msra.mxu0 %v6338_v61 }
 0xaee   : > { %9151 = vmatprep.subr.mxu0 %v11609_v47  ;;  %9157 = vmatprep.mubr.msk.f32.mxu0 %vm9333_vm1, %v11609_v47 }
 0xaef   : > { %9152 = vmatpush3.msra.mxu0 %v6337_v26 }
 0xaf0   : > { %9153 = vmatprep.subr.mxu0 %v11609_v47 }
 0xaf1   : > { %9154 = vmatpush3.msra.mxu0 %v6336_v38 }
 0xaf2   : > { %9155 = vmatprep.subr.mxu0 %v11609_v47 }
 0xaf3   : > { %9156 = vmatpush3.msra.mxu0 %v6335_v8 }
 0xaf4   : > { %9160 = vmatprep.subr.mxu0 %v11609_v47 }
 0xb5b   : > { %v6692_v57 = vpop.permute.xlu0 %6691 }
 0xb5f   : > { %v6694_v26 = vpop.permute.xlu0 %6693 }
 0xb85   : > { %v6328_v52 = vpop.f32.mrf.mxu1 }
 0xb86   : > { %v6329_v34 = vadd.f32 %v7198_v62, %v6328_v52 }
 0xb87   : > { %v9137_v28 = vpop.f32.mrf.mxu1 }
 0xb88   : > { %v6334_v63 = vmax.f32 %v6329_v34, 0.0  ;;  %6705 = vrot.lane.b32.xlu1 %v6329_v34, %s9335_s8 }
 0xb8a   : > { %9158 = vmatmul.mubr.msk.f32.vlgmr.msra.gmra.mxu0 %vm6346_vm7, %v6334_v63 }
 0xb8b   : > { %9168 = vmatprep.mubr.msk.f32.mxu0 %vm9333_vm1, %v11609_v47  ;;  %9161 = vmatpush3.msra.mxu0 %v6524_v18 }
 0xb8c   : > { %9162 = vmatprep.subr.mxu0 %v11609_v47 }
 0xb8d   : > { %9163 = vmatpush3.msra.mxu0 %v6523_v11 }
 0xb8e   : > { %9164 = vmatprep.subr.mxu0 %v11609_v47 }
 0xb8f   : > { %9165 = vmatpush3.msra.mxu0 %v6522_v32 }
 0xb90   : > { %9166 = vmatprep.subr.mxu0 %v11609_v47 }
 0xb91   : > { %9167 = vmatpush3.msra.mxu0 %v6521_v40 }
 0xb92   : > { %9171 = vmatprep.subr.mxu0 %v11609_v47 }
 0xbac   : > { %v9148_v56 = vpop.f32.mrf.mxu0 }
 0xbad   : > { %v6425_v59 = vadd.f32 %v9148_v56, %v7199_v42 }
 0xbae   : > { %v6419_v9 = vpop.f32.mrf.mxu0 }
 0xbaf   : > { %v6420_v48 = vadd.f32 %v7199_v42, %v6419_v9  ;;  %v6503_v23 = vsel %vm6502_vm8, %v6425_v59, 0.0 }
 0xbb1   : > { %v6501_v19 = vsel %vm6346_vm7, %v6420_v48, 0.0 }
 0xbb2   : > { %v6504_v24 = vadd.f32 %v6503_v23, %v6501_v19 }
 0xbb4   : > { %v6505_v50 = vrot.slane %v6504_v24, 4 }
 0xbb6   : > { %v6506_v22 = vadd.f32 %v6505_v50, %v6504_v24 }
 0xbb8   : > { %v6507_v33 = vrot.slane %v6506_v22, 2 }
 0xbba   : > { %v6508_v0 = vadd.f32 %v6507_v33, %v6506_v22 }
 0xbbc   : > { %v6509_v16 = vrot.slane %v6508_v0, 1 }
 0xbbe   : > { %v6510_v51 = vadd.f32 %v6509_v16, %v6508_v0 }
 0xbfa   : > { %v6706_v38 = vpop.permute.xlu1 %6705 }
 0xc4a   : > { %v6497_v7 = vpop.f32.mrf.mxu0 }
 0xc4b   : > { %v6498_v14 = vadd.f32 %v7199_v42, %v6497_v7 }
 0xc4c   : > { %v9159_v31 = vpop.f32.mrf.mxu0 }
 0xc4d   : > { %v6512_v45 = vsel %vm6511_vm9, %v6498_v14, 0.0 }
 0xc4e   : > { %v6513_v10 = vrot.slane %v6512_v45, 4 }
 0xc50   : > { %v6514_v20 = vadd.f32 %v6513_v10, %v6512_v45 }
 0xc52   : > { %v6515_v44 = vrot.slane %v6514_v20, 2 }
 0xc54   : > { %v6516_v12 = vadd.f32 %v6515_v44, %v6514_v20 }
 0xc56   : > { %v6517_v6 = vrot.slane %v6516_v12, 1 }
 0xc58   : > { %v6518_v35 = vadd.f32 %v6517_v6, %v6516_v12 }
 0xc5a   : > { %v6519_v55 = vadd.f32 %v6518_v35, %v6510_v51 }
 0xc5c   : > { %v6520_v36 = vmul.f32 0.055555556, %v6519_v55 }
 0xc5e   : > { %9169 = vmatmul.mubr.msk.f32.vlgmr.msra.gmra.mxu0 %vm6346_vm7, %v6520_v36 }
 0xc5f   : > { %9173 = vmatprep.mubr.msk.f32.mxu0 %vm9333_vm1, %v11609_v47  ;;  %9172 = vmatpush3.msk.msra.mxu0 %vm825_vm0, %v6599_v43  ;;  %v6683_v47 = vlaneseq }
 0xc61   : > { %v6684_v41 = vshrl.u32 %v6683_v47, 7 }
 0xc63   : > { %v6685_v54 = vsub.s32 0, %v6684_v41 }
 0xd1e   : > { %v6594_v53 = vpop.f32.mrf.mxu0 }
 0xd1f   : > { %v6598_v30 = vmax.f32 %v6594_v53, 0.0 }
 0xd20   : > { %v9170_v39 = vpop.f32.mrf.mxu0 }
 0xd21   : > { %9174 = vmatmul.mubr.msk.f32.vlgmr.msra.gmra.mxu0 %vm6600_vm10, %v6598_v30 }
 0xde1   : > { %v6673_v27 = vpop.f32.mrf.mxu0 }
 0xde2   : > { %v7206_v60 = vmul.f32 -1.442695, %v6673_v27 }
 0xde3   : > { %v9175_v5 = vpop.f32.mrf.mxu0 }
 0xde4   : > { %9314 = vpow2.f32 %v7206_v60 }
 0xdf1   : > { %v9315_v3 = vpop.eup %9314 }
 0xdf2   : > { %v6680_v58 = vadd.f32 1.0, %v9315_v3 }
 0xdf4   : > { %9316 = vrcp.f32 %v6680_v58 }
 0xe01   : > { %v9317_v21 = vpop.eup %9316 }
 0xe02   : > { %v6686_v2 = vrot.slane %v9317_v21, %v6685_v54 }
 0xe04   : > { %v6687_v13 = vmul.f32 %v6686_v2, %v6420_v48  ;;  %v6688_v46 = vmul.f32 %v6686_v2, %v6425_v59  ;;  %v6703_v61 = vmul.f32 %v6686_v2, %v6498_v14 }
 0xe06   : > { %v6697_v8 = vadd.f32 %v6692_v57, %v6687_v13  ;;  %v6698_v25 = vadd.f32 %v6694_v26, %v6688_v46  ;;  %v6708_v29 = vadd.f32 %v6706_v38, %v6703_v61 }
 0xe08   : > { %v6699_v62 = vmax.f32 %v6697_v8, 0.0  ;;  %v6700_v17 = vmax.f32 %v6698_v25, 0.0  ;;  %v6709_v1 = vmax.f32 %v6708_v29, 0.0 }
 0xe0a   : > { %6701 = vst.msk [vmem:[%s757_s30] sm:$0xff] %vm6346_vm7, %v6699_v62 }
 0xe0b   : > { %6702 = vst.msk [vmem:[%s757_s30 + $0x8] sm:$0x3f] %vm6502_vm8, %v6700_v17 }
 0xe0c   : > { %6710 = vst.msk [vmem:[%s757_s30 + $0xe] sm:$0xf] %vm6511_vm9, %v6709_v1 }
 0xe0d PF: > { %s34_s5 = sadd.s32 1, %s9330_s5  }
 0xe0e   : > { %p31_p4 = scmp.ge.s32.totalorder %s34_s5, 4  }
 0xe10   :  { %33 = sbr.rel (!%p31_p4) target bundleno = 10 (0xa), region = 175 }

</bundles_post_ra>
